<compile_context>
chip_gen: v5e
topology: v5e:2x2
jax: 0.10.0
libtpu: 0.0.40
codegen_flags: <defaults>
</compile_context>

<pallas_src>
import functools

import jax
import jax.numpy as jnp
from jax.experimental import pallas as pl
from jax.experimental.pallas import tpu as pltpu


# ---------------------------------------------------------------------------
# helpers shared by kernel and reference
# ---------------------------------------------------------------------------
def _chunk_bounds(c, n_chunks):
    size = -(-c // n_chunks)                       # ceil, same as torch.chunk
    return [(c0, min(c0 + size, c)) for c0 in range(0, c, size)]


def _gelu(x):
    # nn.GELU() default: 0.5*x*(1+erf(x/sqrt(2))).  erf via A&S 7.1.26
    # (|err| ~ 1.5e-7); the divide goes to the EUP (approx reciprocal) to
    # relieve the VALU slot.
    a1, a2, a3, a4, a5 = (0.254829592, -0.284496736, 1.421413741,
                          -1.453152027, 1.061405429)
    p = 0.3275911
    z = x * 0.7071067811865476
    az = jnp.abs(z)
    t = pl.reciprocal(1.0 + p * az, approx=True)
    poly = ((((a5 * t + a4) * t + a3) * t + a2) * t + a1) * t
    erf_abs = 1.0 - poly * jnp.exp(-az * az)
    erf_z = jnp.where(z >= 0.0, erf_abs, -erf_abs)
    return 0.5 * x * (1.0 + erf_z)


def _gn(x, gamma, beta, eps):
    # GroupNorm(num_groups=1, C) over one sample, single-pass stats.
    # x: (HW, C) f32 ; gamma/beta: (1, C) f32
    n = float(x.shape[0] * x.shape[1])
    s1 = jnp.sum(x, keepdims=True)                 # (1, 1)
    s2 = jnp.sum(x * x, keepdims=True)             # (1, 1)
    mean = s1 * (1.0 / n)
    var = s2 * (1.0 / n) - mean * mean
    inv = jax.lax.rsqrt(var + eps)
    return (x - mean) * inv * gamma + beta


# ---------------------------------------------------------------------------
# fused AxialShift kernel (one grid step = one batch element)
# ---------------------------------------------------------------------------
def _axial_shift_kernel(x_ref, w1_ref, b1_ref, g1_ref, be1_ref,
                        w21_ref, b21_ref, w22_ref, b22_ref,
                        g2_ref, be2_ref, w3_ref, b3_ref,
                        o_ref, pad_ref, *, H, W, C, shift_size, eps):
    pad = shift_size // 2
    HW = H * W

    # ---- conv1 (1x1) + GroupNorm(1,C) + GELU, fused -----------------------
    x = x_ref[0].astype(jnp.bfloat16)                               # (HW, C)
    h = jnp.dot(x, w1_ref[...], preferred_element_type=jnp.float32) + b1_ref[...]
    h = _gelu(_gn(h, g1_ref[...], be1_ref[...], eps))               # f32

    # ---- write into zero-padded VMEM scratch (border = zeros) -------------
    pad_ref[...] = jnp.zeros_like(pad_ref)
    pad_ref[pl.ds(pad, H), pl.ds(pad, W), :] = h.reshape(H, W, C)

    # ---- axial shifts fused: shifted windows + per-chunk lane masks -------
    bounds = _chunk_bounds(C, shift_size)          # torch.chunk(dim=C) bounds
    shifts = list(range(-pad, pad + 1))            # zip truncation == torch zip
    lane = jax.lax.broadcasted_iota(jnp.int32, (1, 1, C), 2)
    x_lr = None
    x_td = None
    for idx, ((c0, c1), s) in enumerate(zip(bounds, shifts)):
        slab_lr = pad_ref[pl.ds(pad, H), pl.ds(pad - s, W), :]      # shift along W
        slab_td = pad_ref[pl.ds(pad - s, H), pl.ds(pad, W), :]      # shift along H
        if idx == 0:
            x_lr, x_td = slab_lr, slab_td
        else:
            m = (lane >= c0) & (lane < c1)
            x_lr = jnp.where(m, slab_lr, x_lr)
            x_td = jnp.where(m, slab_td, x_td)

    x_lr = x_lr.reshape(HW, C).astype(jnp.bfloat16)
    x_td = x_td.reshape(HW, C).astype(jnp.bfloat16)

    # ---- conv2_1 / conv2_2 + GELU + add ------------------------------------
    y_lr = jnp.dot(x_lr, w21_ref[...], preferred_element_type=jnp.float32) + b21_ref[...]
    y_td = jnp.dot(x_td, w22_ref[...], preferred_element_type=jnp.float32) + b22_ref[...]
    y = _gelu(y_lr) + _gelu(y_td)

    # ---- GroupNorm(1,C) + conv3 (1x1), fused -------------------------------
    y = _gn(y, g2_ref[...], be2_ref[...], eps)
    out = jnp.dot(y.astype(jnp.bfloat16), w3_ref[...],
                  preferred_element_type=jnp.float32) + b3_ref[...]
    o_ref[0] = out.astype(o_ref.dtype)


# ---------------------------------------------------------------------------
# wrapper: NCHW in / NCHW out (layout transposes stay as cheap XLA glue)
# ---------------------------------------------------------------------------
def axial_shift_forward(x_nchw, params, shift_size, eps=1e-5):
    B, C, H, W = x_nchw.shape
    pad = shift_size // 2
    Hp, Wp = H + 2 * pad, W + 2 * pad
    HW = H * W

    x = jnp.transpose(x_nchw, (0, 2, 3, 1)).reshape(B, HW, C)       # NHWC rows

    to_bf16 = lambda w: w.astype(jnp.bfloat16)
    row = lambda v: v.reshape(1, C).astype(jnp.float32)

    kernel = functools.partial(_axial_shift_kernel, H=H, W=W, C=C,
                               shift_size=shift_size, eps=eps)

    act_spec = pl.BlockSpec((1, HW, C), lambda b: (b, 0, 0))
    mat_spec = pl.BlockSpec((C, C), lambda b: (0, 0))
    vec_spec = pl.BlockSpec((1, C), lambda b: (0, 0))

    # rough per-sample VMEM budget (activation copies + padded scratch + weights)
    est = (6 * HW * C + Hp * Wp * C + 4 * C * C) * 4
    vmem_limit = int(min(48 * 2 ** 20, max(16 * 2 ** 20, 2 * est)))

    out = pl.pallas_call(
        kernel,
        out_shape=jax.ShapeDtypeStruct((B, HW, C), x_nchw.dtype),
        grid=(B,),
        in_specs=[act_spec,
                  mat_spec, vec_spec, vec_spec, vec_spec,   # conv1, norm1
                  mat_spec, vec_spec,                       # conv2_1
                  mat_spec, vec_spec,                       # conv2_2
                  vec_spec, vec_spec,                       # norm2
                  mat_spec, vec_spec],                      # conv3
        out_specs=act_spec,
        scratch_shapes=[pltpu.VMEM((Hp, Wp, C), jnp.float32)],
        compiler_params=pltpu.CompilerParams(
            dimension_semantics=("parallel",),
            vmem_limit_bytes=vmem_limit),
    )(x,
      to_bf16(params['conv1_w']), row(params['conv1_b']),
      row(params['norm1_g']), row(params['norm1_b']),
      to_bf16(params['conv2_1_w']), row(params['conv2_1_b']),
      to_bf16(params['conv2_2_w']), row(params['conv2_2_b']),
      row(params['norm2_g']), row(params['norm2_b']),
      to_bf16(params['conv3_w']), row(params['conv3_b']))

    return jnp.transpose(out.reshape(B, H, W, C), (0, 3, 1, 2))     # back to NCHW


# ---------------------------------------------------------------------------
# pure-JAX f32 reference (mirrors the PyTorch forward) for validation
# ---------------------------------------------------------------------------
def axial_shift_reference(x_nchw, params, shift_size, eps=1e-5):
    B, C, H, W = x_nchw.shape
    pad = shift_size // 2
    x = jnp.transpose(x_nchw, (0, 2, 3, 1))                         # NHWC

    def pw(t, w, b):
        return jnp.einsum('bhwc,cd->bhwd', t, w) + b

    def gn(t, g, b):
        mean = jnp.mean(t, axis=(1, 2, 3), keepdims=True)
        var = jnp.mean((t - mean) ** 2, axis=(1, 2, 3), keepdims=True)
        return (t - mean) * jax.lax.rsqrt(var + eps) * g + b

    gelu = lambda t: jax.nn.gelu(t, approximate=False)

    h = gelu(gn(pw(x, params['conv1_w'], params['conv1_b']),
                params['norm1_g'], params['norm1_b']))
    hp = jnp.pad(h, ((0, 0), (pad, pad), (pad, pad), (0, 0)))
    bounds = _chunk_bounds(C, shift_size)
    shifts = list(range(-pad, pad + 1))
    lr, td = [], []
    for (c0, c1), s in zip(bounds, shifts):
        lr.append(hp[:, pad:pad + H, pad - s:pad - s + W, c0:c1])
        td.append(hp[:, pad - s:pad - s + H, pad:pad + W, c0:c1])
    x_lr = jnp.concatenate(lr, axis=-1)
    x_td = jnp.concatenate(td, axis=-1)
    y = gelu(pw(x_lr, params['conv2_1_w'], params['conv2_1_b'])) + \
        gelu(pw(x_td, params['conv2_2_w'], params['conv2_2_b']))
    y = gn(y, params['norm2_g'], params['norm2_b'])
    y = pw(y, params['conv3_w'], params['conv3_b'])
    return jnp.transpose(y, (0, 3, 1, 2))


# ---------------------------------------------------------------------------
if __name__ == "__main__":
    B, C, H, W = 2, 128, 16, 16     # lane-dense channel width, (8,128)-aligned
    shift_size = 3

    key = jax.random.PRNGKey(0)
    keys = jax.random.split(key, 13)

    # weights stored in (Cin, Cout) orientation for right-multiplication
    def wmat(k): return 0.02 * jax.random.normal(k, (C, C), jnp.float32)
    def bvec(k): return 0.02 * jax.random.normal(k, (C,), jnp.float32)

    params = dict(
        conv1_w=wmat(keys[0]), conv1_b=bvec(keys[1]),
        norm1_g=1.0 + 0.1 * jax.random.normal(keys[2], (C,), jnp.float32),
        norm1_b=0.02 * jax.random.normal(keys[3], (C,), jnp.float32),
        conv2_1_w=wmat(keys[4]), conv2_1_b=bvec(keys[5]),
        conv2_2_w=wmat(keys[6]), conv2_2_b=bvec(keys[7]),
        norm2_g=1.0 + 0.1 * jax.random.normal(keys[8], (C,), jnp.float32),
        norm2_b=0.02 * jax.random.normal(keys[9], (C,), jnp.float32),
        conv3_w=wmat(keys[10]), conv3_b=bvec(keys[11]),
    )
    x = jax.random.normal(keys[12], (B, C, H, W), jnp.float32)

    fwd = jax.jit(functools.partial(axial_shift_forward, shift_size=shift_size))
    out = jax.block_until_ready(fwd(x, params))

    assert out.shape == (B, C, H, W), out.shape
    assert bool(jnp.all(jnp.isfinite(out)))

    ref = axial_shift_reference(x, params, shift_size)
    err = float(jnp.max(jnp.abs(out - ref)))
    # bf16 matmul inputs + approx EUP reciprocal in GELU -> small numeric drift
    assert err < 5e-2, f"max abs err vs reference: {err}"

    print("KERNEL_OK")
</pallas_src>

<mosaic_0001>
module attributes {stable_mosaic.version = 11 : i64} {
  func.func @_axial_shift_kernel(%arg0: i32, %arg1: memref<1x256x128xf32, #tpu.memory_space<vmem>>, %arg2: memref<128x128xbf16, #tpu.memory_space<vmem>>, %arg3: memref<1x128xf32, #tpu.memory_space<vmem>>, %arg4: memref<1x128xf32, #tpu.memory_space<vmem>>, %arg5: memref<1x128xf32, #tpu.memory_space<vmem>>, %arg6: memref<128x128xbf16, #tpu.memory_space<vmem>>, %arg7: memref<1x128xf32, #tpu.memory_space<vmem>>, %arg8: memref<128x128xbf16, #tpu.memory_space<vmem>>, %arg9: memref<1x128xf32, #tpu.memory_space<vmem>>, %arg10: memref<1x128xf32, #tpu.memory_space<vmem>>, %arg11: memref<1x128xf32, #tpu.memory_space<vmem>>, %arg12: memref<128x128xbf16, #tpu.memory_space<vmem>>, %arg13: memref<1x128xf32, #tpu.memory_space<vmem>>, %arg14: memref<1x256x128xf32, #tpu.memory_space<vmem>>, %arg15: memref<18x18x128xf32, #tpu.memory_space<vmem>>) attributes {dimension_semantics = [#tpu.dimension_semantics<parallel>], iteration_bounds = array<i64: 2>, scalar_prefetch = 0 : i64, scratch_operands = 1 : i64, tpu.core_type = #tpu.core_type<tc>, window_params = [{transform_indices = @transform_0, window_bounds = array<i64: 1, 256, 128>}, {pipeline_mode = #tpu.pipeline_mode<synchronous>, transform_indices = @transform_1, window_bounds = array<i64: 128, 128>}, {pipeline_mode = #tpu.pipeline_mode<synchronous>, transform_indices = @transform_2, window_bounds = array<i64: 1, 128>}, {pipeline_mode = #tpu.pipeline_mode<synchronous>, transform_indices = @transform_3, window_bounds = array<i64: 1, 128>}, {pipeline_mode = #tpu.pipeline_mode<synchronous>, transform_indices = @transform_4, window_bounds = array<i64: 1, 128>}, {pipeline_mode = #tpu.pipeline_mode<synchronous>, transform_indices = @transform_5, window_bounds = array<i64: 128, 128>}, {pipeline_mode = #tpu.pipeline_mode<synchronous>, transform_indices = @transform_6, window_bounds = array<i64: 1, 128>}, {pipeline_mode = #tpu.pipeline_mode<synchronous>, transform_indices = @transform_7, window_bounds = array<i64: 128, 128>}, {pipeline_mode = #tpu.pipeline_mode<synchronous>, transform_indices = @transform_8, window_bounds = array<i64: 1, 128>}, {pipeline_mode = #tpu.pipeline_mode<synchronous>, transform_indices = @transform_9, window_bounds = array<i64: 1, 128>}, {pipeline_mode = #tpu.pipeline_mode<synchronous>, transform_indices = @transform_10, window_bounds = array<i64: 1, 128>}, {pipeline_mode = #tpu.pipeline_mode<synchronous>, transform_indices = @transform_11, window_bounds = array<i64: 128, 128>}, {pipeline_mode = #tpu.pipeline_mode<synchronous>, transform_indices = @transform_12, window_bounds = array<i64: 1, 128>}, {transform_indices = @transform_13, window_bounds = array<i64: 1, 256, 128>}]} {
    %c0 = arith.constant 0 : index
    %c0_0 = arith.constant 0 : index
    %c0_1 = arith.constant 0 : index
    %0 = vector.load %arg1[%c0, %c0_0, %c0_1] : memref<1x256x128xf32, #tpu.memory_space<vmem>>, vector<1x256x128xf32>
    %1 = vector.shape_cast %0 : vector<1x256x128xf32> to vector<256x128xf32>
    %2 = arith.truncf %1 : vector<256x128xf32> to vector<256x128xbf16>
    %c0_2 = arith.constant 0 : index
    %c0_3 = arith.constant 0 : index
    %3 = vector.load %arg2[%c0_2, %c0_3] : memref<128x128xbf16, #tpu.memory_space<vmem>>, vector<128x128xbf16>
    %cst = arith.constant dense<0.000000e+00> : vector<256x128xf32>
    %4 = tpu.matmul %2, %3, %cst {dimension_numbers = #tpu.dot_dimension_numbers<[1], [0], [0], [1], [0, 0, 1, 1], [], []>} : vector<256x128xbf16>, vector<128x128xbf16>, vector<256x128xf32> -> vector<256x128xf32>
    %c0_4 = arith.constant 0 : index
    %c0_5 = arith.constant 0 : index
    %5 = vector.load %arg3[%c0_4, %c0_5] : memref<1x128xf32, #tpu.memory_space<vmem>>, vector<1x128xf32>
    %6 = vector.broadcast %5 : vector<1x128xf32> to vector<256x128xf32>
    %7 = arith.addf %4, %6 : vector<256x128xf32>
    %c0_6 = arith.constant 0 : index
    %c0_7 = arith.constant 0 : index
    %8 = vector.load %arg4[%c0_6, %c0_7] : memref<1x128xf32, #tpu.memory_space<vmem>>, vector<1x128xf32>
    %c0_8 = arith.constant 0 : index
    %c0_9 = arith.constant 0 : index
    %9 = vector.load %arg5[%c0_8, %c0_9] : memref<1x128xf32, #tpu.memory_space<vmem>>, vector<1x128xf32>
    %10 = vector.shape_cast %7 : vector<256x128xf32> to vector<1x256x128xf32>
    %cst_10 = arith.constant dense<0.000000e+00> : vector<1xf32>
    %11 = vector.multi_reduction <add>, %10, %cst_10 [1, 2] : vector<1x256x128xf32> to vector<1xf32>
    %12 = vector.shape_cast %11 : vector<1xf32> to vector<1x1x1xf32>
    %13 = vector.extract %12[0, 0, 0] : f32 from vector<1x1x1xf32>
    %14 = vector.broadcast %13 : f32 to vector<1x1xf32>
    %15 = arith.mulf %7, %7 : vector<256x128xf32>
    %16 = vector.shape_cast %15 : vector<256x128xf32> to vector<1x256x128xf32>
    %cst_11 = arith.constant dense<0.000000e+00> : vector<1xf32>
    %17 = vector.multi_reduction <add>, %16, %cst_11 [1, 2] : vector<1x256x128xf32> to vector<1xf32>
    %18 = vector.shape_cast %17 : vector<1xf32> to vector<1x1x1xf32>
    %19 = vector.extract %18[0, 0, 0] : f32 from vector<1x1x1xf32>
    %20 = vector.broadcast %19 : f32 to vector<1x1xf32>
    %cst_12 = arith.constant 3.05175781E-5 : f32
    %21 = vector.broadcast %cst_12 : f32 to vector<1x1xf32>
    %22 = arith.mulf %14, %21 : vector<1x1xf32>
    %cst_13 = arith.constant 3.05175781E-5 : f32
    %23 = vector.broadcast %cst_13 : f32 to vector<1x1xf32>
    %24 = arith.mulf %20, %23 : vector<1x1xf32>
    %25 = arith.mulf %22, %22 : vector<1x1xf32>
    %26 = arith.subf %24, %25 : vector<1x1xf32>
    %cst_14 = arith.constant 9.99999974E-6 : f32
    %27 = vector.broadcast %cst_14 : f32 to vector<1x1xf32>
    %28 = arith.addf %26, %27 : vector<1x1xf32>
    %29 = math.rsqrt %28 : vector<1x1xf32>
    %30 = vector.broadcast %22 : vector<1x1xf32> to vector<256x128xf32>
    %31 = arith.subf %7, %30 : vector<256x128xf32>
    %32 = vector.broadcast %29 : vector<1x1xf32> to vector<256x128xf32>
    %33 = arith.mulf %31, %32 : vector<256x128xf32>
    %34 = vector.broadcast %8 : vector<1x128xf32> to vector<256x128xf32>
    %35 = arith.mulf %33, %34 : vector<256x128xf32>
    %36 = vector.broadcast %9 : vector<1x128xf32> to vector<256x128xf32>
    %37 = arith.addf %35, %36 : vector<256x128xf32>
    %cst_15 = arith.constant 0.707106769 : f32
    %38 = vector.broadcast %cst_15 : f32 to vector<256x128xf32>
    %39 = arith.mulf %37, %38 : vector<256x128xf32>
    %40 = math.absf %39 : vector<256x128xf32>
    %cst_16 = arith.constant 0.327591091 : f32
    %41 = vector.broadcast %cst_16 : f32 to vector<256x128xf32>
    %42 = arith.mulf %41, %40 : vector<256x128xf32>
    %cst_17 = arith.constant 1.000000e+00 : f32
    %43 = vector.broadcast %cst_17 : f32 to vector<256x128xf32>
    %44 = arith.addf %43, %42 : vector<256x128xf32>
    %45 = tpu.reciprocal %44 {approx = true} : vector<256x128xf32> -> vector<256x128xf32>
    %cst_18 = arith.constant 1.06140542 : f32
    %46 = vector.broadcast %cst_18 : f32 to vector<256x128xf32>
    %47 = arith.mulf %46, %45 : vector<256x128xf32>
    %cst_19 = arith.constant -1.45315206 : f32
    %48 = vector.broadcast %cst_19 : f32 to vector<256x128xf32>
    %49 = arith.addf %47, %48 : vector<256x128xf32>
    %50 = arith.mulf %49, %45 : vector<256x128xf32>
    %cst_20 = arith.constant 1.42141378 : f32
    %51 = vector.broadcast %cst_20 : f32 to vector<256x128xf32>
    %52 = arith.addf %50, %51 : vector<256x128xf32>
    %53 = arith.mulf %52, %45 : vector<256x128xf32>
    %cst_21 = arith.constant -0.284496725 : f32
    %54 = vector.broadcast %cst_21 : f32 to vector<256x128xf32>
    %55 = arith.addf %53, %54 : vector<256x128xf32>
    %56 = arith.mulf %55, %45 : vector<256x128xf32>
    %cst_22 = arith.constant 0.254829586 : f32
    %57 = vector.broadcast %cst_22 : f32 to vector<256x128xf32>
    %58 = arith.addf %56, %57 : vector<256x128xf32>
    %59 = arith.mulf %58, %45 : vector<256x128xf32>
    %cst_23 = arith.constant 0.000000e+00 : f32
    %60 = vector.broadcast %cst_23 : f32 to vector<256x128xf32>
    %61 = arith.subf %60, %40 : vector<256x128xf32>
    %62 = arith.mulf %61, %40 : vector<256x128xf32>
    %63 = math.exp %62 : vector<256x128xf32>
    %64 = arith.mulf %59, %63 : vector<256x128xf32>
    %cst_24 = arith.constant 1.000000e+00 : f32
    %65 = vector.broadcast %cst_24 : f32 to vector<256x128xf32>
    %66 = arith.subf %65, %64 : vector<256x128xf32>
    %cst_25 = arith.constant 0.000000e+00 : f32
    %67 = vector.broadcast %cst_25 : f32 to vector<256x128xf32>
    %68 = arith.cmpf oge, %39, %67 : vector<256x128xf32>
    %cst_26 = arith.constant 0.000000e+00 : f32
    %69 = vector.broadcast %cst_26 : f32 to vector<256x128xf32>
    %70 = arith.subf %69, %66 : vector<256x128xf32>
    %71 = arith.select %68, %66, %70 : vector<256x128xi1>, vector<256x128xf32>
    %cst_27 = arith.constant 5.000000e-01 : f32
    %72 = vector.broadcast %cst_27 : f32 to vector<256x128xf32>
    %73 = arith.mulf %72, %37 : vector<256x128xf32>
    %cst_28 = arith.constant 1.000000e+00 : f32
    %74 = vector.broadcast %cst_28 : f32 to vector<256x128xf32>
    %75 = arith.addf %74, %71 : vector<256x128xf32>
    %76 = arith.mulf %73, %75 : vector<256x128xf32>
    %cst_29 = arith.constant 0.000000e+00 : f32
    %77 = vector.broadcast %cst_29 : f32 to vector<18x18x128xf32>
    %c0_30 = arith.constant 0 : index
    %c0_31 = arith.constant 0 : index
    %c0_32 = arith.constant 0 : index
    %78 = vector.load %arg15[%c0_30, %c0_31, %c0_32] : memref<18x18x128xf32, #tpu.memory_space<vmem>>, vector<18x18x128xf32>
    tpu.vector_store %arg15[%c0_30, %c0_31, %c0_32], %77 {strides = array<i32>} : memref<18x18x128xf32, #tpu.memory_space<vmem>>, vector<18x18x128xf32>,
    %79 = vector.shape_cast %76 : vector<256x128xf32> to vector<16x16x128xf32>
    %c1 = arith.constant 1 : index
    %c1_33 = arith.constant 1 : index
    %c0_34 = arith.constant 0 : index
    %80 = vector.load %arg15[%c1, %c1_33, %c0_34] : memref<18x18x128xf32, #tpu.memory_space<vmem>>, vector<16x16x128xf32>
    tpu.vector_store %arg15[%c1, %c1_33, %c0_34], %79 {strides = array<i32>} : memref<18x18x128xf32, #tpu.memory_space<vmem>>, vector<16x16x128xf32>,
    %81 = tpu.iota {dimensions = array<i32: 2>} : vector<1x1x128xi32>
    %c1_35 = arith.constant 1 : index
    %c2 = arith.constant 2 : index
    %c0_36 = arith.constant 0 : index
    %82 = vector.load %arg15[%c1_35, %c2, %c0_36] : memref<18x18x128xf32, #tpu.memory_space<vmem>>, vector<16x16x128xf32>
    %c2_37 = arith.constant 2 : index
    %c1_38 = arith.constant 1 : index
    %c0_39 = arith.constant 0 : index
    %83 = vector.load %arg15[%c2_37, %c1_38, %c0_39] : memref<18x18x128xf32, #tpu.memory_space<vmem>>, vector<16x16x128xf32>
    %c1_40 = arith.constant 1 : index
    %c1_41 = arith.constant 1 : index
    %c0_42 = arith.constant 0 : index
    %84 = vector.load %arg15[%c1_40, %c1_41, %c0_42] : memref<18x18x128xf32, #tpu.memory_space<vmem>>, vector<16x16x128xf32>
    %c1_43 = arith.constant 1 : index
    %c1_44 = arith.constant 1 : index
    %c0_45 = arith.constant 0 : index
    %85 = vector.load %arg15[%c1_43, %c1_44, %c0_45] : memref<18x18x128xf32, #tpu.memory_space<vmem>>, vector<16x16x128xf32>
    %c43_i32 = arith.constant 43 : i32
    %86 = vector.broadcast %c43_i32 : i32 to vector<1x1x128xi32>
    %87 = arith.cmpi sge, %81, %86 : vector<1x1x128xi32>
    %c86_i32 = arith.constant 86 : i32
    %88 = vector.broadcast %c86_i32 : i32 to vector<1x1x128xi32>
    %89 = arith.cmpi slt, %81, %88 : vector<1x1x128xi32>
    %90 = arith.andi %87, %89 : vector<1x1x128xi1>
    %91 = vector.shape_cast %90 : vector<1x1x128xi1> to vector<1x1x128xi1>
    %92 = vector.broadcast %91 : vector<1x1x128xi1> to vector<16x16x128xi1>
    %93 = arith.select %92, %84, %82 : vector<16x16x128xi1>, vector<16x16x128xf32>
    %94 = vector.shape_cast %90 : vector<1x1x128xi1> to vector<1x1x128xi1>
    %95 = vector.broadcast %94 : vector<1x1x128xi1> to vector<16x16x128xi1>
    %96 = arith.select %95, %85, %83 : vector<16x16x128xi1>, vector<16x16x128xf32>
    %c1_46 = arith.constant 1 : index
    %c0_47 = arith.constant 0 : index
    %c0_48 = arith.constant 0 : index
    %97 = vector.load %arg15[%c1_46, %c0_47, %c0_48] : memref<18x18x128xf32, #tpu.memory_space<vmem>>, vector<16x16x128xf32>
    %c0_49 = arith.constant 0 : index
    %c1_50 = arith.constant 1 : index
    %c0_51 = arith.constant 0 : index
    %98 = vector.load %arg15[%c0_49, %c1_50, %c0_51] : memref<18x18x128xf32, #tpu.memory_space<vmem>>, vector<16x16x128xf32>
    %c86_i32_52 = arith.constant 86 : i32
    %99 = vector.broadcast %c86_i32_52 : i32 to vector<1x1x128xi32>
    %100 = arith.cmpi sge, %81, %99 : vector<1x1x128xi32>
    %c128_i32 = arith.constant 128 : i32
    %101 = vector.broadcast %c128_i32 : i32 to vector<1x1x128xi32>
    %102 = arith.cmpi slt, %81, %101 : vector<1x1x128xi32>
    %103 = arith.andi %100, %102 : vector<1x1x128xi1>
    %104 = vector.shape_cast %103 : vector<1x1x128xi1> to vector<1x1x128xi1>
    %105 = vector.broadcast %104 : vector<1x1x128xi1> to vector<16x16x128xi1>
    %106 = arith.select %105, %97, %93 : vector<16x16x128xi1>, vector<16x16x128xf32>
    %107 = vector.shape_cast %103 : vector<1x1x128xi1> to vector<1x1x128xi1>
    %108 = vector.broadcast %107 : vector<1x1x128xi1> to vector<16x16x128xi1>
    %109 = arith.select %108, %98, %96 : vector<16x16x128xi1>, vector<16x16x128xf32>
    %110 = vector.shape_cast %106 : vector<16x16x128xf32> to vector<256x128xf32>
    %111 = arith.truncf %110 : vector<256x128xf32> to vector<256x128xbf16>
    %112 = vector.shape_cast %109 : vector<16x16x128xf32> to vector<256x128xf32>
    %113 = arith.truncf %112 : vector<256x128xf32> to vector<256x128xbf16>
    %c0_53 = arith.constant 0 : index
    %c0_54 = arith.constant 0 : index
    %114 = vector.load %arg6[%c0_53, %c0_54] : memref<128x128xbf16, #tpu.memory_space<vmem>>, vector<128x128xbf16>
    %cst_55 = arith.constant dense<0.000000e+00> : vector<256x128xf32>
    %115 = tpu.matmul %111, %114, %cst_55 {dimension_numbers = #tpu.dot_dimension_numbers<[1], [0], [0], [1], [0, 0, 1, 1], [], []>} : vector<256x128xbf16>, vector<128x128xbf16>, vector<256x128xf32> -> vector<256x128xf32>
    %c0_56 = arith.constant 0 : index
    %c0_57 = arith.constant 0 : index
    %116 = vector.load %arg7[%c0_56, %c0_57] : memref<1x128xf32, #tpu.memory_space<vmem>>, vector<1x128xf32>
    %117 = vector.broadcast %116 : vector<1x128xf32> to vector<256x128xf32>
    %118 = arith.addf %115, %117 : vector<256x128xf32>
    %c0_58 = arith.constant 0 : index
    %c0_59 = arith.constant 0 : index
    %119 = vector.load %arg8[%c0_58, %c0_59] : memref<128x128xbf16, #tpu.memory_space<vmem>>, vector<128x128xbf16>
    %cst_60 = arith.constant dense<0.000000e+00> : vector<256x128xf32>
    %120 = tpu.matmul %113, %119, %cst_60 {dimension_numbers = #tpu.dot_dimension_numbers<[1], [0], [0], [1], [0, 0, 1, 1], [], []>} : vector<256x128xbf16>, vector<128x128xbf16>, vector<256x128xf32> -> vector<256x128xf32>
    %c0_61 = arith.constant 0 : index
    %c0_62 = arith.constant 0 : index
    %121 = vector.load %arg9[%c0_61, %c0_62] : memref<1x128xf32, #tpu.memory_space<vmem>>, vector<1x128xf32>
    %122 = vector.broadcast %121 : vector<1x128xf32> to vector<256x128xf32>
    %123 = arith.addf %120, %122 : vector<256x128xf32>
    %cst_63 = arith.constant 0.707106769 : f32
    %124 = vector.broadcast %cst_63 : f32 to vector<256x128xf32>
    %125 = arith.mulf %118, %124 : vector<256x128xf32>
    %126 = math.absf %125 : vector<256x128xf32>
    %cst_64 = arith.constant 0.327591091 : f32
    %127 = vector.broadcast %cst_64 : f32 to vector<256x128xf32>
    %128 = arith.mulf %127, %126 : vector<256x128xf32>
    %cst_65 = arith.constant 1.000000e+00 : f32
    %129 = vector.broadcast %cst_65 : f32 to vector<256x128xf32>
    %130 = arith.addf %129, %128 : vector<256x128xf32>
    %131 = tpu.reciprocal %130 {approx = true} : vector<256x128xf32> -> vector<256x128xf32>
    %cst_66 = arith.constant 1.06140542 : f32
    %132 = vector.broadcast %cst_66 : f32 to vector<256x128xf32>
    %133 = arith.mulf %132, %131 : vector<256x128xf32>
    %cst_67 = arith.constant -1.45315206 : f32
    %134 = vector.broadcast %cst_67 : f32 to vector<256x128xf32>
    %135 = arith.addf %133, %134 : vector<256x128xf32>
    %136 = arith.mulf %135, %131 : vector<256x128xf32>
    %cst_68 = arith.constant 1.42141378 : f32
    %137 = vector.broadcast %cst_68 : f32 to vector<256x128xf32>
    %138 = arith.addf %136, %137 : vector<256x128xf32>
    %139 = arith.mulf %138, %131 : vector<256x128xf32>
    %cst_69 = arith.constant -0.284496725 : f32
    %140 = vector.broadcast %cst_69 : f32 to vector<256x128xf32>
    %141 = arith.addf %139, %140 : vector<256x128xf32>
    %142 = arith.mulf %141, %131 : vector<256x128xf32>
    %cst_70 = arith.constant 0.254829586 : f32
    %143 = vector.broadcast %cst_70 : f32 to vector<256x128xf32>
    %144 = arith.addf %142, %143 : vector<256x128xf32>
    %145 = arith.mulf %144, %131 : vector<256x128xf32>
    %cst_71 = arith.constant 0.000000e+00 : f32
    %146 = vector.broadcast %cst_71 : f32 to vector<256x128xf32>
    %147 = arith.subf %146, %126 : vector<256x128xf32>
    %148 = arith.mulf %147, %126 : vector<256x128xf32>
    %149 = math.exp %148 : vector<256x128xf32>
    %150 = arith.mulf %145, %149 : vector<256x128xf32>
    %cst_72 = arith.constant 1.000000e+00 : f32
    %151 = vector.broadcast %cst_72 : f32 to vector<256x128xf32>
    %152 = arith.subf %151, %150 : vector<256x128xf32>
    %cst_73 = arith.constant 0.000000e+00 : f32
    %153 = vector.broadcast %cst_73 : f32 to vector<256x128xf32>
    %154 = arith.cmpf oge, %125, %153 : vector<256x128xf32>
    %cst_74 = arith.constant 0.000000e+00 : f32
    %155 = vector.broadcast %cst_74 : f32 to vector<256x128xf32>
    %156 = arith.subf %155, %152 : vector<256x128xf32>
    %157 = arith.select %154, %152, %156 : vector<256x128xi1>, vector<256x128xf32>
    %cst_75 = arith.constant 5.000000e-01 : f32
    %158 = vector.broadcast %cst_75 : f32 to vector<256x128xf32>
    %159 = arith.mulf %158, %118 : vector<256x128xf32>
    %cst_76 = arith.constant 1.000000e+00 : f32
    %160 = vector.broadcast %cst_76 : f32 to vector<256x128xf32>
    %161 = arith.addf %160, %157 : vector<256x128xf32>
    %162 = arith.mulf %159, %161 : vector<256x128xf32>
    %cst_77 = arith.constant 0.707106769 : f32
    %163 = vector.broadcast %cst_77 : f32 to vector<256x128xf32>
    %164 = arith.mulf %123, %163 : vector<256x128xf32>
    %165 = math.absf %164 : vector<256x128xf32>
    %cst_78 = arith.constant 0.327591091 : f32
    %166 = vector.broadcast %cst_78 : f32 to vector<256x128xf32>
    %167 = arith.mulf %166, %165 : vector<256x128xf32>
    %cst_79 = arith.constant 1.000000e+00 : f32
    %168 = vector.broadcast %cst_79 : f32 to vector<256x128xf32>
    %169 = arith.addf %168, %167 : vector<256x128xf32>
    %170 = tpu.reciprocal %169 {approx = true} : vector<256x128xf32> -> vector<256x128xf32>
    %cst_80 = arith.constant 1.06140542 : f32
    %171 = vector.broadcast %cst_80 : f32 to vector<256x128xf32>
    %172 = arith.mulf %171, %170 : vector<256x128xf32>
    %cst_81 = arith.constant -1.45315206 : f32
    %173 = vector.broadcast %cst_81 : f32 to vector<256x128xf32>
    %174 = arith.addf %172, %173 : vector<256x128xf32>
    %175 = arith.mulf %174, %170 : vector<256x128xf32>
    %cst_82 = arith.constant 1.42141378 : f32
    %176 = vector.broadcast %cst_82 : f32 to vector<256x128xf32>
    %177 = arith.addf %175, %176 : vector<256x128xf32>
    %178 = arith.mulf %177, %170 : vector<256x128xf32>
    %cst_83 = arith.constant -0.284496725 : f32
    %179 = vector.broadcast %cst_83 : f32 to vector<256x128xf32>
    %180 = arith.addf %178, %179 : vector<256x128xf32>
    %181 = arith.mulf %180, %170 : vector<256x128xf32>
    %cst_84 = arith.constant 0.254829586 : f32
    %182 = vector.broadcast %cst_84 : f32 to vector<256x128xf32>
    %183 = arith.addf %181, %182 : vector<256x128xf32>
    %184 = arith.mulf %183, %170 : vector<256x128xf32>
    %cst_85 = arith.constant 0.000000e+00 : f32
    %185 = vector.broadcast %cst_85 : f32 to vector<256x128xf32>
    %186 = arith.subf %185, %165 : vector<256x128xf32>
    %187 = arith.mulf %186, %165 : vector<256x128xf32>
    %188 = math.exp %187 : vector<256x128xf32>
    %189 = arith.mulf %184, %188 : vector<256x128xf32>
    %cst_86 = arith.constant 1.000000e+00 : f32
    %190 = vector.broadcast %cst_86 : f32 to vector<256x128xf32>
    %191 = arith.subf %190, %189 : vector<256x128xf32>
    %cst_87 = arith.constant 0.000000e+00 : f32
    %192 = vector.broadcast %cst_87 : f32 to vector<256x128xf32>
    %193 = arith.cmpf oge, %164, %192 : vector<256x128xf32>
    %cst_88 = arith.constant 0.000000e+00 : f32
    %194 = vector.broadcast %cst_88 : f32 to vector<256x128xf32>
    %195 = arith.subf %194, %191 : vector<256x128xf32>
    %196 = arith.select %193, %191, %195 : vector<256x128xi1>, vector<256x128xf32>
    %cst_89 = arith.constant 5.000000e-01 : f32
    %197 = vector.broadcast %cst_89 : f32 to vector<256x128xf32>
    %198 = arith.mulf %197, %123 : vector<256x128xf32>
    %cst_90 = arith.constant 1.000000e+00 : f32
    %199 = vector.broadcast %cst_90 : f32 to vector<256x128xf32>
    %200 = arith.addf %199, %196 : vector<256x128xf32>
    %201 = arith.mulf %198, %200 : vector<256x128xf32>
    %202 = arith.addf %162, %201 : vector<256x128xf32>
    %c0_91 = arith.constant 0 : index
    %c0_92 = arith.constant 0 : index
    %203 = vector.load %arg10[%c0_91, %c0_92] : memref<1x128xf32, #tpu.memory_space<vmem>>, vector<1x128xf32>
    %c0_93 = arith.constant 0 : index
    %c0_94 = arith.constant 0 : index
    %204 = vector.load %arg11[%c0_93, %c0_94] : memref<1x128xf32, #tpu.memory_space<vmem>>, vector<1x128xf32>
    %205 = vector.shape_cast %202 : vector<256x128xf32> to vector<1x256x128xf32>
    %cst_95 = arith.constant dense<0.000000e+00> : vector<1xf32>
    %206 = vector.multi_reduction <add>, %205, %cst_95 [1, 2] : vector<1x256x128xf32> to vector<1xf32>
    %207 = vector.shape_cast %206 : vector<1xf32> to vector<1x1x1xf32>
    %208 = vector.extract %207[0, 0, 0] : f32 from vector<1x1x1xf32>
    %209 = vector.broadcast %208 : f32 to vector<1x1xf32>
    %210 = arith.mulf %202, %202 : vector<256x128xf32>
    %211 = vector.shape_cast %210 : vector<256x128xf32> to vector<1x256x128xf32>
    %cst_96 = arith.constant dense<0.000000e+00> : vector<1xf32>
    %212 = vector.multi_reduction <add>, %211, %cst_96 [1, 2] : vector<1x256x128xf32> to vector<1xf32>
    %213 = vector.shape_cast %212 : vector<1xf32> to vector<1x1x1xf32>
    %214 = vector.extract %213[0, 0, 0] : f32 from vector<1x1x1xf32>
    %215 = vector.broadcast %214 : f32 to vector<1x1xf32>
    %cst_97 = arith.constant 3.05175781E-5 : f32
    %216 = vector.broadcast %cst_97 : f32 to vector<1x1xf32>
    %217 = arith.mulf %209, %216 : vector<1x1xf32>
    %cst_98 = arith.constant 3.05175781E-5 : f32
    %218 = vector.broadcast %cst_98 : f32 to vector<1x1xf32>
    %219 = arith.mulf %215, %218 : vector<1x1xf32>
    %220 = arith.mulf %217, %217 : vector<1x1xf32>
    %221 = arith.subf %219, %220 : vector<1x1xf32>
    %cst_99 = arith.constant 9.99999974E-6 : f32
    %222 = vector.broadcast %cst_99 : f32 to vector<1x1xf32>
    %223 = arith.addf %221, %222 : vector<1x1xf32>
    %224 = math.rsqrt %223 : vector<1x1xf32>
    %225 = vector.broadcast %217 : vector<1x1xf32> to vector<256x128xf32>
    %226 = arith.subf %202, %225 : vector<256x128xf32>
    %227 = vector.broadcast %224 : vector<1x1xf32> to vector<256x128xf32>
    %228 = arith.mulf %226, %227 : vector<256x128xf32>
    %229 = vector.broadcast %203 : vector<1x128xf32> to vector<256x128xf32>
    %230 = arith.mulf %228, %229 : vector<256x128xf32>
    %231 = vector.broadcast %204 : vector<1x128xf32> to vector<256x128xf32>
    %232 = arith.addf %230, %231 : vector<256x128xf32>
    %233 = arith.truncf %232 : vector<256x128xf32> to vector<256x128xbf16>
    %c0_100 = arith.constant 0 : index
    %c0_101 = arith.constant 0 : index
    %234 = vector.load %arg12[%c0_100, %c0_101] : memref<128x128xbf16, #tpu.memory_space<vmem>>, vector<128x128xbf16>
    %cst_102 = arith.constant dense<0.000000e+00> : vector<256x128xf32>
    %235 = tpu.matmul %233, %234, %cst_102 {dimension_numbers = #tpu.dot_dimension_numbers<[1], [0], [0], [1], [0, 0, 1, 1], [], []>} : vector<256x128xbf16>, vector<128x128xbf16>, vector<256x128xf32> -> vector<256x128xf32>
    %c0_103 = arith.constant 0 : index
    %c0_104 = arith.constant 0 : index
    %236 = vector.load %arg13[%c0_103, %c0_104] : memref<1x128xf32, #tpu.memory_space<vmem>>, vector<1x128xf32>
    %237 = vector.broadcast %236 : vector<1x128xf32> to vector<256x128xf32>
    %238 = arith.addf %235, %237 : vector<256x128xf32>
    %c0_105 = arith.constant 0 : index
    %c0_106 = arith.constant 0 : index
    %c0_107 = arith.constant 0 : index
    %239 = vector.load %arg14[%c0_105, %c0_106, %c0_107] : memref<1x256x128xf32, #tpu.memory_space<vmem>>, vector<1x256x128xf32>
    %240 = vector.shape_cast %239 : vector<1x256x128xf32> to vector<256x128xf32>
    %241 = vector.shape_cast %238 : vector<256x128xf32> to vector<1x256x128xf32>
    tpu.vector_store %arg14[%c0_105, %c0_106, %c0_107], %241 {strides = array<i32>} : memref<1x256x128xf32, #tpu.memory_space<vmem>>, vector<1x256x128xf32>,
    return
  }
  func.func @transform_0(%arg0: i32) -> (i32, i32, i32) {
    %c0_i32 = arith.constant 0 : i32
    %c0_i32_0 = arith.constant 0 : i32
    %c0_i32_1 = arith.constant 0 : i32
    return %arg0, %c0_i32, %c0_i32_0 : i32, i32, i32
  }
  func.func @transform_1(%arg0: i32) -> (i32, i32) {
    %c0_i32 = arith.constant 0 : i32
    %c0_i32_0 = arith.constant 0 : i32
    %c0_i32_1 = arith.constant 0 : i32
    return %c0_i32, %c0_i32_0 : i32, i32
  }
  func.func @transform_2(%arg0: i32) -> (i32, i32) {
    %c0_i32 = arith.constant 0 : i32
    %c0_i32_0 = arith.constant 0 : i32
    %c0_i32_1 = arith.constant 0 : i32
    return %c0_i32, %c0_i32_0 : i32, i32
  }
  func.func @transform_3(%arg0: i32) -> (i32, i32) {
    %c0_i32 = arith.constant 0 : i32
    %c0_i32_0 = arith.constant 0 : i32
    %c0_i32_1 = arith.constant 0 : i32
    return %c0_i32, %c0_i32_0 : i32, i32
  }
  func.func @transform_4(%arg0: i32) -> (i32, i32) {
    %c0_i32 = arith.constant 0 : i32
    %c0_i32_0 = arith.constant 0 : i32
    %c0_i32_1 = arith.constant 0 : i32
    return %c0_i32, %c0_i32_0 : i32, i32
  }
  func.func @transform_5(%arg0: i32) -> (i32, i32) {
    %c0_i32 = arith.constant 0 : i32
    %c0_i32_0 = arith.constant 0 : i32
    %c0_i32_1 = arith.constant 0 : i32
    return %c0_i32, %c0_i32_0 : i32, i32
  }
  func.func @transform_6(%arg0: i32) -> (i32, i32) {
    %c0_i32 = arith.constant 0 : i32
    %c0_i32_0 = arith.constant 0 : i32
    %c0_i32_1 = arith.constant 0 : i32
    return %c0_i32, %c0_i32_0 : i32, i32
  }
  func.func @transform_7(%arg0: i32) -> (i32, i32) {
    %c0_i32 = arith.constant 0 : i32
    %c0_i32_0 = arith.constant 0 : i32
    %c0_i32_1 = arith.constant 0 : i32
    return %c0_i32, %c0_i32_0 : i32, i32
  }
  func.func @transform_8(%arg0: i32) -> (i32, i32) {
    %c0_i32 = arith.constant 0 : i32
    %c0_i32_0 = arith.constant 0 : i32
    %c0_i32_1 = arith.constant 0 : i32
    return %c0_i32, %c0_i32_0 : i32, i32
  }
  func.func @transform_9(%arg0: i32) -> (i32, i32) {
    %c0_i32 = arith.constant 0 : i32
    %c0_i32_0 = arith.constant 0 : i32
    %c0_i32_1 = arith.constant 0 : i32
    return %c0_i32, %c0_i32_0 : i32, i32
  }
  func.func @transform_10(%arg0: i32) -> (i32, i32) {
    %c0_i32 = arith.constant 0 : i32
    %c0_i32_0 = arith.constant 0 : i32
    %c0_i32_1 = arith.constant 0 : i32
    return %c0_i32, %c0_i32_0 : i32, i32
  }
  func.func @transform_11(%arg0: i32) -> (i32, i32) {
    %c0_i32 = arith.constant 0 : i32
    %c0_i32_0 = arith.constant 0 : i32
    %c0_i32_1 = arith.constant 0 : i32
    return %c0_i32, %c0_i32_0 : i32, i32
  }
  func.func @transform_12(%arg0: i32) -> (i32, i32) {
    %c0_i32 = arith.constant 0 : i32
    %c0_i32_0 = arith.constant 0 : i32
    %c0_i32_1 = arith.constant 0 : i32
    return %c0_i32, %c0_i32_0 : i32, i32
  }
  func.func @transform_13(%arg0: i32) -> (i32, i32, i32) {
    %c0_i32 = arith.constant 0 : i32
    %c0_i32_0 = arith.constant 0 : i32
    %c0_i32_1 = arith.constant 0 : i32
    return %arg0, %c0_i32, %c0_i32_0 : i32, i32, i32
  }
}

</mosaic_0001>

<bundles_post_ra>
// kernel: axial_shift_forward.1
= control target key start
LH: loop header
LB: loop body
LE: loop exit
PB: predicated region body
PF: predicated region fallthrough
CT: control target
= control target key end

     0   :  { %s10125_s0 = inlined_call_operand.hbm [shape: f32[2,256,128], index: 0, kind: input, shape index: {}]   ;;  %s10126_s1 = inlined_call_operand.vmem [shape: bf16[128,128], index: 1, kind: input, shape index: {}]   ;;  %s10127_s2 = inlined_call_operand.vmem [shape: f32[1,128], index: 2, kind: input, shape index: {}]   ;;  %s10128_s3 = inlined_call_operand.vmem [shape: f32[1,128], index: 3, kind: input, shape index: {}]   ;;  %s10129_s4 = inlined_call_operand.vmem [shape: f32[1,128], index: 4, kind: input, shape index: {}]   ;;  %s10130_s5 = inlined_call_operand.vmem [shape: bf16[128,128], index: 5, kind: input, shape index: {}]   ;;  %s10131_s6 = inlined_call_operand.vmem [shape: f32[1,128], index: 6, kind: input, shape index: {}]   ;;  %s10132_s7 = inlined_call_operand.vmem [shape: bf16[128,128], index: 7, kind: input, shape index: {}]   ;;  %s10133_s8 = inlined_call_operand.vmem [shape: f32[1,128], index: 8, kind: input, shape index: {}]   ;;  %s10134_s9 = inlined_call_operand.vmem [shape: f32[1,128], index: 9, kind: input, shape index: {}]   ;;  %s10135_s10 = inlined_call_operand.vmem [shape: f32[1,128], index: 10, kind: input, shape index: {}]   ;;  %s10136_s11 = inlined_call_operand.vmem [shape: bf16[128,128], index: 11, kind: input, shape index: {}]   ;;  %s10137_s12 = inlined_call_operand.vmem [shape: f32[1,128], index: 12, kind: input, shape index: {}]   ;;  %s10138_s13 = inlined_call_operand.hbm [shape: f32[2,256,128], index: 13, kind: output, shape index: {}]  }
   0x1   :  { %10425 = sst [smem:[#allocation140_spill]] %s10125_s0 }
   0x2   :  { %10426 = sst [smem:[#allocation141_spill]] %s10138_s13 }
   0x3   :  { %18 = vsyncpa [#allocation4], 0 }
   0x4   :  { %20 = vsyncpa [#allocation4 + $0x1], 0 }
   0x5   :  { %21 = vsyncpa [#allocation5], 0 }
   0x6   :  { %23 = vsyncpa [#allocation5 + $0x1], 0  ;;  %s5562_s25 = smov 0   ;;  %s5564_s26 = smov 0  }
   0x7   :  { %s5566_s27 = smov 0   ;;  %s5568_s28 = smov 0  }
   0x8 LB: > { %10427 = sst [smem:[#allocation9_spill]] %s5473_s25  ;;  %s5583_s29 = sadd.s32 4294967295, %s5485_s28   ;;  %s5485_s28 = sphi %s5568_s28, %s10977_s28   ;;  %s5481_s27 = sphi %s5566_s27, %s10982_s27   ;;  %s5477_s26 = sphi %s5564_s26, %s10981_s26   ;;  %s5473_s25 = sphi %s5562_s25, %s10980_s25  }
   0x9   : > { %10428 = sst [smem:[#allocation10_spill]] %s5481_s27  ;;  %s4752_s30 = sadd.s32 4294967294, %s5485_s28  }
   0xa   : > { %s5587_s14 = sadd.s32 1, %s5485_s28   ;;  %s36_s15 = sadd.s32 1, %s5481_s27 }
   0xb   : > { %10429 = sst [smem:[#allocation11_spill]] %s5587_s14  ;;  %s33_s16 = ssub.s32 %s5485_s28, %s5587_s14 }
   0xc   : > { %p43_p0 = scmp.ne.s32.totalorder %s5481_s27, %s5477_s26  ;;  %p34_p1 = scmp.eq.s32.totalorder %s33_s16, 0 }
   0xd   : > { %p44_p2 = scmp.eq.s32.totalorder %s5485_s28, 0  ;;  %p49_p3 = scmp.ne.s32.totalorder %s5477_s26, %s5473_s25 }
   0xe   : > { %p50_p4 = scmp.eq.s32.totalorder %s5583_s29, 0  ;;  %p325_p7 = scmp.eq.s32.totalorder %s5583_s29, 1 }
   0xf   : > { %s5599_s17 = scalar_select %p34_p1, %s5481_s27, %s36_s15  }
  0x10   : > { %p5601_p5 = por %p44_p2, %p43_p0  ;;  %p5605_p6 = por %p50_p4, %p49_p3 }
  0x11   : > { %10430 = sst [smem:[#allocation12_spill]] %s5599_s17  ;;  %p331_p8 = scmp.eq.s32.totalorder %s4752_s30, 1 }
  0x12   : > { %p4948_p10 = scmp.lt.s32.totalorder %s5485_s28, 2  ;;  %p5612_p11 = por %p325_p7, %p43_p0 }
  0x13   : > { %p5616_p12 = por %p331_p8, %p49_p3  ;;  %s387_s22 = sand.u32 1, %s5481_s27  }
  0x14   : > { %s10433_s20 = scalar_select %p5612_p11, 1, 0 }
  0x15   : > { %s10435_s21 = scalar_select %p5616_p12, 1, 0 }
  0x16   : > { %10434 = sst [smem:[#allocation13_spill]] %s10433_s20  ;;  %s4894_s23 = sshll.u32 %s5485_s28, 8 }
  0x17   : > { %10436 = sst [smem:[#allocation14_spill]] %s10435_s21  ;;  %s4755_s24 = sshll.u32 %s387_s22, 8 }
  0x18   : > { %s10437_s0 = sld [smem:[#allocation140_spill]]  ;;  %s391_s30 = scalar_lea.vmem [#allocation3], %s4755_s24 }
  0x19   : > { %s399_s25 = sshll.u32 %s391_s30, 4  ;;  %p5627_p13 = pnand %p4948_p10, %p5601_p5  ;;  %s400_s25 = int_to_ptr.vmem [resolvable:$true] %s399_s25 }
  0x1a   : > { %p4758_p0 = scmp.ge.s32.totalorder %s5485_s28, 1  ;;  %p407_p1 = scmp.lt.s32.totalorder %s5485_s28, 3 }
  0x1b   : > { %s388_s27 = scalar_lea.sflag [#allocation4], %s387_s22  ;;  %p5393_p3 = pneg %p5627_p13 }
  0x1e   : > { %s396_s17 = scalar_lea.hbm %s10437_s0, %s4894_s23  ;;  %s5396_s18 = scalar_lea.hbm %s10437_s0, 512 }
  0x1f   : > { %s397_s14 = sshll.u32 %s396_s17, 4  ;;  %s398_s14 = int_to_ptr.hbm [resolvable:$true] %s397_s14 }
  0x20   : > { %s5389_s21 = sshra.s32 %s398_s14, 4  ;;  %s5390_s21 = int_to_ptr.hbm [resolvable:$true] %s5389_s21 }
  0x21   : > { %s5391_s20 = scalar_lea.hbm %s5390_s21, 256  ;;  %p5397_p5 = scmp.lt.s32.totalorder %s5390_s21, %s10437_s0 }
  0x22   : > { %p5392_p2 = scmp.ne.s32.totalorder %s5390_s21, %s5391_s20  ;;  %p5398_p8 = scmp.lt.s32.totalorder %s5396_s18, %s5391_s20 }
  0x24   : > { %p5394_p4 = pnand %p5393_p3, %p5392_p2  ;;  %p5399_p10 = por %p5398_p8, %p5397_p5 }
  0x26   : > { %p5395_p7 = pneg %p5394_p4 }
  0x28   : > { %p5400_p9 = pnand %p5399_p10, %p5395_p7 }
  0x2a   : > { %5403 = shalt.err (!%p5400_p9)
}
  0x2b   : > { %s5487_s22 = smov 128   ;;  %s5488_s16 = smov 8  }
  0x2c   : > { %4943 = dma.hbm_to_vmem [thread:$0]  (!%p5627_p13), %s398_s14, 4096, %s400_s25, %s388_s27, %s5487_s22, %s5487_s22, %s5488_s16  }
  0x2d   : > { %p408_p2 = pnand %p4758_p0, %p407_p1 }
  0x2f   : > { %411 = sbr.rel (%p408_p2) target bundleno = 2187 (0x88b), region = 72 }
  0x34   : > { %s5648_s30 = sand.u32 1, %s5477_s26  }
  0x35   : > { %s4759_s20 = sshll.u32 %s5648_s30, 8  ;;  %s414_s21 = scalar_lea.sflag [#allocation4], %s5648_s30 }
  0x36   : > { %s5654_s17 = scalar_lea.vmem [#allocation3], %s4759_s20 }
  0x37   : > { %5464 = dma.done.wait (%p5605_p6), %s414_s21, 4096  }
  0x38   : > { %5466 = vsyncadd (%p5605_p6), %s414_s21, 4294963200  ;;  %v4902_v0 = vld [vmem:[%s10126_s1 + $0x38] sm:$0xff]  ;;  %v4901_v1 = vld [vmem:[%s10126_s1 + $0x30] sm:$0xff]  ;;  %v5489_v29 = vmov 0.0   ;;  %s4664_s25 = scalar_lea.sflag [#allocation5], %s5648_s30 }
  0x39   : > { %577 = vmatpush.bf16.msra.mxu0 %v4902_v0  ;;  %v4900_v2 = vld [vmem:[%s10126_s1 + $0x28] sm:$0xff]  ;;  %v4899_v3 = vld [vmem:[%s10126_s1 + $0x20] sm:$0xff]  ;;  %v4898_v4 = vld [vmem:[%s10126_s1 + $0x18] sm:$0xff]  ;;  %1766 = vst [vmem:[#allocation2 + $0x18] sm:$0xff] %v5489_v29 }
  0x3a   : > { %v4897_v5 = vld [vmem:[%s10126_s1 + $0x10] sm:$0xff]  ;;  %v4896_v6 = vld [vmem:[%s10126_s1 + $0x8] sm:$0xff]  ;;  %v4895_v7 = vld [vmem:[%s10126_s1] sm:$0xff]  ;;  %1767 = vst [vmem:[#allocation2 + $0x20] sm:$0xff] %v5489_v29 }
  0x3b   : > { %v461_v8 = vld [vmem:[%s5654_s17] sm:$0xff]  ;;  %v462_v9 = vld [vmem:[%s5654_s17 + $0x8] sm:$0xff]  ;;  %v463_v11 = vld [vmem:[%s5654_s17 + $0x10] sm:$0xff]  ;;  %1763 = vst [vmem:[#allocation2] sm:$0xff] %v5489_v29 }
  0x3c   : > { %v493_v10 = vpack.c.bf16 %v462_v9, %v461_v8  ;;  %v464_v12 = vld [vmem:[%s5654_s17 + $0x18] sm:$0xff]  ;;  %v465_v14 = vld [vmem:[%s5654_s17 + $0x20] sm:$0xff]  ;;  %v466_v15 = vld [vmem:[%s5654_s17 + $0x28] sm:$0xff]  ;;  %1764 = vst [vmem:[#allocation2 + $0x8] sm:$0xff] %v5489_v29 }
  0x3d   : > { %578 = vmatpush.bf16.msra.mxu0 %v4901_v1  ;;  %v494_v13 = vpack.c.bf16 %v464_v12, %v463_v11  ;;  %v495_v16 = vpack.c.bf16 %v466_v15, %v465_v14  ;;  %v467_v17 = vld [vmem:[%s5654_s17 + $0x30] sm:$0xff]  ;;  %v468_v18 = vld [vmem:[%s5654_s17 + $0x38] sm:$0xff]  ;;  %v469_v20 = vld [vmem:[%s5654_s17 + $0x40] sm:$0xff]  ;;  %1765 = vst [vmem:[#allocation2 + $0x10] sm:$0x3] %v5489_v29 }
  0x3e   : > { %v496_v19 = vpack.c.bf16 %v468_v18, %v467_v17  ;;  %v470_v21 = vld [vmem:[%s5654_s17 + $0x48] sm:$0xff]  ;;  %v471_v23 = vld [vmem:[%s5654_s17 + $0x50] sm:$0xff]  ;;  %v472_v24 = vld [vmem:[%s5654_s17 + $0x58] sm:$0xff]  ;;  %1768 = vst [vmem:[#allocation2 + $0x28] sm:$0x3] %v5489_v29 }
  0x3f   : > { %v497_v22 = vpack.c.bf16 %v470_v21, %v469_v20  ;;  %v498_v25 = vpack.c.bf16 %v472_v24, %v471_v23  ;;  %v473_v26 = vld [vmem:[%s5654_s17 + $0x60] sm:$0xff]  ;;  %v474_v27 = vld [vmem:[%s5654_s17 + $0x68] sm:$0xff]  ;;  %1769 = vst [vmem:[#allocation2 + $0x30] sm:$0xff] %v5489_v29  ;;  %v475_v30 = vld [vmem:[%s5654_s17 + $0x70] sm:$0xff] }
  0x40   : > { %v499_v28 = vpack.c.bf16 %v474_v27, %v473_v26  ;;  %1770 = vst [vmem:[#allocation2 + $0x38] sm:$0xff] %v5489_v29  ;;  %v476_v31 = vld [vmem:[%s5654_s17 + $0x78] sm:$0xff]  ;;  %v477_v33 = vld [vmem:[%s5654_s17 + $0x80] sm:$0xff]  ;;  %v478_v34 = vld [vmem:[%s5654_s17 + $0x88] sm:$0xff] }
  0x41   : > { %579 = vmatpush.bf16.msra.mxu0 %v4900_v2  ;;  %1771 = vst [vmem:[#allocation2 + $0x40] sm:$0x3] %v5489_v29  ;;  %v500_v32 = vpack.c.bf16 %v476_v31, %v475_v30  ;;  %v501_v35 = vpack.c.bf16 %v478_v34, %v477_v33  ;;  %v479_v38 = vld [vmem:[%s5654_s17 + $0x90] sm:$0xff]  ;;  %v480_v39 = vld [vmem:[%s5654_s17 + $0x98] sm:$0xff]  ;;  %v481_v43 = vld [vmem:[%s5654_s17 + $0xa0] sm:$0xff] }
  0x42   : > { %1772 = vst [vmem:[#allocation2 + $0x48] sm:$0xff] %v5489_v29  ;;  %v502_v40 = vpack.c.bf16 %v480_v39, %v479_v38  ;;  %v482_v44 = vld [vmem:[%s5654_s17 + $0xa8] sm:$0xff]  ;;  %v483_v48 = vld [vmem:[%s5654_s17 + $0xb0] sm:$0xff]  ;;  %v484_v49 = vld [vmem:[%s5654_s17 + $0xb8] sm:$0xff] }
  0x43   : > { %1773 = vst [vmem:[#allocation2 + $0x50] sm:$0xff] %v5489_v29  ;;  %v503_v45 = vpack.c.bf16 %v482_v44, %v481_v43  ;;  %v504_v50 = vpack.c.bf16 %v484_v49, %v483_v48  ;;  %v485_v53 = vld [vmem:[%s5654_s17 + $0xc0] sm:$0xff]  ;;  %v486_v54 = vld [vmem:[%s5654_s17 + $0xc8] sm:$0xff]  ;;  %v487_v58 = vld [vmem:[%s5654_s17 + $0xd0] sm:$0xff] }
  0x44   : > { %1774 = vst [vmem:[#allocation2 + $0x58] sm:$0x3] %v5489_v29  ;;  %v505_v55 = vpack.c.bf16 %v486_v54, %v485_v53  ;;  %v488_v59 = vld [vmem:[%s5654_s17 + $0xd8] sm:$0xff]  ;;  %v489_v63 = vld [vmem:[%s5654_s17 + $0xe0] sm:$0xff]  ;;  %v490_v0 = vld [vmem:[%s5654_s17 + $0xe8] sm:$0xff] }
  0x45   : > { %580 = vmatpush.bf16.msra.mxu0 %v4899_v3  ;;  %1775 = vst [vmem:[#allocation2 + $0x60] sm:$0xff] %v5489_v29  ;;  %v506_v60 = vpack.c.bf16 %v488_v59, %v487_v58  ;;  %v507_v1 = vpack.c.bf16 %v490_v0, %v489_v63  ;;  %v5793_v17 = vld [vmem:[%s10127_s2] ss:$0 sm:$0xff] }
  0x46   : > { %1776 = vst [vmem:[#allocation2 + $0x68] sm:$0xff] %v5489_v29 }
  0x47   : > { %1777 = vst [vmem:[#allocation2 + $0x70] sm:$0x3] %v5489_v29 }
  0x48   : > { %1778 = vst [vmem:[#allocation2 + $0x78] sm:$0xff] %v5489_v29 }
  0x49   : > { %581 = vmatpush.bf16.msra.mxu0 %v4898_v4  ;;  %1779 = vst [vmem:[#allocation2 + $0x80] sm:$0xff] %v5489_v29  ;;  %v491_v4 = vld [vmem:[%s5654_s17 + $0xf0] sm:$0xff] }
  0x4a   : > { %1780 = vst [vmem:[#allocation2 + $0x88] sm:$0x3] %v5489_v29 }
  0x4b   : > { %1781 = vst [vmem:[#allocation2 + $0x90] sm:$0xff] %v5489_v29 }
  0x4c   : > { %1782 = vst [vmem:[#allocation2 + $0x98] sm:$0xff] %v5489_v29 }
  0x4d   : > { %582 = vmatpush.bf16.msra.mxu0 %v4897_v5  ;;  %1783 = vst [vmem:[#allocation2 + $0xa0] sm:$0x3] %v5489_v29  ;;  %v492_v5 = vld [vmem:[%s5654_s17 + $0xf8] sm:$0xff] }
  0x4e   : > { %1784 = vst [vmem:[#allocation2 + $0xa8] sm:$0xff] %v5489_v29 }
  0x4f   : > { %1785 = vst [vmem:[#allocation2 + $0xb0] sm:$0xff] %v5489_v29 }
  0x50   : > { %1786 = vst [vmem:[#allocation2 + $0xb8] sm:$0x3] %v5489_v29 }
  0x51   : > { %583 = vmatpush.bf16.msra.mxu0 %v4896_v6  ;;  %1787 = vst [vmem:[#allocation2 + $0xc0] sm:$0xff] %v5489_v29  ;;  %v508_v6 = vpack.c.bf16 %v492_v5, %v491_v4 }
  0x52   : > { %1788 = vst [vmem:[#allocation2 + $0xc8] sm:$0xff] %v5489_v29 }
  0x53   : > { %1789 = vst [vmem:[#allocation2 + $0xd0] sm:$0x3] %v5489_v29 }
  0x54   : > { %1790 = vst [vmem:[#allocation2 + $0xd8] sm:$0xff] %v5489_v29 }
  0x55   : > { %584 = vmatpush.bf16.msra.mxu0 %v4895_v7  ;;  %1791 = vst [vmem:[#allocation2 + $0xe0] sm:$0xff] %v5489_v29 }
  0x56   : > { %1792 = vst [vmem:[#allocation2 + $0xe8] sm:$0x3] %v5489_v29 }
  0x57   : > { %1793 = vst [vmem:[#allocation2 + $0xf0] sm:$0xff] %v5489_v29 }
  0x58   : > { %585 = vmatmul.bf16.vlgmr.msra.gmra.mxu0 %v493_v10  ;;  %1794 = vst [vmem:[#allocation2 + $0xf8] sm:$0xff] %v5489_v29 }
  0x59   : > { %1795 = vst [vmem:[#allocation2 + $0x100] sm:$0x3] %v5489_v29 }
  0x5a   : > { %1796 = vst [vmem:[#allocation2 + $0x108] sm:$0xff] %v5489_v29 }
  0x5b   : > { %1797 = vst [vmem:[#allocation2 + $0x110] sm:$0xff] %v5489_v29 }
  0x5c   : > { %1798 = vst [vmem:[#allocation2 + $0x118] sm:$0x3] %v5489_v29 }
  0x5d   : > { %1799 = vst [vmem:[#allocation2 + $0x120] sm:$0xff] %v5489_v29 }
  0x5e   : > { %1800 = vst [vmem:[#allocation2 + $0x128] sm:$0xff] %v5489_v29 }
  0x5f   : > { %1801 = vst [vmem:[#allocation2 + $0x130] sm:$0x3] %v5489_v29 }
  0x60   : > { %1802 = vst [vmem:[#allocation2 + $0x138] sm:$0xff] %v5489_v29 }
  0x61   : > { %1803 = vst [vmem:[#allocation2 + $0x140] sm:$0xff] %v5489_v29 }
  0x62   : > { %1804 = vst [vmem:[#allocation2 + $0x148] sm:$0x3] %v5489_v29 }
  0x63   : > { %1805 = vst [vmem:[#allocation2 + $0x150] sm:$0xff] %v5489_v29 }
  0x64   : > { %1806 = vst [vmem:[#allocation2 + $0x158] sm:$0xff] %v5489_v29 }
  0x65   : > { %1807 = vst [vmem:[#allocation2 + $0x160] sm:$0x3] %v5489_v29 }
  0x66   : > { %1808 = vst [vmem:[#allocation2 + $0x168] sm:$0xff] %v5489_v29 }
  0x67   : > { %1809 = vst [vmem:[#allocation2 + $0x170] sm:$0xff] %v5489_v29 }
  0x68   : > { %590 = vmatmul.bf16.gmra.mxu0 %v494_v13  ;;  %1810 = vst [vmem:[#allocation2 + $0x178] sm:$0x3] %v5489_v29 }
  0x69   : > { %1811 = vst [vmem:[#allocation2 + $0x180] sm:$0xff] %v5489_v29 }
  0x6a   : > { %1812 = vst [vmem:[#allocation2 + $0x188] sm:$0xff] %v5489_v29 }
  0x6b   : > { %1813 = vst [vmem:[#allocation2 + $0x190] sm:$0x3] %v5489_v29 }
  0x6c   : > { %1814 = vst [vmem:[#allocation2 + $0x198] sm:$0xff] %v5489_v29 }
  0x6d   : > { %1815 = vst [vmem:[#allocation2 + $0x1a0] sm:$0xff] %v5489_v29 }
  0x6e   : > { %1816 = vst [vmem:[#allocation2 + $0x1a8] sm:$0x3] %v5489_v29 }
  0x78   : > { %595 = vmatmul.bf16.gmra.mxu0 %v495_v16 }
  0x88   : > { %600 = vmatmul.bf16.gmra.mxu0 %v496_v19 }
  0x98   : > { %605 = vmatmul.bf16.gmra.mxu0 %v497_v22 }
  0xa8   : > { %610 = vmatmul.bf16.gmra.mxu0 %v498_v25 }
  0xb8   : > { %615 = vmatmul.bf16.gmra.mxu0 %v499_v28 }
  0xc8   : > { %620 = vmatmul.bf16.gmra.mxu0 %v500_v32 }
  0xd5   : > { %v5730_v36 = vpop.f32.mrf.mxu0 }
  0xd6   : > { %v5801_v19 = vadd.f32 %v5793_v17, %v5730_v36 }
  0xd8   : > { %625 = vmatmul.bf16.gmra.mxu0 %v501_v35  ;;  %v709_v29 = vmul.f32 %v5801_v19, %v5801_v19 }
  0xdd   : > { %v5741_v37 = vpop.f32.mrf.mxu0 }
  0xde   : > { %v5797_v18 = vadd.f32 %v5793_v17, %v5741_v37 }
  0xe0   : > { %v668_v21 = vadd.f32 %v5797_v18, %v5801_v19  ;;  %v710_v26 = vmul.f32 %v5797_v18, %v5797_v18 }
  0xe2   : > { %v741_v33 = vadd.f32 %v710_v26, %v709_v29 }
  0xe5   : > { %v591_v41 = vpop.f32.mrf.mxu0 }
  0xe6   : > { %v5804_v20 = vadd.f32 %v5793_v17, %v591_v41 }
  0xe8   : > { %630 = vmatmul.bf16.gmra.mxu0 %v502_v40  ;;  %v669_v24 = vadd.f32 %v668_v21, %v5804_v20  ;;  %v711_v30 = vmul.f32 %v5804_v20, %v5804_v20 }
  0xea   : > { %v742_v38 = vadd.f32 %v741_v33, %v711_v30 }
  0xed   : > { %v593_v42 = vpop.f32.mrf.mxu0 }
  0xee   : > { %v5809_v22 = vadd.f32 %v5793_v17, %v593_v42 }
  0xf0   : > { %v670_v27 = vadd.f32 %v669_v24, %v5809_v22  ;;  %v712_v34 = vmul.f32 %v5809_v22, %v5809_v22 }
  0xf2   : > { %v743_v42 = vadd.f32 %v742_v38, %v712_v34 }
  0xf5   : > { %v596_v46 = vpop.f32.mrf.mxu0 }
  0xf6   : > { %v5815_v25 = vadd.f32 %v5793_v17, %v596_v46 }
  0xf8   : > { %635 = vmatmul.bf16.gmra.mxu0 %v503_v45  ;;  %v671_v31 = vadd.f32 %v670_v27, %v5815_v25  ;;  %v713_v39 = vmul.f32 %v5815_v25, %v5815_v25 }
  0xfa   : > { %v744_v46 = vadd.f32 %v743_v42, %v713_v39 }
  0xfd   : > { %v598_v47 = vpop.f32.mrf.mxu0 }
  0xfe   : > { %v5821_v28 = vadd.f32 %v5793_v17, %v598_v47 }
 0x100   : > { %v672_v35 = vadd.f32 %v671_v31, %v5821_v28  ;;  %v714_v43 = vmul.f32 %v5821_v28, %v5821_v28 }
 0x105   : > { %v601_v51 = vpop.f32.mrf.mxu0 }
 0x106   : > { %v5829_v32 = vadd.f32 %v5793_v17, %v601_v51 }
 0x108   : > { %640 = vmatmul.bf16.gmra.mxu0 %v504_v50  ;;  %v673_v40 = vadd.f32 %v672_v35, %v5829_v32  ;;  %v715_v47 = vmul.f32 %v5829_v32, %v5829_v32  ;;  %v745_v50 = vadd.f32 %v744_v46, %v714_v43 }
 0x10d   : > { %v603_v52 = vpop.f32.mrf.mxu0 }
 0x10e   : > { %v5835_v36 = vadd.f32 %v5793_v17, %v603_v52 }
 0x110   : > { %v674_v44 = vadd.f32 %v673_v40, %v5835_v36  ;;  %v716_v51 = vmul.f32 %v5835_v36, %v5835_v36 }
 0x115   : > { %v606_v56 = vpop.f32.mrf.mxu0 }
 0x116   : > { %v5843_v41 = vadd.f32 %v5793_v17, %v606_v56 }
 0x118   : > { %645 = vmatmul.bf16.gmra.mxu0 %v505_v55  ;;  %v675_v48 = vadd.f32 %v674_v44, %v5843_v41  ;;  %v746_v55 = vadd.f32 %v745_v50, %v715_v47  ;;  %v717_v56 = vmul.f32 %v5843_v41, %v5843_v41 }
 0x11a   : > { %v747_v59 = vadd.f32 %v746_v55, %v716_v51 }
 0x11c   : > { %v748_v63 = vadd.f32 %v747_v59, %v717_v56 }
 0x11d   : > { %v608_v57 = vpop.f32.mrf.mxu0 }
 0x11e   : > { %v5849_v45 = vadd.f32 %v5793_v17, %v608_v57 }
 0x120   : > { %v676_v52 = vadd.f32 %v675_v48, %v5849_v45 }
 0x125   : > { %v611_v61 = vpop.f32.mrf.mxu0 }
 0x126   : > { %v5855_v49 = vadd.f32 %v5793_v17, %v611_v61 }
 0x128   : > { %650 = vmatmul.bf16.gmra.mxu0 %v506_v60  ;;  %v677_v57 = vadd.f32 %v676_v52, %v5855_v49  ;;  %v718_v60 = vmul.f32 %v5849_v45, %v5849_v45  ;;  %v719_v0 = vmul.f32 %v5855_v49, %v5855_v49 }
 0x12d   : > { %v613_v62 = vpop.f32.mrf.mxu0 }
 0x12e   : > { %v5861_v53 = vadd.f32 %v5793_v17, %v613_v62 }
 0x130   : > { %v678_v61 = vadd.f32 %v677_v57, %v5861_v53  ;;  %v720_v5 = vmul.f32 %v5861_v53, %v5861_v53 }
 0x135   : > { %v616_v2 = vpop.f32.mrf.mxu0 }
 0x136   : > { %v5869_v58 = vadd.f32 %v5793_v17, %v616_v2  ;;  %v749_v2 = vadd.f32 %v748_v63, %v718_v60 }
 0x138   : > { %655 = vmatmul.bf16.gmra.mxu0 %v507_v1  ;;  %v679_v1 = vadd.f32 %v678_v61, %v5869_v58  ;;  %v750_v24 = vadd.f32 %v749_v2, %v719_v0  ;;  %v721_v26 = vmul.f32 %v5869_v58, %v5869_v58 }
 0x13a   : > { %v751_v29 = vadd.f32 %v750_v24, %v720_v5 }
 0x13c   : > { %v752_v33 = vadd.f32 %v751_v29, %v721_v26 }
 0x13d   : > { %v618_v3 = vpop.f32.mrf.mxu0 }
 0x13e   : > { %v5875_v62 = vadd.f32 %v5793_v17, %v618_v3 }
 0x140   : > { %v722_v30 = vmul.f32 %v5875_v62, %v5875_v62 }
 0x142   : > { %v753_v38 = vadd.f32 %v752_v33, %v722_v30 }
 0x145   : > { %v621_v7 = vpop.f32.mrf.mxu0 }
 0x146   : > { %v5881_v4 = vadd.f32 %v5793_v17, %v621_v7 }
 0x148   : > { %660 = vmatmul.bf16.gmra.mxu0 %v508_v6  ;;  %v680_v6 = vadd.f32 %v679_v1, %v5875_v62  ;;  %v723_v34 = vmul.f32 %v5881_v4, %v5881_v4 }
 0x14a   : > { %v681_v27 = vadd.f32 %v680_v6, %v5881_v4  ;;  %v754_v43 = vadd.f32 %v753_v38, %v723_v34 }
 0x14d   : > { %v623_v8 = vpop.f32.mrf.mxu0 }
 0x14e   : > { %v5887_v21 = vadd.f32 %v5793_v17, %v623_v8 }
 0x150   : > { %v682_v31 = vadd.f32 %v681_v27, %v5887_v21  ;;  %v724_v39 = vmul.f32 %v5887_v21, %v5887_v21 }
 0x152   : > { %v755_v47 = vadd.f32 %v754_v43, %v724_v39 }
 0x155   : > { %v5774_v9 = vpop.f32.mrf.mxu0 }
 0x156   : > { %v5894_v7 = vadd.f32 %v5793_v17, %v5774_v9 }
 0x158   : > { %v683_v35 = vadd.f32 %v682_v31, %v5894_v7  ;;  %v725_v44 = vmul.f32 %v5894_v7, %v5894_v7 }
 0x15a   : > { %v756_v51 = vadd.f32 %v755_v47, %v725_v44 }
 0x15d   : > { %v5776_v10 = vpop.f32.mrf.mxu0 }
 0x15e   : > { %v5901_v8 = vadd.f32 %v5793_v17, %v5776_v10 }
 0x160   : > { %v684_v40 = vadd.f32 %v683_v35, %v5901_v8  ;;  %v726_v48 = vmul.f32 %v5901_v8, %v5901_v8 }
 0x162   : > { %v757_v56 = vadd.f32 %v756_v51, %v726_v48 }
 0x165   : > { %v5778_v11 = vpop.f32.mrf.mxu0 }
 0x166   : > { %v5908_v9 = vadd.f32 %v5793_v17, %v5778_v11 }
 0x168   : > { %v685_v46 = vadd.f32 %v684_v40, %v5908_v9  ;;  %v727_v52 = vmul.f32 %v5908_v9, %v5908_v9 }
 0x16a   : > { %v758_v61 = vadd.f32 %v757_v56, %v727_v52 }
 0x16d   : > { %v5780_v12 = vpop.f32.mrf.mxu0 }
 0x16e   : > { %v5915_v10 = vadd.f32 %v5793_v17, %v5780_v12 }
 0x170   : > { %v686_v50 = vadd.f32 %v685_v46, %v5915_v10  ;;  %v728_v57 = vmul.f32 %v5915_v10, %v5915_v10 }
 0x172   : > { %v759_v1 = vadd.f32 %v758_v61, %v728_v57 }
 0x175   : > { %v5782_v13 = vpop.f32.mrf.mxu0 }
 0x176   : > { %v5922_v11 = vadd.f32 %v5793_v17, %v5782_v13 }
 0x178   : > { %v687_v55 = vadd.f32 %v686_v50, %v5922_v11  ;;  %v729_v63 = vmul.f32 %v5922_v11, %v5922_v11 }
 0x17a   : > { %v760_v6 = vadd.f32 %v759_v1, %v729_v63 }
 0x17d   : > { %v5784_v14 = vpop.f32.mrf.mxu0 }
 0x17e   : > { %v5929_v12 = vadd.f32 %v5793_v17, %v5784_v14 }
 0x180   : > { %v688_v59 = vadd.f32 %v687_v55, %v5929_v12  ;;  %v730_v2 = vmul.f32 %v5929_v12, %v5929_v12 }
 0x182   : > { %v761_v27 = vadd.f32 %v760_v6, %v730_v2 }
 0x185   : > { %v5786_v15 = vpop.f32.mrf.mxu0 }
 0x186   : > { %v5936_v13 = vadd.f32 %v5793_v17, %v5786_v15 }
 0x188   : > { %v689_v0 = vadd.f32 %v688_v59, %v5936_v13  ;;  %v731_v24 = vmul.f32 %v5936_v13, %v5936_v13 }
 0x18a   : > { %v762_v33 = vadd.f32 %v761_v27, %v731_v24 }
 0x18d   : > { %v5788_v16 = vpop.f32.mrf.mxu0 }
 0x18e   : > { %v5943_v14 = vadd.f32 %v5793_v17, %v5788_v16 }
 0x190   : > { %v690_v5 = vadd.f32 %v689_v0, %v5943_v14  ;;  %v732_v29 = vmul.f32 %v5943_v14, %v5943_v14 }
 0x195   : > { %v5811_v23 = vpop.f32.mrf.mxu0 }
 0x196   : > { %v5950_v15 = vadd.f32 %v5793_v17, %v5811_v23 }
 0x198   : > { %v691_v26 = vadd.f32 %v690_v5, %v5950_v15  ;;  %v733_v34 = vmul.f32 %v5950_v15, %v5950_v15 }
 0x19d   : > { %v5837_v37 = vpop.f32.mrf.mxu0 }
 0x19e   : > { %v5957_v16 = vadd.f32 %v5793_v17, %v5837_v37 }
 0x1a0   : > { %v692_v30 = vadd.f32 %v691_v26, %v5957_v16  ;;  %v734_v39 = vmul.f32 %v5957_v16, %v5957_v16 }
 0x1a5   : > { %v5863_v54 = vpop.f32.mrf.mxu0 }
 0x1a6   : > { %v5964_v23 = vadd.f32 %v5793_v17, %v5863_v54  ;;  %v763_v54 = vadd.f32 %v762_v33, %v732_v29 }
 0x1a8   : > { %v693_v35 = vadd.f32 %v692_v30, %v5964_v23  ;;  %v735_v44 = vmul.f32 %v5964_v23, %v5964_v23 }
 0x1ad   : > { %v653_v3 = vpop.f32.mrf.mxu0 }
 0x1ae   : > { %v5970_v31 = vadd.f32 %v5793_v17, %v653_v3  ;;  %v764_v3 = vadd.f32 %v763_v54, %v733_v34 }
 0x1b0   : > { %v694_v40 = vadd.f32 %v693_v35, %v5970_v31  ;;  %v736_v48 = vmul.f32 %v5970_v31, %v5970_v31 }
 0x1b5   : > { %v656_v42 = vpop.f32.mrf.mxu0 }
 0x1b6   : > { %v5976_v38 = vadd.f32 %v5793_v17, %v656_v42  ;;  %v765_v42 = vadd.f32 %v764_v3, %v734_v39 }
 0x1b8   : > { %v695_v46 = vadd.f32 %v694_v40, %v5976_v38  ;;  %v766_v52 = vadd.f32 %v765_v42, %v735_v44  ;;  %v737_v55 = vmul.f32 %v5976_v38, %v5976_v38 }
 0x1ba   : > { %v767_v59 = vadd.f32 %v766_v52, %v736_v48 }
 0x1bc   : > { %v768_v63 = vadd.f32 %v767_v59, %v737_v55 }
 0x1bd   : > { %v658_v60 = vpop.f32.mrf.mxu0 }
 0x1be   : > { %v5982_v43 = vadd.f32 %v5793_v17, %v658_v60 }
 0x1c0   : > { %v696_v50 = vadd.f32 %v695_v46, %v5982_v43  ;;  %v738_v60 = vmul.f32 %v5982_v43, %v5982_v43 }
 0x1c2   : > { %v769_v2 = vadd.f32 %v768_v63, %v738_v60 }
 0x1c5   : > { %v661_v37 = vpop.f32.mrf.mxu0 }
 0x1c6   : > { %v5988_v47 = vadd.f32 %v5793_v17, %v661_v37 }
 0x1c8   : > { %v697_v57 = vadd.f32 %v696_v50, %v5988_v47  ;;  %v739_v0 = vmul.f32 %v5988_v47, %v5988_v47 }
 0x1ca   : > { %v770_v5 = vadd.f32 %v769_v2, %v739_v0 }
 0x1cd   : > { %v663_v51 = vpop.f32.mrf.mxu0 }
 0x1ce   : > { %v5996_v56 = vadd.f32 %v5793_v17, %v663_v51 }
 0x1d0   : > { %v698_v61 = vadd.f32 %v697_v57, %v5996_v56  ;;  %v740_v1 = vmul.f32 %v5996_v56, %v5996_v56 }
 0x1d2   : > { %699 = vadd.xlane.f32.xlu0 %v698_v61  ;;  %v771_v17 = vadd.f32 %v770_v5, %v740_v1 }
 0x1da   : > { %772 = vadd.xlane.f32.xlu0 %v771_v17 }
 0x245   : > { %v700_v6 = vpop.xlane.xlu0 %699 }
 0x246   : > { %v701_v24 = vrot.slane %v700_v6, 4 }
 0x248   : > { %v702_v26 = vadd.f32 %v701_v24, %v700_v6 }
 0x24a   : > { %v703_v27 = vrot.slane %v702_v26, 2 }
 0x24c   : > { %v704_v29 = vadd.f32 %v703_v27, %v702_v26 }
 0x24d   : > { %v773_v30 = vpop.xlane.xlu0 %772 }
 0x24e   : > { %v774_v37 = vrot.slane %v773_v30, 4  ;;  %v705_v33 = vrot.slane %v704_v29, 1 }
 0x250   : > { %v775_v34 = vadd.f32 %v774_v37, %v773_v30  ;;  %v706_v35 = vadd.f32 %v705_v33, %v704_v29 }
 0x252   : > { %v776_v54 = vrot.slane %v775_v34, 2  ;;  %4928 = vpush %v706_v35 }
 0x254   : > { %v777_v39 = vadd.f32 %v776_v54, %v775_v34 }
 0x256   : > { %v778_v40 = vrot.slane %v777_v39, 1 }
 0x258   : > { %v779_v3 = vadd.f32 %v778_v40, %v777_v39 }
 0x25a   : > { %4930 = vpush %v779_v3 }
 0x283   : > { %s4929_s18 = spop %4928 }
 0x284   : > { %v708_v44 = vstv %s4929_s18  ;;  %s10014_s18 = scalar_lea.vmem [#allocation6], %s4759_s20  ;;  %s4927_s20 = sshll.u32 %s5583_s29, 8 }
 0x285   : > { %v6006_v42 = vmul.f32 3.0517578e-05, %v708_v44  ;;  %s4676_s21 = sshll.u32 %s10014_s18, 4  ;;  %s4677_s21 = int_to_ptr.vmem [resolvable:$true] %s4676_s21 }
 0x287   : > { %v784_v50 = vmul.f32 %v6006_v42, %v6006_v42  ;;  %v797_v63 = vsub.f32 %v5801_v19, %v6006_v42  ;;  %v798_v0 = vsub.f32 %v5797_v18, %v6006_v42  ;;  %v799_v1 = vsub.f32 %v5804_v20, %v6006_v42 }
 0x288   : > { %v800_v2 = vsub.f32 %v5809_v22, %v6006_v42  ;;  %v801_v5 = vsub.f32 %v5815_v25, %v6006_v42  ;;  %v802_v17 = vsub.f32 %v5821_v28, %v6006_v42  ;;  %v803_v6 = vsub.f32 %v5829_v32, %v6006_v42 }
 0x289   : > { %v804_v19 = vsub.f32 %v5835_v36, %v6006_v42  ;;  %v805_v18 = vsub.f32 %v5843_v41, %v6006_v42  ;;  %v806_v20 = vsub.f32 %v5849_v45, %v6006_v42  ;;  %v807_v22 = vsub.f32 %v5855_v49, %v6006_v42 }
 0x28a   : > { %v808_v25 = vsub.f32 %v5861_v53, %v6006_v42  ;;  %v809_v28 = vsub.f32 %v5869_v58, %v6006_v42  ;;  %v810_v32 = vsub.f32 %v5875_v62, %v6006_v42  ;;  %v811_v36 = vsub.f32 %v5881_v4, %v6006_v42 }
 0x28b   : > { %s4931_s19 = spop %4930  ;;  %v812_v41 = vsub.f32 %v5887_v21, %v6006_v42  ;;  %v813_v45 = vsub.f32 %v5894_v7, %v6006_v42  ;;  %v814_v49 = vsub.f32 %v5901_v8, %v6006_v42  ;;  %v815_v53 = vsub.f32 %v5908_v9, %v6006_v42 }
 0x28c   : > { %v781_v46 = vstv %s4931_s19  ;;  %v816_v58 = vsub.f32 %v5915_v10, %v6006_v42  ;;  %v817_v62 = vsub.f32 %v5922_v11, %v6006_v42  ;;  %v818_v4 = vsub.f32 %v5929_v12, %v6006_v42 }
 0x28d   : > { %v783_v48 = vmul.f32 3.0517578e-05, %v781_v46  ;;  %v819_v21 = vsub.f32 %v5936_v13, %v6006_v42  ;;  %v820_v7 = vsub.f32 %v5943_v14, %v6006_v42  ;;  %v821_v9 = vsub.f32 %v5950_v15, %v6006_v42 }
 0x28e   : > { %v822_v10 = vsub.f32 %v5957_v16, %v6006_v42  ;;  %v823_v11 = vsub.f32 %v5964_v23, %v6006_v42  ;;  %v824_v26 = vsub.f32 %v5970_v31, %v6006_v42  ;;  %v825_v12 = vsub.f32 %v5976_v38, %v6006_v42 }
 0x28f   : > { %v785_v51 = vsub.f32 %v783_v48, %v784_v50  ;;  %v826_v13 = vsub.f32 %v5982_v43, %v6006_v42  ;;  %v827_v14 = vsub.f32 %v5988_v47, %v6006_v42  ;;  %v828_v15 = vsub.f32 %v5996_v56, %v6006_v42  ;;  %v4988_v47 = vld [vmem:[%s10128_s3] ss:$0 sm:$0xff] }
 0x291   : > { %v786_v52 = vadd.f32 1e-05, %v785_v51 }
 0x293   : > { %4995 = vrsqrt.f32 %v786_v52  ;;  %vm793_vm1 = vweird.f32 %v786_v52 }
 0x299   : > { %v4996_v55 = vpop.eup %4995 }
 0x29a   : > { %v788_v57 = vmul.f32 %v4996_v55, %v786_v52  ;;  %vm794_vm0 = vweird.f32 %v4996_v55 }
 0x29b   : > { %vm795_vm2 = vmor %vm793_vm1, %vm794_vm0 }
 0x29c   : > { %v789_v59 = vmul.f32 %v4996_v55, %v788_v57 }
 0x29e   : > { %v790_v60 = vmul.f32 0.5, %v789_v59 }
 0x2a0   : > { %v791_v61 = vsub.f32 1.5, %v790_v60 }
 0x2a2   : > { %v792_v24 = vmul.f32 %v4996_v55, %v791_v61 }
 0x2a4   : > { %v796_v8 = vsel %vm795_vm2, %v4996_v55, %v792_v24 }
 0x2a5   : > { %v829_v27 = vmul.f32 %v797_v63, %v796_v8  ;;  %v830_v16 = vmul.f32 %v798_v0, %v796_v8  ;;  %v831_v29 = vmul.f32 %v799_v1, %v796_v8  ;;  %v832_v30 = vmul.f32 %v800_v2, %v796_v8 }
 0x2a6   : > { %v833_v23 = vmul.f32 %v801_v5, %v796_v8  ;;  %v834_v37 = vmul.f32 %v802_v17, %v796_v8  ;;  %v835_v33 = vmul.f32 %v803_v6, %v796_v8  ;;  %v836_v31 = vmul.f32 %v804_v19, %v796_v8 }
 0x2a7   : > { %v837_v34 = vmul.f32 %v805_v18, %v796_v8  ;;  %v838_v35 = vmul.f32 %v806_v20, %v796_v8  ;;  %v839_v38 = vmul.f32 %v807_v22, %v796_v8  ;;  %v840_v54 = vmul.f32 %v808_v25, %v796_v8 }
 0x2a8   : > { %v841_v39 = vmul.f32 %v809_v28, %v796_v8  ;;  %v842_v43 = vmul.f32 %v810_v32, %v796_v8  ;;  %v843_v40 = vmul.f32 %v811_v36, %v796_v8  ;;  %v844_v3 = vmul.f32 %v812_v41, %v796_v8 }
 0x2a9   : > { %v845_v56 = vmul.f32 %v813_v45, %v796_v8  ;;  %v846_v44 = vmul.f32 %v814_v49, %v796_v8  ;;  %v847_v46 = vmul.f32 %v815_v53, %v796_v8  ;;  %v848_v42 = vmul.f32 %v816_v58, %v796_v8  ;;  %v6080_v53 = vld [vmem:[%s10129_s4] ss:$0 sm:$0xff] }
 0x2aa   : > { %v849_v48 = vmul.f32 %v817_v62, %v796_v8  ;;  %v850_v50 = vmul.f32 %v818_v4, %v796_v8  ;;  %v851_v51 = vmul.f32 %v819_v21, %v796_v8  ;;  %v852_v52 = vmul.f32 %v820_v7, %v796_v8 }
 0x2ab   : > { %v853_v55 = vmul.f32 %v821_v9, %v796_v8  ;;  %v854_v57 = vmul.f32 %v822_v10, %v796_v8  ;;  %v855_v59 = vmul.f32 %v823_v11, %v796_v8  ;;  %v856_v60 = vmul.f32 %v824_v26, %v796_v8 }
 0x2ac   : > { %v857_v61 = vmul.f32 %v825_v12, %v796_v8  ;;  %v858_v63 = vmul.f32 %v826_v13, %v796_v8  ;;  %v859_v0 = vmul.f32 %v827_v14, %v796_v8  ;;  %v860_v1 = vmul.f32 %v828_v15, %v796_v8 }
 0x2ad   : > { %v864_v2 = vmul.f32 %v4988_v47, %v829_v27  ;;  %v865_v5 = vmul.f32 %v4988_v47, %v830_v16  ;;  %v866_v17 = vmul.f32 %v4988_v47, %v831_v29  ;;  %v867_v6 = vmul.f32 %v4988_v47, %v832_v30 }
 0x2ae   : > { %v868_v19 = vmul.f32 %v4988_v47, %v833_v23  ;;  %v869_v18 = vmul.f32 %v4988_v47, %v834_v37  ;;  %v870_v20 = vmul.f32 %v4988_v47, %v835_v33  ;;  %v871_v24 = vmul.f32 %v4988_v47, %v836_v31 }
 0x2af   : > { %v872_v22 = vmul.f32 %v4988_v47, %v837_v34  ;;  %v873_v25 = vmul.f32 %v4988_v47, %v838_v35  ;;  %v874_v28 = vmul.f32 %v4988_v47, %v839_v38  ;;  %v875_v32 = vmul.f32 %v4988_v47, %v840_v54 }
 0x2b0   : > { %v876_v36 = vmul.f32 %v4988_v47, %v841_v39  ;;  %v877_v41 = vmul.f32 %v4988_v47, %v842_v43  ;;  %v878_v45 = vmul.f32 %v4988_v47, %v843_v40  ;;  %v879_v49 = vmul.f32 %v4988_v47, %v844_v3 }
 0x2b1   : > { %v880_v58 = vmul.f32 %v4988_v47, %v845_v56  ;;  %v881_v62 = vmul.f32 %v4988_v47, %v846_v44  ;;  %v882_v4 = vmul.f32 %v4988_v47, %v847_v46  ;;  %v883_v21 = vmul.f32 %v4988_v47, %v848_v42 }
 0x2b2   : > { %v884_v7 = vmul.f32 %v4988_v47, %v849_v48  ;;  %v885_v8 = vmul.f32 %v4988_v47, %v850_v50  ;;  %v886_v9 = vmul.f32 %v4988_v47, %v851_v51  ;;  %v887_v10 = vmul.f32 %v4988_v47, %v852_v52 }
 0x2b3   : > { %v888_v11 = vmul.f32 %v4988_v47, %v853_v55  ;;  %v889_v26 = vmul.f32 %v4988_v47, %v854_v57  ;;  %v890_v12 = vmul.f32 %v4988_v47, %v855_v59  ;;  %v891_v13 = vmul.f32 %v4988_v47, %v856_v60 }
 0x2b4   : > { %v892_v14 = vmul.f32 %v4988_v47, %v857_v61  ;;  %v893_v15 = vmul.f32 %v4988_v47, %v858_v63  ;;  %v894_v27 = vmul.f32 %v4988_v47, %v859_v0  ;;  %v895_v16 = vmul.f32 %v4988_v47, %v860_v1 }
 0x2b5   : > { %v6083_v29 = vadd.f32 %v6080_v53, %v864_v2  ;;  %v6086_v30 = vadd.f32 %v6080_v53, %v865_v5  ;;  %v6089_v23 = vadd.f32 %v6080_v53, %v866_v17  ;;  %v6092_v37 = vadd.f32 %v6080_v53, %v867_v6 }
 0x2b6   : > { %v6095_v33 = vadd.f32 %v6080_v53, %v868_v19  ;;  %v6098_v31 = vadd.f32 %v6080_v53, %v869_v18  ;;  %v6101_v34 = vadd.f32 %v6080_v53, %v870_v20  ;;  %v6104_v35 = vadd.f32 %v6080_v53, %v871_v24 }
 0x2b7   : > { %10439 = vst [vmem:[#allocation15_spill] sm:$0xff] %v6083_v29  ;;  %v6107_v38 = vadd.f32 %v6080_v53, %v872_v22  ;;  %v6110_v54 = vadd.f32 %v6080_v53, %v873_v25  ;;  %v6113_v39 = vadd.f32 %v6080_v53, %v874_v28  ;;  %v6116_v43 = vadd.f32 %v6080_v53, %v875_v32 }
 0x2b8   : > { %10440 = vst [vmem:[#allocation16_spill] sm:$0xff] %v6086_v30  ;;  %v6119_v40 = vadd.f32 %v6080_v53, %v876_v36  ;;  %v6122_v3 = vadd.f32 %v6080_v53, %v877_v41  ;;  %v6125_v47 = vadd.f32 %v6080_v53, %v878_v45  ;;  %v6128_v56 = vadd.f32 %v6080_v53, %v879_v49 }
 0x2b9   : > { %10441 = vst [vmem:[#allocation17_spill] sm:$0xff] %v6089_v23  ;;  %v6131_v44 = vadd.f32 %v6080_v53, %v880_v58  ;;  %v6134_v46 = vadd.f32 %v6080_v53, %v881_v62  ;;  %v6137_v42 = vadd.f32 %v6080_v53, %v882_v4  ;;  %v6140_v48 = vadd.f32 %v6080_v53, %v883_v21 }
 0x2ba   : > { %10442 = vst [vmem:[#allocation18_spill] sm:$0xff] %v6092_v37  ;;  %v6143_v50 = vadd.f32 %v6080_v53, %v884_v7  ;;  %v6146_v51 = vadd.f32 %v6080_v53, %v885_v8  ;;  %v6149_v52 = vadd.f32 %v6080_v53, %v886_v9  ;;  %v6152_v55 = vadd.f32 %v6080_v53, %v887_v10 }
 0x2bb   : > { %10443 = vst [vmem:[#allocation19_spill] sm:$0xff] %v6095_v33  ;;  %v6155_v57 = vadd.f32 %v6080_v53, %v888_v11  ;;  %v6158_v59 = vadd.f32 %v6080_v53, %v889_v26  ;;  %v6161_v60 = vmul.f32 0.70710677, %v6083_v29  ;;  %v6164_v61 = vmul.f32 0.70710677, %v6086_v30 }
 0x2bc   : > { %10444 = vst [vmem:[#allocation20_spill] sm:$0xff] %v6098_v31  ;;  %v6167_v63 = vadd.f32 %v6080_v53, %v890_v12  ;;  %v6170_v0 = vmul.f32 0.70710677, %v6089_v23  ;;  %v6173_v1 = vmul.f32 0.70710677, %v6092_v37  ;;  %v6179_v5 = vadd.f32 %v6080_v53, %v891_v13 }
 0x2bd   : > { %10445 = vst [vmem:[#allocation21_spill] sm:$0xff] %v6101_v34  ;;  %v6176_v2 = vmul.f32 0.70710677, %v6095_v33  ;;  %v6182_v17 = vmul.f32 0.70710677, %v6098_v31  ;;  %v6191_v18 = vadd.f32 %v6080_v53, %v892_v14  ;;  %v6203_v25 = vadd.f32 %v6080_v53, %v893_v15 }
 0x2be   : > { %10446 = vst [vmem:[#allocation22_spill] sm:$0xff] %v6104_v35  ;;  %v6185_v6 = vmul.f32 0.70710677, %v6101_v34  ;;  %v6188_v19 = vmul.f32 0.70710677, %v6104_v35  ;;  %v6215_v41 = vadd.f32 %v6080_v53, %v894_v27  ;;  %v6227_v62 = vadd.f32 %v6080_v53, %v895_v16 }
 0x2bf   : > { %10447 = vst [vmem:[#allocation23_spill] sm:$0xff] %v6107_v38  ;;  %v6194_v20 = vmul.f32 0.70710677, %v6107_v38  ;;  %v6197_v24 = vmul.f32 0.70710677, %v6110_v54 }
 0x2c0   : > { %10448 = vst [vmem:[#allocation24_spill] sm:$0xff] %v6110_v54  ;;  %v6200_v22 = vmul.f32 0.70710677, %v6113_v39  ;;  %v6206_v28 = vmul.f32 0.70710677, %v6116_v43 }
 0x2c1   : > { %10449 = vst [vmem:[#allocation25_spill] sm:$0xff] %v6113_v39  ;;  %v6209_v32 = vmul.f32 0.70710677, %v6119_v40  ;;  %v6212_v36 = vmul.f32 0.70710677, %v6122_v3 }
 0x2c2   : > { %10450 = vst [vmem:[#allocation26_spill] sm:$0xff] %v6116_v43  ;;  %v6218_v45 = vmul.f32 0.70710677, %v6125_v47  ;;  %v6221_v49 = vmul.f32 0.70710677, %v6128_v56 }
 0x2c3   : > { %10451 = vst [vmem:[#allocation27_spill] sm:$0xff] %v6119_v40  ;;  %v6224_v58 = vmul.f32 0.70710677, %v6131_v44  ;;  %v6230_v4 = vmul.f32 0.70710677, %v6134_v46 }
 0x2c4   : > { %10452 = vst [vmem:[#allocation28_spill] sm:$0xff] %v6122_v3  ;;  %v6233_v21 = vmul.f32 0.70710677, %v6137_v42  ;;  %v6236_v7 = vmul.f32 0.70710677, %v6140_v48 }
 0x2c5   : > { %10453 = vst [vmem:[#allocation29_spill] sm:$0xff] %v6125_v47  ;;  %v6239_v8 = vmul.f32 0.70710677, %v6143_v50  ;;  %v6242_v9 = vmul.f32 0.70710677, %v6146_v51 }
 0x2c6   : > { %10454 = vst [vmem:[#allocation30_spill] sm:$0xff] %v6128_v56  ;;  %v6245_v10 = vmul.f32 0.70710677, %v6149_v52  ;;  %v6248_v53 = vmul.f32 0.70710677, %v6152_v55 }
 0x2c7   : > { %10455 = vst [vmem:[#allocation31_spill] sm:$0xff] %v6131_v44  ;;  %v6251_v11 = vmul.f32 0.70710677, %v6155_v57  ;;  %v6254_v26 = vmul.f32 0.70710677, %v6158_v59 }
 0x2c8   : > { %10456 = vst [vmem:[#allocation32_spill] sm:$0xff] %v6134_v46  ;;  %v6257_v12 = vmul.f32 0.70710677, %v6167_v63  ;;  %v6260_v13 = vmul.f32 0.70710677, %v6179_v5 }
 0x2c9   : > { %10457 = vst [vmem:[#allocation33_spill] sm:$0xff] %v6137_v42  ;;  %v6263_v14 = vmul.f32 0.70710677, %v6191_v18  ;;  %v6266_v15 = vmul.f32 0.70710677, %v6203_v25 }
 0x2ca   : > { %10458 = vst [vmem:[#allocation34_spill] sm:$0xff] %v6140_v48  ;;  %v6269_v27 = vmul.f32 0.70710677, %v6215_v41  ;;  %v6272_v16 = vmul.f32 0.70710677, %v6227_v62 }
 0x2cb   : > { %10459 = vst [vmem:[#allocation35_spill] sm:$0xff] %v6143_v50  ;;  %v6308_v50 = vand.u32 2147483647, %v6206_v28  ;;  %v6311_v48 = vand.u32 2147483647, %v6209_v32 }
 0x2cc   : > { %10460 = vst [vmem:[#allocation36_spill] sm:$0xff] %v6146_v51  ;;  %v6305_v51 = vand.u32 2147483647, %v6200_v22  ;;  %v6314_v42 = vand.u32 2147483647, %v6212_v36 }
 0x2cd   : > { %10461 = vst [vmem:[#allocation37_spill] sm:$0xff] %v6149_v52  ;;  %v6302_v52 = vand.u32 2147483647, %v6197_v24  ;;  %v6317_v46 = vand.u32 2147483647, %v6218_v45 }
 0x2ce   : > { %10462 = vst [vmem:[#allocation38_spill] sm:$0xff] %v6152_v55  ;;  %v6299_v55 = vand.u32 2147483647, %v6194_v20  ;;  %v6320_v44 = vand.u32 2147483647, %v6221_v49 }
 0x2cf   : > { %10463 = vst [vmem:[#allocation39_spill] sm:$0xff] %v6155_v57  ;;  %v6296_v57 = vand.u32 2147483647, %v6188_v19  ;;  %v6323_v56 = vand.u32 2147483647, %v6224_v58 }
 0x2d0   : > { %10464 = vst [vmem:[#allocation40_spill] sm:$0xff] %v6158_v59  ;;  %v6275_v59 = vand.u32 2147483647, %v6161_v60  ;;  %v6326_v47 = vand.u32 2147483647, %v6230_v4 }
 0x2d1   : > { %10465 = vst [vmem:[#allocation41_spill] sm:$0xff] %v6161_v60  ;;  %v6329_v3 = vand.u32 2147483647, %v6233_v21  ;;  %v6332_v40 = vand.u32 2147483647, %v6236_v7 }
 0x2d2   : > { %10466 = vst [vmem:[#allocation42_spill] sm:$0xff] %v6164_v61  ;;  %v6335_v43 = vand.u32 2147483647, %v6239_v8  ;;  %v6338_v39 = vand.u32 2147483647, %v6242_v9 }
 0x2d3   : > { %10467 = vst [vmem:[#allocation43_spill] sm:$0xff] %v6167_v63  ;;  %v6278_v63 = vand.u32 2147483647, %v6164_v61  ;;  %v6341_v54 = vand.u32 2147483647, %v6245_v10 }
 0x2d4   : > { %10468 = vst [vmem:[#allocation44_spill] sm:$0xff] %v6170_v0  ;;  %v6344_v38 = vand.u32 2147483647, %v6248_v53  ;;  %v6347_v35 = vand.u32 2147483647, %v6251_v11 }
 0x2d5   : > { %10469 = vst [vmem:[#allocation45_spill] sm:$0xff] %v6173_v1  ;;  %v6350_v34 = vand.u32 2147483647, %v6254_v26  ;;  %v995_v31 = vmul.f32 0.3275911, %v6275_v59 }
 0x2d6   : > { %10470 = vst [vmem:[#allocation46_spill] sm:$0xff] %v6176_v2  ;;  %v6354_v33 = vand.u32 2147483647, %v6257_v12  ;;  %v6357_v37 = vand.u32 2147483647, %v6260_v13 }
 0x2d7   : > { %10471 = vst [vmem:[#allocation47_spill] sm:$0xff] %v6179_v5  ;;  %v6281_v5 = vand.u32 2147483647, %v6170_v0  ;;  %v996_v23 = vmul.f32 0.3275911, %v6278_v63 }
 0x2d8   : > { %10472 = vst [vmem:[#allocation48_spill] sm:$0xff] %v6182_v17  ;;  %v6361_v30 = vand.u32 2147483647, %v6263_v14  ;;  %v6364_v29 = vand.u32 2147483647, %v6266_v15 }
 0x2d9   : > { %10473 = vst [vmem:[#allocation49_spill] sm:$0xff] %v6185_v6 }
 0x2da   : > { %10474 = vst [vmem:[#allocation50_spill] sm:$0xff] %v6188_v19 }
 0x2db   : > { %10475 = vst [vmem:[#allocation51_spill] sm:$0xff] %v6191_v18  ;;  %v6284_v18 = vand.u32 2147483647, %v6173_v1 }
 0x2dc   : > { %10476 = vst [vmem:[#allocation52_spill] sm:$0xff] %v6194_v20 }
 0x2dd   : > { %10477 = vst [vmem:[#allocation53_spill] sm:$0xff] %v6197_v24  ;;  %v1014_v24 = vmul.f32 0.3275911, %v6332_v40 }
 0x2de   : > { %10478 = vst [vmem:[#allocation54_spill] sm:$0xff] %v6200_v22 }
 0x2df   : > { %10479 = vst [vmem:[#allocation55_spill] sm:$0xff] %v6203_v25  ;;  %v6287_v25 = vand.u32 2147483647, %v6176_v2  ;;  %v1021_v2 = vmul.f32 0.3275911, %v6354_v33 }
 0x2e0   : > { %10480 = vst [vmem:[#allocation56_spill] sm:$0xff] %v6206_v28  ;;  %v1011_v28 = vmul.f32 0.3275911, %v6323_v56 }
 0x2e1   : > { %10481 = vst [vmem:[#allocation57_spill] sm:$0xff] %v6209_v32 }
 0x2e2   : > { %10482 = vst [vmem:[#allocation58_spill] sm:$0xff] %v6212_v36  ;;  %v1009_v36 = vmul.f32 0.3275911, %v6317_v46 }
 0x2e3   : > { %10483 = vst [vmem:[#allocation59_spill] sm:$0xff] %v6215_v41  ;;  %v6290_v41 = vand.u32 2147483647, %v6182_v17  ;;  %v1020_v17 = vmul.f32 0.3275911, %v6350_v34 }
 0x2e4   : > { %10484 = vst [vmem:[#allocation60_spill] sm:$0xff] %v6218_v45  ;;  %v1008_v45 = vmul.f32 0.3275911, %v6314_v42 }
 0x2e5   : > { %10485 = vst [vmem:[#allocation61_spill] sm:$0xff] %v6221_v49  ;;  %v1007_v49 = vmul.f32 0.3275911, %v6311_v48 }
 0x2e6   : > { %10486 = vst [vmem:[#allocation62_spill] sm:$0xff] %v6224_v58  ;;  %v1040_v60 = vadd.f32 1.0, %v1008_v45 }
 0x2e7   : > { %10487 = vst [vmem:[#allocation63_spill] sm:$0xff] %v6227_v62  ;;  %v6293_v62 = vand.u32 2147483647, %v6185_v6  ;;  %v1039_v0 = vadd.f32 1.0, %v1007_v49  ;;  %v1046_v49 = vadd.f32 1.0, %v1014_v24 }
 0x2e8   : > { %10488 = vst [vmem:[#allocation64_spill] sm:$0xff] %v6230_v4  ;;  %v1006_v4 = vmul.f32 0.3275911, %v6308_v50 }
 0x2e9   : > { %10489 = vst [vmem:[#allocation65_spill] sm:$0xff] %v6233_v21 }
 0x2ea   : > { %10490 = vst [vmem:[#allocation66_spill] sm:$0xff] %v6236_v7  ;;  %v1003_v7 = vmul.f32 0.3275911, %v6299_v55 }
 0x2eb   : > { %10491 = vst [vmem:[#allocation67_spill] sm:$0xff] %v6239_v8  ;;  %v1028_v8 = vadd.f32 1.0, %v996_v23  ;;  %v1010_v23 = vmul.f32 0.3275911, %v6320_v44 }
 0x2ec   : > { %10492 = vst [vmem:[#allocation68_spill] sm:$0xff] %v6242_v9  ;;  %v1027_v9 = vadd.f32 1.0, %v995_v31  ;;  %v1035_v19 = vadd.f32 1.0, %v1003_v7  ;;  %v1022_v7 = vmul.f32 0.3275911, %v6357_v37 }
 0x2ed   : > { %10493 = vst [vmem:[#allocation69_spill] sm:$0xff] %v6245_v10  ;;  %v1000_v10 = vmul.f32 0.3275911, %v6290_v41 }
 0x2ee   : > { %10494 = vst [vmem:[#allocation70_spill] sm:$0xff] %v6248_v53  ;;  %v6371_v53 = vand.u32 2147483647, %v6272_v16  ;;  %4997 = vrcp.f32 %v1027_v9  ;;  %v1015_v9 = vmul.f32 0.3275911, %v6335_v43 }
 0x2ef   : > { %10495 = vst [vmem:[#allocation71_spill] sm:$0xff] %v6251_v11  ;;  %v997_v11 = vmul.f32 0.3275911, %v6281_v5  ;;  %v1032_v32 = vadd.f32 1.0, %v1000_v10  ;;  %4999 = vrcp.f32 %v1028_v8  ;;  %v1017_v8 = vmul.f32 0.3275911, %v6341_v54 }
 0x2f0   : > { %10496 = vst [vmem:[#allocation72_spill] sm:$0xff] %v6254_v26  ;;  %v6368_v26 = vand.u32 2147483647, %v6269_v27  ;;  %v1018_v10 = vmul.f32 0.3275911, %v6344_v38 }
 0x2f1   : > { %10497 = vst [vmem:[#allocation73_spill] sm:$0xff] %v6257_v12  ;;  %v998_v12 = vmul.f32 0.3275911, %v6284_v18  ;;  %v1029_v21 = vadd.f32 1.0, %v997_v11  ;;  %v1012_v11 = vmul.f32 0.3275911, %v6326_v47 }
 0x2f2   : > { %10498 = vst [vmem:[#allocation74_spill] sm:$0xff] %v6260_v13  ;;  %v999_v13 = vmul.f32 0.3275911, %v6287_v25 }
 0x2f3   : > { %10499 = vst [vmem:[#allocation75_spill] sm:$0xff] %v6263_v14  ;;  %v1001_v14 = vmul.f32 0.3275911, %v6293_v62  ;;  %v1030_v58 = vadd.f32 1.0, %v998_v12  ;;  %5001 = vrcp.f32 %v1029_v21  ;;  %v1013_v12 = vmul.f32 0.3275911, %v6329_v3 }
 0x2f4   : > { %10500 = vst [vmem:[#allocation76_spill] sm:$0xff] %v6266_v15  ;;  %v1002_v15 = vmul.f32 0.3275911, %v6296_v57  ;;  %v1031_v31 = vadd.f32 1.0, %v999_v13  ;;  %v1016_v13 = vmul.f32 0.3275911, %v6338_v39 }
 0x2f5   : > { %10501 = vst [vmem:[#allocation77_spill] sm:$0xff] %v6269_v27  ;;  %v1004_v27 = vmul.f32 0.3275911, %v6302_v52  ;;  %v1033_v22 = vadd.f32 1.0, %v1001_v14  ;;  %5003 = vrcp.f32 %v1030_v58  ;;  %v6394_v14 = vpop.eup %4997  ;;  %v1019_v21 = vmul.f32 0.3275911, %v6347_v35 }
 0x2f6   : > { %10502 = vst [vmem:[#allocation78_spill] sm:$0xff] %v6272_v16  ;;  %v1005_v16 = vmul.f32 0.3275911, %v6305_v51  ;;  %v1034_v20 = vadd.f32 1.0, %v1002_v15  ;;  %5005 = vrcp.f32 %v1031_v31  ;;  %v6398_v58 = vpop.eup %4999  ;;  %v1038_v31 = vadd.f32 1.0, %v1006_v4 }
 0x2f7   : > { %10503 = vst [vmem:[#allocation79_spill] sm:$0xff] %v6275_v59  ;;  %v1036_v6 = vadd.f32 1.0, %v1004_v27  ;;  %5007 = vrcp.f32 %v1032_v32  ;;  %v1023_v32 = vmul.f32 0.3275911, %v6361_v30  ;;  %v1024_v27 = vmul.f32 0.3275911, %v6364_v29 }
 0x2f8   : > { %10504 = vst [vmem:[#allocation80_spill] sm:$0xff] %v6278_v63  ;;  %v1037_v15 = vadd.f32 1.0, %v1005_v16  ;;  %5009 = vrcp.f32 %v1033_v22  ;;  %v1025_v22 = vmul.f32 0.3275911, %v6368_v26  ;;  %v1026_v16 = vmul.f32 0.3275911, %v6371_v53 }
 0x2f9   : > { %10505 = vst [vmem:[#allocation81_spill] sm:$0xff] %v6281_v5  ;;  %5011 = vrcp.f32 %v1034_v20  ;;  %v6402_v1 = vpop.eup %5001  ;;  %v1041_v4 = vadd.f32 1.0, %v1009_v36  ;;  %v1042_v20 = vadd.f32 1.0, %v1010_v23  ;;  %v1052_v23 = vadd.f32 1.0, %v1020_v17 }
 0x2fa   : > { %10506 = vst [vmem:[#allocation82_spill] sm:$0xff] %v6284_v18  ;;  %5013 = vrcp.f32 %v1035_v19  ;;  %v1092_v24 = vmul.f32 1.0614054, %v6398_v58 }
 0x2fb   : > { %10507 = vst [vmem:[#allocation83_spill] sm:$0xff] %v6287_v25  ;;  %v6406_v61 = vpop.eup %5003  ;;  %5015 = vrcp.f32 %v1036_v6  ;;  %v1050_v6 = vadd.f32 1.0, %v1018_v10 }
 0x2fc   : > { %10508 = vst [vmem:[#allocation84_spill] sm:$0xff] %v6290_v41  ;;  %5017 = vrcp.f32 %v1037_v15  ;;  %v1094_v10 = vmul.f32 1.0614054, %v6406_v61 }
 0x2fd   : > { %10509 = vst [vmem:[#allocation85_spill] sm:$0xff] %v6293_v62  ;;  %5019 = vrcp.f32 %v1038_v31 }
 0x2fe   : > { %10510 = vst [vmem:[#allocation86_spill] sm:$0xff] %v6296_v57  ;;  %5021 = vrcp.f32 %v1039_v0  ;;  %v1093_v0 = vmul.f32 1.0614054, %v6402_v1 }
 0x2ff   : > { %10511 = vst [vmem:[#allocation87_spill] sm:$0xff] %v6299_v55  ;;  %5023 = vrcp.f32 %v1040_v60  ;;  %v6429_v60 = vadd.f32 1.0, %v1024_v27 }
 0x300   : > { %10512 = vst [vmem:[#allocation88_spill] sm:$0xff] %v6302_v52  ;;  %5025 = vrcp.f32 %v1041_v4  ;;  %v1124_v4 = vadd.f32 -1.4531521, %v1092_v24 }
 0x301   : > { %10513 = vst [vmem:[#allocation89_spill] sm:$0xff] %v6305_v51  ;;  %5027 = vrcp.f32 %v1042_v20  ;;  %v1058_v20 = vadd.f32 1.0, %v1026_v16 }
 0x302   : > { %10514 = vst [vmem:[#allocation90_spill] sm:$0xff] %v6308_v50 }
 0x303   : > { %10515 = vst [vmem:[#allocation91_spill] sm:$0xff] %v6311_v48 }
 0x304   : > { %10516 = vst [vmem:[#allocation92_spill] sm:$0xff] %v6314_v42 }
 0x305   : > { %10517 = vst [vmem:[#allocation93_spill] sm:$0xff] %v6317_v46 }
 0x306   : > { %10518 = vst [vmem:[#allocation94_spill] sm:$0xff] %v6320_v44 }
 0x307   : > { %10519 = vst [vmem:[#allocation95_spill] sm:$0xff] %v6323_v56 }
 0x308   : > { %10520 = vst [vmem:[#allocation96_spill] sm:$0xff] %v6326_v47 }
 0x309   : > { %10521 = vst [vmem:[#allocation97_spill] sm:$0xff] %v6329_v3 }
 0x30a   : > { %10522 = vst [vmem:[#allocation98_spill] sm:$0xff] %v6332_v40 }
 0x30b   : > { %10523 = vst [vmem:[#allocation99_spill] sm:$0xff] %v6335_v43 }
 0x30c   : > { %10524 = vst [vmem:[#allocation100_spill] sm:$0xff] %v6338_v39  ;;  %v1125_v39 = vadd.f32 -1.4531521, %v1093_v0 }
 0x30d   : > { %10525 = vst [vmem:[#allocation101_spill] sm:$0xff] %v6341_v54 }
 0x30e   : > { %10526 = vst [vmem:[#allocation102_spill] sm:$0xff] %v6344_v38  ;;  %v1049_v38 = vadd.f32 1.0, %v1017_v8 }
 0x30f   : > { %10527 = vst [vmem:[#allocation103_spill] sm:$0xff] %v6347_v35  ;;  %v1047_v35 = vadd.f32 1.0, %v1015_v9  ;;  %v1054_v9 = vadd.f32 1.0, %v1022_v7 }
 0x310   : > { %10528 = vst [vmem:[#allocation104_spill] sm:$0xff] %v6350_v34 }
 0x311   : > { %10529 = vst [vmem:[#allocation105_spill] sm:$0xff] %v6354_v33  ;;  %v6410_v33 = vpop.eup %5005 }
 0x312   : > { %10530 = vst [vmem:[#allocation106_spill] sm:$0xff] %v6357_v37  ;;  %v1043_v37 = vadd.f32 1.0, %v1011_v28  ;;  %v6412_v34 = vpop.eup %5007  ;;  %v1091_v28 = vmul.f32 1.0614054, %v6394_v14 }
 0x313   : > { %10531 = vst [vmem:[#allocation107_spill] sm:$0xff] %v6361_v30  ;;  %v1044_v30 = vadd.f32 1.0, %v1012_v11  ;;  %v6414_v19 = vpop.eup %5009  ;;  %v1053_v11 = vadd.f32 1.0, %v1021_v2  ;;  %v1095_v2 = vmul.f32 1.0614054, %v6410_v33 }
 0x314   : > { %10532 = vst [vmem:[#allocation108_spill] sm:$0xff] %v6364_v29  ;;  %v1045_v29 = vadd.f32 1.0, %v1013_v12  ;;  %v6416_v45 = vpop.eup %5011  ;;  %5029 = vrcp.f32 %v1043_v37  ;;  %v1097_v15 = vmul.f32 1.0614054, %v6414_v19  ;;  %v1123_v7 = vadd.f32 -1.4531521, %v1091_v28 }
 0x315   : > { %10533 = vst [vmem:[#allocation109_spill] sm:$0xff] %v6368_v26  ;;  %v1048_v26 = vadd.f32 1.0, %v1016_v13  ;;  %v6419_v36 = vpop.eup %5013  ;;  %v6424_v13 = vadd.f32 1.0, %v1023_v32  ;;  %5031 = vrcp.f32 %v1044_v30  ;;  %v1057_v32 = vadd.f32 1.0, %v1025_v22 }
 0x316   : > { %10534 = vst [vmem:[#allocation110_spill] sm:$0xff] %v6371_v53  ;;  %v1051_v53 = vadd.f32 1.0, %v1019_v21  ;;  %v6422_v12 = vpop.eup %5015  ;;  %v1096_v21 = vmul.f32 1.0614054, %v6412_v34  ;;  %5033 = vrcp.f32 %v1045_v29  ;;  %v1098_v27 = vmul.f32 1.0614054, %v6416_v45 }
 0x317   : > { %10535 = vst [vmem:[#allocation111_spill] sm:$0xff] %v6394_v14  ;;  %v6427_v8 = vpop.eup %5017  ;;  %5035 = vrcp.f32 %v1046_v49  ;;  %v1099_v54 = vmul.f32 1.0614054, %v6419_v36  ;;  %v1100_v43 = vmul.f32 1.0614054, %v6422_v12  ;;  %v6449_v24 = vmul.f32 %v6394_v14, %v1123_v7 }
 0x318   : > { %10536 = vst [vmem:[#allocation112_spill] sm:$0xff] %v6402_v1  ;;  %v6433_v17 = vpop.eup %5019  ;;  %5037 = vrcp.f32 %v1047_v35  ;;  %v1126_v28 = vadd.f32 -1.4531521, %v1094_v10  ;;  %v1127_v40 = vadd.f32 -1.4531521, %v1095_v2  ;;  %v6455_v35 = vmul.f32 %v6398_v58, %v1124_v4 }
 0x319   : > { %10537 = vst [vmem:[#allocation113_spill] sm:$0xff] %v6406_v61  ;;  %v6437_v31 = vpop.eup %5021  ;;  %5039 = vrcp.f32 %v1048_v26  ;;  %v1128_v29 = vadd.f32 -1.4531521, %v1096_v21  ;;  %v1129_v22 = vadd.f32 -1.4531521, %v1097_v15  ;;  %v6461_v2 = vmul.f32 %v6402_v1, %v1125_v39 }
 0x31a   : > { %10538 = vst [vmem:[#allocation114_spill] sm:$0xff] %v6410_v33  ;;  %v6440_v37 = vpop.eup %5023  ;;  %5041 = vrcp.f32 %v1049_v38  ;;  %v1101_v49 = vmul.f32 1.0614054, %v6427_v8  ;;  %v1130_v0 = vadd.f32 -1.4531521, %v1098_v27  ;;  %v6466_v38 = vmul.f32 %v6406_v61, %v1126_v28 }
 0x31b   : > { %10539 = vst [vmem:[#allocation115_spill] sm:$0xff] %v6412_v34  ;;  %v6443_v30 = vpop.eup %5025  ;;  %5043 = vrcp.f32 %v1050_v6  ;;  %v1102_v10 = vmul.f32 1.0614054, %v6433_v17  ;;  %v1131_v26 = vadd.f32 -1.4531521, %v1099_v54  ;;  %v6469_v7 = vmul.f32 %v6410_v33, %v1127_v40 }
 0x31c   : > { %10540 = vst [vmem:[#allocation116_spill] sm:$0xff] %v6416_v45  ;;  %v6446_v3 = vpop.eup %5027  ;;  %5045 = vrcp.f32 %v1051_v53  ;;  %v1132_v15 = vadd.f32 -1.4531521, %v1100_v43  ;;  %v1103_v6 = vmul.f32 1.0614054, %v6437_v31  ;;  %v6475_v54 = vmul.f32 %v6412_v34, %v1128_v29 }
 0x31d   : > { %10541 = vst [vmem:[#allocation117_spill] sm:$0xff] %v6419_v36  ;;  %v6451_v16 = vpop.eup %5029  ;;  %5047 = vrcp.f32 %v1052_v23  ;;  %v6478_v39 = vmul.f32 %v6414_v19, %v1129_v22  ;;  %v1104_v43 = vmul.f32 1.0614054, %v6440_v37  ;;  %v1133_v53 = vadd.f32 -1.4531521, %v1101_v49 }
 0x31e   : > { %10542 = vst [vmem:[#allocation118_spill] sm:$0xff] %v6422_v12  ;;  %v6457_v47 = vpop.eup %5031  ;;  %5049 = vrcp.f32 %v1053_v11  ;;  %v6484_v40 = vmul.f32 %v6416_v45, %v1130_v0  ;;  %v1105_v23 = vmul.f32 1.0614054, %v6443_v30  ;;  %v1134_v56 = vadd.f32 -1.4531521, %v1102_v10 }
 0x31f   : > { %10543 = vst [vmem:[#allocation119_spill] sm:$0xff] %v6427_v8  ;;  %v6463_v21 = vpop.eup %5033  ;;  %5051 = vrcp.f32 %v1054_v9  ;;  %v6490_v29 = vmul.f32 %v6419_v36, %v1131_v26  ;;  %v1106_v11 = vmul.f32 1.0614054, %v6446_v3  ;;  %v1107_v49 = vmul.f32 1.0614054, %v6451_v16 }
 0x320   : > { %10544 = vst [vmem:[#allocation120_spill] sm:$0xff] %v6433_v17  ;;  %v6471_v27 = vpop.eup %5035  ;;  %5053 = vrcp.f32 %v6424_v13  ;;  %v6498_v0 = vmul.f32 %v6422_v12, %v1132_v15  ;;  %v1108_v9 = vmul.f32 1.0614054, %v6457_v47  ;;  %v1109_v10 = vmul.f32 1.0614054, %v6463_v21 }
 0x321   : > { %10545 = vst [vmem:[#allocation121_spill] sm:$0xff] %v6437_v31  ;;  %v6480_v4 = vpop.eup %5037  ;;  %5055 = vrcp.f32 %v6429_v60  ;;  %v1135_v26 = vadd.f32 -1.4531521, %v1103_v6  ;;  %v1110_v13 = vmul.f32 1.0614054, %v6471_v27  ;;  %v6509_v48 = vmul.f32 %v6427_v8, %v1133_v53 }
 0x322   : > { %10546 = vst [vmem:[#allocation122_spill] sm:$0xff] %v6440_v37  ;;  %v6486_v28 = vpop.eup %5039  ;;  %5057 = vrcp.f32 %v1057_v32  ;;  %v1136_v42 = vadd.f32 -1.4531521, %v1104_v43  ;;  %v1111_v50 = vmul.f32 1.0614054, %v6480_v4  ;;  %v1166_v57 = vmul.f32 %v6433_v17, %v1134_v56 }
 0x323   : > { %10547 = vst [vmem:[#allocation123_spill] sm:$0xff] %v6443_v30  ;;  %v6492_v22 = vpop.eup %5041  ;;  %5059 = vrcp.f32 %v1058_v20  ;;  %v1112_v60 = vmul.f32 1.0614054, %v6486_v28  ;;  %v1137_v51 = vadd.f32 -1.4531521, %v1105_v23  ;;  %v1167_v20 = vmul.f32 %v6437_v31, %v1135_v26 }
 0x324   : > { %10548 = vst [vmem:[#allocation124_spill] sm:$0xff] %v6446_v3  ;;  %v6500_v44 = vpop.eup %5043  ;;  %v1113_v6 = vmul.f32 1.0614054, %v6492_v22  ;;  %v1138_v55 = vadd.f32 -1.4531521, %v1106_v11  ;;  %v1168_v11 = vmul.f32 %v6440_v37, %v1136_v42 }
 0x325   : > { %10549 = vst [vmem:[#allocation125_spill] sm:$0xff] %v6451_v16  ;;  %v6505_v46 = vpop.eup %5045  ;;  %v1139_v32 = vadd.f32 -1.4531521, %v1107_v49  ;;  %v1114_v53 = vmul.f32 1.0614054, %v6500_v44 }
 0x326   : > { %10550 = vst [vmem:[#allocation126_spill] sm:$0xff] %v6457_v47  ;;  %v6511_v15 = vpop.eup %5047  ;;  %v1140_v62 = vadd.f32 -1.4531521, %v1108_v9  ;;  %v1141_v41 = vadd.f32 -1.4531521, %v1109_v10  ;;  %v1169_v9 = vmul.f32 %v6443_v30, %v1137_v51  ;;  %v1170_v17 = vmul.f32 %v6446_v3, %v1138_v55 }
 0x327   : > { %10551 = vst [vmem:[#allocation127_spill] sm:$0xff] %v6463_v21  ;;  %v6515_v52 = vpop.eup %5049  ;;  %v1115_v23 = vmul.f32 1.0614054, %v6505_v46  ;;  %v1116_v18 = vmul.f32 1.0614054, %v6511_v15  ;;  %v1171_v8 = vmul.f32 %v6451_v16, %v1139_v32 }
 0x328   : > { %10552 = vst [vmem:[#allocation128_spill] sm:$0xff] %v6471_v27  ;;  %v6519_v43 = vpop.eup %5051  ;;  %v1142_v5 = vadd.f32 -1.4531521, %v1110_v13  ;;  %v1117_v56 = vmul.f32 1.0614054, %v6515_v52  ;;  %v1172_v12 = vmul.f32 %v6457_v47, %v1140_v62 }
 0x329   : > { %10553 = vst [vmem:[#allocation129_spill] sm:$0xff] %v6480_v4  ;;  %v6523_v25 = vpop.eup %5053  ;;  %v1143_v63 = vadd.f32 -1.4531521, %v1111_v50  ;;  %v1144_v59 = vadd.f32 -1.4531521, %v1112_v60  ;;  %v1173_v50 = vmul.f32 %v6463_v21, %v1141_v41 }
 0x32a   : > { %10554 = vst [vmem:[#allocation130_spill] sm:$0xff] %v6486_v28  ;;  %v6528_v49 = vpop.eup %5055  ;;  %v1118_v26 = vmul.f32 1.0614054, %v6519_v43  ;;  %v1145_v31 = vadd.f32 -1.4531521, %v1113_v6  ;;  %v1174_v36 = vmul.f32 %v6471_v27, %v1142_v5 }
 0x32b   : > { %10555 = vst [vmem:[#allocation131_spill] sm:$0xff] %v6492_v22  ;;  %v6532_v10 = vpop.eup %5057  ;;  %v1119_v42 = vmul.f32 1.0614054, %v6523_v25  ;;  %v1146_v37 = vadd.f32 -1.4531521, %v1114_v53  ;;  %v1175_v32 = vmul.f32 %v6480_v4, %v1143_v63  ;;  %v1176_v16 = vmul.f32 %v6486_v28, %v1144_v59 }
 0x32c   : > { %10556 = vst [vmem:[#allocation132_spill] sm:$0xff] %v6500_v44  ;;  %v6537_v13 = vpop.eup %5059  ;;  %v1120_v51 = vmul.f32 1.0614054, %v6528_v49  ;;  %v1147_v60 = vadd.f32 -1.4531521, %v1115_v23  ;;  %v1177_v62 = vmul.f32 %v6492_v22, %v1145_v31 }
 0x32d   : > { %10557 = vst [vmem:[#allocation133_spill] sm:$0xff] %v6505_v46  ;;  %v1148_v30 = vadd.f32 -1.4531521, %v1116_v18  ;;  %v1121_v6 = vmul.f32 1.0614054, %v6532_v10  ;;  %v1178_v23 = vmul.f32 %v6500_v44, %v1146_v37 }
 0x32e   : > { %10558 = vst [vmem:[#allocation134_spill] sm:$0xff] %v6511_v15  ;;  %v1149_v55 = vadd.f32 -1.4531521, %v1117_v56  ;;  %v1122_v3 = vmul.f32 1.0614054, %v6537_v13  ;;  %v1179_v56 = vmul.f32 %v6505_v46, %v1147_v60 }
 0x32f   : > { %10559 = vst [vmem:[#allocation135_spill] sm:$0xff] %v6515_v52  ;;  %v1150_v53 = vadd.f32 -1.4531521, %v1118_v26  ;;  %v1187_v41 = vadd.f32 1.4214138, %v6449_v24  ;;  %v1180_v63 = vmul.f32 %v6511_v15, %v1148_v30 }
 0x330   : > { %10560 = vst [vmem:[#allocation136_spill] sm:$0xff] %v6519_v43  ;;  %v1151_v21 = vadd.f32 -1.4531521, %v1119_v42  ;;  %v1188_v18 = vadd.f32 1.4214138, %v6455_v35  ;;  %v1181_v26 = vmul.f32 %v6515_v52, %v1149_v55 }
 0x331   : > { %10561 = vst [vmem:[#allocation137_spill] sm:$0xff] %v6523_v25  ;;  %v1189_v5 = vadd.f32 1.4214138, %v6461_v2  ;;  %v1152_v27 = vadd.f32 -1.4531521, %v1120_v51  ;;  %v1182_v37 = vmul.f32 %v6519_v43, %v1150_v53 }
 0x332   : > { %10562 = vst [vmem:[#allocation138_spill] sm:$0xff] %v6528_v49  ;;  %v1190_v59 = vadd.f32 1.4214138, %v6466_v38  ;;  %v1153_v28 = vadd.f32 -1.4531521, %v1121_v6  ;;  %v1183_v51 = vmul.f32 %v6523_v25, %v1151_v21 }
 0x333   : > { %10563 = vst [vmem:[#allocation139_spill] sm:$0xff] %v6532_v10  ;;  %v1191_v31 = vadd.f32 1.4214138, %v6469_v7  ;;  %v1192_v24 = vadd.f32 1.4214138, %v6475_v54  ;;  %v1184_v6 = vmul.f32 %v6528_v49, %v1152_v27 }
 0x334   : > { %v1154_v42 = vadd.f32 -1.4531521, %v1122_v3  ;;  %v1193_v35 = vadd.f32 1.4214138, %v6478_v39  ;;  %v1194_v2 = vadd.f32 1.4214138, %v6484_v40  ;;  %v1185_v3 = vmul.f32 %v6532_v10, %v1153_v28 }
 0x335   : > { %v1195_v30 = vadd.f32 1.4214138, %v6490_v29  ;;  %v1196_v38 = vadd.f32 1.4214138, %v6498_v0  ;;  %v1197_v60 = vadd.f32 1.4214138, %v6509_v48  ;;  %v1219_v48 = vmul.f32 %v6394_v14, %v1187_v41 }
 0x336   : > { %v1198_v7 = vadd.f32 1.4214138, %v1166_v57  ;;  %v1199_v55 = vadd.f32 1.4214138, %v1167_v20  ;;  %v1200_v54 = vadd.f32 1.4214138, %v1168_v11  ;;  %v1186_v40 = vmul.f32 %v6537_v13, %v1154_v42 }
 0x337   : > { %v1201_v53 = vadd.f32 1.4214138, %v1169_v9  ;;  %v1202_v43 = vadd.f32 1.4214138, %v1170_v17  ;;  %v1203_v39 = vadd.f32 1.4214138, %v1171_v8  ;;  %v1220_v20 = vmul.f32 %v6398_v58, %v1188_v18 }
 0x338   : > { %v1204_v52 = vadd.f32 1.4214138, %v1172_v12  ;;  %v1205_v21 = vadd.f32 1.4214138, %v1173_v50  ;;  %v1206_v25 = vadd.f32 1.4214138, %v1174_v36  ;;  %v1221_v8 = vmul.f32 %v6402_v1, %v1189_v5 }
 0x339   : > { %v1207_v29 = vadd.f32 1.4214138, %v1175_v32  ;;  %v1208_v15 = vadd.f32 1.4214138, %v1176_v16  ;;  %v1209_v0 = vadd.f32 1.4214138, %v1177_v62  ;;  %v1222_v36 = vmul.f32 %v6406_v61, %v1190_v59 }
 0x33a   : > { %v1210_v46 = vadd.f32 1.4214138, %v1178_v23  ;;  %v1211_v27 = vadd.f32 1.4214138, %v1179_v56  ;;  %v1212_v57 = vadd.f32 1.4214138, %v1180_v63  ;;  %v1223_v16 = vmul.f32 %v6410_v33, %v1191_v31 }
 0x33b   : > { %v1213_v11 = vadd.f32 1.4214138, %v1181_v26  ;;  %v1214_v28 = vadd.f32 1.4214138, %v1182_v37  ;;  %v1215_v9 = vadd.f32 1.4214138, %v1183_v51  ;;  %v1224_v50 = vmul.f32 %v6412_v34, %v1192_v24 }
 0x33c   : > { %v1216_v17 = vadd.f32 1.4214138, %v1184_v6  ;;  %v1217_v42 = vadd.f32 1.4214138, %v1185_v3  ;;  %v1218_v12 = vadd.f32 1.4214138, %v1186_v40  ;;  %v1225_v32 = vmul.f32 %v6414_v19, %v1193_v35 }
 0x33d   : > { %v1226_v62 = vmul.f32 %v6416_v45, %v1194_v2  ;;  %v10564_v41 = vld [vmem:[#allocation117_spill] sm:$0xff]  ;;  %v10565_v18 = vld [vmem:[#allocation118_spill] sm:$0xff]  ;;  %v10566_v63 = vld [vmem:[#allocation119_spill] sm:$0xff]  ;;  %v1236_v2 = vmul.f32 %v6457_v47, %v1204_v52 }
 0x33e   : > { %v1227_v23 = vmul.f32 %v10564_v41, %v1195_v30  ;;  %v1228_v56 = vmul.f32 %v10565_v18, %v1196_v38  ;;  %v1229_v26 = vmul.f32 %v10566_v63, %v1197_v60  ;;  %v10567_v5 = vld [vmem:[#allocation120_spill] sm:$0xff]  ;;  %v10568_v51 = vld [vmem:[#allocation121_spill] sm:$0xff]  ;;  %v10569_v3 = vld [vmem:[#allocation122_spill] sm:$0xff]  ;;  %v1239_v60 = vmul.f32 %v6480_v4, %v1207_v29 }
 0x33f   : > { %v1230_v37 = vmul.f32 %v10567_v5, %v1198_v7  ;;  %v1231_v6 = vmul.f32 %v10568_v51, %v1199_v55  ;;  %v1232_v59 = vmul.f32 %v10569_v3, %v1200_v54  ;;  %v10570_v40 = vld [vmem:[#allocation123_spill] sm:$0xff]  ;;  %v10571_v33 = vld [vmem:[#allocation124_spill] sm:$0xff]  ;;  %v10572_v34 = vld [vmem:[#allocation125_spill] sm:$0xff]  ;;  %v1241_v55 = vmul.f32 %v6492_v22, %v1209_v0 }
 0x340   : > { %v1233_v31 = vmul.f32 %v10570_v40, %v1201_v53  ;;  %v1234_v24 = vmul.f32 %v10571_v33, %v1202_v43  ;;  %v1235_v35 = vmul.f32 %v10572_v34, %v1203_v39  ;;  %v10573_v45 = vld [vmem:[#allocation127_spill] sm:$0xff]  ;;  %v10574_v41 = vld [vmem:[#allocation128_spill] sm:$0xff]  ;;  %v10575_v63 = vld [vmem:[#allocation130_spill] sm:$0xff]  ;;  %v1251_v51 = vadd.f32 -0.28449672, %v1219_v48 }
 0x341   : > { %v1237_v30 = vmul.f32 %v10573_v45, %v1205_v21  ;;  %v1238_v38 = vmul.f32 %v10574_v41, %v1206_v25  ;;  %v1240_v7 = vmul.f32 %v10575_v63, %v1208_v15  ;;  %v1242_v54 = vmul.f32 %v6500_v44, %v1210_v46  ;;  %v10576_v53 = vld [vmem:[#allocation133_spill] sm:$0xff]  ;;  %v10577_v43 = vld [vmem:[#allocation134_spill] sm:$0xff]  ;;  %v10578_v34 = vld [vmem:[#allocation135_spill] sm:$0xff] }
 0x342   : > { %v1243_v40 = vmul.f32 %v10576_v53, %v1211_v27  ;;  %v1244_v33 = vmul.f32 %v10577_v43, %v1212_v57  ;;  %v1252_v39 = vadd.f32 -0.28449672, %v1220_v20  ;;  %v1245_v52 = vmul.f32 %v10578_v34, %v1213_v11  ;;  %v10579_v47 = vld [vmem:[#allocation136_spill] sm:$0xff]  ;;  %v10580_v45 = vld [vmem:[#allocation137_spill] sm:$0xff] }
 0x343   : > { %v1246_v21 = vmul.f32 %v10579_v47, %v1214_v28  ;;  %v1247_v25 = vmul.f32 %v10580_v45, %v1215_v9  ;;  %v1253_v41 = vadd.f32 -0.28449672, %v1221_v8  ;;  %v1248_v29 = vmul.f32 %v6528_v49, %v1216_v17 }
 0x344   : > { %v1249_v15 = vmul.f32 %v6532_v10, %v1217_v42  ;;  %v1250_v0 = vmul.f32 %v6537_v13, %v1218_v12  ;;  %v1254_v48 = vadd.f32 -0.28449672, %v1222_v36  ;;  %v1255_v46 = vadd.f32 -0.28449672, %v1223_v16 }
 0x345   : > { %v1256_v44 = vadd.f32 -0.28449672, %v1224_v50  ;;  %v1257_v27 = vadd.f32 -0.28449672, %v1225_v32  ;;  %v1283_v57 = vmul.f32 %v6394_v14, %v1251_v51  ;;  %v1258_v20 = vadd.f32 -0.28449672, %v1226_v62 }
 0x346   : > { %v1259_v43 = vadd.f32 -0.28449672, %v1227_v23  ;;  %v1260_v11 = vadd.f32 -0.28449672, %v1228_v56  ;;  %v1284_v28 = vmul.f32 %v6398_v58, %v1252_v39  ;;  %v1261_v47 = vadd.f32 -0.28449672, %v1229_v26 }
 0x347   : > { %v1262_v9 = vadd.f32 -0.28449672, %v1230_v37  ;;  %v1263_v8 = vadd.f32 -0.28449672, %v1231_v6  ;;  %v1285_v17 = vmul.f32 %v6402_v1, %v1253_v41  ;;  %v1264_v49 = vadd.f32 -0.28449672, %v1232_v59 }
 0x348   : > { %v1265_v42 = vadd.f32 -0.28449672, %v1233_v31  ;;  %v1266_v10 = vadd.f32 -0.28449672, %v1234_v24  ;;  %v1286_v12 = vmul.f32 %v6406_v61, %v1254_v48  ;;  %v1267_v36 = vadd.f32 -0.28449672, %v1235_v35 }
 0x349   : > { %v1268_v16 = vadd.f32 -0.28449672, %v1236_v2  ;;  %v1269_v50 = vadd.f32 -0.28449672, %v1237_v30  ;;  %v10581_v32 = vld [vmem:[#allocation114_spill] sm:$0xff]  ;;  %v10582_v14 = vld [vmem:[#allocation115_spill] sm:$0xff]  ;;  %v1289_v41 = vmul.f32 %v6414_v19, %v1257_v27 }
 0x34a   : > { %v1287_v51 = vmul.f32 %v10581_v32, %v1255_v46  ;;  %v1270_v62 = vadd.f32 -0.28449672, %v1238_v38  ;;  %v1271_v23 = vadd.f32 -0.28449672, %v1239_v60  ;;  %v1272_v56 = vadd.f32 -0.28449672, %v1240_v7 }
 0x34b   : > { %v1288_v39 = vmul.f32 %v10582_v14, %v1256_v44  ;;  %v1273_v26 = vadd.f32 -0.28449672, %v1241_v55  ;;  %v1274_v37 = vadd.f32 -0.28449672, %v1242_v54  ;;  %v1275_v6 = vadd.f32 -0.28449672, %v1243_v40 }
 0x34c   : > { %v1276_v59 = vadd.f32 -0.28449672, %v1244_v33  ;;  %v1277_v31 = vadd.f32 -0.28449672, %v1245_v52  ;;  %v1278_v24 = vadd.f32 -0.28449672, %v1246_v21  ;;  %v1292_v60 = vmul.f32 %v10565_v18, %v1260_v11 }
 0x34d   : > { %v10583_v1 = vld [vmem:[#allocation116_spill] sm:$0xff]  ;;  %v1279_v35 = vadd.f32 -0.28449672, %v1247_v25  ;;  %v1280_v2 = vadd.f32 -0.28449672, %v1248_v29  ;;  %v10584_v61 = vld [vmem:[#allocation117_spill] sm:$0xff]  ;;  %v1294_v55 = vmul.f32 %v10567_v5, %v1262_v9  ;;  %v1296_v33 = vmul.f32 %v10569_v3, %v1264_v49 }
 0x34e   : > { %v1290_v48 = vmul.f32 %v10583_v1, %v1258_v20  ;;  %v1281_v30 = vadd.f32 -0.28449672, %v1249_v15  ;;  %v1291_v46 = vmul.f32 %v10584_v61, %v1259_v43  ;;  %v1282_v38 = vadd.f32 -0.28449672, %v1250_v0  ;;  %v10585_v7 = vld [vmem:[#allocation119_spill] sm:$0xff]  ;;  %v10586_v40 = vld [vmem:[#allocation121_spill] sm:$0xff] }
 0x34f   : > { %v1293_v44 = vmul.f32 %v10585_v7, %v1261_v47  ;;  %v1295_v54 = vmul.f32 %v10586_v40, %v1263_v8  ;;  %v10587_v52 = vld [vmem:[#allocation123_spill] sm:$0xff]  ;;  %v10588_v27 = vld [vmem:[#allocation124_spill] sm:$0xff]  ;;  %v10589_v25 = vld [vmem:[#allocation125_spill] sm:$0xff]  ;;  %v1303_v47 = vmul.f32 %v6480_v4, %v1271_v23  ;;  %v1304_v9 = vmul.f32 %v10575_v63, %v1272_v56 }
 0x350   : > { %v1297_v21 = vmul.f32 %v10587_v52, %v1265_v42  ;;  %v1298_v20 = vmul.f32 %v10588_v27, %v1266_v10  ;;  %v1299_v29 = vmul.f32 %v10589_v25, %v1267_v36  ;;  %v10590_v15 = vld [vmem:[#allocation126_spill] sm:$0xff]  ;;  %v10591_v43 = vld [vmem:[#allocation127_spill] sm:$0xff]  ;;  %v10592_v61 = vld [vmem:[#allocation128_spill] sm:$0xff]  ;;  %v1305_v8 = vmul.f32 %v6492_v22, %v1273_v26 }
 0x351   : > { %v1300_v1 = vmul.f32 %v10590_v15, %v1268_v16  ;;  %v1301_v0 = vmul.f32 %v10591_v43, %v1269_v50  ;;  %v1302_v11 = vmul.f32 %v10592_v61, %v1270_v62  ;;  %v10593_v40 = vld [vmem:[#allocation132_spill] sm:$0xff]  ;;  %v1307_v42 = vmul.f32 %v10576_v53, %v1275_v6  ;;  %v10594_v52 = vld [vmem:[#allocation134_spill] sm:$0xff]  ;;  %v10597_v4 = vld [vmem:[#allocation139_spill] sm:$0xff] }
 0x352   : > { %v1306_v49 = vmul.f32 %v10593_v40, %v1274_v37  ;;  %v1308_v10 = vmul.f32 %v10594_v52, %v1276_v59  ;;  %v1309_v36 = vmul.f32 %v10578_v34, %v1277_v31  ;;  %v1315_v25 = vadd.f32 0.2548296, %v1283_v57  ;;  %v10595_v16 = vld [vmem:[#allocation136_spill] sm:$0xff]  ;;  %v10596_v62 = vld [vmem:[#allocation138_spill] sm:$0xff]  ;;  %v10598_v34 = vld [vmem:[#allocation111_spill] sm:$0xff] }
 0x353   : > { %v1310_v15 = vmul.f32 %v10595_v16, %v1278_v24  ;;  %v1311_v50 = vmul.f32 %v10580_v45, %v1279_v35  ;;  %v1312_v61 = vmul.f32 %v10596_v62, %v1280_v2  ;;  %v1316_v23 = vadd.f32 0.2548296, %v1284_v28 }
 0x354   : > { %v1313_v56 = vmul.f32 %v10597_v4, %v1281_v30  ;;  %v1317_v63 = vadd.f32 0.2548296, %v1285_v17  ;;  %v1318_v26 = vadd.f32 0.2548296, %v1286_v12  ;;  %v1319_v22 = vadd.f32 0.2548296, %v1287_v51 }
 0x355   : > { %v1314_v37 = vmul.f32 %v6537_v13, %v1282_v38  ;;  %v1320_v6 = vadd.f32 0.2548296, %v1288_v39  ;;  %v1321_v53 = vadd.f32 0.2548296, %v1289_v41  ;;  %v1322_v59 = vadd.f32 0.2548296, %v1290_v48 }
 0x356   : > { %v1323_v52 = vadd.f32 0.2548296, %v1291_v46  ;;  %v1324_v31 = vadd.f32 0.2548296, %v1292_v60  ;;  %v1325_v57 = vadd.f32 0.2548296, %v1293_v44  ;;  %v6634_v24 = vmul.f32 %v10598_v34, %v1315_v25 }
 0x357   : > { %v1326_v35 = vadd.f32 0.2548296, %v1294_v55  ;;  %v1327_v45 = vadd.f32 0.2548296, %v1295_v54  ;;  %v1328_v2 = vadd.f32 0.2548296, %v1296_v33  ;;  %v6637_v28 = vmul.f32 %v6398_v58, %v1316_v23 }
 0x358   : > { %v1329_v17 = vadd.f32 0.2548296, %v1297_v21  ;;  %v1330_v12 = vadd.f32 0.2548296, %v1298_v20  ;;  %v1331_v51 = vadd.f32 0.2548296, %v1299_v29  ;;  %v6646_v54 = vmul.f32 %v10581_v32, %v1319_v22 }
 0x359   : > { %v10599_v30 = vld [vmem:[#allocation112_spill] sm:$0xff]  ;;  %v1332_v39 = vadd.f32 0.2548296, %v1300_v1  ;;  %v1333_v41 = vadd.f32 0.2548296, %v1301_v0  ;;  %v10600_v46 = vld [vmem:[#allocation113_spill] sm:$0xff]  ;;  %v6649_v20 = vmul.f32 %v10582_v14, %v1320_v6  ;;  %v6652_v29 = vmul.f32 %v6414_v19, %v1321_v53 }
 0x35a   : > { %v6640_v38 = vmul.f32 %v10599_v30, %v1317_v63  ;;  %v1334_v48 = vadd.f32 0.2548296, %v1302_v11  ;;  %v6643_v60 = vmul.f32 %v10600_v46, %v1318_v26  ;;  %v1335_v34 = vadd.f32 0.2548296, %v1303_v47  ;;  %v10602_v22 = vld [vmem:[#allocation117_spill] sm:$0xff]  ;;  %v10608_v23 = vld [vmem:[#allocation126_spill] sm:$0xff] }
 0x35b   : > { %v1336_v44 = vadd.f32 0.2548296, %v1304_v9  ;;  %v1337_v55 = vadd.f32 0.2548296, %v1305_v8  ;;  %v1338_v58 = vadd.f32 0.2548296, %v1306_v49  ;;  %v6658_v32 = vmul.f32 %v10602_v22, %v1323_v52 }
 0x35c   : > { %v1339_v33 = vadd.f32 0.2548296, %v1307_v42  ;;  %v1340_v21 = vadd.f32 0.2548296, %v1308_v10  ;;  %v1341_v63 = vadd.f32 0.2548296, %v1309_v36  ;;  %v6661_v49 = vmul.f32 %v10565_v18, %v1324_v31 }
 0x35d   : > { %v1342_v25 = vadd.f32 0.2548296, %v1310_v15  ;;  %v1343_v1 = vadd.f32 0.2548296, %v1311_v50  ;;  %v1344_v0 = vadd.f32 0.2548296, %v1312_v61  ;;  %v6664_v14 = vmul.f32 %v10585_v7, %v1325_v57 }
 0x35e   : > { %v1345_v11 = vadd.f32 0.2548296, %v1313_v56  ;;  %v1346_v47 = vadd.f32 0.2548296, %v1314_v37  ;;  %v10601_v9 = vld [vmem:[#allocation116_spill] sm:$0xff]  ;;  %v6667_v15 = vmul.f32 %v10567_v5, %v1326_v35  ;;  %v10603_v19 = vld [vmem:[#allocation121_spill] sm:$0xff]  ;;  %v6673_v61 = vmul.f32 %v10569_v3, %v1328_v2 }
 0x35f   : > { %v6655_v8 = vmul.f32 %v10601_v9, %v1322_v59  ;;  %v6670_v53 = vmul.f32 %v10603_v19, %v1327_v45  ;;  %v10604_v42 = vld [vmem:[#allocation123_spill] sm:$0xff]  ;;  %v6680_v18 = vmul.f32 %v10588_v27, %v1330_v12  ;;  %v10606_v50 = vld [vmem:[#allocation125_spill] sm:$0xff]  ;;  %v6686_v5 = vmul.f32 %v10608_v23, %v1332_v39  ;;  %v10610_v56 = vld [vmem:[#allocation80_spill] sm:$0xff] }
 0x360   : > { %v6676_v10 = vmul.f32 %v10604_v42, %v1329_v17  ;;  %v10605_v52 = vld [vmem:[#allocation79_spill] sm:$0xff]  ;;  %v6683_v7 = vmul.f32 %v10606_v50, %v1331_v51  ;;  %v1380_v45 = vsub.f32 0.0, %v10610_v56  ;;  %v6690_v26 = vmul.f32 %v10591_v43, %v1333_v41  ;;  %v10612_v3 = vld [vmem:[#allocation128_spill] sm:$0xff]  ;;  %v10614_v6 = vld [vmem:[#allocation129_spill] sm:$0xff] }
 0x361   : > { %v1379_v36 = vsub.f32 0.0, %v10605_v52  ;;  %10609 = vst [vmem:[#allocation120_spill] sm:$0xff] %v6686_v5  ;;  %v6693_v37 = vmul.f32 %v10612_v3, %v1334_v48  ;;  %v6696_v59 = vmul.f32 %v10614_v6, %v1335_v34  ;;  %v10616_v31 = vld [vmem:[#allocation81_spill] sm:$0xff]  ;;  %v10617_v57 = vld [vmem:[#allocation130_spill] sm:$0xff]  ;;  %v10619_v2 = vld [vmem:[#allocation131_spill] sm:$0xff]  ;;  %v6706_v12 = vmul.f32 %v10593_v40, %v1338_v58 }
 0x362   : > { %10607 = vst [vmem:[#allocation118_spill] sm:$0xff] %v6683_v7  ;;  %v1381_v27 = vsub.f32 0.0, %v10616_v31  ;;  %v6700_v35 = vmul.f32 %v10617_v57, %v1336_v44  ;;  %v6703_v17 = vmul.f32 %v10619_v2, %v1337_v55  ;;  %v10622_v51 = vld [vmem:[#allocation82_spill] sm:$0xff]  ;;  %v10623_v30 = vld [vmem:[#allocation133_spill] sm:$0xff]  ;;  %v10627_v46 = vld [vmem:[#allocation83_spill] sm:$0xff]  ;;  %v6721_v55 = vmul.f32 %v10595_v16, %v1342_v25 }
 0x363   : > { %10611 = vst [vmem:[#allocation122_spill] sm:$0xff] %v6690_v26  ;;  %v1382_v43 = vsub.f32 0.0, %v10622_v51  ;;  %v6710_v39 = vmul.f32 %v10623_v30, %v1339_v33  ;;  %v10625_v41 = vld [vmem:[#allocation134_spill] sm:$0xff]  ;;  %v1383_v34 = vsub.f32 0.0, %v10627_v46  ;;  %v1411_v9 = vmul.f32 %v1379_v36, %v10605_v52  ;;  %v10628_v44 = vld [vmem:[#allocation135_spill] sm:$0xff]  ;;  %v10631_v40 = vld [vmem:[#allocation84_spill] sm:$0xff] }
 0x364   : > { %10613 = vst [vmem:[#allocation114_spill] sm:$0xff] %v6693_v37  ;;  %v6713_v48 = vmul.f32 %v10625_v41, %v1340_v21  ;;  %v6718_v22 = vmul.f32 %v10628_v44, %v1341_v63  ;;  %v1384_v58 = vsub.f32 0.0, %v10631_v40  ;;  %v1412_v19 = vmul.f32 %v1380_v45, %v10610_v56  ;;  %v10632_v42 = vld [vmem:[#allocation137_spill] sm:$0xff]  ;;  %v10638_v25 = vld [vmem:[#allocation86_spill] sm:$0xff]  ;;  %v10639_v45 = vld [vmem:[#allocation87_spill] sm:$0xff] }
 0x365   : > { %10615 = vst [vmem:[#allocation115_spill] sm:$0xff] %v6696_v59  ;;  %v6726_v33 = vmul.f32 %v10632_v42, %v1343_v1  ;;  %v6729_v21 = vmul.f32 %v10596_v62, %v1344_v0  ;;  %v10635_v50 = vld [vmem:[#allocation85_spill] sm:$0xff]  ;;  %v1413_v52 = vmul.f32 %v1381_v27, %v10616_v31  ;;  %v6734_v63 = vmul.f32 %v10597_v4, %v1345_v11  ;;  %v10640_v3 = vld [vmem:[#allocation88_spill] sm:$0xff]  ;;  %v10642_v31 = vld [vmem:[#allocation90_spill] sm:$0xff] }
 0x366   : > { %10618 = vst [vmem:[#allocation119_spill] sm:$0xff] %v6700_v35  ;;  %v1385_v23 = vsub.f32 0.0, %v10635_v50  ;;  %v6737_v16 = vmul.f32 %v6537_v13, %v1346_v47  ;;  %v1386_v36 = vsub.f32 0.0, %v10638_v25  ;;  %v1414_v56 = vmul.f32 %v1382_v43, %v10622_v51  ;;  %v10641_v57 = vld [vmem:[#allocation89_spill] sm:$0xff]  ;;  %v10643_v13 = vld [vmem:[#allocation91_spill] sm:$0xff]  ;;  %v10644_v30 = vld [vmem:[#allocation92_spill] sm:$0xff] }
 0x367   : > { %10620 = vst [vmem:[#allocation124_spill] sm:$0xff] %v6703_v17  ;;  %v1387_v1 = vsub.f32 0.0, %v10639_v45  ;;  %v1388_v6 = vsub.f32 0.0, %v10640_v3  ;;  %v1415_v62 = vmul.f32 %v1383_v34, %v10627_v46  ;;  %v1443_v0 = vmul.f32 1.442695, %v1411_v9  ;;  %v10645_v44 = vld [vmem:[#allocation93_spill] sm:$0xff] }
 0x368   : > { %10621 = vst [vmem:[#allocation127_spill] sm:$0xff] %v6706_v12  ;;  %v1389_v2 = vsub.f32 0.0, %v10641_v57  ;;  %v1390_v27 = vsub.f32 0.0, %v10642_v31  ;;  %v1416_v4 = vmul.f32 %v1384_v58, %v10631_v40  ;;  %v1445_v11 = vmul.f32 1.442695, %v1412_v19  ;;  %v10647_v9 = vld [vmem:[#allocation95_spill] sm:$0xff] }
 0x369   : > { %10624 = vst [vmem:[#allocation132_spill] sm:$0xff] %v6710_v39  ;;  %v1391_v47 = vsub.f32 0.0, %v10643_v13  ;;  %v1392_v41 = vsub.f32 0.0, %v10644_v30  ;;  %v1417_v51 = vmul.f32 %v1385_v23, %v10635_v50  ;;  %v1447_v43 = vmul.f32 1.442695, %v1413_v52  ;;  %v10648_v58 = vld [vmem:[#allocation96_spill] sm:$0xff] }
 0x36a   : > { %10626 = vst [vmem:[#allocation136_spill] sm:$0xff] %v6713_v48  ;;  %v1393_v42 = vsub.f32 0.0, %v10645_v44  ;;  %v1418_v46 = vmul.f32 %v1386_v36, %v10638_v25  ;;  %v1449_v34 = vmul.f32 1.442695, %v1414_v56  ;;  %5061 = vpow2.f32 %v1443_v0  ;;  %v10649_v23 = vld [vmem:[#allocation97_spill] sm:$0xff]  ;;  %v10650_v25 = vld [vmem:[#allocation98_spill] sm:$0xff] }
 0x36b   : > { %10629 = vst [vmem:[#allocation138_spill] sm:$0xff] %v6718_v22  ;;  %v1451_v40 = vmul.f32 1.442695, %v1415_v62  ;;  %v1396_v19 = vsub.f32 0.0, %v10648_v58  ;;  %5063 = vpow2.f32 %v1445_v11  ;;  %v1453_v50 = vmul.f32 1.442695, %v1416_v4 }
 0x36c   : > { %10630 = vst [vmem:[#allocation139_spill] sm:$0xff] %v6721_v55  ;;  %v1420_v55 = vmul.f32 %v1388_v6, %v10640_v3  ;;  %v1397_v52 = vsub.f32 0.0, %v10649_v23  ;;  %v1421_v22 = vmul.f32 %v1389_v2, %v10641_v57  ;;  %5065 = vpow2.f32 %v1447_v43  ;;  %v10652_v6 = vld [vmem:[#allocation100_spill] sm:$0xff] }
 0x36d   : > { %10633 = vst [vmem:[#allocation111_spill] sm:$0xff] %v6726_v33  ;;  %v1419_v33 = vmul.f32 %v1387_v1, %v10639_v45  ;;  %v1455_v48 = vmul.f32 1.442695, %v1417_v51  ;;  %v1398_v36 = vsub.f32 0.0, %v10650_v25  ;;  %v1422_v56 = vmul.f32 %v1390_v27, %v10642_v31  ;;  %v10651_v1 = vld [vmem:[#allocation99_spill] sm:$0xff]  ;;  %v10653_v51 = vld [vmem:[#allocation101_spill] sm:$0xff] }
 0x36e   : > { %10634 = vst [vmem:[#allocation112_spill] sm:$0xff] %v6729_v21  ;;  %v1395_v21 = vsub.f32 0.0, %v10647_v9  ;;  %5067 = vpow2.f32 %v1449_v34  ;;  %v1457_v45 = vmul.f32 1.442695, %v1418_v46  ;;  %v1399_v62 = vsub.f32 0.0, %v10651_v1  ;;  %v10654_v34 = vld [vmem:[#allocation102_spill] sm:$0xff] }
 0x36f   : > { %10636 = vst [vmem:[#allocation113_spill] sm:$0xff] %v6734_v63  ;;  %v1423_v0 = vmul.f32 %v1391_v47, %v10643_v13  ;;  %5069 = vpow2.f32 %v1451_v40  ;;  %v1459_v3 = vmul.f32 1.442695, %v1419_v33  ;;  %v1400_v4 = vsub.f32 0.0, %v10652_v6 }
 0x370   : > { %10637 = vst [vmem:[#allocation116_spill] sm:$0xff] %v6737_v16  ;;  %v10646_v16 = vld [vmem:[#allocation94_spill] sm:$0xff]  ;;  %v1424_v11 = vmul.f32 %v1392_v41, %v10644_v30  ;;  %5071 = vpow2.f32 %v1453_v50  ;;  %v1461_v57 = vmul.f32 1.442695, %v1420_v55  ;;  %v6765_v2 = vpop.eup %5061  ;;  %v1401_v43 = vsub.f32 0.0, %v10653_v51  ;;  %v10655_v30 = vld [vmem:[#allocation103_spill] sm:$0xff] }
 0x371   : > { %v1394_v63 = vsub.f32 0.0, %v10646_v16  ;;  %v1425_v31 = vmul.f32 %v1393_v42, %v10645_v44  ;;  %5073 = vpow2.f32 %v1455_v48  ;;  %v1463_v27 = vmul.f32 1.442695, %v1421_v22  ;;  %v6769_v46 = vpop.eup %5063  ;;  %v10656_v48 = vld [vmem:[#allocation104_spill] sm:$0xff] }
 0x372   : > { %v1402_v13 = vsub.f32 0.0, %v10654_v34  ;;  %5075 = vpow2.f32 %v1457_v45  ;;  %v1465_v47 = vmul.f32 1.442695, %v1422_v56  ;;  %v6773_v40 = vpop.eup %5065  ;;  %v1403_v55 = vsub.f32 0.0, %v10655_v30 }
 0x373   : > { %v1426_v33 = vmul.f32 %v1394_v63, %v10646_v16  ;;  %v1427_v41 = vmul.f32 %v1395_v21, %v10647_v9  ;;  %5077 = vpow2.f32 %v1459_v3  ;;  %v1467_v50 = vmul.f32 1.442695, %v1423_v0  ;;  %v10657_v63 = vld [vmem:[#allocation105_spill] sm:$0xff]  ;;  %v10658_v21 = vld [vmem:[#allocation106_spill] sm:$0xff] }
 0x374   : > { %v6777_v39 = vpop.eup %5067  ;;  %v1404_v22 = vsub.f32 0.0, %v10656_v48  ;;  %v1428_v44 = vmul.f32 %v1396_v19, %v10648_v58  ;;  %5079 = vpow2.f32 %v1461_v57  ;;  %v1469_v42 = vmul.f32 1.442695, %v1424_v11  ;;  %v10659_v58 = vld [vmem:[#allocation107_spill] sm:$0xff] }
 0x375   : > { %v6781_v12 = vpop.eup %5069  ;;  %v1405_v16 = vsub.f32 0.0, %v10657_v63  ;;  %v1429_v56 = vmul.f32 %v1397_v52, %v10649_v23  ;;  %5081 = vpow2.f32 %v1463_v27  ;;  %v1471_v45 = vmul.f32 1.442695, %v1425_v31  ;;  %v10660_v23 = vld [vmem:[#allocation108_spill] sm:$0xff] }
 0x376   : > { %v6785_v17 = vpop.eup %5071  ;;  %v1406_v9 = vsub.f32 0.0, %v10658_v21  ;;  %v1430_v0 = vmul.f32 %v1398_v36, %v10650_v25  ;;  %5083 = vpow2.f32 %v1465_v47  ;;  %v1473_v3 = vmul.f32 1.442695, %v1426_v33  ;;  %v10661_v25 = vld [vmem:[#allocation109_spill] sm:$0xff] }
 0x377   : > { %v6789_v35 = vpop.eup %5073  ;;  %v1407_v19 = vsub.f32 0.0, %v10659_v58  ;;  %v1431_v11 = vmul.f32 %v1399_v62, %v10651_v1  ;;  %5085 = vpow2.f32 %v1467_v50  ;;  %v1475_v57 = vmul.f32 1.442695, %v1427_v41  ;;  %v10662_v1 = vld [vmem:[#allocation110_spill] sm:$0xff] }
 0x378   : > { %v6793_v59 = vpop.eup %5075  ;;  %v1408_v52 = vsub.f32 0.0, %v10660_v23  ;;  %v1432_v31 = vmul.f32 %v1400_v4, %v10652_v6  ;;  %5087 = vpow2.f32 %v1469_v42  ;;  %v1477_v27 = vmul.f32 1.442695, %v1428_v44 }
 0x379   : > { %v6797_v37 = vpop.eup %5077  ;;  %v1409_v36 = vsub.f32 0.0, %v10661_v25  ;;  %v1433_v33 = vmul.f32 %v1401_v43, %v10653_v51  ;;  %5089 = vpow2.f32 %v1471_v45  ;;  %v1479_v47 = vmul.f32 1.442695, %v1429_v56 }
 0x37a   : > { %v5080_v26 = vpop.eup %5079  ;;  %v1410_v62 = vsub.f32 0.0, %v10662_v1  ;;  %v1434_v41 = vmul.f32 %v1402_v13, %v10654_v34  ;;  %5091 = vpow2.f32 %v1473_v3  ;;  %v1481_v50 = vmul.f32 1.442695, %v1430_v0 }
 0x37b   : > { %v5082_v5 = vpop.eup %5081  ;;  %v1435_v6 = vmul.f32 %v1403_v55, %v10655_v30  ;;  %v1436_v4 = vmul.f32 %v1404_v22, %v10656_v48  ;;  %5093 = vpow2.f32 %v1475_v57  ;;  %v1483_v44 = vmul.f32 1.442695, %v1431_v11 }
 0x37c   : > { %v5084_v42 = vpop.eup %5083  ;;  %v1437_v7 = vmul.f32 %v1405_v16, %v10657_v63  ;;  %v1438_v51 = vmul.f32 %v1406_v9, %v10658_v21  ;;  %5095 = vpow2.f32 %v1477_v27  ;;  %v1485_v43 = vmul.f32 1.442695, %v1432_v31 }
 0x37d   : > { %v5086_v56 = vpop.eup %5085  ;;  %v1439_v45 = vmul.f32 %v1407_v19, %v10659_v58  ;;  %v1440_v34 = vmul.f32 %v1408_v52, %v10660_v23  ;;  %5097 = vpow2.f32 %v1479_v47  ;;  %v1487_v13 = vmul.f32 1.442695, %v1433_v33 }
 0x37e   : > { %v5088_v0 = vpop.eup %5087  ;;  %v1441_v30 = vmul.f32 %v1409_v36, %v10661_v25  ;;  %v1442_v55 = vmul.f32 %v1410_v62, %v10662_v1  ;;  %5099 = vpow2.f32 %v1481_v50  ;;  %v1489_v48 = vmul.f32 1.442695, %v1434_v41 }
 0x37f   : > { %v5090_v22 = vpop.eup %5089  ;;  %5101 = vpow2.f32 %v1483_v44  ;;  %v1491_v63 = vmul.f32 1.442695, %v1435_v6  ;;  %v6813_v16 = vmul.f32 %v6765_v2, %v6634_v24  ;;  %v6817_v21 = vmul.f32 %v6769_v46, %v6637_v28  ;;  %v10670_v6 = vld [vmem:[#allocation118_spill] sm:$0xff]  ;;  %v10672_v44 = vld [vmem:[#allocation120_spill] sm:$0xff] }
 0x380   : > { %v5092_v9 = vpop.eup %5091  ;;  %5103 = vpow2.f32 %v1485_v43  ;;  %v1493_v3 = vmul.f32 1.442695, %v1436_v4  ;;  %v1495_v58 = vmul.f32 1.442695, %v1437_v7  ;;  %v6821_v19 = vmul.f32 %v6773_v40, %v6640_v38 }
 0x381   : > { %v5094_v11 = vpop.eup %5093  ;;  %5105 = vpow2.f32 %v1487_v13  ;;  %v1497_v57 = vmul.f32 1.442695, %v1438_v51  ;;  %v1499_v23 = vmul.f32 1.442695, %v1439_v45  ;;  %v6825_v24 = vmul.f32 %v6777_v39, %v6643_v60 }
 0x382   : > { %v5096_v2 = vpop.eup %5095  ;;  %5107 = vpow2.f32 %v1489_v48  ;;  %v1501_v28 = vmul.f32 1.442695, %v1440_v34  ;;  %v1503_v46 = vmul.f32 1.442695, %v1441_v30  ;;  %v1505_v52 = vmul.f32 1.442695, %v1442_v55 }
 0x383   : > { %v5098_v31 = vpop.eup %5097  ;;  %5109 = vpow2.f32 %v1491_v63  ;;  %v6829_v7 = vmul.f32 %v6781_v12, %v6646_v54  ;;  %v10364_v38 = vsub.f32 1.0, %v6813_v16  ;;  %v10365_v40 = vsub.f32 1.0, %v6817_v21  ;;  %v10676_v34 = vld [vmem:[#allocation114_spill] sm:$0xff] }
 0x384   : > { %v5100_v27 = vpop.eup %5099  ;;  %5111 = vpow2.f32 %v1493_v3  ;;  %v6835_v60 = vmul.f32 %v6785_v17, %v6649_v20  ;;  %v6839_v39 = vmul.f32 %v6789_v35, %v6652_v29  ;;  %v10366_v25 = vsub.f32 1.0, %v6821_v19 }
 0x385   : > { %v5102_v36 = vpop.eup %5101  ;;  %5113 = vpow2.f32 %v1495_v58  ;;  %v6844_v54 = vmul.f32 %v6793_v59, %v6655_v8  ;;  %v6848_v12 = vmul.f32 %v6797_v37, %v6658_v32  ;;  %v10367_v33 = vsub.f32 1.0, %v6825_v24  ;;  %v10684_v58 = vld [vmem:[#allocation127_spill] sm:$0xff] }
 0x386   : > { %v5104_v20 = vpop.eup %5103  ;;  %5115 = vpow2.f32 %v1497_v57  ;;  %v6852_v17 = vmul.f32 %v5080_v26, %v6661_v49  ;;  %v6855_v29 = vmul.f32 %v5082_v5, %v6664_v14  ;;  %v6858_v35 = vmul.f32 %v5084_v42, %v6667_v15  ;;  %v10705_v57 = vld [vmem:[#allocation56_spill] sm:$0xff] }
 0x387   : > { %v5106_v47 = vpop.eup %5105  ;;  %5117 = vpow2.f32 %v1499_v23  ;;  %v6861_v8 = vmul.f32 %v5086_v56, %v6670_v53  ;;  %v6864_v32 = vmul.f32 %v5088_v0, %v6673_v61  ;;  %v10368_v37 = vsub.f32 1.0, %v6829_v7  ;;  %v10674_v56 = vld [vmem:[#allocation122_spill] sm:$0xff]  ;;  %v10678_v0 = vld [vmem:[#allocation115_spill] sm:$0xff] }
 0x388   : > { %10663 = vst [vmem:[#allocation117_spill] sm:$0xff] %v6852_v17  ;;  %v5108_v59 = vpop.eup %5107  ;;  %5119 = vpow2.f32 %v1501_v28  ;;  %v6868_v49 = vmul.f32 %v5090_v22, %v6676_v10  ;;  %v10369_v14 = vsub.f32 1.0, %v6835_v60  ;;  %v10370_v15 = vsub.f32 1.0, %v6839_v39  ;;  %v10680_v22 = vld [vmem:[#allocation119_spill] sm:$0xff] }
 0x389   : > { %10664 = vst [vmem:[#allocation121_spill] sm:$0xff] %v6855_v29  ;;  %v5110_v5 = vpop.eup %5109  ;;  %5121 = vpow2.f32 %v1503_v46  ;;  %v6873_v26 = vmul.f32 %v5092_v9, %v6680_v18  ;;  %v10371_v53 = vsub.f32 1.0, %v6844_v54  ;;  %v10372_v61 = vsub.f32 1.0, %v6848_v12  ;;  %v10682_v9 = vld [vmem:[#allocation124_spill] sm:$0xff] }
 0x38a   : > { %10665 = vst [vmem:[#allocation123_spill] sm:$0xff] %v6858_v35  ;;  %v5112_v1 = vpop.eup %5111  ;;  %5123 = vpow2.f32 %v1505_v52  ;;  %v10373_v62 = vsub.f32 1.0, %v6852_v17  ;;  %v10375_v10 = vsub.f32 1.0, %v6855_v29  ;;  %v6881_v4 = vmul.f32 %v5094_v11, %v10670_v6  ;;  %v10687_v46 = vld [vmem:[#allocation136_spill] sm:$0xff]  ;;  %v10690_v6 = vld [vmem:[#allocation111_spill] sm:$0xff] }
 0x38b   : > { %10666 = vst [vmem:[#allocation79_spill] sm:$0xff] %v6861_v8  ;;  %v5114_v50 = vpop.eup %5113  ;;  %v6884_v42 = vmul.f32 %v5096_v2, %v10672_v44  ;;  %v6889_v45 = vmul.f32 %v5098_v31, %v10674_v56  ;;  %v6892_v13 = vmul.f32 %v5100_v27, %v10676_v34  ;;  %v6895_v30 = vmul.f32 %v5102_v36, %v10678_v0  ;;  %v10686_v2 = vld [vmem:[#allocation132_spill] sm:$0xff]  ;;  %v10688_v31 = vld [vmem:[#allocation138_spill] sm:$0xff]  ;;  %v10689_v36 = vld [vmem:[#allocation139_spill] sm:$0xff] }
 0x38c   : > { %10667 = vst [vmem:[#allocation125_spill] sm:$0xff] %v6864_v32  ;;  %v5116_v43 = vpop.eup %5115  ;;  %v6899_v63 = vmul.f32 %v5104_v20, %v10680_v22  ;;  %v6902_v3 = vmul.f32 %v5106_v47, %v10682_v9  ;;  %v6905_v11 = vmul.f32 %v5108_v59, %v10684_v58  ;;  %v6909_v28 = vmul.f32 %v5110_v5, %v10686_v2  ;;  %v10691_v59 = vld [vmem:[#allocation112_spill] sm:$0xff]  ;;  %v10697_v2 = vld [vmem:[#allocation45_spill] sm:$0xff]  ;;  %v10701_v9 = vld [vmem:[#allocation50_spill] sm:$0xff] }
 0x38d   : > { %10668 = vst [vmem:[#allocation126_spill] sm:$0xff] %v6868_v49  ;;  %v5118_v48 = vpop.eup %5117  ;;  %v6912_v52 = vmul.f32 %v5112_v1, %v10687_v46  ;;  %v6915_v27 = vmul.f32 %v5114_v50, %v10688_v31  ;;  %v6918_v20 = vmul.f32 %v5116_v43, %v10689_v36  ;;  %v10692_v1 = vld [vmem:[#allocation113_spill] sm:$0xff]  ;;  %v10693_v58 = vld [vmem:[#allocation116_spill] sm:$0xff]  ;;  %vm1574_vm6 = vcmp.ge.f32.partialorder %v10697_v2, 0.0  ;;  %v10698_v46 = vld [vmem:[#allocation46_spill] sm:$0xff] }
 0x38e   : > { %10669 = vst [vmem:[#allocation80_spill] sm:$0xff] %v6873_v26  ;;  %v5120_v23 = vpop.eup %5119  ;;  %v6921_v44 = vmul.f32 %v5118_v48, %v10690_v6  ;;  %vm1575_vm7 = vcmp.ge.f32.partialorder %v10698_v46, 0.0  ;;  %v6953_v36 = vsub.f32 0.0, %v10364_v38  ;;  %v6957_v6 = vsub.f32 0.0, %v10365_v40  ;;  %v10700_v31 = vld [vmem:[#allocation49_spill] sm:$0xff]  ;;  %v10702_v5 = vld [vmem:[#allocation52_spill] sm:$0xff] }
 0x38f   : > { %10671 = vst [vmem:[#allocation128_spill] sm:$0xff] %v6881_v4  ;;  %v5122_v47 = vpop.eup %5121  ;;  %v6924_v56 = vmul.f32 %v5120_v23, %v10691_v59  ;;  %v10694_v59 = vld [vmem:[#allocation41_spill] sm:$0xff]  ;;  %v10696_v23 = vld [vmem:[#allocation44_spill] sm:$0xff]  ;;  %vm1577_vm9 = vcmp.ge.f32.partialorder %v10700_v31, 0.0  ;;  %vm1578_vm10 = vcmp.ge.f32.partialorder %v10701_v9, 0.0  ;;  %v1605_v38 = vsub.f32 0.0, %v10366_v25 }
 0x390   : > { %10673 = vst [vmem:[#allocation129_spill] sm:$0xff] %v6884_v42  ;;  %v5124_v0 = vpop.eup %5123  ;;  %v6929_v22 = vmul.f32 %v5122_v47, %v10692_v1  ;;  %vm1571_vm3 = vcmp.ge.f32.partialorder %v10694_v59, 0.0  ;;  %vm1573_vm5 = vcmp.ge.f32.partialorder %v10696_v23, 0.0  ;;  %v10699_v47 = vld [vmem:[#allocation48_spill] sm:$0xff]  ;;  %v1606_v43 = vsub.f32 0.0, %v10367_v33  ;;  %v10703_v1 = vld [vmem:[#allocation53_spill] sm:$0xff] }
 0x391   : > { %10675 = vst [vmem:[#allocation81_spill] sm:$0xff] %v6889_v45  ;;  %v6935_v48 = vmul.f32 %v5124_v0, %v10693_v58  ;;  %v10695_v58 = vld [vmem:[#allocation42_spill] sm:$0xff]  ;;  %v4918_v0 = vld [vmem:[%s10132_s7 + $0x38] sm:$0xff]  ;;  %vm1576_vm8 = vcmp.ge.f32.partialorder %v10699_v47, 0.0  ;;  %v1607_v40 = vsub.f32 0.0, %v10368_v37  ;;  %vm1579_vm11 = vcmp.ge.f32.partialorder %v10702_v5, 0.0 }
 0x392   : > { %10677 = vst [vmem:[#allocation130_spill] sm:$0xff] %v6892_v13  ;;  %vm1572_vm4 = vcmp.ge.f32.partialorder %v10695_v58, 0.0  ;;  %vm1580_vm12 = vcmp.ge.f32.partialorder %v10703_v1, 0.0  ;;  %v10704_v34 = vld [vmem:[#allocation54_spill] sm:$0xff]  ;;  %vm1582_vm14 = vcmp.ge.f32.partialorder %v10705_v57, 0.0  ;;  %v1608_v55 = vsub.f32 0.0, %v10369_v14  ;;  %2408 = vmatpush.bf16.msra.mxu2 %v4918_v0 }
 0x393   : > { %10679 = vst [vmem:[#allocation131_spill] sm:$0xff] %v6895_v30  ;;  %vm1581_vm13 = vcmp.ge.f32.partialorder %v10704_v34, 0.0  ;;  %v1609_v25 = vsub.f32 0.0, %v10370_v15  ;;  %v1610_v33 = vsub.f32 0.0, %v10371_v53  ;;  %v1611_v41 = vsub.f32 0.0, %v10372_v61  ;;  %v4917_v37 = vld [vmem:[%s10132_s7 + $0x30] sm:$0xff] }
 0x394   : > { %10681 = vst [vmem:[#allocation82_spill] sm:$0xff] %v6899_v63  ;;  %v1612_v14 = vsub.f32 0.0, %v10373_v62  ;;  %v1613_v15 = vsub.f32 0.0, %v10375_v10  ;;  %v10710_v53 = vsub.f32 1.0, %v6858_v35  ;;  %v10715_v18 = vsub.f32 1.0, %v6861_v8  ;;  %v10734_v1 = vld [vmem:[#allocation74_spill] sm:$0xff] }
 0x395   : > { %10683 = vst [vmem:[#allocation133_spill] sm:$0xff] %v6902_v3  ;;  %v10716_v34 = vsub.f32 1.0, %v6864_v32  ;;  %v10717_v29 = vsub.f32 1.0, %v6868_v49  ;;  %v10718_v35 = vsub.f32 1.0, %v6873_v26  ;;  %v10730_v51 = vsub.f32 1.0, %v6895_v30  ;;  %v10735_v17 = vld [vmem:[#allocation75_spill] sm:$0xff] }
 0x396   : > { %10685 = vst [vmem:[#allocation134_spill] sm:$0xff] %v6905_v11  ;;  %v1614_v0 = vsub.f32 0.0, %v10710_v53  ;;  %v1615_v61 = vsub.f32 0.0, %v10715_v18  ;;  %v10722_v18 = vsub.f32 1.0, %v6881_v4  ;;  %2409 = vmatpush.bf16.msra.mxu2 %v4917_v37  ;;  %vm1598_vm15 = vcmp.ge.f32.partialorder %v10734_v1, 0.0  ;;  %v10736_v57 = vld [vmem:[#allocation76_spill] sm:$0xff] }
 0x397   : > { %v1616_v62 = vsub.f32 0.0, %v10716_v34  ;;  %v1617_v10 = vsub.f32 0.0, %v10717_v29  ;;  %v1618_v53 = vsub.f32 0.0, %v10718_v35  ;;  %v10723_v34 = vsub.f32 1.0, %v6884_v42  ;;  %v10737_v50 = vld [vmem:[#allocation77_spill] sm:$0xff]  ;;  %v10761_v9 = vld [vmem:[#allocation123_spill] sm:$0xff] }
 0x398   : > { %v1619_v32 = vsub.f32 0.0, %v10722_v18  ;;  %v10724_v29 = vsub.f32 1.0, %v6889_v45  ;;  %v10725_v35 = vsub.f32 1.0, %v6892_v13  ;;  %v1623_v18 = vsub.f32 0.0, %v10730_v51  ;;  %v10755_v23 = vld [vmem:[#allocation117_spill] sm:$0xff] }
 0x399   : > { %v1620_v49 = vsub.f32 0.0, %v10723_v34  ;;  %v10731_v42 = vsub.f32 1.0, %v6899_v63  ;;  %v10732_v45 = vsub.f32 1.0, %v6902_v3  ;;  %v10733_v13 = vsub.f32 1.0, %v6905_v11  ;;  %v10758_v46 = vld [vmem:[#allocation121_spill] sm:$0xff] }
 0x39a   : > { %v1621_v26 = vsub.f32 0.0, %v10724_v29  ;;  %v1622_v8 = vsub.f32 0.0, %v10725_v35  ;;  %vm1599_vm1 = vcmp.ge.f32.partialorder %v10735_v17, 0.0  ;;  %vm1600_vm2 = vcmp.ge.f32.partialorder %v10736_v57, 0.0 }
 0x39b   : > { %v1624_v34 = vsub.f32 0.0, %v10731_v42  ;;  %v1625_v29 = vsub.f32 0.0, %v10732_v45  ;;  %v1626_v35 = vsub.f32 0.0, %v10733_v13  ;;  %vm1601_vm0 = vcmp.ge.f32.partialorder %v10737_v50, 0.0 }
 0x39c   : > { %v10738_v51 = vsub.f32 1.0, %v6909_v28  ;;  %v10739_v42 = vsub.f32 1.0, %v6912_v52  ;;  %v10740_v45 = vsub.f32 1.0, %v6915_v27  ;;  %v10741_v13 = vsub.f32 1.0, %v6918_v20 }
 0x39d   : > { %v10742_v1 = vsub.f32 1.0, %v6921_v44  ;;  %v10743_v17 = vsub.f32 1.0, %v6924_v56  ;;  %v10744_v50 = vsub.f32 1.0, %v6929_v22  ;;  %v10748_v59 = vsub.f32 1.0, %v6825_v24 }
 0x39e   : > { %v1627_v30 = vsub.f32 0.0, %v10738_v51  ;;  %v1628_v63 = vsub.f32 0.0, %v10739_v42  ;;  %v1629_v3 = vsub.f32 0.0, %v10740_v45  ;;  %v1630_v37 = vsub.f32 0.0, %v10741_v13  ;;  %v4910_v45 = vld [vmem:[%s10130_s5 + $0x38] sm:$0xff] }
 0x39f   : > { %v1631_v11 = vsub.f32 0.0, %v10742_v1  ;;  %v1632_v57 = vsub.f32 0.0, %v10743_v17  ;;  %v1633_v4 = vsub.f32 0.0, %v10744_v50  ;;  %v10745_v51 = vsub.f32 1.0, %v6813_v16  ;;  %v4916_v1 = vld [vmem:[%s10132_s7 + $0x28] sm:$0xff]  ;;  %2251 = vmatpush.bf16.msra.mxu1 %v4910_v45 }
 0x3a0   : > { %v10746_v17 = vsub.f32 1.0, %v6817_v21  ;;  %v10747_v16 = vsub.f32 1.0, %v6821_v19  ;;  %v7081_v13 = vsel %vm1574_vm6, %v10748_v59, %v1606_v43  ;;  %v10751_v19 = vsub.f32 1.0, %v6835_v60  ;;  %2410 = vmatpush.bf16.msra.mxu2 %v4916_v1  ;;  %v10766_v1 = vld [vmem:[#allocation57_spill] sm:$0xff]  ;;  %v10770_v59 = vld [vmem:[#allocation58_spill] sm:$0xff] }
 0x3a1   : > { %v7056_v42 = vsel %vm1571_vm3, %v10745_v51, %v6953_v36  ;;  %v10749_v51 = vsub.f32 1.0, %v6829_v7  ;;  %v10752_v24 = vsub.f32 1.0, %v6839_v39  ;;  %v10753_v7 = vsub.f32 1.0, %v6844_v54 }
 0x3a2   : > { %v7069_v50 = vsel %vm1572_vm4, %v10746_v17, %v6957_v6  ;;  %v7075_v36 = vsel %vm1573_vm5, %v10747_v16, %v1605_v38  ;;  %v10750_v6 = vsub.f32 1.0, %v6935_v48  ;;  %v7095_v38 = vsel %vm1576_vm8, %v10751_v19, %v1608_v55  ;;  %v10774_v19 = vld [vmem:[#allocation60_spill] sm:$0xff] }
 0x3a3   : > { %v7087_v21 = vsel %vm1575_vm7, %v10749_v51, %v1607_v40  ;;  %v7101_v43 = vsel %vm1577_vm9, %v10752_v24, %v1609_v25  ;;  %v7107_v40 = vsel %vm1578_vm10, %v10753_v7, %v1610_v33  ;;  %v10754_v60 = vsub.f32 1.0, %v6848_v12 }
 0x3a4   : > { %v1634_v58 = vsub.f32 0.0, %v10750_v6  ;;  %v10756_v39 = vsub.f32 1.0, %v10755_v23  ;;  %v10759_v54 = vsub.f32 1.0, %v10758_v46  ;;  %v10762_v47 = vsub.f32 1.0, %v10761_v9  ;;  %v10782_v46 = vld [vmem:[#allocation62_spill] sm:$0xff]  ;;  %v10786_v9 = vld [vmem:[#allocation64_spill] sm:$0xff] }
 0x3a5   : > { %v7113_v55 = vsel %vm1579_vm11, %v10754_v60, %v1611_v41  ;;  %v10764_v41 = vld [vmem:[#allocation79_spill] sm:$0xff]  ;;  %vm10767_vm3 = vcmp.ge.f32.partialorder %v10766_v1, 0.0  ;;  %vm10771_vm4 = vcmp.ge.f32.partialorder %v10770_v59, 0.0  ;;  %vm10775_vm5 = vcmp.ge.f32.partialorder %v10774_v19, 0.0  ;;  %v10778_v60 = vld [vmem:[#allocation61_spill] sm:$0xff]  ;;  %v10792_v1 = vld [vmem:[#allocation130_spill] sm:$0xff] }
 0x3a6   : > { %v7119_v25 = vsel %vm1580_vm12, %v10756_v39, %v1612_v14  ;;  %v7125_v33 = vsel %vm1581_vm13, %v10759_v54, %v1613_v15  ;;  %v7131_v12 = vsel %vm1582_vm14, %v10762_v47, %v1614_v0  ;;  %v10765_v5 = vsub.f32 1.0, %v10764_v41  ;;  %v10768_v14 = vld [vmem:[#allocation125_spill] sm:$0xff]  ;;  %v10772_v15 = vld [vmem:[#allocation126_spill] sm:$0xff]  ;;  %v10776_v0 = vld [vmem:[#allocation80_spill] sm:$0xff] }
 0x3a7   : > { %v10769_v16 = vsub.f32 1.0, %v10768_v14  ;;  %v10773_v6 = vsub.f32 1.0, %v10772_v15  ;;  %v10777_v7 = vsub.f32 1.0, %v10776_v0  ;;  %vm10779_vm6 = vcmp.ge.f32.partialorder %v10778_v60, 0.0  ;;  %v10780_v39 = vld [vmem:[#allocation128_spill] sm:$0xff]  ;;  %v10784_v54 = vld [vmem:[#allocation129_spill] sm:$0xff] }
 0x3a8   : > { %v7137_v17 = vsel %vm10767_vm3, %v10765_v5, %v1615_v61  ;;  %v4909_v61 = vld [vmem:[%s10130_s5 + $0x30] sm:$0xff]  ;;  %v10781_v2 = vsub.f32 1.0, %v10780_v39  ;;  %vm10783_vm7 = vcmp.ge.f32.partialorder %v10782_v46, 0.0  ;;  %v10785_v31 = vsub.f32 1.0, %v10784_v54  ;;  %v10788_v47 = vld [vmem:[#allocation81_spill] sm:$0xff]  ;;  %v10801_v0 = vld [vmem:[#allocation82_spill] sm:$0xff] }
 0x3a9   : > { %v7143_v51 = vsel %vm10771_vm4, %v10769_v16, %v1616_v62  ;;  %v7149_v24 = vsel %vm10775_vm5, %v10773_v6, %v1617_v10  ;;  %v7155_v23 = vsel %vm10779_vm6, %v10777_v7, %v1618_v53  ;;  %v4915_v62 = vld [vmem:[%s10132_s7 + $0x20] sm:$0xff]  ;;  %vm10787_vm8 = vcmp.ge.f32.partialorder %v10786_v9, 0.0  ;;  %v10794_v16 = vld [vmem:[#allocation66_spill] sm:$0xff]  ;;  %v10797_v15 = vld [vmem:[#allocation131_spill] sm:$0xff]  ;;  %2252 = vmatpush.bf16.msra.mxu1 %v4909_v61 }
 0x3aa   : > { %v7167_v10 = vsel %vm10783_vm7, %v10781_v2, %v1619_v32  ;;  %v7173_v53 = vsel %vm10787_vm8, %v10785_v31, %v1620_v49  ;;  %v10789_v45 = vsub.f32 1.0, %v10788_v47  ;;  %v10790_v41 = vld [vmem:[#allocation65_spill] sm:$0xff]  ;;  %v10793_v14 = vsub.f32 1.0, %v10792_v1  ;;  %v10796_v32 = vld [vmem:[#allocation78_spill] sm:$0xff]  ;;  %v10799_v19 = vld [vmem:[#allocation67_spill] sm:$0xff]  ;;  %2411 = vmatpush.bf16.msra.mxu2 %v4915_v62 }
 0x3ab   : > { %vm10791_vm9 = vcmp.ge.f32.partialorder %v10790_v41, 0.0  ;;  %vm10795_vm10 = vcmp.ge.f32.partialorder %v10794_v16, 0.0  ;;  %vm1602_vm11 = vcmp.ge.f32.partialorder %v10796_v32, 0.0  ;;  %v10798_v6 = vsub.f32 1.0, %v10797_v15  ;;  %v10803_v60 = vld [vmem:[#allocation68_spill] sm:$0xff]  ;;  %v10805_v39 = vld [vmem:[#allocation133_spill] sm:$0xff] }
 0x3ac   : > { %v7179_v5 = vsel %vm10791_vm9, %v10789_v45, %v1621_v26  ;;  %v7185_v59 = vsel %vm10795_vm10, %v10793_v14, %v1622_v8  ;;  %vm10800_vm12 = vcmp.ge.f32.partialorder %v10799_v19, 0.0  ;;  %v10802_v7 = vsub.f32 1.0, %v10801_v0  ;;  %v10807_v46 = vld [vmem:[#allocation69_spill] sm:$0xff]  ;;  %v10809_v54 = vld [vmem:[#allocation134_spill] sm:$0xff]  ;;  %v10814_v45 = vld [vmem:[#allocation71_spill] sm:$0xff] }
 0x3ad   : > { %v7192_v49 = vsel %vm10800_vm12, %v10798_v6, %v1623_v18  ;;  %vm10804_vm13 = vcmp.ge.f32.partialorder %v10803_v60, 0.0  ;;  %v10806_v2 = vsub.f32 1.0, %v10805_v39  ;;  %vm10808_vm14 = vcmp.ge.f32.partialorder %v10807_v46, 0.0  ;;  %v10811_v9 = vld [vmem:[#allocation70_spill] sm:$0xff]  ;;  %v10817_v1 = vld [vmem:[#allocation72_spill] sm:$0xff]  ;;  %v10820_v62 = vld [vmem:[#allocation73_spill] sm:$0xff] }
 0x3ae   : > { %v7198_v26 = vsel %vm10804_vm13, %v10802_v7, %v1624_v34  ;;  %v10810_v31 = vsub.f32 1.0, %v10809_v54  ;;  %vm10812_vm3 = vcmp.ge.f32.partialorder %v10811_v9, 0.0  ;;  %v10813_v47 = vsub.f32 1.0, %v6909_v28  ;;  %v10834_v0 = vld [vmem:[#allocation16_spill] sm:$0xff]  ;;  %v10836_v39 = vld [vmem:[#allocation18_spill] sm:$0xff]  ;;  %v10837_v46 = vld [vmem:[#allocation19_spill] sm:$0xff] }
 0x3af   : > { %v7204_v8 = vsel %vm10808_vm14, %v10806_v2, %v1625_v29  ;;  %vm10815_vm4 = vcmp.ge.f32.partialorder %v10814_v45, 0.0  ;;  %v10816_v41 = vsub.f32 1.0, %v6912_v52  ;;  %vm10818_vm5 = vcmp.ge.f32.partialorder %v10817_v1, 0.0  ;;  %v10842_v1 = vld [vmem:[#allocation24_spill] sm:$0xff]  ;;  %v10844_v16 = vld [vmem:[#allocation26_spill] sm:$0xff]  ;;  %v10845_v15 = vld [vmem:[#allocation27_spill] sm:$0xff] }
 0x3b0   : > { %v7210_v18 = vsel %vm10812_vm3, %v10810_v31, %v1626_v35  ;;  %v7216_v34 = vsel %vm10815_vm4, %v10813_v47, %v1627_v30  ;;  %v10819_v61 = vsub.f32 1.0, %v6915_v27  ;;  %vm10821_vm6 = vcmp.ge.f32.partialorder %v10820_v62, 0.0  ;;  %v10838_v31 = vld [vmem:[#allocation20_spill] sm:$0xff]  ;;  %v10839_v47 = vld [vmem:[#allocation21_spill] sm:$0xff] }
 0x3b1   : > { %v7222_v29 = vsel %vm10818_vm5, %v10816_v41, %v1628_v63  ;;  %v10822_v35 = vsub.f32 1.0, %v6918_v20  ;;  %v10824_v30 = vsub.f32 1.0, %v6921_v44  ;;  %v10826_v63 = vsub.f32 1.0, %v6924_v56  ;;  %v4908_v44 = vld [vmem:[%s10130_s5 + $0x28] sm:$0xff]  ;;  %v10843_v62 = vld [vmem:[#allocation25_spill] sm:$0xff]  ;;  %v10846_v6 = vld [vmem:[#allocation28_spill] sm:$0xff] }
 0x3b2   : > { %v7228_v14 = vsel %vm10821_vm6, %v10819_v61, %v1629_v3  ;;  %v10828_v3 = vsub.f32 1.0, %v6929_v22  ;;  %v10831_v56 = vsub.f32 1.0, %v6935_v48  ;;  %v1668_v7 = vmul.f32 0.5, %v10834_v0  ;;  %2253 = vmatpush.bf16.msra.mxu1 %v4908_v44  ;;  %v10840_v48 = vld [vmem:[#allocation22_spill] sm:$0xff]  ;;  %v10847_v19 = vld [vmem:[#allocation29_spill] sm:$0xff] }
 0x3b3   : > { %v7234_v28 = vsel %vm1598_vm15, %v10822_v35, %v1630_v37  ;;  %v7240_v52 = vsel %vm1599_vm1, %v10824_v30, %v1631_v11  ;;  %v7246_v27 = vsel %vm1600_vm2, %v10826_v63, %v1632_v57  ;;  %v4914_v11 = vld [vmem:[%s10132_s7 + $0x18] sm:$0xff]  ;;  %v10833_v37 = vld [vmem:[#allocation15_spill] sm:$0xff]  ;;  %v1670_v2 = vmul.f32 0.5, %v10836_v39 }
 0x3b4   : > { %v7252_v20 = vsel %vm1601_vm0, %v10828_v3, %v1633_v4  ;;  %v7264_v57 = vsel %vm1602_vm11, %v10831_v56, %v1634_v58  ;;  %v1667_v22 = vmul.f32 0.5, %v10833_v37  ;;  %v10835_v4 = vld [vmem:[#allocation17_spill] sm:$0xff]  ;;  %v1671_v54 = vmul.f32 0.5, %v10837_v46  ;;  %2412 = vmatpush.bf16.msra.mxu2 %v4914_v11  ;;  %v10841_v58 = vld [vmem:[#allocation23_spill] sm:$0xff]  ;;  %v10848_v37 = vld [vmem:[#allocation30_spill] sm:$0xff] }
 0x3b5   : > { %10830 = vst [vmem:[#allocation83_spill] sm:$0xff] %v7252_v20  ;;  %v1669_v60 = vmul.f32 0.5, %v10835_v4  ;;  %v1672_v9 = vmul.f32 0.5, %v10838_v31  ;;  %v1673_v45 = vmul.f32 0.5, %v10839_v47  ;;  %v1674_v32 = vmul.f32 0.5, %v10840_v48  ;;  %v4907_v11 = vld [vmem:[%s10130_s5 + $0x20] sm:$0xff] }
 0x3b6   : > { %10832 = vst [vmem:[#allocation135_spill] sm:$0xff] %v7264_v57  ;;  %v1675_v41 = vmul.f32 0.5, %v10841_v58  ;;  %v7276_v61 = vmul.f32 0.5, %v10842_v1  ;;  %v7279_v35 = vmul.f32 0.5, %v10843_v62  ;;  %v7282_v30 = vmul.f32 0.5, %v10844_v16  ;;  %v4913_v56 = vld [vmem:[%s10132_s7 + $0x10] sm:$0xff]  ;;  %2254 = vmatpush.bf16.msra.mxu1 %v4907_v11 }
 0x3b7   : > { %v7285_v63 = vmul.f32 0.5, %v10845_v15  ;;  %v7288_v3 = vmul.f32 0.5, %v10846_v6  ;;  %v7291_v44 = vmul.f32 0.5, %v10847_v19  ;;  %v7300_v0 = vmul.f32 0.5, %v10848_v37  ;;  %v10849_v4 = vld [vmem:[#allocation31_spill] sm:$0xff]  ;;  %v10850_v46 = vld [vmem:[#allocation32_spill] sm:$0xff] }
 0x3b8   : > { %v7303_v39 = vmul.f32 0.5, %v10849_v4  ;;  %v7306_v31 = vmul.f32 0.5, %v10850_v46  ;;  %v1699_v47 = vadd.f32 1.0, %v7056_v42  ;;  %v10851_v48 = vld [vmem:[#allocation33_spill] sm:$0xff]  ;;  %v1700_v1 = vadd.f32 1.0, %v7069_v50  ;;  %2413 = vmatpush.bf16.msra.mxu2 %v4913_v56  ;;  %v10852_v15 = vld [vmem:[#allocation34_spill] sm:$0xff] }
 0x3b9   : > { %v7310_v58 = vmul.f32 0.5, %v10851_v48  ;;  %v1701_v62 = vadd.f32 1.0, %v7075_v36  ;;  %v1702_v16 = vadd.f32 1.0, %v7081_v13  ;;  %v7316_v6 = vmul.f32 0.5, %v10852_v15  ;;  %v10853_v19 = vld [vmem:[#allocation35_spill] sm:$0xff]  ;;  %v10854_v4 = vld [vmem:[#allocation36_spill] sm:$0xff] }
 0x3ba   : > { %v7319_v37 = vmul.f32 0.5, %v10853_v19  ;;  %v7322_v46 = vmul.f32 0.5, %v10854_v4  ;;  %v1703_v42 = vadd.f32 1.0, %v7087_v21  ;;  %v10856_v48 = vld [vmem:[#allocation37_spill] sm:$0xff]  ;;  %v10858_v50 = vld [vmem:[#allocation38_spill] sm:$0xff]  ;;  %v10860_v13 = vld [vmem:[#allocation39_spill] sm:$0xff] }
 0x3bb   : > { %v7326_v57 = vmul.f32 0.5, %v10856_v48  ;;  %v7329_v36 = vmul.f32 0.5, %v10858_v50  ;;  %v7332_v11 = vmul.f32 0.5, %v10860_v13  ;;  %v1704_v56 = vadd.f32 1.0, %v7095_v38  ;;  %v4906_v15 = vld [vmem:[%s10130_s5 + $0x18] sm:$0xff]  ;;  %v10864_v20 = vld [vmem:[#allocation43_spill] sm:$0xff] }
 0x3bc   : > { %10855 = vst [vmem:[#allocation84_spill] sm:$0xff] %v7322_v46  ;;  %v10862_v19 = vld [vmem:[#allocation40_spill] sm:$0xff]  ;;  %v7342_v21 = vmul.f32 0.5, %v10864_v20  ;;  %v1705_v48 = vadd.f32 1.0, %v7101_v43  ;;  %v1706_v50 = vadd.f32 1.0, %v7107_v40  ;;  %v7348_v13 = vmul.f32 %v1700_v1, %v1668_v7  ;;  %2255 = vmatpush.bf16.msra.mxu1 %v4906_v15  ;;  %v10867_v40 = vld [vmem:[#allocation55_spill] sm:$0xff] }
 0x3bd   : > { %10857 = vst [vmem:[#allocation137_spill] sm:$0xff] %v7326_v57  ;;  %v7339_v4 = vmul.f32 0.5, %v10862_v19  ;;  %v7345_v57 = vmul.f32 %v1699_v47, %v1667_v22  ;;  %v7352_v38 = vmul.f32 %v1702_v16, %v1670_v2  ;;  %v10866_v19 = vld [vmem:[#allocation51_spill] sm:$0xff]  ;;  %v1707_v20 = vadd.f32 1.0, %v7113_v55 }
 0x3be   : > { %10859 = vst [vmem:[#allocation85_spill] sm:$0xff] %v7329_v36  ;;  %v10865_v36 = vld [vmem:[#allocation47_spill] sm:$0xff]  ;;  %v7361_v43 = vmul.f32 %v1703_v42, %v1671_v54  ;;  %v7365_v22 = vmul.f32 0.5, %v10867_v40  ;;  %v1708_v2 = vadd.f32 1.0, %v7119_v25  ;;  %v7371_v47 = vmul.f32 %v1704_v56, %v1672_v9  ;;  %v4912_v25 = vld [vmem:[%s10132_s7 + $0x8] sm:$0xff] }
 0x3bf   : > { %10861 = vst [vmem:[#allocation86_spill] sm:$0xff] %v7332_v11  ;;  %v7350_v11 = vmul.f32 %v1701_v62, %v1669_v60  ;;  %v7355_v46 = vmul.f32 0.5, %v10865_v36  ;;  %v10868_v7 = vld [vmem:[#allocation59_spill] sm:$0xff]  ;;  %v1709_v55 = vadd.f32 1.0, %v7125_v33  ;;  %v1710_v54 = vadd.f32 1.0, %v7131_v12  ;;  %2414 = vmatpush.bf16.msra.mxu2 %v4912_v25 }
 0x3c0   : > { %10863 = vst [vmem:[#allocation87_spill] sm:$0xff] %v7339_v4  ;;  %v7358_v4 = vmul.f32 0.5, %v10866_v19  ;;  %v7368_v60 = vmul.f32 0.5, %v10868_v7  ;;  %v10869_v1 = vld [vmem:[#allocation63_spill] sm:$0xff]  ;;  %v7379_v16 = vmul.f32 %v1705_v48, %v1673_v45  ;;  %v1711_v9 = vadd.f32 1.0, %v7137_v17 }
 0x3c1   : > { %1818 = vst [vmem:[#allocation2 + $0x19] sm:$0xff] %v7345_v57  ;;  %v7375_v62 = vmul.f32 0.5, %v10869_v1  ;;  %v4905_v42 = vld [vmem:[%s10130_s5 + $0x10] sm:$0xff]  ;;  %v1712_v36 = vadd.f32 1.0, %v7143_v51  ;;  %v1713_v33 = vadd.f32 1.0, %v7149_v24  ;;  %v7391_v56 = vmul.f32 %v1706_v50, %v1674_v32 }
 0x3c2   : > { %1819 = vst [vmem:[#allocation2 + $0x21] sm:$0xff] %v7348_v13  ;;  %v1714_v12 = vadd.f32 1.0, %v7155_v23  ;;  %v1715_v45 = vadd.f32 1.0, %v7167_v10  ;;  %v1716_v15 = vadd.f32 1.0, %v7173_v53  ;;  %v7397_v48 = vmul.f32 %v1707_v20, %v1675_v41  ;;  %2256 = vmatpush.bf16.msra.mxu1 %v4905_v42  ;;  %v2051_v7 = vld [vmem:[#allocation2 + $0x9] sm:$0xff] }
 0x3c3   : > { %1820 = vst [vmem:[#allocation2 + $0x31] sm:$0xff] %v7350_v11  ;;  %v1717_v17 = vadd.f32 1.0, %v7179_v5  ;;  %v1718_v51 = vadd.f32 1.0, %v7185_v59  ;;  %v1719_v24 = vadd.f32 1.0, %v7192_v49  ;;  %v7404_v32 = vmul.f32 %v1708_v2, %v7276_v61  ;;  %v4904_v5 = vld [vmem:[%s10130_s5 + $0x8] sm:$0xff]  ;;  %v4911_v59 = vld [vmem:[%s10132_s7] sm:$0xff] }
 0x3c4   : > { %1821 = vst [vmem:[#allocation2 + $0x39] sm:$0xff] %v7352_v38  ;;  %v1720_v23 = vadd.f32 1.0, %v7198_v26  ;;  %v1721_v10 = vadd.f32 1.0, %v7204_v8  ;;  %v7410_v53 = vmul.f32 %v1709_v55, %v7279_v35  ;;  %v1850_v49 = vlaneseq  ;;  %2415 = vmatpush.bf16.msra.mxu2 %v4911_v59 }
 0x3c5   : > { %1822 = vst [vmem:[#allocation2 + $0x49] sm:$0xff] %v7361_v43  ;;  %v1722_v26 = vadd.f32 1.0, %v7210_v18  ;;  %v1723_v8 = vadd.f32 1.0, %v7216_v34  ;;  %v7422_v41 = vadd.f32 1.0, %v7222_v29  ;;  %v7425_v61 = vmul.f32 %v1710_v54, %v7282_v30  ;;  %v4903_v18 = vld [vmem:[%s10130_s5] sm:$0xff] }
 0x3c6   : > { %1823 = vst [vmem:[#allocation2 + $0x51] sm:$0xff] %v7371_v47  ;;  %v7429_v35 = vadd.f32 1.0, %v7228_v14  ;;  %v7432_v50 = vadd.f32 1.0, %v7234_v28  ;;  %v7435_v19 = vmul.f32 %v1711_v9, %v7285_v63  ;;  %v7441_v34 = vand.u32 127, %v1850_v49  ;;  %v2050_v29 = vld [vmem:[#allocation2 + $0x1] sm:$0xff]  ;;  %2257 = vmatpush.bf16.msra.mxu1 %v4904_v5 }
 0x3c7   : > { %1824 = vst [vmem:[#allocation2 + $0x61] sm:$0xff] %v7379_v16  ;;  %v7444_v30 = vadd.f32 1.0, %v7240_v52  ;;  %v7447_v14 = vmul.f32 %v1712_v36, %v7288_v3  ;;  %v7450_v28 = vmul.f32 %v1713_v33, %v7291_v44  ;;  %v7453_v63 = vmul.f32 %v1714_v12, %v7300_v0  ;;  %v10874_v59 = vld [vmem:[#allocation85_spill] sm:$0xff] }
 0x3c8   : > { %1825 = vst [vmem:[#allocation2 + $0x69] sm:$0xff] %v7391_v56  ;;  %v7457_v2 = vmul.f32 %v1715_v45, %v7303_v39  ;;  %vm1949_vm15 = vcmp.ge.s32.totalorder %v7441_v34, 43  ;;  %vm1950_vm0 = vcmp.lt.s32.totalorder %v7441_v34, 86  ;;  %v2018_v52 = vld [vmem:[#allocation2 + $0x18] sm:$0xff]  ;;  %vm2082_vm1 = vcmp.ge.s32.totalorder %v7441_v34, 86 }
 0x3c9   : > { %1826 = vst [vmem:[#allocation2 + $0x79] sm:$0xff] %v7397_v48  ;;  %v1852_v20 = vld [vmem:[#allocation2 + $0x1a] sm:$0xff]  ;;  %v1853_v40 = vld [vmem:[#allocation2 + $0x22] sm:$0xff]  ;;  %v7464_v44 = vmul.f32 %v1716_v15, %v7306_v31  ;;  %v7467_v0 = vmul.f32 %v1717_v17, %v7310_v58  ;;  %v7470_v39 = vmul.f32 %v1718_v51, %v7316_v6  ;;  %v7473_v1 = vmul.f32 %v1719_v24, %v7319_v37  ;;  %vm7476_vm2 = vmand %vm1949_vm15, %vm1950_vm0 }
 0x3ca   : > { %1827 = vst [vmem:[#allocation2 + $0x81] sm:$0xff] %v7404_v32  ;;  %v2019_v3 = vld [vmem:[#allocation2 + $0x20] sm:$0xff]  ;;  %v1954_v31 = vsel %vm7476_vm2, %v7345_v57, %v1852_v20  ;;  %v1955_v58 = vsel %vm7476_vm2, %v7348_v13, %v1853_v40  ;;  %v1986_v6 = vsel %vm7476_vm2, %v7345_v57, %v7350_v11  ;;  %v1987_v37 = vsel %vm7476_vm2, %v7348_v13, %v7352_v38  ;;  %v10872_v45 = vld [vmem:[#allocation84_spill] sm:$0xff]  ;;  %v10875_v40 = vld [vmem:[#allocation83_spill] sm:$0xff] }
 0x3cb   : > { %1828 = vst [vmem:[#allocation2 + $0x91] sm:$0xff] %v7410_v53  ;;  %v1854_v54 = vld [vmem:[#allocation2 + $0x32] sm:$0xff]  ;;  %v1855_v42 = vld [vmem:[#allocation2 + $0x3a] sm:$0xff]  ;;  %v2087_v25 = vsel %vm2082_vm1, %v2018_v52, %v1954_v31  ;;  %v2088_v9 = vsel %vm2082_vm1, %v2019_v3, %v1955_v58  ;;  %v2119_v36 = vsel %vm2082_vm1, %v2050_v29, %v1986_v6  ;;  %v2120_v33 = vsel %vm2082_vm1, %v2051_v7, %v1987_v37  ;;  %v10876_v7 = vld [vmem:[#allocation86_spill] sm:$0xff] }
 0x3cc   : > { %1829 = vst [vmem:[#allocation2 + $0x99] sm:$0xff] %v7425_v61  ;;  %v1728_v12 = vadd.f32 1.0, %v7246_v27  ;;  %v7506_v15 = vmul.f32 %v1720_v23, %v10872_v45  ;;  %2258 = vmatpush.bf16.msra.mxu1 %v4903_v18  ;;  %v2151_v17 = vpack.c.bf16 %v2088_v9, %v2087_v25  ;;  %v2167_v51 = vpack.c.bf16 %v2120_v33, %v2119_v36  ;;  %v10873_v24 = vld [vmem:[#allocation137_spill] sm:$0xff]  ;;  %v2020_v23 = vld [vmem:[#allocation2 + $0x30] sm:$0xff]  ;;  %v2021_v20 = vld [vmem:[#allocation2 + $0x38] sm:$0xff] }
 0x3cd   : > { %1830 = vst [vmem:[#allocation2 + $0xa9] sm:$0xff] %v7435_v19  ;;  %v1753_v5 = vmul.f32 %v1721_v10, %v10873_v24  ;;  %v1754_v49 = vmul.f32 %v1722_v26, %v10874_v59  ;;  %v1956_v29 = vsel %vm7476_vm2, %v7350_v11, %v1854_v54  ;;  %v1957_v27 = vsel %vm7476_vm2, %v7352_v38, %v1855_v42  ;;  %v1856_v3 = vld [vmem:[#allocation2 + $0x4a] sm:$0xff]  ;;  %v1857_v31 = vld [vmem:[#allocation2 + $0x52] sm:$0xff] }
 0x3ce   : > { %1831 = vst [vmem:[#allocation2 + $0xb1] sm:$0xff] %v7447_v14  ;;  %v1729_v18 = vadd.f32 1.0, %v10875_v40  ;;  %v1755_v52 = vmul.f32 %v1723_v8, %v10876_v7  ;;  %2416 = vmatmul.bf16.vlgmr.msra.gmra.mxu2 %v2167_v51  ;;  %v1988_v10 = vsel %vm7476_vm2, %v7350_v11, %v7361_v43  ;;  %v1989_v26 = vsel %vm7476_vm2, %v7352_v38, %v7371_v47  ;;  %v10877_v58 = vld [vmem:[#allocation135_spill] sm:$0xff]  ;;  %v2022_v45 = vld [vmem:[#allocation2 + $0x48] sm:$0xff] }
 0x3cf   : > { %1832 = vst [vmem:[#allocation2 + $0xc1] sm:$0xff] %v7450_v28  ;;  %v1730_v6 = vadd.f32 1.0, %v10877_v58  ;;  %v10878_v37 = vld [vmem:[#allocation87_spill] sm:$0xff]  ;;  %v1757_v54 = vmul.f32 %v7429_v35, %v7342_v21  ;;  %v7536_v42 = vmul.f32 %v7432_v50, %v7355_v46  ;;  %2259 = vmatmul.bf16.vlgmr.msra.gmra.mxu1 %v2151_v17  ;;  %v7542_v25 = vsel %vm2082_vm1, %v2020_v23, %v1956_v29 }
 0x3d0   : > { %1833 = vst [vmem:[#allocation2 + $0xc9] sm:$0xff] %v7453_v63  ;;  %v1756_v8 = vmul.f32 %v7422_v41, %v10878_v37  ;;  %v7546_v9 = vsel %vm2082_vm1, %v2021_v20, %v1957_v27  ;;  %v1990_v21 = vsel %vm7476_vm2, %v7361_v43, %v7379_v16  ;;  %v1991_v46 = vsel %vm7476_vm2, %v7371_v47, %v7391_v56  ;;  %v2023_v17 = vld [vmem:[#allocation2 + $0x50] sm:$0xff]  ;;  %v2026_v29 = vld [vmem:[#allocation2 + $0x78] sm:$0xff] }
 0x3d1   : > { %1834 = vst [vmem:[#allocation2 + $0xd9] sm:$0xff] %v7457_v2  ;;  %v1860_v41 = vld [vmem:[#allocation2 + $0x7a] sm:$0xff]  ;;  %v7560_v35 = vsel %vm2082_vm1, %v7345_v57, %v1988_v10  ;;  %v7565_v50 = vsel %vm2082_vm1, %v7348_v13, %v1989_v26  ;;  %v1958_v36 = vsel %vm7476_vm2, %v7361_v43, %v1856_v3  ;;  %v1959_v33 = vsel %vm7476_vm2, %v7371_v47, %v1857_v31  ;;  %v1861_v51 = vld [vmem:[#allocation2 + $0x82] sm:$0xff] }
 0x3d2   : > { %1835 = vst [vmem:[#allocation2 + $0xe1] sm:$0xff] %v7464_v44  ;;  %v1759_v57 = vmul.f32 %v7444_v30, %v7358_v4  ;;  %v1760_v24 = vmul.f32 %v1728_v12, %v7365_v22  ;;  %v7580_v13 = vsel %vm2082_vm1, %v7350_v11, %v1990_v21  ;;  %v7585_v59 = vsel %vm2082_vm1, %v7352_v38, %v1991_v46  ;;  %v2027_v27 = vld [vmem:[#allocation2 + $0x80] sm:$0xff]  ;;  %v2028_v40 = vld [vmem:[#allocation2 + $0x90] sm:$0xff] }
 0x3d3   : > { %1836 = vst [vmem:[#allocation2 + $0xf1] sm:$0xff] %v7467_v0  ;;  %v1761_v23 = vmul.f32 %v1729_v18, %v7368_v60  ;;  %v7589_v4 = vmul.f32 %v1730_v6, %v7375_v62  ;;  %v2152_v22 = vpack.c.bf16 %v7546_v9, %v7542_v25  ;;  %v1962_v11 = vsel %vm7476_vm2, %v7397_v48, %v1860_v41  ;;  %v1862_v30 = vld [vmem:[#allocation2 + $0x92] sm:$0xff]  ;;  %v1863_v20 = vld [vmem:[#allocation2 + $0x9a] sm:$0xff] }
 0x3d4   : > { %1837 = vst [vmem:[#allocation2 + $0xf9] sm:$0xff] %v7470_v39  ;;  %v2168_v38 = vpack.c.bf16 %v7565_v50, %v7560_v35  ;;  %v7601_v60 = vsel %vm2082_vm1, %v2022_v45, %v1958_v36  ;;  %v7605_v62 = vsel %vm2082_vm1, %v2023_v17, %v1959_v33  ;;  %v1963_v12 = vsel %vm7476_vm2, %v7404_v32, %v1861_v51  ;;  %v2029_v26 = vld [vmem:[#allocation2 + $0x98] sm:$0xff]  ;;  %v2030_v36 = vld [vmem:[#allocation2 + $0xa8] sm:$0xff] }
 0x3d5   : > { %1838 = vst [vmem:[#allocation2 + $0x109] sm:$0xff] %v7473_v1  ;;  %v7614_v18 = vsel %vm2082_vm1, %v2026_v29, %v1962_v11  ;;  %v7618_v7 = vsel %vm2082_vm1, %v2027_v27, %v1963_v12  ;;  %v1994_v10 = vsel %vm7476_vm2, %v7397_v48, %v7410_v53  ;;  %v1995_v3 = vsel %vm7476_vm2, %v7404_v32, %v7425_v61  ;;  %v1864_v6 = vld [vmem:[#allocation2 + $0xaa] sm:$0xff]  ;;  %v1865_v37 = vld [vmem:[#allocation2 + $0xb2] sm:$0xff] }
 0x3d6   : > { %1839 = vst [vmem:[#allocation2 + $0x111] sm:$0xff] %v7506_v15  ;;  %v7633_v31 = vsel %vm2082_vm1, %v7379_v16, %v1994_v10  ;;  %v1964_v58 = vsel %vm7476_vm2, %v7410_v53, %v1862_v30  ;;  %v1965_v21 = vsel %vm7476_vm2, %v7425_v61, %v1863_v20  ;;  %v1996_v41 = vsel %vm7476_vm2, %v7410_v53, %v7435_v19  ;;  %v2032_v20 = vld [vmem:[#allocation2 + $0xc0] sm:$0xff] }
 0x3d7   : > { %1840 = vst [vmem:[#allocation2 + $0x121] sm:$0xff] %v1753_v5  ;;  %v7648_v46 = vsel %vm2082_vm1, %v2028_v40, %v1964_v58  ;;  %v7658_v45 = vsel %vm2082_vm1, %v2029_v26, %v1965_v21  ;;  %v1997_v17 = vsel %vm7476_vm2, %v7425_v61, %v7447_v14  ;;  %v7667_v51 = vsel %vm2082_vm1, %v7397_v48, %v1996_v41  ;;  %v1866_v29 = vld [vmem:[#allocation2 + $0xc2] sm:$0xff]  ;;  %v1867_v12 = vld [vmem:[#allocation2 + $0xca] sm:$0xff] }
 0x3d8   : > { %1841 = vst [vmem:[#allocation2 + $0x129] sm:$0xff] %v1754_v49  ;;  %v7675_v27 = vsel %vm2082_vm1, %v7404_v32, %v1997_v17  ;;  %v1966_v11 = vsel %vm7476_vm2, %v7435_v19, %v1864_v6  ;;  %v1967_v30 = vsel %vm7476_vm2, %v7447_v14, %v1865_v37  ;;  %v1998_v26 = vsel %vm7476_vm2, %v7435_v19, %v7450_v28  ;;  %v2034_v17 = vld [vmem:[#allocation2 + $0xd8] sm:$0xff] }
 0x3d9   : > { %1842 = vst [vmem:[#allocation2 + $0x139] sm:$0xff] %v1755_v52  ;;  %v7641_v52 = vsel %vm2082_vm1, %v7391_v56, %v1995_v3  ;;  %v7687_v40 = vsel %vm2082_vm1, %v2030_v36, %v1966_v11  ;;  %v2033_v3 = vld [vmem:[#allocation2 + $0xc8] sm:$0xff]  ;;  %v1999_v58 = vsel %vm7476_vm2, %v7447_v14, %v7453_v63  ;;  %v7706_v6 = vsel %vm2082_vm1, %v7410_v53, %v1998_v26  ;;  %v1868_v21 = vld [vmem:[#allocation2 + $0xda] sm:$0xff] }
 0x3da   : > { %1843 = vst [vmem:[#allocation2 + $0x141] sm:$0xff] %v1756_v8  ;;  %v2031_v8 = vld [vmem:[#allocation2 + $0xb0] sm:$0xff]  ;;  %v1968_v37 = vsel %vm7476_vm2, %v7450_v28, %v1866_v29  ;;  %v1869_v41 = vld [vmem:[#allocation2 + $0xe2] sm:$0xff]  ;;  %v1969_v36 = vsel %vm7476_vm2, %v7453_v63, %v1867_v12  ;;  %v2001_v11 = vsel %vm7476_vm2, %v7453_v63, %v7464_v44  ;;  %v1970_v26 = vsel %vm7476_vm2, %v7457_v2, %v1868_v21 }
 0x3db   : > { %1844 = vst [vmem:[#allocation2 + $0x151] sm:$0xff] %v1757_v54  ;;  %v7691_v10 = vsel %vm2082_vm1, %v2031_v8, %v1967_v30  ;;  %v7721_v53 = vsel %vm2082_vm1, %v2032_v20, %v1968_v37  ;;  %v2000_v8 = vsel %vm7476_vm2, %v7450_v28, %v7457_v2  ;;  %v7732_v29 = vsel %vm2082_vm1, %v2033_v3, %v1969_v36  ;;  %v1870_v12 = vld [vmem:[#allocation2 + $0xf2] sm:$0xff]  ;;  %v1871_v3 = vld [vmem:[#allocation2 + $0xfa] sm:$0xff] }
 0x3dc   : > { %1845 = vst [vmem:[#allocation2 + $0x159] sm:$0xff] %v7536_v42  ;;  %v7741_v30 = vsel %vm2082_vm1, %v7435_v19, %v2000_v8  ;;  %v7751_v20 = vsel %vm2082_vm1, %v7447_v14, %v2001_v11  ;;  %v1971_v19 = vsel %vm7476_vm2, %v7464_v44, %v1869_v41  ;;  %v7766_v14 = vsel %vm2082_vm1, %v2034_v17, %v1970_v26  ;;  %v2037_v37 = vld [vmem:[#allocation2 + $0xf8] sm:$0xff]  ;;  %v1937_v21 = vld [vmem:[#allocation2 + $0x109] sm:$0xff] }
 0x3dd   : > { %1846 = vst [vmem:[#allocation2 + $0x169] sm:$0xff] %v1759_v57  ;;  %v2003_v9 = vsel %vm7476_vm2, %v7464_v44, %v7470_v39  ;;  %v1972_v41 = vsel %vm7476_vm2, %v7467_v0, %v1870_v12  ;;  %v1872_v36 = vld [vmem:[#allocation2 + $0x10a] sm:$0xff]  ;;  %v1873_v8 = vld [vmem:[#allocation2 + $0x112] sm:$0xff]  ;;  %v1973_v26 = vsel %vm7476_vm2, %v7470_v39, %v1871_v3  ;;  %v2004_v12 = vsel %vm7476_vm2, %v7467_v0, %v7473_v1 }
 0x3de   : > { %1847 = vst [vmem:[#allocation2 + $0x171] sm:$0xff] %v1760_v24  ;;  %v7714_v24 = vsel %vm2082_vm1, %v7425_v61, %v1999_v58  ;;  %2421 = vmatmul.bf16.gmra.mxu2 %v2168_v38  ;;  %v2036_v58 = vld [vmem:[#allocation2 + $0xf0] sm:$0xff]  ;;  %v2002_v38 = vsel %vm7476_vm2, %v7457_v2, %v7467_v0  ;;  %v7793_v11 = vsel %vm2082_vm1, %v7453_v63, %v2003_v9  ;;  %v1905_v25 = vld [vmem:[#allocation2 + $0x121] sm:$0xff]  ;;  %v2071_v1 = vld [vmem:[#allocation2 + $0xf9] sm:$0xff] }
 0x3df   : > { %1848 = vst [vmem:[#allocation2 + $0x181] sm:$0xff] %v1761_v23  ;;  %v2035_v23 = vld [vmem:[#allocation2 + $0xe0] sm:$0xff]  ;;  %2264 = vmatmul.bf16.gmra.mxu1 %v2152_v22  ;;  %v7785_v22 = vsel %vm2082_vm1, %v7450_v28, %v2002_v38  ;;  %v1938_v17 = vld [vmem:[#allocation2 + $0x111] sm:$0xff]  ;;  %v7800_v28 = vsel %vm2082_vm1, %v2036_v58, %v1972_v41  ;;  %v7810_v9 = vsel %vm2082_vm1, %v2037_v37, %v1973_v26  ;;  %v1906_v0 = vld [vmem:[#allocation2 + $0x129] sm:$0xff] }
 0x3e0   : > { %1849 = vst [vmem:[#allocation2 + $0x189] sm:$0xff] %v7589_v4  ;;  %v7770_v50 = vsel %vm2082_vm1, %v2035_v23, %v1971_v19  ;;  %v2070_v23 = vld [vmem:[#allocation2 + $0xf1] sm:$0xff]  ;;  %v2038_v19 = vld [vmem:[#allocation2 + $0x108] sm:$0xff]  ;;  %v2005_v3 = vsel %vm7476_vm2, %v7470_v39, %v7506_v15  ;;  %v7819_v58 = vsel %vm2082_vm1, %v7457_v2, %v2004_v12  ;;  %v1974_v26 = vsel %vm7476_vm2, %v1937_v21, %v1872_v36  ;;  %v2040_v2 = vld [vmem:[#allocation2 + $0x120] sm:$0xff] }
 0x3e1   : > { %v2039_v38 = vld [vmem:[#allocation2 + $0x110] sm:$0xff]  ;;  %v1874_v41 = vld [vmem:[#allocation2 + $0x122] sm:$0xff]  ;;  %v7826_v37 = vsel %vm2082_vm1, %v7464_v44, %v2005_v3  ;;  %v1975_v39 = vsel %vm7476_vm2, %v1938_v17, %v1873_v8  ;;  %v1907_v12 = vld [vmem:[#allocation2 + $0x139] sm:$0xff]  ;;  %v7836_v63 = vsel %vm2082_vm1, %v2038_v19, %v1974_v26  ;;  %v2006_v36 = vsel %vm7476_vm2, %v1937_v21, %v1905_v25 }
 0x3e2   : > { %v1875_v15 = vld [vmem:[#allocation2 + $0x12a] sm:$0xff]  ;;  %v7840_v44 = vsel %vm2082_vm1, %v2039_v38, %v1975_v39  ;;  %v1908_v35 = vld [vmem:[#allocation2 + $0x141] sm:$0xff]  ;;  %v2007_v57 = vsel %vm7476_vm2, %v1938_v17, %v1906_v0  ;;  %v7850_v4 = vsel %vm2082_vm1, %v2070_v23, %v2006_v36  ;;  %v1976_v19 = vsel %vm7476_vm2, %v1905_v25, %v1874_v41  ;;  %v2042_v36 = vld [vmem:[#allocation2 + $0x138] sm:$0xff] }
 0x3e3   : > { %v2041_v3 = vld [vmem:[#allocation2 + $0x128] sm:$0xff]  ;;  %v1876_v38 = vld [vmem:[#allocation2 + $0x13a] sm:$0xff]  ;;  %v7856_v39 = vsel %vm2082_vm1, %v2071_v1, %v2007_v57  ;;  %v1977_v61 = vsel %vm7476_vm2, %v1906_v0, %v1875_v15  ;;  %v7862_v8 = vsel %vm2082_vm1, %v2040_v2, %v1976_v19  ;;  %v2008_v23 = vsel %vm7476_vm2, %v1905_v25, %v1907_v12  ;;  %v7866_v42 = vld [vmem:[#allocation2 + $0x151] sm:$0xff] }
 0x3e4   : > { %v1877_v26 = vld [vmem:[#allocation2 + $0x142] sm:$0xff]  ;;  %v7872_v57 = vsel %vm2082_vm1, %v2041_v3, %v1977_v61  ;;  %v2009_v1 = vsel %vm7476_vm2, %v1906_v0, %v1908_v35  ;;  %v7878_v15 = vsel %vm2082_vm1, %v1937_v21, %v2008_v23  ;;  %v1910_v2 = vld [vmem:[#allocation2 + $0x159] sm:$0xff]  ;;  %v1978_v41 = vsel %vm7476_vm2, %v1907_v12, %v1876_v38  ;;  %v2044_v19 = vld [vmem:[#allocation2 + $0x150] sm:$0xff] }
 0x3e5   : > { %v2043_v54 = vld [vmem:[#allocation2 + $0x140] sm:$0xff]  ;;  %v7884_v49 = vsel %vm2082_vm1, %v1938_v17, %v2009_v1  ;;  %v1979_v61 = vsel %vm7476_vm2, %v1908_v35, %v1877_v26  ;;  %v7894_v21 = vsel %vm2082_vm1, %v2042_v36, %v1978_v41  ;;  %v2010_v17 = vsel %vm7476_vm2, %v1907_v12, %v7866_v42  ;;  %v1878_v1 = vld [vmem:[#allocation2 + $0x152] sm:$0xff] }
 0x3e6   : > { %10879 = vst [vmem:[#allocation88_spill] sm:$0xff] %v7894_v21  ;;  %v7898_v23 = vsel %vm2082_vm1, %v2043_v54, %v1979_v61  ;;  %v1879_v38 = vld [vmem:[#allocation2 + $0x15a] sm:$0xff]  ;;  %v2011_v3 = vsel %vm7476_vm2, %v1908_v35, %v1910_v2  ;;  %v7909_v36 = vsel %vm2082_vm1, %v1905_v25, %v2010_v17  ;;  %v1980_v54 = vsel %vm7476_vm2, %v7866_v42, %v1878_v1  ;;  %v1911_v61 = vld [vmem:[#allocation2 + $0x169] sm:$0xff]  ;;  %v1912_v33 = vld [vmem:[#allocation2 + $0x171] sm:$0xff] }
 0x3e7   : > { %v2045_v41 = vld [vmem:[#allocation2 + $0x158] sm:$0xff]  ;;  %v7916_v5 = vsel %vm2082_vm1, %v1906_v0, %v2011_v3  ;;  %v1981_v26 = vsel %vm7476_vm2, %v1910_v2, %v1879_v38  ;;  %v7922_v21 = vsel %vm2082_vm1, %v2044_v19, %v1980_v54  ;;  %v2012_v25 = vsel %vm7476_vm2, %v7866_v42, %v1911_v61  ;;  %v2046_v38 = vld [vmem:[#allocation2 + $0x168] sm:$0xff]  ;;  %v2048_v17 = vld [vmem:[#allocation2 + $0x180] sm:$0xff] }
 0x3e8   : > { %v7931_v1 = vsel %vm2082_vm1, %v2045_v41, %v1981_v26  ;;  %v2013_v0 = vsel %vm7476_vm2, %v1910_v2, %v1912_v33  ;;  %v7937_v3 = vsel %vm2082_vm1, %v1907_v12, %v2012_v25  ;;  %v2153_v19 = vpack.c.bf16 %v7605_v62, %v7601_v60  ;;  %v1858_v12 = vld [vmem:[#allocation2 + $0x62] sm:$0xff]  ;;  %v1859_v25 = vld [vmem:[#allocation2 + $0x6a] sm:$0xff] }
 0x3e9   : > { %v7945_v54 = vsel %vm2082_vm1, %v1908_v35, %v2013_v0  ;;  %v10880_v26 = vpack.c.bf16 %v7585_v59, %v7580_v13  ;;  %v1960_v60 = vsel %vm7476_vm2, %v7379_v16, %v1858_v12  ;;  %v2024_v62 = vld [vmem:[#allocation2 + $0x60] sm:$0xff]  ;;  %v1992_v35 = vsel %vm7476_vm2, %v7379_v16, %v7397_v48  ;;  %v2025_v59 = vld [vmem:[#allocation2 + $0x68] sm:$0xff]  ;;  %v1881_v12 = vld [vmem:[#allocation2 + $0x172] sm:$0xff] }
 0x3ea   : > { %v1993_v13 = vsel %vm7476_vm2, %v7391_v56, %v7404_v32  ;;  %v1961_v0 = vsel %vm7476_vm2, %v7391_v56, %v1859_v25  ;;  %v2125_v16 = vsel %vm2082_vm1, %v7361_v43, %v1992_v35  ;;  %v1983_v56 = vsel %vm7476_vm2, %v1912_v33, %v1881_v12  ;;  %v2047_v25 = vld [vmem:[#allocation2 + $0x170] sm:$0xff]  ;;  %v1913_v41 = vld [vmem:[#allocation2 + $0x181] sm:$0xff] }
 0x3eb   : > { %v2126_v48 = vsel %vm2082_vm1, %v7371_v47, %v1993_v13  ;;  %v7984_v43 = vsel %vm2082_vm1, %v2047_v25, %v1983_v56  ;;  %v2014_v47 = vsel %vm7476_vm2, %v1911_v61, %v1913_v41  ;;  %v2094_v13 = vsel %vm2082_vm1, %v2025_v59, %v1961_v0  ;;  %v1882_v59 = vld [vmem:[#allocation2 + $0x182] sm:$0xff]  ;;  %v1883_v0 = vld [vmem:[#allocation2 + $0x18a] sm:$0xff] }
 0x3ec   : > { %v2170_v56 = vpack.c.bf16 %v2126_v48, %v2125_v16  ;;  %v10886_v55 = vpack.c.bf16 %v7618_v7, %v7614_v18  ;;  %v10888_v34 = vpack.c.bf16 %v7658_v45, %v7648_v46  ;;  %v10891_v18 = vpack.c.bf16 %v7751_v20, %v7741_v30 }
 0x3ed   : > { %v10892_v7 = vpack.c.bf16 %v7732_v29, %v7721_v53 }
 0x3ee   : > { %2426 = vmatmul.bf16.gmra.mxu2 %v10880_v26  ;;  %v1880_v26 = vld [vmem:[#allocation2 + $0x16a] sm:$0xff] }
 0x3ef   : > { %2269 = vmatmul.bf16.gmra.mxu1 %v2153_v19  ;;  %v2093_v19 = vsel %vm2082_vm1, %v2024_v62, %v1960_v60  ;;  %v1982_v32 = vsel %vm7476_vm2, %v1911_v61, %v1880_v26  ;;  %v1914_v60 = vld [vmem:[#allocation2 + $0x189] sm:$0xff]  ;;  %v1984_v26 = vsel %vm7476_vm2, %v1913_v41, %v1882_v59 }
 0x3f0   : > { %v7980_v62 = vsel %vm2082_vm1, %v2046_v38, %v1982_v32  ;;  %v2015_v35 = vsel %vm7476_vm2, %v1912_v33, %v1914_v60  ;;  %v7997_v38 = vsel %vm2082_vm1, %v7866_v42, %v2014_v47  ;;  %v2154_v25 = vpack.c.bf16 %v2094_v13, %v2093_v19  ;;  %v2049_v47 = vld [vmem:[#allocation2 + $0x188] sm:$0xff] }
 0x3f1   : > { %10881 = vst [vmem:[#allocation89_spill] sm:$0xff] %v7980_v62  ;;  %v8001_v12 = vsel %vm2082_vm1, %v1910_v2, %v2015_v35  ;;  %v1985_v42 = vsel %vm7476_vm2, %v1914_v60, %v1883_v0  ;;  %v1915_v62 = vld [vmem:[#allocation2 + $0x199] sm:$0xff]  ;;  %v1916_v2 = vld [vmem:[#allocation2 + $0x1a1] sm:$0xff]  ;;  %v8011_v35 = vsel %vm2082_vm1, %v2048_v17, %v1984_v26 }
 0x3f2   : > { %10882 = vst [vmem:[#allocation90_spill] sm:$0xff] %v8011_v35  ;;  %v8015_v19 = vsel %vm2082_vm1, %v2049_v47, %v1985_v42  ;;  %v2016_v16 = vsel %vm7476_vm2, %v1913_v41, %v1915_v62  ;;  %v2017_v48 = vsel %vm7476_vm2, %v1914_v60, %v1916_v2  ;;  %v10885_v41 = vpack.c.bf16 %v7641_v52, %v7633_v31  ;;  %v8060_v52 = vld [vmem:[%s10131_s6] ss:$0 sm:$0xff] }
 0x3f3   : > { %10883 = vst [vmem:[#allocation91_spill] sm:$0xff] %v8015_v19  ;;  %v8029_v17 = vsel %vm2082_vm1, %v1912_v33, %v2017_v48  ;;  %v10887_v60 = vpack.c.bf16 %v7675_v27, %v7667_v51  ;;  %v10889_v33 = vpack.c.bf16 %v7714_v24, %v7706_v6  ;;  %v10890_v31 = vpack.c.bf16 %v7691_v10, %v7687_v40  ;;  %v8069_v27 = vld [vmem:[%s10133_s8] ss:$0 sm:$0xff] }
 0x3f4   : > { %v10893_v51 = vpack.c.bf16 %v7793_v11, %v7785_v22  ;;  %v10894_v10 = vpack.c.bf16 %v7770_v50, %v7766_v14 }
 0x3fe   : > { %2431 = vmatmul.bf16.gmra.mxu2 %v2170_v56  ;;  %v8025_v56 = vsel %vm2082_vm1, %v1911_v61, %v2016_v16 }
 0x3ff   : > { %2274 = vmatmul.bf16.gmra.mxu1 %v2154_v25  ;;  %10884 = vst [vmem:[#allocation92_spill] sm:$0xff] %v8025_v56 }
 0x40e   : > { %2436 = vmatmul.bf16.gmra.mxu2 %v10885_v41 }
 0x40f   : > { %2279 = vmatmul.bf16.gmra.mxu1 %v10886_v55 }
 0x41e   : > { %2441 = vmatmul.bf16.gmra.mxu2 %v10887_v60 }
 0x41f   : > { %2284 = vmatmul.bf16.gmra.mxu1 %v10888_v34 }
 0x42e   : > { %2446 = vmatmul.bf16.gmra.mxu2 %v10889_v33 }
 0x42f   : > { %2289 = vmatmul.bf16.gmra.mxu1 %v10890_v31  ;;  %v10895_v31 = vpack.c.bf16 %v7826_v37, %v7819_v58 }
 0x43e   : > { %2451 = vmatmul.bf16.gmra.mxu2 %v10891_v18 }
 0x43f   : > { %2294 = vmatmul.bf16.gmra.mxu1 %v10892_v7 }
 0x44c   : > { %v2260_v46 = vpop.f32.mrf.mxu1 }
 0x44d   : > { %v2261_v45 = vadd.f32 %v8060_v52, %v2260_v46  ;;  %v10896_v46 = vpack.c.bf16 %v7810_v9, %v7800_v28 }
 0x44e   : > { %2456 = vmatmul.bf16.gmra.mxu2 %v10893_v51 }
 0x44f   : > { %v8071_v40 = vmul.f32 0.70710677, %v2261_v45  ;;  %2299 = vmatmul.bf16.gmra.mxu1 %v10894_v10 }
 0x451   : > { %v2529_v6 = vand.u32 2147483647, %v8071_v40  ;;  %v2417_v24 = vpop.f32.mrf.mxu2  ;;  %vm3137_vm7 = vcmp.ge.f32.partialorder %v8071_v40, 0.0 }
 0x452   : > { %v2418_v53 = vadd.f32 %v8069_v27, %v2417_v24  ;;  %v8104_v24 = vmul.f32 0.5, %v2261_v45 }
 0x453   : > { %v2561_v29 = vmul.f32 0.3275911, %v2529_v6  ;;  %v2945_v59 = vsub.f32 0.0, %v2529_v6 }
 0x454   : > { %v8078_v30 = vmul.f32 0.70710677, %v2418_v53  ;;  %v2262_v20 = vpop.f32.mrf.mxu1 }
 0x455   : > { %v2593_v22 = vadd.f32 1.0, %v2561_v29  ;;  %v2263_v11 = vadd.f32 %v8060_v52, %v2262_v20  ;;  %v2977_v34 = vmul.f32 %v2945_v59, %v2529_v6  ;;  %v8114_v59 = vmul.f32 0.5, %v2418_v53 }
 0x456   : > { %v3361_v61 = vand.u32 2147483647, %v8078_v30  ;;  %vm3969_vm8 = vcmp.ge.f32.partialorder %v8078_v30, 0.0 }
 0x457   : > { %5125 = vrcp.f32 %v2593_v22  ;;  %v8082_v62 = vmul.f32 0.70710677, %v2263_v11  ;;  %v3009_v37 = vmul.f32 1.442695, %v2977_v34 }
 0x458   : > { %v3393_v25 = vmul.f32 0.3275911, %v3361_v61  ;;  %v3777_v18 = vsub.f32 0.0, %v3361_v61 }
 0x459   : > { %v2530_v14 = vand.u32 2147483647, %v8082_v62  ;;  %v2419_v50 = vpop.f32.mrf.mxu2  ;;  %vm3138_vm9 = vcmp.ge.f32.partialorder %v8082_v62, 0.0 }
 0x45a   : > { %v3425_v0 = vadd.f32 1.0, %v3393_v25  ;;  %v2420_v42 = vadd.f32 %v8069_v27, %v2419_v50  ;;  %v3809_v9 = vmul.f32 %v3777_v18, %v3361_v61 }
 0x45b   : > { %v2562_v47 = vmul.f32 0.3275911, %v2530_v14  ;;  %v2946_v6 = vsub.f32 0.0, %v2530_v14 }
 0x45c   : > { %5127 = vrcp.f32 %v3425_v0  ;;  %v8086_v2 = vmul.f32 0.70710677, %v2420_v42  ;;  %v2265_v16 = vpop.f32.mrf.mxu1  ;;  %v3841_v18 = vmul.f32 1.442695, %v3809_v9 }
 0x45d   : > { %v8088_v48 = vpop.eup %5125  ;;  %v2594_v41 = vadd.f32 1.0, %v2562_v47  ;;  %v8091_v55 = vadd.f32 %v8060_v52, %v2265_v16  ;;  %v8116_v47 = vmul.f32 0.5, %v2263_v11  ;;  %v2978_v34 = vmul.f32 %v2946_v6, %v2530_v14 }
 0x45e   : > { %v2657_v60 = vmul.f32 1.0614054, %v8088_v48  ;;  %v3362_v33 = vand.u32 2147483647, %v8086_v2  ;;  %2461 = vmatmul.bf16.gmra.mxu2 %v10895_v31  ;;  %vm3970_vm10 = vcmp.ge.f32.partialorder %v8086_v2, 0.0 }
 0x45f   : > { %5129 = vrcp.f32 %v2594_v41  ;;  %v8099_v7 = vmul.f32 0.70710677, %v8091_v55  ;;  %2304 = vmatmul.bf16.gmra.mxu1 %v10896_v46 }
 0x460   : > { %v2689_v51 = vadd.f32 -1.4531521, %v2657_v60  ;;  %v3394_v10 = vmul.f32 0.3275911, %v3362_v33  ;;  %v3778_v31 = vsub.f32 0.0, %v3362_v33 }
 0x461   : > { %v2531_v29 = vand.u32 2147483647, %v8099_v7  ;;  %v2422_v20 = vpop.f32.mrf.mxu2  ;;  %vm3139_vm11 = vcmp.ge.f32.partialorder %v8099_v7, 0.0 }
 0x462   : > { %v8107_v22 = vpop.eup %5127  ;;  %v2721_v58 = vmul.f32 %v8088_v48, %v2689_v51  ;;  %v3426_v25 = vadd.f32 1.0, %v3394_v10  ;;  %v8111_v50 = vadd.f32 %v8069_v27, %v2422_v20 }
 0x463   : > { %v3489_v28 = vmul.f32 1.0614054, %v8107_v22  ;;  %v2563_v45 = vmul.f32 0.3275911, %v2531_v29  ;;  %v2947_v20 = vsub.f32 0.0, %v2531_v29 }
 0x464   : > { %v2753_v0 = vadd.f32 1.4214138, %v2721_v58  ;;  %5131 = vrcp.f32 %v3426_v25  ;;  %v8119_v16 = vmul.f32 0.70710677, %v8111_v50  ;;  %v2267_v51 = vpop.f32.mrf.mxu1  ;;  %v4067_v7 = vmul.f32 0.5, %v8111_v50 }
 0x465   : > { %v8121_v41 = vpop.eup %5129  ;;  %v3521_v60 = vadd.f32 -1.4531521, %v3489_v28  ;;  %v2595_v46 = vadd.f32 1.0, %v2563_v45  ;;  %5133 = vpow2.f32 %v3009_v37  ;;  %v8131_v6 = vadd.f32 %v8060_v52, %v2267_v51 }
 0x466   : > { %v2785_v10 = vmul.f32 %v8088_v48, %v2753_v0  ;;  %v2658_v53 = vmul.f32 1.0614054, %v8121_v41  ;;  %v8126_v61 = vand.u32 2147483647, %v8119_v16  ;;  %v3011_v45 = vmul.f32 1.442695, %v2978_v34 }
 0x467   : > { %v3553_v11 = vmul.f32 %v8107_v22, %v3521_v60  ;;  %5135 = vrcp.f32 %v2595_v46  ;;  %v3810_v37 = vmul.f32 %v3778_v31, %v3362_v33  ;;  %v8133_v0 = vmul.f32 0.5, %v2420_v42 }
 0x468   : > { %v2817_v58 = vadd.f32 -0.28449672, %v2785_v10  ;;  %v2690_v25 = vadd.f32 -1.4531521, %v2658_v53  ;;  %v3395_v14 = vmul.f32 0.3275911, %v8126_v61  ;;  %5137 = vpow2.f32 %v3841_v18 }
 0x469   : > { %v3585_v28 = vadd.f32 1.4214138, %v3553_v11  ;;  %v8140_v46 = vmul.f32 0.70710677, %v8131_v6  ;;  %v2979_v53 = vmul.f32 %v2947_v20, %v2531_v29  ;;  %v2424_v20 = vpop.f32.mrf.mxu2  ;;  %vm3971_vm12 = vcmp.ge.f32.partialorder %v8119_v16, 0.0 }
 0x46a   : > { %v8135_v13 = vpop.eup %5131  ;;  %v2849_v26 = vmul.f32 %v8088_v48, %v2817_v58  ;;  %v2722_v9 = vmul.f32 %v8121_v41, %v2690_v25  ;;  %v3427_v60 = vadd.f32 1.0, %v3395_v14  ;;  %v3843_v14 = vmul.f32 1.442695, %v3810_v37 }
 0x46b   : > { %v3617_v10 = vmul.f32 %v8107_v22, %v3585_v28  ;;  %v3490_v51 = vmul.f32 1.0614054, %v8135_v13  ;;  %v5134_v34 = vpop.eup %5133  ;;  %v8145_v31 = vand.u32 2147483647, %v8140_v46  ;;  %v3779_v37 = vsub.f32 0.0, %v8126_v61 }
 0x46c   : > { %v2881_v33 = vadd.f32 0.2548296, %v2849_v26  ;;  %v2754_v42 = vadd.f32 1.4214138, %v2722_v9  ;;  %5139 = vrcp.f32 %v3427_v60  ;;  %v10897_v9 = vpack.c.bf16 %v7856_v39, %v7850_v4 }
 0x46d   : > { %v8147_v11 = vpop.eup %5135  ;;  %v3649_v58 = vadd.f32 -0.28449672, %v3617_v10  ;;  %5141 = vpow2.f32 %v3011_v45  ;;  %v3522_v25 = vadd.f32 -1.4531521, %v3490_v51  ;;  %v2564_v26 = vmul.f32 0.3275911, %v8145_v31 }
 0x46e   : > { %v2913_v18 = vmul.f32 %v8088_v48, %v2881_v33  ;;  %v2786_v28 = vmul.f32 %v8121_v41, %v2754_v42  ;;  %v2659_v29 = vmul.f32 1.0614054, %v8147_v11  ;;  %2466 = vmatmul.bf16.gmra.mxu2 %v10897_v9  ;;  %v3013_v45 = vmul.f32 1.442695, %v2979_v53  ;;  %v5138_v35 = vpop.eup %5137 }
 0x46f   : > { %v3681_v60 = vmul.f32 %v8107_v22, %v3649_v58  ;;  %v3554_v10 = vmul.f32 %v8135_v13, %v3522_v25  ;;  %v10898_v48 = vpack.c.bf16 %v7840_v44, %v7836_v63  ;;  %v2596_v32 = vadd.f32 1.0, %v2564_v26 }
 0x470   : > { %v3073_v51 = vmul.f32 %v5134_v34, %v2913_v18  ;;  %v2818_v33 = vadd.f32 -0.28449672, %v2786_v28  ;;  %v2691_v42 = vadd.f32 -1.4531521, %v2659_v29  ;;  %5143 = vpow2.f32 %v3843_v14 }
 0x471   : > { %2309 = vmatmul.bf16.gmra.mxu1 %v10898_v48  ;;  %v3713_v19 = vadd.f32 0.2548296, %v3681_v60  ;;  %v3586_v56 = vadd.f32 1.4214138, %v3554_v10  ;;  %v8164_v4 = vadd.f32 %v8069_v27, %v2424_v20  ;;  %5145 = vrcp.f32 %v2596_v32 }
 0x472   : > { %v8166_v39 = vpop.eup %5139  ;;  %v3105_v53 = vsub.f32 1.0, %v3073_v51  ;;  %v2850_v58 = vmul.f32 %v8121_v41, %v2818_v33  ;;  %v2723_v63 = vmul.f32 %v8147_v11, %v2691_v42  ;;  %5147 = vpow2.f32 %v3013_v45 }
 0x473   : > { %v5142_v44 = vpop.eup %5141  ;;  %v3745_v34 = vmul.f32 %v8107_v22, %v3713_v19  ;;  %v3618_v25 = vmul.f32 %v8135_v13, %v3586_v56  ;;  %v3491_v14 = vmul.f32 1.0614054, %v8166_v39  ;;  %v3811_v26 = vmul.f32 %v3779_v37, %v8126_v61 }
 0x474   : > { %v3169_v18 = vsub.f32 0.0, %v3105_v53  ;;  %v2882_v28 = vadd.f32 0.2548296, %v2850_v58  ;;  %v2755_v29 = vadd.f32 1.4214138, %v2723_v63  ;;  %v2948_v32 = vsub.f32 0.0, %v8145_v31 }
 0x475   : > { %v3905_v20 = vmul.f32 %v5138_v35, %v3745_v34  ;;  %v3650_v9 = vadd.f32 -0.28449672, %v3618_v25  ;;  %v3523_v60 = vadd.f32 -1.4531521, %v3491_v14  ;;  %v8182_v10 = vmul.f32 0.70710677, %v8164_v4 }
 0x476   : > { %v3201_v19 = vsel %vm3137_vm7, %v3105_v53, %v3169_v18  ;;  %v2914_v56 = vmul.f32 %v8121_v41, %v2882_v28  ;;  %v2787_v22 = vmul.f32 %v8147_v11, %v2755_v29  ;;  %v5144_v45 = vpop.eup %5143  ;;  %v3845_v40 = vmul.f32 1.442695, %v3811_v26 }
 0x477   : > { %v3265_v48 = vadd.f32 1.0, %v3201_v19  ;;  %v3937_v61 = vsub.f32 1.0, %v3905_v20  ;;  %v3682_v35 = vmul.f32 %v8135_v13, %v3650_v9  ;;  %v3555_v37 = vmul.f32 %v8166_v39, %v3523_v60  ;;  %v8186_v51 = vpop.eup %5145 }
 0x478   : > { %v3074_v33 = vmul.f32 %v5142_v44, %v2914_v56  ;;  %v2819_v42 = vadd.f32 -0.28449672, %v2787_v22  ;;  %v3364_v53 = vand.u32 2147483647, %v8182_v10  ;;  %v5148_v41 = vpop.eup %5147  ;;  %v2980_v25 = vmul.f32 %v2948_v32, %v8145_v31 }
 0x479   : > { %v4001_v58 = vsub.f32 0.0, %v3937_v61  ;;  %v3714_v63 = vadd.f32 0.2548296, %v3682_v35  ;;  %v3587_v34 = vadd.f32 1.4214138, %v3555_v37  ;;  %v3297_v20 = vmul.f32 %v3265_v48, %v8104_v24 }
 0x47a   : > { %v3106_v14 = vsub.f32 1.0, %v3074_v33  ;;  %v2851_v18 = vmul.f32 %v8147_v11, %v2819_v42  ;;  %v2660_v28 = vmul.f32 1.0614054, %v8186_v51  ;;  %v3396_v29 = vmul.f32 0.3275911, %v3364_v53 }
 0x47b   : > { %v4033_v44 = vsel %vm3969_vm8, %v3937_v61, %v4001_v58  ;;  %v3746_v26 = vmul.f32 %v8135_v13, %v3714_v63  ;;  %v3619_v9 = vmul.f32 %v8166_v39, %v3587_v34  ;;  %5149 = vpow2.f32 %v3845_v40  ;;  %v2270_v13 = vpop.f32.mrf.mxu1 }
 0x47c   : > { %v4097_v60 = vadd.f32 1.0, %v4033_v44  ;;  %v3170_v19 = vsub.f32 0.0, %v3106_v14  ;;  %v2883_v56 = vadd.f32 0.2548296, %v2851_v18  ;;  %v2692_v22 = vadd.f32 -1.4531521, %v2660_v28 }
 0x47d   : > { %v3906_v31 = vmul.f32 %v5144_v45, %v3746_v26  ;;  %v3651_v32 = vadd.f32 -0.28449672, %v3619_v9  ;;  %v3428_v35 = vadd.f32 1.0, %v3396_v29  ;;  %v10899_v61 = vpack.c.bf16 %v7884_v49, %v7878_v15  ;;  %v2427_v15 = vpop.f32.mrf.mxu2 }
 0x47e   : > { %v4129_v37 = vmul.f32 %v4097_v60, %v8114_v59  ;;  %v3202_v24 = vsel %vm3138_vm9, %v3106_v14, %v3170_v19  ;;  %v2915_v30 = vmul.f32 %v8147_v11, %v2883_v56  ;;  %v2724_v48 = vmul.f32 %v8186_v51, %v2692_v22 }
 0x47f   : > { %2471 = vmatmul.bf16.gmra.mxu2 %v10899_v61  ;;  %v3266_v33 = vadd.f32 1.0, %v3202_v24  ;;  %v3938_v42 = vsub.f32 1.0, %v3906_v31  ;;  %v3683_v45 = vmul.f32 %v8166_v39, %v3651_v32  ;;  %5151 = vrcp.f32 %v3428_v35 }
 0x480   : > { %v10900_v59 = vpack.c.bf16 %v7872_v57, %v7862_v8  ;;  %v8209_v62 = vadd.f32 %v4129_v37, %v3297_v20  ;;  %v3075_v40 = vmul.f32 %v5148_v41, %v2915_v30  ;;  %v2756_v11 = vadd.f32 1.4214138, %v2724_v48 }
 0x481   : > { %v3015_v58 = vmul.f32 1.442695, %v2980_v25  ;;  %v4002_v63 = vsub.f32 0.0, %v3938_v42  ;;  %v3715_v34 = vadd.f32 0.2548296, %v3683_v45  ;;  %v3780_v14 = vsub.f32 0.0, %v3364_v53  ;;  %v5150_v57 = vpop.eup %5149 }
 0x482   : > { %2314 = vmatmul.bf16.gmra.mxu1 %v10900_v59  ;;  %10901 = vst [vmem:[#allocation93_spill] sm:$0xff] %v8209_v62  ;;  %v8212_v49 = vadd.f32 %v8060_v52, %v2270_v13  ;;  %v3107_v18 = vsub.f32 1.0, %v3075_v40  ;;  %v2788_v8 = vmul.f32 %v8186_v51, %v2756_v11  ;;  %v3298_v28 = vmul.f32 %v3266_v33, %v8116_v47 }
 0x483   : > { %v4034_v41 = vsel %vm3970_vm10, %v3938_v42, %v4002_v63  ;;  %v3747_v25 = vmul.f32 %v8166_v39, %v3715_v34  ;;  %v8223_v9 = vadd.f32 %v8069_v27, %v2427_v15  ;;  %5153 = vpow2.f32 %v3015_v58  ;;  %v2272_v13 = vpop.f32.mrf.mxu1 }
 0x484   : > { %v8220_v29 = vmul.f32 0.70710677, %v8212_v49  ;;  %v4098_v20 = vadd.f32 1.0, %v4034_v41  ;;  %v3171_v44 = vsub.f32 0.0, %v3107_v18  ;;  %v2820_v26 = vadd.f32 -0.28449672, %v2788_v8 }
 0x485   : > { %v8225_v2 = vpop.eup %5151  ;;  %v3907_v60 = vmul.f32 %v5150_v57, %v3747_v25  ;;  %v3812_v19 = vmul.f32 %v3780_v14, %v3364_v53  ;;  %v8236_v53 = vmul.f32 0.70710677, %v8223_v9  ;;  %v8245_v63 = vadd.f32 %v8060_v52, %v2272_v13  ;;  %v10904_v25 = vld [vmem:[#allocation88_spill] sm:$0xff] }
 0x486   : > { %v2533_v56 = vand.u32 2147483647, %v8220_v29  ;;  %v4130_v47 = vmul.f32 %v4098_v20, %v8133_v0  ;;  %v3203_v39 = vsel %vm3139_vm11, %v3107_v18, %v3171_v44  ;;  %v2852_v22 = vmul.f32 %v8186_v51, %v2820_v26 }
 0x487   : > { %v3492_v31 = vmul.f32 1.0614054, %v8225_v2  ;;  %v3267_v32 = vadd.f32 1.0, %v3203_v39  ;;  %v3939_v35 = vsub.f32 1.0, %v3907_v60  ;;  %v3235_v0 = vmul.f32 0.5, %v8091_v55  ;;  %v2429_v55 = vpop.f32.mrf.mxu2 }
 0x488   : > { %v2565_v37 = vmul.f32 0.3275911, %v2533_v56  ;;  %v8233_v24 = vadd.f32 %v4130_v47, %v3298_v28  ;;  %v2884_v30 = vadd.f32 0.2548296, %v2852_v22  ;;  %v3847_v59 = vmul.f32 1.442695, %v3812_v19 }
 0x489   : > { %v3524_v48 = vadd.f32 -1.4531521, %v3492_v31  ;;  %v4003_v61 = vsub.f32 0.0, %v3939_v35  ;;  %v5154_v40 = vpop.eup %5153  ;;  %v3365_v58 = vand.u32 2147483647, %v8236_v53  ;;  %v3299_v34 = vmul.f32 %v3267_v32, %v3235_v0 }
 0x48a   : > { %10902 = vst [vmem:[#allocation94_spill] sm:$0xff] %v8233_v24  ;;  %v2597_v33 = vadd.f32 1.0, %v2565_v37  ;;  %v2916_v42 = vmul.f32 %v8186_v51, %v2884_v30  ;;  %v10903_v8 = vpack.c.bf16 %v7916_v5, %v7909_v36  ;;  %v8252_v41 = vmul.f32 0.70710677, %v8245_v63 }
 0x48b   : > { %v3556_v45 = vmul.f32 %v8225_v2, %v3524_v48  ;;  %v4035_v11 = vsel %vm3971_vm12, %v3939_v35, %v4003_v61  ;;  %v3397_v18 = vmul.f32 0.3275911, %v3365_v58  ;;  %v10905_v20 = vpack.c.bf16 %v7898_v23, %v10904_v25  ;;  %v2275_v30 = vpop.f32.mrf.mxu1 }
 0x48c   : > { %5155 = vrcp.f32 %v2597_v33  ;;  %v4099_v14 = vadd.f32 1.0, %v4035_v11  ;;  %v3076_v50 = vmul.f32 %v5154_v40, %v2916_v42  ;;  %v8260_v60 = vadd.f32 %v8069_v27, %v2429_v55 }
 0x48d   : > { %v3588_v15 = vadd.f32 1.4214138, %v3556_v45  ;;  %v3429_v28 = vadd.f32 1.0, %v3397_v18  ;;  %5157 = vpow2.f32 %v3847_v59  ;;  %v2949_v5 = vsub.f32 0.0, %v2533_v56 }
 0x48e   : > { %v4131_v16 = vmul.f32 %v4099_v14, %v4067_v7  ;;  %v3108_v57 = vsub.f32 1.0, %v3076_v50  ;;  %v2534_v36 = vand.u32 2147483647, %v8252_v41  ;;  %v3236_v22 = vmul.f32 0.5, %v8131_v6 }
 0x48f   : > { %v3620_v51 = vmul.f32 %v8225_v2, %v3588_v15  ;;  %2476 = vmatmul.bf16.gmra.mxu2 %v10903_v8  ;;  %5159 = vrcp.f32 %v3429_v28  ;;  %vm3140_vm13 = vcmp.ge.f32.partialorder %v8140_v46, 0.0  ;;  %v4068_v35 = vmul.f32 0.5, %v8164_v4  ;;  %v2432_v61 = vpop.f32.mrf.mxu2 }
 0x490   : > { %v8257_v44 = vadd.f32 %v4131_v16, %v3299_v34  ;;  %v3172_v39 = vsub.f32 0.0, %v3108_v57  ;;  %v2566_v31 = vmul.f32 0.3275911, %v2534_v36  ;;  %v8271_v37 = vmul.f32 0.70710677, %v8260_v60 }
 0x491   : > { %v3652_v26 = vadd.f32 -0.28449672, %v3620_v51  ;;  %vm3972_vm14 = vcmp.ge.f32.partialorder %v8182_v10, 0.0  ;;  %v2981_v13 = vmul.f32 %v2949_v5, %v2533_v56  ;;  %v8276_v33 = vmul.f32 0.5, %v8212_v49 }
 0x492   : > { %2319 = vmatmul.bf16.gmra.mxu1 %v10905_v20  ;;  %10906 = vst [vmem:[#allocation95_spill] sm:$0xff] %v8257_v44  ;;  %v8262_v19 = vpop.eup %5155  ;;  %v2598_v0 = vadd.f32 1.0, %v2566_v31  ;;  %v3781_v42 = vsub.f32 0.0, %v3365_v58  ;;  %v3366_v45 = vand.u32 2147483647, %v8271_v37  ;;  %v3204_v59 = vsel %vm3140_vm13, %v3108_v57, %v3172_v39 }
 0x493   : > { %v3684_v47 = vmul.f32 %v8225_v2, %v3652_v26  ;;  %v2661_v23 = vmul.f32 1.0614054, %v8262_v19  ;;  %v5158_v7 = vpop.eup %5157  ;;  %v8285_v56 = vadd.f32 %v8060_v52, %v2275_v30  ;;  %v8289_v49 = vadd.f32 %v8069_v27, %v2432_v61 }
 0x494   : > { %5161 = vrcp.f32 %v2598_v0  ;;  %v3398_v55 = vmul.f32 0.3275911, %v3366_v45  ;;  %v3017_v14 = vmul.f32 1.442695, %v2981_v13  ;;  %v3813_v18 = vmul.f32 %v3781_v42, %v3365_v58 }
 0x495   : > { %v3716_v32 = vadd.f32 0.2548296, %v3684_v47  ;;  %v2693_v48 = vadd.f32 -1.4531521, %v2661_v23  ;;  %v8279_v4 = vpop.eup %5159  ;;  %v8292_v50 = vmul.f32 0.70710677, %v8285_v56 }
 0x496   : > { %v3430_v16 = vadd.f32 1.0, %v3398_v55  ;;  %v3268_v51 = vadd.f32 1.0, %v3204_v59  ;;  %v2950_v57 = vsub.f32 0.0, %v2534_v36  ;;  %v8298_v26 = vmul.f32 0.70710677, %v8289_v49 }
 0x497   : > { %v3748_v6 = vmul.f32 %v8225_v2, %v3716_v32  ;;  %v2725_v40 = vmul.f32 %v8262_v19, %v2693_v48  ;;  %v3493_v2 = vmul.f32 1.0614054, %v8279_v4  ;;  %v2535_v28 = vand.u32 2147483647, %v8292_v50 }
 0x498   : > { %5163 = vrcp.f32 %v3430_v16  ;;  %v3782_v39 = vsub.f32 0.0, %v3366_v45  ;;  %v3849_v32 = vmul.f32 1.442695, %v3813_v18  ;;  %v10907_v48 = vpack.c.bf16 %v7945_v54, %v7937_v3 }
 0x499   : > { %v3908_v11 = vmul.f32 %v5158_v7, %v3748_v6  ;;  %v2757_v34 = vadd.f32 1.4214138, %v2725_v40  ;;  %v3525_v15 = vadd.f32 -1.4531521, %v3493_v2  ;;  %5165 = vpow2.f32 %v3017_v14 }
 0x49a   : > { %v8300_v5 = vpop.eup %5161  ;;  %v2567_v58 = vmul.f32 0.3275911, %v2535_v28  ;;  %v3300_v13 = vmul.f32 %v3268_v51, %v3236_v22  ;;  %v10908_v6 = vpack.c.bf16 %v7931_v1, %v7922_v21  ;;  %v2982_v59 = vmul.f32 %v2950_v57, %v2534_v36  ;;  %v2277_v1 = vpop.f32.mrf.mxu1 }
 0x49b   : > { %v3940_v46 = vsub.f32 1.0, %v3908_v11  ;;  %v2789_v8 = vmul.f32 %v8262_v19, %v2757_v34  ;;  %v3557_v20 = vmul.f32 %v8279_v4, %v3525_v15  ;;  %v2662_v30 = vmul.f32 1.0614054, %v8300_v5 }
 0x49c   : > { %v2599_v7 = vadd.f32 1.0, %v2567_v58  ;;  %v8314_v40 = vand.u32 2147483647, %v8298_v26  ;;  %v3814_v3 = vmul.f32 %v3782_v39, %v3366_v45  ;;  %v3019_v18 = vmul.f32 1.442695, %v2982_v59 }
 0x49d   : > { %v4004_v25 = vsub.f32 0.0, %v3940_v46  ;;  %v2821_v47 = vadd.f32 -0.28449672, %v2789_v8  ;;  %v3589_v31 = vadd.f32 1.4214138, %v3557_v20  ;;  %vm3141_vm3 = vcmp.ge.f32.partialorder %v8220_v29, 0.0 }
 0x49e   : > { %v2694_v42 = vadd.f32 -1.4531521, %v2662_v30  ;;  %5167 = vrcp.f32 %v2599_v7  ;;  %v8316_v54 = vpop.eup %5163  ;;  %v3399_v21 = vmul.f32 0.3275911, %v8314_v40  ;;  %v3851_v57 = vmul.f32 1.442695, %v3814_v3 }
 0x49f   : > { %v4036_v23 = vsel %vm3972_vm14, %v3940_v46, %v4004_v25  ;;  %2481 = vmatmul.bf16.gmra.mxu2 %v10907_v48  ;;  %v2853_v61 = vmul.f32 %v8262_v19, %v2821_v47  ;;  %v3621_v10 = vmul.f32 %v8279_v4, %v3589_v31  ;;  %5169 = vpow2.f32 %v3849_v32  ;;  %v5166_v34 = vpop.eup %5165 }
 0x4a0   : > { %v4100_v0 = vadd.f32 1.0, %v4036_v23  ;;  %v2726_v55 = vmul.f32 %v8300_v5, %v2694_v42  ;;  %v3494_v46 = vmul.f32 1.0614054, %v8316_v54  ;;  %v3431_v16 = vadd.f32 1.0, %v3399_v21 }
 0x4a1   : > { %v2885_v2 = vadd.f32 0.2548296, %v2853_v61  ;;  %v3653_v22 = vadd.f32 -0.28449672, %v3621_v10  ;;  %v8326_v25 = vadd.f32 %v8060_v52, %v2277_v1  ;;  %vm3973_vm4 = vcmp.ge.f32.partialorder %v8236_v53, 0.0 }
 0x4a2   : > { %2324 = vmatmul.bf16.gmra.mxu1 %v10908_v6  ;;  %v4132_v11 = vmul.f32 %v4100_v0, %v4068_v35  ;;  %v2951_v35 = vsub.f32 0.0, %v2535_v28  ;;  %v2758_v15 = vadd.f32 1.4214138, %v2726_v55  ;;  %v3526_v8 = vadd.f32 -1.4531521, %v3494_v46 }
 0x4a3   : > { %v2917_v36 = vmul.f32 %v8262_v19, %v2885_v2  ;;  %v3685_v45 = vmul.f32 %v8279_v4, %v3653_v22  ;;  %5171 = vrcp.f32 %v3431_v16  ;;  %v4069_v58 = vmul.f32 0.5, %v8223_v9 }
 0x4a4   : > { %v8320_v14 = vadd.f32 %v4132_v11, %v3300_v13  ;;  %v2790_v47 = vmul.f32 %v8300_v5, %v2758_v15  ;;  %v8330_v19 = vpop.eup %5167  ;;  %v3558_v23 = vmul.f32 %v8316_v54, %v3526_v8  ;;  %v2983_v31 = vmul.f32 %v2951_v35, %v2535_v28  ;;  %v2434_v28 = vpop.f32.mrf.mxu2 }
 0x4a5   : > { %v3077_v51 = vmul.f32 %v5166_v34, %v2917_v36  ;;  %v3717_v20 = vadd.f32 0.2548296, %v3685_v45  ;;  %v5170_v32 = vpop.eup %5169  ;;  %5173 = vpow2.f32 %v3019_v18  ;;  %v2663_v13 = vmul.f32 1.0614054, %v8330_v19 }
 0x4a6   : > { %10909 = vst [vmem:[#allocation96_spill] sm:$0xff] %v8320_v14  ;;  %v2822_v48 = vadd.f32 -0.28449672, %v2790_v47  ;;  %v3590_v61 = vadd.f32 1.4214138, %v3558_v23  ;;  %5175 = vpow2.f32 %v3851_v57  ;;  %v3783_v42 = vsub.f32 0.0, %v8314_v40 }
 0x4a7   : > { %v3109_v39 = vsub.f32 1.0, %v3077_v51  ;;  %v3749_v30 = vmul.f32 %v8279_v4, %v3717_v20  ;;  %v8338_v7 = vmul.f32 0.70710677, %v8326_v25  ;;  %v2695_v9 = vadd.f32 -1.4531521, %v2663_v13  ;;  %v10911_v23 = vld [vmem:[#allocation89_spill] sm:$0xff] }
 0x4a8   : > { %v2854_v10 = vmul.f32 %v8300_v5, %v2822_v48  ;;  %v3622_v59 = vmul.f32 %v8316_v54, %v3590_v61  ;;  %v3021_v11 = vmul.f32 1.442695, %v2983_v31  ;;  %v8354_v29 = vadd.f32 %v8069_v27, %v2434_v28 }
 0x4a9   : > { %v3173_v0 = vsub.f32 0.0, %v3109_v39  ;;  %v3909_v6 = vmul.f32 %v5170_v32, %v3749_v30  ;;  %v8346_v2 = vand.u32 2147483647, %v8338_v7  ;;  %v8348_v3 = vpop.eup %5171  ;;  %v2727_v1 = vmul.f32 %v8330_v19, %v2695_v9 }
 0x4aa   : > { %v2886_v21 = vadd.f32 0.2548296, %v2854_v10  ;;  %v3654_v34 = vadd.f32 -0.28449672, %v3622_v59  ;;  %v3495_v36 = vmul.f32 1.0614054, %v8348_v3  ;;  %v3815_v16 = vmul.f32 %v3783_v42, %v8314_v40 }
 0x4ab   : > { %v3205_v4 = vsel %vm3141_vm3, %v3109_v39, %v3173_v0  ;;  %v3941_v55 = vsub.f32 1.0, %v3909_v6  ;;  %v2568_v46 = vmul.f32 0.3275911, %v8346_v2  ;;  %v5174_v35 = vpop.eup %5173  ;;  %v2759_v18 = vadd.f32 1.4214138, %v2727_v1 }
 0x4ac   : > { %v3269_v22 = vadd.f32 1.0, %v3205_v4  ;;  %v2918_v15 = vmul.f32 %v8300_v5, %v2886_v21  ;;  %v10910_v51 = vpack.c.bf16 %v8001_v12, %v7997_v38  ;;  %v5176_v8 = vpop.eup %5175  ;;  %v3686_v20 = vmul.f32 %v8316_v54, %v3654_v34 }
 0x4ad   : > { %v4005_v45 = vsub.f32 0.0, %v3941_v55  ;;  %v3527_v47 = vadd.f32 -1.4531521, %v3495_v36  ;;  %v2600_v39 = vadd.f32 1.0, %v2568_v46  ;;  %v10912_v31 = vpack.c.bf16 %v7984_v43, %v10911_v23 }
 0x4ae   : > { %v3301_v57 = vmul.f32 %v3269_v22, %v8276_v33  ;;  %v3078_v32 = vmul.f32 %v5174_v35, %v2918_v15  ;;  %v2791_v40 = vmul.f32 %v8330_v19, %v2759_v18  ;;  %v8370_v38 = vmul.f32 0.70710677, %v8354_v29  ;;  %v2437_v15 = vpop.f32.mrf.mxu2 }
 0x4af   : > { %2486 = vmatmul.bf16.gmra.mxu2 %v10910_v51  ;;  %v4037_v5 = vsel %vm3973_vm4, %v3941_v55, %v4005_v45  ;;  %v3718_v30 = vadd.f32 0.2548296, %v3686_v20  ;;  %v3559_v33 = vmul.f32 %v8348_v3, %v3527_v47  ;;  %5177 = vrcp.f32 %v2600_v39  ;;  %v2280_v45 = vpop.f32.mrf.mxu1 }
 0x4b0   : > { %v4101_v12 = vadd.f32 1.0, %v4037_v5  ;;  %v3110_v48 = vsub.f32 1.0, %v3078_v32  ;;  %vm3142_vm5 = vcmp.ge.f32.partialorder %v8252_v41, 0.0  ;;  %v2823_v13 = vadd.f32 -0.28449672, %v2791_v40 }
 0x4b1   : > { %v3368_v43 = vand.u32 2147483647, %v8370_v38  ;;  %v3750_v53 = vmul.f32 %v8316_v54, %v3718_v30  ;;  %5179 = vpow2.f32 %v3021_v11  ;;  %v3591_v61 = vadd.f32 1.4214138, %v3559_v33 }
 0x4b2   : > { %2329 = vmatmul.bf16.gmra.mxu1 %v10912_v31  ;;  %v4133_v0 = vmul.f32 %v4101_v12, %v4069_v58  ;;  %v3174_v6 = vsub.f32 0.0, %v3110_v48  ;;  %v2855_v10 = vmul.f32 %v8330_v19, %v2823_v13  ;;  %v3853_v9 = vmul.f32 1.442695, %v3815_v16  ;;  %v10914_v13 = vld [vmem:[#allocation92_spill] sm:$0xff] }
 0x4b3   : > { %v3400_v42 = vmul.f32 0.3275911, %v3368_v43  ;;  %v3910_v4 = vmul.f32 %v5176_v8, %v3750_v53  ;;  %v3623_v59 = vmul.f32 %v8348_v3, %v3591_v61  ;;  %v2952_v41 = vsub.f32 0.0, %v8346_v2 }
 0x4b4   : > { %v8377_v28 = vadd.f32 %v4133_v0, %v3301_v57  ;;  %v3206_v22 = vsel %vm3142_vm5, %v3110_v48, %v3174_v6  ;;  %v2887_v55 = vadd.f32 0.2548296, %v2855_v10  ;;  %v3238_v54 = vmul.f32 0.5, %v8245_v63 }
 0x4b5   : > { %v3432_v21 = vadd.f32 1.0, %v3400_v42  ;;  %v8381_v58 = vpop.eup %5177  ;;  %v3270_v11 = vadd.f32 1.0, %v3206_v22  ;;  %v3942_v1 = vsub.f32 1.0, %v3910_v4  ;;  %v4070_v34 = vmul.f32 0.5, %v8260_v60  ;;  %v10916_v42 = vld [vmem:[#allocation91_spill] sm:$0xff]  ;;  %v10917_v4 = vld [vmem:[#allocation90_spill] sm:$0xff] }
 0x4b6   : > { %10913 = vst [vmem:[#allocation97_spill] sm:$0xff] %v8377_v28  ;;  %v2919_v36 = vmul.f32 %v8330_v19, %v2887_v55  ;;  %v3655_v46 = vadd.f32 -0.28449672, %v3623_v59  ;;  %v2664_v35 = vmul.f32 1.0614054, %v8381_v58  ;;  %vm3974_vm6 = vcmp.ge.f32.partialorder %v8271_v37, 0.0 }
 0x4b7   : > { %5181 = vrcp.f32 %v3432_v21  ;;  %v5180_v18 = vpop.eup %5179  ;;  %v4006_v16 = vsub.f32 0.0, %v3942_v1  ;;  %v2984_v51 = vmul.f32 %v2952_v41, %v8346_v2  ;;  %v3784_v60 = vsub.f32 0.0, %v3368_v43 }
 0x4b8   : > { %5183 = vpow2.f32 %v3853_v9  ;;  %v3079_v63 = vmul.f32 %v5180_v18, %v2919_v36  ;;  %v3687_v8 = vmul.f32 %v8348_v3, %v3655_v46  ;;  %v2696_v57 = vadd.f32 -1.4531521, %v2664_v35 }
 0x4b9   : > { %v3302_v20 = vmul.f32 %v3270_v11, %v3238_v54  ;;  %v4038_v19 = vsel %vm3974_vm6, %v3942_v1, %v4006_v16  ;;  %v8391_v47 = vadd.f32 %v8060_v52, %v2280_v45  ;;  %v8394_v39 = vadd.f32 %v8069_v27, %v2437_v15  ;;  %v2439_v16 = vpop.f32.mrf.mxu2 }
 0x4ba   : > { %v4102_v23 = vadd.f32 1.0, %v4038_v19  ;;  %v3111_v31 = vsub.f32 1.0, %v3079_v63  ;;  %v3719_v37 = vadd.f32 0.2548296, %v3687_v8  ;;  %v2728_v5 = vmul.f32 %v8381_v58, %v2696_v57 }
 0x4bb   : > { %vm3143_vm15 = vcmp.ge.f32.partialorder %v8292_v50, 0.0  ;;  %v3023_v2 = vmul.f32 1.442695, %v2984_v51  ;;  %v8399_v32 = vmul.f32 0.70710677, %v8391_v47  ;;  %v10915_v0 = vpack.c.bf16 %v8029_v17, %v10914_v13  ;;  %v2282_v50 = vpop.f32.mrf.mxu1 }
 0x4bc   : > { %v4134_v12 = vmul.f32 %v4102_v23, %v4070_v34  ;;  %v3175_v30 = vsub.f32 0.0, %v3111_v31  ;;  %v3751_v33 = vmul.f32 %v8348_v3, %v3719_v37  ;;  %v2760_v48 = vadd.f32 1.4214138, %v2728_v5 }
 0x4bd   : > { %v8401_v40 = vpop.eup %5181  ;;  %v3816_v6 = vmul.f32 %v3784_v60, %v3368_v43  ;;  %v2537_v10 = vand.u32 2147483647, %v8399_v32  ;;  %v8410_v9 = vmul.f32 0.70710677, %v8394_v39  ;;  %v10918_v59 = vpack.c.bf16 %v10916_v42, %v10917_v4 }
 0x4be   : > { %v5184_v53 = vpop.eup %5183  ;;  %v3496_v61 = vmul.f32 1.0614054, %v8401_v40  ;;  %v8415_v41 = vadd.f32 %v4134_v12, %v3302_v20  ;;  %v3207_v3 = vsel %vm3143_vm15, %v3111_v31, %v3175_v30  ;;  %v2792_v22 = vmul.f32 %v8381_v58, %v2760_v48 }
 0x4bf   : > { %2491 = vmatmul.bf16.gmra.mxu2 %v10915_v0  ;;  %v3911_v17 = vmul.f32 %v5184_v53, %v3751_v33  ;;  %v2569_v21 = vmul.f32 0.3275911, %v2537_v10  ;;  %v3271_v11 = vadd.f32 1.0, %v3207_v3  ;;  %5185 = vpow2.f32 %v3023_v2 }
 0x4c0   : > { %10919 = vst [vmem:[#allocation98_spill] sm:$0xff] %v8415_v41  ;;  %v3528_v55 = vadd.f32 -1.4531521, %v3496_v61  ;;  %v2824_v54 = vadd.f32 -0.28449672, %v2792_v22  ;;  %v3239_v15 = vmul.f32 0.5, %v8285_v56  ;;  %v8428_v23 = vadd.f32 %v8060_v52, %v2282_v50 }
 0x4c1   : > { %v3943_v43 = vsub.f32 1.0, %v3911_v17  ;;  %v2601_v34 = vadd.f32 1.0, %v2569_v21  ;;  %v3855_v35 = vmul.f32 1.442695, %v3816_v6  ;;  %v3369_v45 = vand.u32 2147483647, %v8410_v9 }
 0x4c2   : > { %2334 = vmatmul.bf16.gmra.mxu1 %v10918_v59  ;;  %v3560_v1 = vmul.f32 %v8401_v40, %v3528_v55  ;;  %v2856_v46 = vmul.f32 %v8381_v58, %v2824_v54  ;;  %vm3975_vm0 = vcmp.ge.f32.partialorder %v8298_v26, 0.0  ;;  %v4071_v63 = vmul.f32 0.5, %v8289_v49 }
 0x4c3   : > { %v4007_v36 = vsub.f32 0.0, %v3943_v43  ;;  %5187 = vrcp.f32 %v2601_v34  ;;  %v3401_v57 = vmul.f32 0.3275911, %v3369_v45  ;;  %v3303_v60 = vmul.f32 %v3271_v11, %v3239_v15  ;;  %v2285_v50 = vpop.f32.mrf.mxu1  ;;  %v2442_v15 = vpop.f32.mrf.mxu2 }
 0x4c4   : > { %v3592_v18 = vadd.f32 1.4214138, %v3560_v1  ;;  %v2888_v8 = vadd.f32 0.2548296, %v2856_v46  ;;  %5189 = vpow2.f32 %v3855_v35  ;;  %v8432_v26 = vadd.f32 %v8069_v27, %v2439_v16 }
 0x4c5   : > { %v4039_v51 = vsel %vm3975_vm0, %v3943_v43, %v4007_v36  ;;  %v3433_v56 = vadd.f32 1.0, %v3401_v57  ;;  %v5186_v37 = vpop.eup %5185  ;;  %v2953_v49 = vsub.f32 0.0, %v2537_v10  ;;  %v8435_v12 = vmul.f32 0.70710677, %v8428_v23 }
 0x4c6   : > { %v4103_v20 = vadd.f32 1.0, %v4039_v51  ;;  %v3624_v19 = vmul.f32 %v8401_v40, %v3592_v18  ;;  %v2920_v31 = vmul.f32 %v8381_v58, %v2888_v8  ;;  %v8438_v33 = vmul.f32 0.70710677, %v8432_v26 }
 0x4c7   : > { %5191 = vrcp.f32 %v3433_v56  ;;  %v2538_v27 = vand.u32 2147483647, %v8435_v12  ;;  %v2985_v6 = vmul.f32 %v2953_v49, %v2537_v10  ;;  %v3785_v17 = vsub.f32 0.0, %v3369_v45 }
 0x4c8   : > { %v4135_v5 = vmul.f32 %v4103_v20, %v4071_v63  ;;  %v3656_v2 = vadd.f32 -0.28449672, %v3624_v19  ;;  %v3080_v30 = vmul.f32 %v5186_v37, %v2920_v31  ;;  %v8448_v53 = vand.u32 2147483647, %v8438_v33  ;;  %v8473_v20 = vld [vmem:[%s10133_s8] ss:$0 sm:$0xff] }
 0x4c9   : > { %v8440_v52 = vpop.eup %5187  ;;  %v2570_v42 = vmul.f32 0.3275911, %v2538_v27  ;;  %vm3144_vm1 = vcmp.ge.f32.partialorder %v8338_v7, 0.0  ;;  %v3025_v46 = vmul.f32 1.442695, %v2985_v6  ;;  %v3817_v35 = vmul.f32 %v3785_v17, %v3369_v45 }
 0x4ca   : > { %v8442_v58 = vadd.f32 %v4135_v5, %v3303_v60  ;;  %v3688_v48 = vmul.f32 %v8401_v40, %v3656_v2  ;;  %v3112_v13 = vsub.f32 1.0, %v3080_v30  ;;  %v2665_v0 = vmul.f32 1.0614054, %v8440_v52  ;;  %v5190_v4 = vpop.eup %5189  ;;  %v8465_v45 = vld [vmem:[%s10131_s6] ss:$0 sm:$0xff] }
 0x4cb   : > { %v3402_v22 = vmul.f32 0.3275911, %v8448_v53  ;;  %v2602_v21 = vadd.f32 1.0, %v2570_v42  ;;  %v3240_v7 = vmul.f32 0.5, %v8326_v25  ;;  %vm3976_vm2 = vcmp.ge.f32.partialorder %v8370_v38, 0.0 }
 0x4cc   : > { %10920 = vst [vmem:[#allocation99_spill] sm:$0xff] %v8442_v58  ;;  %v3720_v61 = vadd.f32 0.2548296, %v3688_v48  ;;  %v3176_v59 = vsub.f32 0.0, %v3112_v13  ;;  %v2697_v3 = vadd.f32 -1.4531521, %v2665_v0  ;;  %v8468_v25 = vadd.f32 %v8465_v45, %v2285_v50 }
 0x4cd   : > { %v8453_v43 = vpop.eup %5191  ;;  %v3434_v1 = vadd.f32 1.0, %v3402_v22  ;;  %5193 = vrcp.f32 %v2602_v21  ;;  %v4072_v51 = vmul.f32 0.5, %v8354_v29  ;;  %v2954_v8 = vsub.f32 0.0, %v2538_v27 }
 0x4ce   : > { %v3752_v55 = vmul.f32 %v8401_v40, %v3720_v61  ;;  %v3208_v54 = vsel %vm3144_vm1, %v3112_v13, %v3176_v59  ;;  %v2729_v11 = vmul.f32 %v8440_v52, %v2697_v3  ;;  %v3497_v10 = vmul.f32 1.0614054, %v8453_v43 }
 0x4cf   : > { %5195 = vrcp.f32 %v3434_v1  ;;  %v3272_v40 = vadd.f32 1.0, %v3208_v54  ;;  %v8476_v29 = vadd.f32 %v8473_v20, %v2442_v15  ;;  %v3857_v31 = vmul.f32 1.442695, %v3817_v35 }
 0x4d0   : > { %v3912_v34 = vmul.f32 %v5190_v4, %v3752_v55  ;;  %v2761_v36 = vadd.f32 1.4214138, %v2729_v11  ;;  %v3529_v16 = vadd.f32 -1.4531521, %v3497_v10  ;;  %5197 = vpow2.f32 %v3025_v46 }
 0x4d1   : > { %v3786_v56 = vsub.f32 0.0, %v8448_v53  ;;  %v3304_v5 = vmul.f32 %v3272_v40, %v3240_v7  ;;  %v8484_v30 = vmul.f32 0.70710677, %v8468_v25  ;;  %v8491_v6 = vmul.f32 0.70710677, %v8476_v29  ;;  %v2287_v7 = vpop.f32.mrf.mxu1 }
 0x4d2   : > { %v3944_v18 = vsub.f32 1.0, %v3912_v34  ;;  %v2793_v63 = vmul.f32 %v8440_v52, %v2761_v36  ;;  %v3561_v60 = vmul.f32 %v8453_v43, %v3529_v16  ;;  %v2986_v4 = vmul.f32 %v2954_v8, %v2538_v27 }
 0x4d3   : > { %v8479_v37 = vpop.eup %5193  ;;  %v2539_v59 = vand.u32 2147483647, %v8484_v30  ;;  %v8497_v55 = vand.u32 2147483647, %v8491_v6  ;;  %v3818_v11 = vmul.f32 %v3786_v56, %v8448_v53  ;;  %5199 = vpow2.f32 %v3857_v31 }
 0x4d4   : > { %v4008_v57 = vsub.f32 0.0, %v3944_v18  ;;  %v2825_v19 = vadd.f32 -0.28449672, %v2793_v63  ;;  %v3593_v49 = vadd.f32 1.4214138, %v3561_v60  ;;  %v3241_v53 = vmul.f32 0.5, %v8391_v47 }
 0x4d5   : > { %v8486_v48 = vpop.eup %5195  ;;  %v2666_v61 = vmul.f32 1.0614054, %v8479_v37  ;;  %v2571_v1 = vmul.f32 0.3275911, %v2539_v59  ;;  %v3403_v15 = vmul.f32 0.3275911, %v8497_v55 }
 0x4d6   : > { %v4040_v2 = vsel %vm3976_vm2, %v3944_v18, %v4008_v57  ;;  %v2857_v0 = vmul.f32 %v8440_v52, %v2825_v19  ;;  %v3625_v42 = vmul.f32 %v8453_v43, %v3593_v49  ;;  %v3498_v38 = vmul.f32 1.0614054, %v8486_v48  ;;  %v5198_v34 = vpop.eup %5197 }
 0x4d7   : > { %v4104_v13 = vadd.f32 1.0, %v4040_v2  ;;  %v2698_v22 = vadd.f32 -1.4531521, %v2666_v61  ;;  %v2603_v50 = vadd.f32 1.0, %v2571_v1  ;;  %v3027_v16 = vmul.f32 1.442695, %v2986_v4 }
 0x4d8   : > { %v2889_v17 = vadd.f32 0.2548296, %v2857_v0  ;;  %v3657_v21 = vadd.f32 -0.28449672, %v3625_v42  ;;  %v3530_v54 = vadd.f32 -1.4531521, %v3498_v38  ;;  %v8510_v19 = vadd.f32 %v8465_v45, %v2287_v7 }
 0x4d9   : > { %v4136_v3 = vmul.f32 %v4104_v13, %v4072_v51  ;;  %v2730_v36 = vmul.f32 %v8479_v37, %v2698_v22  ;;  %v3859_v8 = vmul.f32 1.442695, %v3818_v11  ;;  %5201 = vrcp.f32 %v2603_v50  ;;  %v5200_v56 = vpop.eup %5199  ;;  %v2444_v22 = vpop.f32.mrf.mxu2 }
 0x4da   : > { %v2921_v27 = vmul.f32 %v8440_v52, %v2889_v17  ;;  %v3689_v46 = vmul.f32 %v8453_v43, %v3657_v21  ;;  %v3562_v35 = vmul.f32 %v8486_v48, %v3530_v54  ;;  %v3435_v60 = vadd.f32 1.0, %v3403_v15 }
 0x4db   : > { %v8500_v10 = vadd.f32 %v4136_v3, %v3304_v5  ;;  %v2762_v18 = vadd.f32 1.4214138, %v2730_v36  ;;  %vm3145_vm7 = vcmp.ge.f32.partialorder %v8399_v32, 0.0  ;;  %vm3977_vm8 = vcmp.ge.f32.partialorder %v8410_v9, 0.0  ;;  %v2290_v9 = vpop.f32.mrf.mxu1 }
 0x4dc   : > { %v3081_v40 = vmul.f32 %v5198_v34, %v2921_v27  ;;  %v3721_v51 = vadd.f32 0.2548296, %v3689_v46  ;;  %v3594_v63 = vadd.f32 1.4214138, %v3562_v35  ;;  %v4073_v2 = vmul.f32 0.5, %v8394_v39 }
 0x4dd   : > { %10921 = vst [vmem:[#allocation100_spill] sm:$0xff] %v8500_v10  ;;  %v2794_v57 = vmul.f32 %v8479_v37, %v2762_v18  ;;  %5203 = vrcp.f32 %v3435_v60  ;;  %v2955_v61 = vsub.f32 0.0, %v2539_v59  ;;  %v8519_v32 = vmul.f32 0.70710677, %v8510_v19 }
 0x4de   : > { %v3113_v52 = vsub.f32 1.0, %v3081_v40  ;;  %v3753_v31 = vmul.f32 %v8453_v43, %v3721_v51  ;;  %v3626_v47 = vmul.f32 %v8486_v48, %v3594_v63  ;;  %5205 = vpow2.f32 %v3027_v16 }
 0x4df   : > { %v2826_v49 = vadd.f32 -0.28449672, %v2794_v57  ;;  %5207 = vpow2.f32 %v3859_v8  ;;  %v8521_v43 = vpop.eup %5201  ;;  %v3242_v17 = vmul.f32 0.5, %v8428_v23  ;;  %v8527_v11 = vand.u32 2147483647, %v8519_v32 }
 0x4e0   : > { %v3177_v5 = vsub.f32 0.0, %v3113_v52  ;;  %v3913_v13 = vmul.f32 %v5200_v56, %v3753_v31  ;;  %v3658_v0 = vadd.f32 -0.28449672, %v3626_v47  ;;  %v2667_v54 = vmul.f32 1.0614054, %v8521_v43 }
 0x4e1   : > { %v2858_v4 = vmul.f32 %v8479_v37, %v2826_v49  ;;  %v2987_v27 = vmul.f32 %v2955_v61, %v2539_v59  ;;  %v3787_v36 = vsub.f32 0.0, %v8497_v55  ;;  %v2572_v23 = vmul.f32 0.3275911, %v8527_v11 }
 0x4e2   : > { %v3209_v42 = vsel %vm3145_vm7, %v3113_v52, %v3177_v5  ;;  %v3945_v3 = vsub.f32 1.0, %v3913_v13  ;;  %v3690_v39 = vmul.f32 %v8486_v48, %v3658_v0  ;;  %v2699_v50 = vadd.f32 -1.4531521, %v2667_v54 }
 0x4e3   : > { %v3273_v38 = vadd.f32 1.0, %v3209_v42  ;;  %v2890_v21 = vadd.f32 0.2548296, %v2858_v4  ;;  %v8530_v46 = vpop.eup %5203  ;;  %v8535_v15 = vadd.f32 %v8473_v20, %v2444_v22  ;;  %v2604_v52 = vadd.f32 1.0, %v2572_v23 }
 0x4e4   : > { %v4009_v1 = vsub.f32 0.0, %v3945_v3  ;;  %v3722_v34 = vadd.f32 0.2548296, %v3690_v39  ;;  %v5206_v7 = vpop.eup %5205  ;;  %v3499_v59 = vmul.f32 1.0614054, %v8530_v46  ;;  %v3819_v47 = vmul.f32 %v3787_v36, %v8497_v55 }
 0x4e5   : > { %v2922_v35 = vmul.f32 %v8479_v37, %v2890_v21  ;;  %v3305_v40 = vmul.f32 %v3273_v38, %v3241_v53  ;;  %v5208_v51 = vpop.eup %5207  ;;  %v2731_v37 = vmul.f32 %v8521_v43, %v2699_v50  ;;  %v3029_v60 = vmul.f32 1.442695, %v2987_v27 }
 0x4e6   : > { %v4041_v18 = vsel %vm3977_vm8, %v3945_v3, %v4009_v1  ;;  %v3754_v16 = vmul.f32 %v8486_v48, %v3722_v34  ;;  %v3531_v31 = vadd.f32 -1.4531521, %v3499_v59  ;;  %5209 = vrcp.f32 %v2604_v52 }
 0x4e7   : > { %v4105_v63 = vadd.f32 1.0, %v4041_v18  ;;  %v3082_v8 = vmul.f32 %v5206_v7, %v2922_v35  ;;  %v2763_v5 = vadd.f32 1.4214138, %v2731_v37  ;;  %vm3146_vm9 = vcmp.ge.f32.partialorder %v8435_v12, 0.0  ;;  %v2447_v18 = vpop.f32.mrf.mxu2 }
 0x4e8   : > { %v3914_v57 = vmul.f32 %v5208_v51, %v3754_v16  ;;  %v3563_v49 = vmul.f32 %v8530_v46, %v3531_v31  ;;  %v8546_v13 = vmul.f32 0.70710677, %v8535_v15  ;;  %vm3978_vm10 = vcmp.ge.f32.partialorder %v8438_v33, 0.0 }
 0x4e9   : > { %v4137_v56 = vmul.f32 %v4105_v63, %v4073_v2  ;;  %v3114_v53 = vsub.f32 1.0, %v3082_v8  ;;  %v2795_v55 = vmul.f32 %v8521_v43, %v2763_v5  ;;  %v8554_v38 = vadd.f32 %v8465_v45, %v2290_v9 }
 0x4ea   : > { %v3946_v48 = vsub.f32 1.0, %v3914_v57  ;;  %v3595_v42 = vadd.f32 1.4214138, %v3563_v49  ;;  %v3372_v4 = vand.u32 2147483647, %v8546_v13  ;;  %5211 = vpow2.f32 %v3029_v60 }
 0x4eb   : > { %v8548_v0 = vadd.f32 %v4137_v56, %v3305_v40  ;;  %v3178_v61 = vsub.f32 0.0, %v3114_v53  ;;  %v2827_v3 = vadd.f32 -0.28449672, %v2795_v55  ;;  %v3861_v39 = vmul.f32 1.442695, %v3819_v47 }
 0x4ec   : > { %v4010_v2 = vsub.f32 0.0, %v3946_v48  ;;  %v3627_v54 = vmul.f32 %v8530_v46, %v3595_v42  ;;  %v3404_v1 = vmul.f32 0.3275911, %v3372_v4  ;;  %v8557_v34 = vpop.eup %5209  ;;  %v4074_v33 = vmul.f32 0.5, %v8432_v26 }
 0x4ed   : > { %10922 = vst [vmem:[#allocation101_spill] sm:$0xff] %v8548_v0  ;;  %v3210_v12 = vsel %vm3146_vm9, %v3114_v53, %v3178_v61  ;;  %v2859_v36 = vmul.f32 %v8521_v43, %v2827_v3  ;;  %v2956_v35 = vsub.f32 0.0, %v8527_v11  ;;  %v2668_v7 = vmul.f32 1.0614054, %v8557_v34 }
 0x4ee   : > { %v3274_v22 = vadd.f32 1.0, %v3210_v12  ;;  %v4042_v21 = vsel %vm3978_vm10, %v3946_v48, %v4010_v2  ;;  %v3659_v23 = vadd.f32 -0.28449672, %v3627_v54  ;;  %v3436_v40 = vadd.f32 1.0, %v3404_v1 }
 0x4ef   : > { %v4106_v27 = vadd.f32 1.0, %v4042_v21  ;;  %v2891_v59 = vadd.f32 0.2548296, %v2859_v36  ;;  %5213 = vpow2.f32 %v3861_v39  ;;  %v2700_v63 = vadd.f32 -1.4531521, %v2668_v7 }
 0x4f0   : > { %v3306_v50 = vmul.f32 %v3274_v22, %v3242_v17  ;;  %v3691_v51 = vmul.f32 %v8530_v46, %v3659_v23  ;;  %5215 = vrcp.f32 %v3436_v40  ;;  %v8565_v26 = vmul.f32 0.70710677, %v8554_v38  ;;  %v5212_v8 = vpop.eup %5211 }
 0x4f1   : > { %v4138_v16 = vmul.f32 %v4106_v27, %v4074_v33  ;;  %v2923_v17 = vmul.f32 %v8521_v43, %v2891_v59  ;;  %v2988_v52 = vmul.f32 %v2956_v35, %v8527_v11  ;;  %v8572_v57 = vadd.f32 %v8473_v20, %v2447_v18  ;;  %v2292_v33 = vpop.f32.mrf.mxu1  ;;  %v2449_v35 = vpop.f32.mrf.mxu2 }
 0x4f2   : > { %v3723_v60 = vadd.f32 0.2548296, %v3691_v51  ;;  %v2732_v31 = vmul.f32 %v8557_v34, %v2700_v63  ;;  %v8576_v47 = vand.u32 2147483647, %v8565_v26  ;;  %v3788_v9 = vsub.f32 0.0, %v3372_v4 }
 0x4f3   : > { %v8567_v37 = vadd.f32 %v4138_v16, %v3306_v50  ;;  %v3083_v56 = vmul.f32 %v5212_v8, %v2923_v17  ;;  %v3031_v61 = vmul.f32 1.442695, %v2988_v52  ;;  %v8581_v11 = vmul.f32 0.70710677, %v8572_v57 }
 0x4f4   : > { %v3755_v53 = vmul.f32 %v8530_v46, %v3723_v60  ;;  %v2764_v5 = vadd.f32 1.4214138, %v2732_v31  ;;  %v2573_v48 = vmul.f32 0.3275911, %v8576_v47  ;;  %v3243_v2 = vmul.f32 0.5, %v8468_v25 }
 0x4f5   : > { %10923 = vst [vmem:[#allocation102_spill] sm:$0xff] %v8567_v37  ;;  %v5214_v49 = vpop.eup %5213  ;;  %v3115_v43 = vsub.f32 1.0, %v3083_v56  ;;  %vm3147_vm11 = vcmp.ge.f32.partialorder %v8484_v30, 0.0  ;;  %v3373_v22 = vand.u32 2147483647, %v8581_v11  ;;  %v3820_v1 = vmul.f32 %v3788_v9, %v3372_v4 }
 0x4f6   : > { %v8583_v55 = vpop.eup %5215  ;;  %v3915_v42 = vmul.f32 %v5214_v49, %v3755_v53  ;;  %v2796_v12 = vmul.f32 %v8557_v34, %v2764_v5  ;;  %v2605_v3 = vadd.f32 1.0, %v2573_v48  ;;  %vm3979_vm12 = vcmp.ge.f32.partialorder %v8491_v6, 0.0 }
 0x4f7   : > { %v3179_v46 = vsub.f32 0.0, %v3115_v43  ;;  %v3500_v39 = vmul.f32 1.0614054, %v8583_v55  ;;  %v3405_v25 = vmul.f32 0.3275911, %v3373_v22  ;;  %v4075_v7 = vmul.f32 0.5, %v8476_v29 }
 0x4f8   : > { %v3947_v21 = vsub.f32 1.0, %v3915_v42  ;;  %v2828_v54 = vadd.f32 -0.28449672, %v2796_v12  ;;  %5217 = vrcp.f32 %v2605_v3  ;;  %v8595_v4 = vadd.f32 %v8465_v45, %v2292_v33 }
 0x4f9   : > { %v3211_v27 = vsel %vm3147_vm11, %v3115_v43, %v3179_v46  ;;  %5219 = vpow2.f32 %v3031_v61  ;;  %v3532_v36 = vadd.f32 -1.4531521, %v3500_v39  ;;  %v3437_v18 = vadd.f32 1.0, %v3405_v25 }
 0x4fa   : > { %v3275_v50 = vadd.f32 1.0, %v3211_v27  ;;  %v4011_v23 = vsub.f32 0.0, %v3947_v21  ;;  %v2860_v30 = vmul.f32 %v8557_v34, %v2828_v54  ;;  %v3863_v51 = vmul.f32 1.442695, %v3820_v1 }
 0x4fb   : > { %v3564_v40 = vmul.f32 %v8583_v55, %v3532_v36  ;;  %v8598_v63 = vadd.f32 %v8473_v20, %v2449_v35  ;;  %5221 = vrcp.f32 %v3437_v18  ;;  %v2957_v60 = vsub.f32 0.0, %v8576_v47  ;;  %v2295_v18 = vpop.f32.mrf.mxu1 }
 0x4fc   : > { %v4043_v16 = vsel %vm3979_vm12, %v3947_v21, %v4011_v23  ;;  %v2892_v59 = vadd.f32 0.2548296, %v2860_v30  ;;  %v3307_v8 = vmul.f32 %v3275_v50, %v3243_v2  ;;  %v8605_v31 = vmul.f32 0.70710677, %v8595_v4 }
 0x4fd   : > { %v4107_v17 = vadd.f32 1.0, %v4043_v16  ;;  %v3596_v6 = vadd.f32 1.4214138, %v3564_v40  ;;  %v8608_v56 = vmul.f32 0.70710677, %v8598_v63  ;;  %v3789_v49 = vsub.f32 0.0, %v3373_v22 }
 0x4fe   : > { %v8600_v52 = vpop.eup %5217  ;;  %v2924_v29 = vmul.f32 %v8557_v34, %v2892_v59  ;;  %v2542_v61 = vand.u32 2147483647, %v8605_v31  ;;  %5223 = vpow2.f32 %v3863_v51  ;;  %v2989_v46 = vmul.f32 %v2957_v60, %v8576_v47 }
 0x4ff   : > { %v5220_v53 = vpop.eup %5219  ;;  %v4139_v5 = vmul.f32 %v4107_v17, %v4075_v7  ;;  %v3628_v9 = vmul.f32 %v8583_v55, %v3596_v6  ;;  %v2669_v48 = vmul.f32 1.0614054, %v8600_v52  ;;  %v8614_v34 = vand.u32 2147483647, %v8608_v56 }
 0x500   : > { %v3084_v43 = vmul.f32 %v5220_v53, %v2924_v29  ;;  %v2574_v39 = vmul.f32 0.3275911, %v2542_v61  ;;  %v3821_v27 = vmul.f32 %v3789_v49, %v3373_v22  ;;  %v2958_v50 = vsub.f32 0.0, %v2542_v61 }
 0x501   : > { %v8616_v2 = vadd.f32 %v4139_v5, %v3307_v8  ;;  %v3660_v42 = vadd.f32 -0.28449672, %v3628_v9  ;;  %v2701_v12 = vadd.f32 -1.4531521, %v2669_v48  ;;  %v3406_v21 = vmul.f32 0.3275911, %v8614_v34  ;;  %v8620_v54 = vpop.eup %5221  ;;  %v2452_v8 = vpop.f32.mrf.mxu2 }
 0x502   : > { %v3116_v3 = vsub.f32 1.0, %v3084_v43  ;;  %v3501_v25 = vmul.f32 1.0614054, %v8620_v54  ;;  %v2606_v35 = vadd.f32 1.0, %v2574_v39  ;;  %vm3148_vm13 = vcmp.ge.f32.partialorder %v8519_v32, 0.0 }
 0x503   : > { %10924 = vst [vmem:[#allocation103_spill] sm:$0xff] %v8616_v2  ;;  %v3692_v1 = vmul.f32 %v8583_v55, %v3660_v42  ;;  %v2733_v33 = vmul.f32 %v8600_v52, %v2701_v12  ;;  %v3438_v7 = vadd.f32 1.0, %v3406_v21  ;;  %v3033_v47 = vmul.f32 1.442695, %v2989_v46 }
 0x504   : > { %v3180_v36 = vsub.f32 0.0, %v3116_v3  ;;  %v3533_v40 = vadd.f32 -1.4531521, %v3501_v25  ;;  %5225 = vrcp.f32 %v2606_v35  ;;  %v5224_v16 = vpop.eup %5223  ;;  %v3244_v17 = vmul.f32 0.5, %v8510_v19 }
 0x505   : > { %v3724_v23 = vadd.f32 0.2548296, %v3692_v1  ;;  %v2765_v30 = vadd.f32 1.4214138, %v2733_v33  ;;  %5227 = vrcp.f32 %v3438_v7  ;;  %v3865_v29 = vmul.f32 1.442695, %v3821_v27 }
 0x506   : > { %v3212_v59 = vsel %vm3148_vm13, %v3116_v3, %v3180_v36  ;;  %v3565_v6 = vmul.f32 %v8620_v54, %v3533_v40  ;;  %v2990_v60 = vmul.f32 %v2958_v50, %v2542_v61  ;;  %v4076_v32 = vmul.f32 0.5, %v8535_v15 }
 0x507   : > { %v3756_v51 = vmul.f32 %v8583_v55, %v3724_v23  ;;  %v2797_v22 = vmul.f32 %v8600_v52, %v2765_v30  ;;  %v8632_v9 = vadd.f32 %v8465_v45, %v2295_v18  ;;  %v3276_v48 = vadd.f32 1.0, %v3212_v59 }
 0x508   : > { %5229 = vpow2.f32 %v3033_v47  ;;  %v3597_v55 = vadd.f32 1.4214138, %v3565_v6  ;;  %v8635_v49 = vadd.f32 %v8473_v20, %v2452_v8  ;;  %vm3980_vm14 = vcmp.ge.f32.partialorder %v8546_v13, 0.0 }
 0x509   : > { %v3916_v53 = vmul.f32 %v5224_v16, %v3756_v51  ;;  %v2829_v5 = vadd.f32 -0.28449672, %v2797_v22  ;;  %v8640_v61 = vmul.f32 0.70710677, %v8632_v9  ;;  %5231 = vpow2.f32 %v3865_v29  ;;  %v2297_v51 = vpop.f32.mrf.mxu1 }
 0x50a   : > { %v8642_v42 = vpop.eup %5225  ;;  %v3629_v15 = vmul.f32 %v8620_v54, %v3597_v55  ;;  %v3035_v12 = vmul.f32 1.442695, %v2990_v60  ;;  %v8646_v3 = vmul.f32 0.70710677, %v8635_v49  ;;  %v3790_v33 = vsub.f32 0.0, %v8614_v34 }
 0x50b   : > { %v3948_v43 = vsub.f32 1.0, %v3916_v53  ;;  %v2861_v19 = vmul.f32 %v8600_v52, %v2829_v5  ;;  %v8648_v46 = vpop.eup %5227  ;;  %v2670_v1 = vmul.f32 1.0614054, %v8642_v42  ;;  %v3308_v27 = vmul.f32 %v3276_v48, %v3244_v17 }
 0x50c   : > { %v3661_v36 = vadd.f32 -0.28449672, %v3629_v15  ;;  %v3502_v25 = vmul.f32 1.0614054, %v8648_v46  ;;  %v2543_v35 = vand.u32 2147483647, %v8640_v61  ;;  %v3822_v17 = vmul.f32 %v3790_v33, %v8614_v34 }
 0x50d   : > { %v4012_v39 = vsub.f32 0.0, %v3948_v43  ;;  %v2893_v21 = vadd.f32 0.2548296, %v2861_v19  ;;  %v2702_v30 = vadd.f32 -1.4531521, %v2670_v1  ;;  %vm3149_vm3 = vcmp.ge.f32.partialorder %v8565_v26, 0.0 }
 0x50e   : > { %v8658_v7 = vand.u32 2147483647, %v8646_v3  ;;  %v5230_v47 = vpop.eup %5229  ;;  %v3693_v18 = vmul.f32 %v8620_v54, %v3661_v36  ;;  %v3534_v16 = vadd.f32 -1.4531521, %v3502_v25  ;;  %v2575_v59 = vmul.f32 0.3275911, %v2543_v35 }
 0x50f   : > { %v4044_v50 = vsel %vm3980_vm14, %v3948_v43, %v4012_v39  ;;  %v2925_v23 = vmul.f32 %v8600_v52, %v2893_v21  ;;  %v2734_v8 = vmul.f32 %v8642_v42, %v2702_v30  ;;  %v5232_v6 = vpop.eup %5231  ;;  %v8666_v43 = vadd.f32 %v8465_v45, %v2297_v51  ;;  %v2454_v51 = vpop.f32.mrf.mxu2 }
 0x510   : > { %v4108_v40 = vadd.f32 1.0, %v4044_v50  ;;  %v3407_v13 = vmul.f32 0.3275911, %v8658_v7  ;;  %v3725_v29 = vadd.f32 0.2548296, %v3693_v18  ;;  %v3566_v60 = vmul.f32 %v8648_v46, %v3534_v16 }
 0x511   : > { %v3085_v22 = vmul.f32 %v5230_v47, %v2925_v23  ;;  %v2607_v53 = vadd.f32 1.0, %v2575_v59  ;;  %v2766_v48 = vadd.f32 1.4214138, %v2734_v8  ;;  %v2959_v36 = vsub.f32 0.0, %v2543_v35 }
 0x512   : > { %v4140_v52 = vmul.f32 %v4108_v40, %v4076_v32  ;;  %v3439_v55 = vadd.f32 1.0, %v3407_v13  ;;  %v3757_v15 = vmul.f32 %v8620_v54, %v3725_v29  ;;  %v3598_v39 = vadd.f32 1.4214138, %v3566_v60 }
 0x513   : > { %v3117_v5 = vsub.f32 1.0, %v3085_v22  ;;  %5233 = vrcp.f32 %v2607_v53  ;;  %v2798_v21 = vmul.f32 %v8642_v42, %v2766_v48  ;;  %v3867_v32 = vmul.f32 1.442695, %v3822_v17 }
 0x514   : > { %v8668_v19 = vadd.f32 %v4140_v52, %v3308_v27  ;;  %5235 = vrcp.f32 %v3439_v55  ;;  %v3917_v1 = vmul.f32 %v5232_v6, %v3757_v15  ;;  %v3630_v33 = vmul.f32 %v8648_v46, %v3598_v39 }
 0x515   : > { %v3181_v34 = vsub.f32 0.0, %v3117_v5  ;;  %v3245_v50 = vmul.f32 0.5, %v8554_v38  ;;  %v2830_v27 = vadd.f32 -0.28449672, %v2798_v21  ;;  %5237 = vpow2.f32 %v3035_v12 }
 0x516   : > { %10925 = vst [vmem:[#allocation104_spill] sm:$0xff] %v8668_v19  ;;  %v3949_v30 = vsub.f32 1.0, %v3917_v1  ;;  %v3662_v54 = vadd.f32 -0.28449672, %v3630_v33  ;;  %v4077_v47 = vmul.f32 0.5, %v8572_v57  ;;  %5239 = vpow2.f32 %v3867_v32 }
 0x517   : > { %v3213_v25 = vsel %vm3149_vm3, %v3117_v5, %v3181_v34  ;;  %v2862_v40 = vmul.f32 %v8642_v42, %v2830_v27  ;;  %v8678_v18 = vmul.f32 0.70710677, %v8666_v43  ;;  %vm3981_vm4 = vcmp.ge.f32.partialorder %v8581_v11, 0.0 }
 0x518   : > { %v3277_v23 = vadd.f32 1.0, %v3213_v25  ;;  %v4013_v16 = vsub.f32 0.0, %v3949_v30  ;;  %v3694_v38 = vmul.f32 %v8648_v46, %v3662_v54  ;;  %v2991_v59 = vmul.f32 %v2959_v36, %v2543_v35 }
 0x519   : > { %v8680_v26 = vpop.eup %5233  ;;  %v2894_v8 = vadd.f32 0.2548296, %v2862_v40  ;;  %v3791_v17 = vsub.f32 0.0, %v8658_v7  ;;  %v8690_v29 = vand.u32 2147483647, %v8678_v18  ;;  %v8694_v53 = vadd.f32 %v8473_v20, %v2454_v51 }
 0x51a   : > { %v8684_v22 = vpop.eup %5235  ;;  %v3309_v12 = vmul.f32 %v3277_v23, %v3245_v50  ;;  %v2671_v57 = vmul.f32 1.0614054, %v8680_v26  ;;  %v4045_v13 = vsel %vm3981_vm4, %v3949_v30, %v4013_v16  ;;  %v3726_v6 = vadd.f32 0.2548296, %v3694_v38 }
 0x51b   : > { %v3503_v52 = vmul.f32 1.0614054, %v8684_v22  ;;  %v4109_v11 = vadd.f32 1.0, %v4045_v13  ;;  %v2926_v60 = vmul.f32 %v8642_v42, %v2894_v8  ;;  %v5238_v5 = vpop.eup %5237  ;;  %v2576_v15 = vmul.f32 0.3275911, %v8690_v29 }
 0x51c   : > { %v2703_v35 = vadd.f32 -1.4531521, %v2671_v57  ;;  %v3758_v48 = vmul.f32 %v8648_v46, %v3726_v6  ;;  %v5240_v39 = vpop.eup %5239  ;;  %v3823_v1 = vmul.f32 %v3791_v17, %v8658_v7  ;;  %v3037_v36 = vmul.f32 1.442695, %v2991_v59  ;;  %v2300_v57 = vpop.f32.mrf.mxu1 }
 0x51d   : > { %v3535_v55 = vadd.f32 -1.4531521, %v3503_v52  ;;  %v4141_v34 = vmul.f32 %v4109_v11, %v4077_v47  ;;  %v3086_v21 = vmul.f32 %v5238_v5, %v2926_v60  ;;  %v2608_v25 = vadd.f32 1.0, %v2576_v15 }
 0x51e   : > { %v2735_v32 = vmul.f32 %v8680_v26, %v2703_v35  ;;  %v3918_v33 = vmul.f32 %v5240_v39, %v3758_v48  ;;  %v8704_v46 = vmul.f32 0.70710677, %v8694_v53  ;;  %v3246_v30 = vmul.f32 0.5, %v8595_v4 }
 0x51f   : > { %v3567_v42 = vmul.f32 %v8684_v22, %v3535_v55  ;;  %v8701_v50 = vadd.f32 %v4141_v34, %v3309_v12  ;;  %v3118_v27 = vsub.f32 1.0, %v3086_v21  ;;  %5241 = vrcp.f32 %v2608_v25  ;;  %v2457_v34 = vpop.f32.mrf.mxu2 }
 0x520   : > { %v2767_v23 = vadd.f32 1.4214138, %v2735_v32  ;;  %v3950_v54 = vsub.f32 1.0, %v3918_v33  ;;  %vm3150_vm5 = vcmp.ge.f32.partialorder %v8605_v31, 0.0  ;;  %v3869_v16 = vmul.f32 1.442695, %v3823_v1 }
 0x521   : > { %10926 = vst [vmem:[#allocation105_spill] sm:$0xff] %v8701_v50  ;;  %v3599_v47 = vadd.f32 1.4214138, %v3567_v42  ;;  %v3182_v7 = vsub.f32 0.0, %v3118_v27  ;;  %vm3982_vm6 = vcmp.ge.f32.partialorder %v8608_v56, 0.0  ;;  %v4078_v4 = vmul.f32 0.5, %v8598_v63 }
 0x522   : > { %v2799_v40 = vmul.f32 %v8680_v26, %v2767_v23  ;;  %v4014_v38 = vsub.f32 0.0, %v3950_v54  ;;  %v8712_v51 = vand.u32 2147483647, %v8704_v46  ;;  %5243 = vpow2.f32 %v3037_v36 }
 0x523   : > { %v3631_v59 = vmul.f32 %v8684_v22, %v3599_v47  ;;  %v3214_v12 = vsel %vm3150_vm5, %v3118_v27, %v3182_v7  ;;  %5245 = vpow2.f32 %v3869_v16  ;;  %v2960_v11 = vsub.f32 0.0, %v8690_v29 }
 0x524   : > { %v2831_v8 = vadd.f32 -0.28449672, %v2799_v40  ;;  %v3278_v17 = vadd.f32 1.0, %v3214_v12  ;;  %v4046_v31 = vsel %vm3982_vm6, %v3950_v54, %v4014_v38  ;;  %v3408_v6 = vmul.f32 0.3275911, %v8712_v51 }
 0x525   : > { %v3663_v13 = vadd.f32 -0.28449672, %v3631_v59  ;;  %v4110_v52 = vadd.f32 1.0, %v4046_v31  ;;  %v8718_v60 = vpop.eup %5241  ;;  %v8722_v48 = vadd.f32 %v8465_v45, %v2300_v57  ;;  %v2992_v27 = vmul.f32 %v2960_v11, %v8690_v29 }
 0x526   : > { %v2863_v56 = vmul.f32 %v8680_v26, %v2831_v8  ;;  %v3310_v35 = vmul.f32 %v3278_v17, %v3246_v30  ;;  %v3440_v63 = vadd.f32 1.0, %v3408_v6  ;;  %v2672_v39 = vmul.f32 1.0614054, %v8718_v60 }
 0x527   : > { %v3695_v5 = vmul.f32 %v8684_v22, %v3663_v13  ;;  %v4142_v55 = vmul.f32 %v4110_v52, %v4078_v4  ;;  %v8726_v32 = vmul.f32 0.70710677, %v8722_v48  ;;  %v8737_v30 = vadd.f32 %v8473_v20, %v2457_v34 }
 0x528   : > { %v2895_v15 = vadd.f32 0.2548296, %v2863_v56  ;;  %5247 = vrcp.f32 %v3440_v63  ;;  %v5244_v1 = vpop.eup %5243  ;;  %v2704_v42 = vadd.f32 -1.4531521, %v2672_v39  ;;  %v3247_v40 = vmul.f32 0.5, %v8632_v9  ;;  %v2459_v63 = vpop.f32.mrf.mxu2 }
 0x529   : > { %v3727_v21 = vadd.f32 0.2548296, %v3695_v5  ;;  %v8728_v33 = vadd.f32 %v4142_v55, %v3310_v35  ;;  %v8734_v23 = vand.u32 2147483647, %v8726_v32  ;;  %v5246_v54 = vpop.eup %5245  ;;  %v8744_v29 = vmul.f32 0.70710677, %v8737_v30  ;;  %v2302_v5 = vpop.f32.mrf.mxu1 }
 0x52a   : > { %v2927_v36 = vmul.f32 %v8680_v26, %v2895_v15  ;;  %v2736_v7 = vmul.f32 %v8718_v60, %v2704_v42  ;;  %v3039_v8 = vmul.f32 1.442695, %v2992_v27  ;;  %v3792_v57 = vsub.f32 0.0, %v8712_v51 }
 0x52b   : > { %10927 = vst [vmem:[#allocation106_spill] sm:$0xff] %v8728_v33  ;;  %v3759_v25 = vmul.f32 %v8684_v22, %v3727_v21  ;;  %v2577_v26 = vmul.f32 0.3275911, %v8734_v23  ;;  %v4079_v22 = vmul.f32 0.5, %v8635_v49  ;;  %v3377_v6 = vand.u32 2147483647, %v8744_v29 }
 0x52c   : > { %v3087_v47 = vmul.f32 %v5244_v1, %v2927_v36  ;;  %v2768_v59 = vadd.f32 1.4214138, %v2736_v7  ;;  %vm3151_vm15 = vcmp.ge.f32.partialorder %v8640_v61, 0.0  ;;  %vm3983_vm0 = vcmp.ge.f32.partialorder %v8646_v3, 0.0 }
 0x52d   : > { %v3919_v16 = vmul.f32 %v5246_v54, %v3759_v25  ;;  %v2609_v17 = vadd.f32 1.0, %v2577_v26  ;;  %v3409_v35 = vmul.f32 0.3275911, %v3377_v6  ;;  %v3824_v39 = vmul.f32 %v3792_v57, %v8712_v51 }
 0x52e   : > { %v3119_v38 = vsub.f32 1.0, %v3087_v47  ;;  %v8746_v12 = vpop.eup %5247  ;;  %v2800_v9 = vmul.f32 %v8718_v60, %v2768_v59  ;;  %v8758_v36 = vadd.f32 %v8465_v45, %v2302_v5  ;;  %v8761_v42 = vadd.f32 %v8473_v20, %v2459_v63 }
 0x52f   : > { %v3951_v4 = vsub.f32 1.0, %v3919_v16  ;;  %v3504_v13 = vmul.f32 1.0614054, %v8746_v12  ;;  %5249 = vrcp.f32 %v2609_v17  ;;  %v3441_v1 = vadd.f32 1.0, %v3409_v35 }
 0x530   : > { %v3183_v31 = vsub.f32 0.0, %v3119_v38  ;;  %v2832_v56 = vadd.f32 -0.28449672, %v2800_v9  ;;  %5251 = vpow2.f32 %v3039_v8  ;;  %v3871_v51 = vmul.f32 1.442695, %v3824_v39 }
 0x531   : > { %v4015_v49 = vsub.f32 0.0, %v3951_v4  ;;  %v3536_v11 = vadd.f32 -1.4531521, %v3504_v13  ;;  %5253 = vrcp.f32 %v3441_v1  ;;  %v2961_v7 = vsub.f32 0.0, %v8734_v23 }
 0x532   : > { %v3215_v52 = vsel %vm3151_vm15, %v3119_v38, %v3183_v31  ;;  %v2864_v21 = vmul.f32 %v8718_v60, %v2832_v56  ;;  %v8767_v16 = vmul.f32 0.70710677, %v8758_v36  ;;  %v8776_v8 = vmul.f32 0.70710677, %v8761_v42 }
 0x533   : > { %v3279_v55 = vadd.f32 1.0, %v3215_v52  ;;  %v4047_v15 = vsel %vm3983_vm0, %v3951_v4, %v4015_v49  ;;  %v3568_v61 = vmul.f32 %v8746_v12, %v3536_v11  ;;  %v3248_v17 = vmul.f32 0.5, %v8666_v43 }
 0x534   : > { %v4111_v34 = vadd.f32 1.0, %v4047_v15  ;;  %v2896_v27 = vadd.f32 0.2548296, %v2864_v21  ;;  %v2546_v4 = vand.u32 2147483647, %v8767_v16  ;;  %5255 = vpow2.f32 %v3871_v51 }
 0x535   : > { %v3311_v3 = vmul.f32 %v3279_v55, %v3247_v40  ;;  %v3600_v54 = vadd.f32 1.4214138, %v3568_v61  ;;  %v8763_v47 = vpop.eup %5249  ;;  %v3793_v13 = vsub.f32 0.0, %v3377_v6  ;;  %v2993_v11 = vmul.f32 %v2961_v7, %v8734_v23 }
 0x536   : > { %v4143_v25 = vmul.f32 %v4111_v34, %v4079_v22  ;;  %v2928_v40 = vmul.f32 %v8718_v60, %v2896_v27  ;;  %v2673_v59 = vmul.f32 1.0614054, %v8763_v47  ;;  %v5252_v22 = vpop.eup %5251  ;;  %v2578_v49 = vmul.f32 0.3275911, %v2546_v4 }
 0x537   : > { %v3632_v38 = vmul.f32 %v8746_v12, %v3600_v54  ;;  %v8779_v52 = vpop.eup %5253  ;;  %v3378_v35 = vand.u32 2147483647, %v8776_v8  ;;  %v2962_v43 = vsub.f32 0.0, %v2546_v4  ;;  %vm3152_vm1 = vcmp.ge.f32.partialorder %v8678_v18, 0.0  ;;  %v2462_v54 = vpop.f32.mrf.mxu2 }
 0x538   : > { %v8769_v26 = vadd.f32 %v4143_v25, %v3311_v3  ;;  %v3088_v57 = vmul.f32 %v5252_v22, %v2928_v40  ;;  %v2705_v9 = vadd.f32 -1.4531521, %v2673_v59  ;;  %v3505_v63 = vmul.f32 1.0614054, %v8779_v52  ;;  %v2305_v3 = vpop.f32.mrf.mxu1 }
 0x539   : > { %v3664_v31 = vadd.f32 -0.28449672, %v3632_v38  ;;  %v2610_v55 = vadd.f32 1.0, %v2578_v49  ;;  %v3410_v34 = vmul.f32 0.3275911, %v3378_v35  ;;  %v3825_v1 = vmul.f32 %v3793_v13, %v3377_v6 }
 0x53a   : > { %10928 = vst [vmem:[#allocation107_spill] sm:$0xff] %v8769_v26  ;;  %v3120_v60 = vsub.f32 1.0, %v3088_v57  ;;  %v2737_v5 = vmul.f32 %v8763_v47, %v2705_v9  ;;  %v3537_v61 = vadd.f32 -1.4531521, %v3505_v63  ;;  %vm3984_vm2 = vcmp.ge.f32.partialorder %v8704_v46, 0.0  ;;  %v5256_v51 = vpop.eup %5255 }
 0x53b   : > { %v3696_v56 = vmul.f32 %v8746_v12, %v3664_v31  ;;  %5257 = vrcp.f32 %v2610_v55  ;;  %v3041_v25 = vmul.f32 1.442695, %v2993_v11  ;;  %v3442_v27 = vadd.f32 1.0, %v3410_v34 }
 0x53c   : > { %v3184_v15 = vsub.f32 0.0, %v3120_v60  ;;  %v2769_v21 = vadd.f32 1.4214138, %v2737_v5  ;;  %v3569_v18 = vmul.f32 %v8779_v52, %v3537_v61  ;;  %v2994_v38 = vmul.f32 %v2962_v43, %v2546_v4 }
 0x53d   : > { %v3728_v39 = vadd.f32 0.2548296, %v3696_v56  ;;  %v4080_v22 = vmul.f32 0.5, %v8694_v53  ;;  %5259 = vrcp.f32 %v3442_v27  ;;  %v8793_v6 = vadd.f32 %v8465_v45, %v2305_v3 }
 0x53e   : > { %v3216_v7 = vsel %vm3152_vm1, %v3120_v60, %v3184_v15  ;;  %v2801_v40 = vmul.f32 %v8763_v47, %v2769_v21  ;;  %v3601_v57 = vadd.f32 1.4214138, %v3569_v18  ;;  %v3873_v31 = vmul.f32 1.442695, %v3825_v1 }
 0x53f   : > { %v3760_v23 = vmul.f32 %v8746_v12, %v3728_v39  ;;  %v8796_v9 = vadd.f32 %v8473_v20, %v2462_v54  ;;  %v3280_v13 = vadd.f32 1.0, %v3216_v7  ;;  %5261 = vpow2.f32 %v3041_v25 }
 0x540   : > { %v2833_v12 = vadd.f32 -0.28449672, %v2801_v40  ;;  %v8799_v60 = vmul.f32 0.70710677, %v8793_v6  ;;  %v3633_v56 = vmul.f32 %v8779_v52, %v3601_v57  ;;  %v3043_v45 = vmul.f32 1.442695, %v2994_v38 }
 0x541   : > { %v3920_v59 = vmul.f32 %v5256_v51, %v3760_v23  ;;  %v8801_v4 = vpop.eup %5257  ;;  %v8806_v11 = vmul.f32 0.70710677, %v8796_v9  ;;  %v3794_v63 = vsub.f32 0.0, %v3378_v35  ;;  %5263 = vpow2.f32 %v3873_v31  ;;  %v2307_v51 = vpop.f32.mrf.mxu1 }
 0x542   : > { %v2865_v53 = vmul.f32 %v8763_v47, %v2833_v12  ;;  %v2674_v20 = vmul.f32 1.0614054, %v8801_v4  ;;  %v8810_v55 = vand.u32 2147483647, %v8799_v60  ;;  %v3665_v15 = vadd.f32 -0.28449672, %v3633_v56 }
 0x543   : > { %v3952_v49 = vsub.f32 1.0, %v3920_v59  ;;  %v8813_v39 = vand.u32 2147483647, %v8806_v11  ;;  %v8815_v34 = vpop.eup %5259  ;;  %v3312_v21 = vmul.f32 %v3280_v13, %v3248_v17  ;;  %v3826_v18 = vmul.f32 %v3794_v63, %v3378_v35 }
 0x544   : > { %v2897_v43 = vadd.f32 0.2548296, %v2865_v53  ;;  %v2706_v1 = vadd.f32 -1.4531521, %v2674_v20  ;;  %v2579_v3 = vmul.f32 0.3275911, %v8810_v55  ;;  %v3697_v27 = vmul.f32 %v8779_v52, %v3665_v15 }
 0x545   : > { %v4016_v5 = vsub.f32 0.0, %v3952_v49  ;;  %v3506_v54 = vmul.f32 1.0614054, %v8815_v34  ;;  %v5262_v7 = vpop.eup %5261  ;;  %v3411_v17 = vmul.f32 0.3275911, %v8813_v39  ;;  %vm3153_vm7 = vcmp.ge.f32.partialorder %v8726_v32, 0.0 }
 0x546   : > { %v2929_v25 = vmul.f32 %v8763_v47, %v2897_v43  ;;  %v2738_v40 = vmul.f32 %v8801_v4, %v2706_v1  ;;  %v2611_v38 = vadd.f32 1.0, %v2579_v3  ;;  %v3729_v12 = vadd.f32 0.2548296, %v3697_v27  ;;  %v8828_v47 = vld [vmem:[%s10131_s6] ss:$0 sm:$0xff] }
 0x547   : > { %v4048_v61 = vsel %vm3984_vm2, %v3952_v49, %v4016_v5  ;;  %v3538_v57 = vadd.f32 -1.4531521, %v3506_v54  ;;  %v3443_v13 = vadd.f32 1.0, %v3411_v17  ;;  %v8831_v49 = vadd.f32 %v8828_v47, %v2307_v51  ;;  %v5264_v53 = vpop.eup %5263 }
 0x548   : > { %v4112_v23 = vadd.f32 1.0, %v4048_v61  ;;  %v3089_v59 = vmul.f32 %v5262_v7, %v2929_v25  ;;  %v2770_v31 = vadd.f32 1.4214138, %v2738_v40  ;;  %5265 = vrcp.f32 %v2611_v38 }
 0x549   : > { %v3570_v5 = vmul.f32 %v8815_v34, %v3538_v57  ;;  %v3249_v20 = vmul.f32 0.5, %v8722_v48  ;;  %v4081_v61 = vmul.f32 0.5, %v8737_v30  ;;  %5267 = vpow2.f32 %v3043_v45 }
 0x54a   : > { %v4144_v46 = vmul.f32 %v4112_v23, %v4080_v22  ;;  %v3121_v56 = vsub.f32 1.0, %v3089_v59  ;;  %v3761_v22 = vmul.f32 %v8779_v52, %v3729_v12  ;;  %v2802_v63 = vmul.f32 %v8801_v4, %v2770_v31  ;;  %v2464_v31 = vpop.f32.mrf.mxu2 }
 0x54b   : > { %v3602_v3 = vadd.f32 1.4214138, %v3570_v5  ;;  %5269 = vrcp.f32 %v3443_v13  ;;  %v2963_v52 = vsub.f32 0.0, %v8810_v55  ;;  %v8843_v27 = vmul.f32 0.70710677, %v8831_v49 }
 0x54c   : > { %v8833_v35 = vadd.f32 %v4144_v46, %v3312_v21  ;;  %v3185_v43 = vsub.f32 0.0, %v3121_v56  ;;  %v3921_v15 = vmul.f32 %v5264_v53, %v3761_v22  ;;  %v2834_v1 = vadd.f32 -0.28449672, %v2802_v63 }
 0x54d   : > { %v3875_v21 = vmul.f32 1.442695, %v3826_v18  ;;  %vm3985_vm8 = vcmp.ge.f32.partialorder %v8744_v29, 0.0  ;;  %v3634_v30 = vmul.f32 %v8815_v34, %v3602_v3  ;;  %v3795_v7 = vsub.f32 0.0, %v8813_v39 }
 0x54e   : > { %10929 = vst [vmem:[#allocation108_spill] sm:$0xff] %v8833_v35  ;;  %v3217_v23 = vsel %vm3153_vm7, %v3121_v56, %v3185_v43  ;;  %v3953_v25 = vsub.f32 1.0, %v3921_v15  ;;  %v8845_v32 = vpop.eup %5265  ;;  %v2866_v54 = vmul.f32 %v8801_v4, %v2834_v1  ;;  %v2548_v40 = vand.u32 2147483647, %v8843_v27 }
 0x54f   : > { %v3281_v48 = vadd.f32 1.0, %v3217_v23  ;;  %v2675_v51 = vmul.f32 1.0614054, %v8845_v32  ;;  %v3250_v38 = vmul.f32 0.5, %v8758_v36  ;;  %v3666_v17 = vadd.f32 -0.28449672, %v3634_v30  ;;  %v5268_v46 = vpop.eup %5267  ;;  %v2310_v30 = vpop.f32.mrf.mxu1 }
 0x550   : > { %v4017_v45 = vsub.f32 0.0, %v3953_v25  ;;  %v2898_v18 = vadd.f32 0.2548296, %v2866_v54  ;;  %5271 = vpow2.f32 %v3875_v21  ;;  %v2995_v29 = vmul.f32 %v2963_v52, %v8810_v55  ;;  %v8865_v21 = vld [vmem:[%s10133_s8] ss:$0 sm:$0xff] }
 0x551   : > { %v2707_v12 = vadd.f32 -1.4531521, %v2675_v51  ;;  %v2580_v57 = vmul.f32 0.3275911, %v2548_v40  ;;  %v8855_v13 = vpop.eup %5269  ;;  %v3313_v53 = vmul.f32 %v3281_v48, %v3249_v20  ;;  %v3698_v5 = vmul.f32 %v8815_v34, %v3666_v17 }
 0x552   : > { %v4049_v59 = vsel %vm3985_vm8, %v3953_v25, %v4017_v45  ;;  %v2930_v22 = vmul.f32 %v8801_v4, %v2898_v18  ;;  %v3507_v36 = vmul.f32 1.0614054, %v8855_v13  ;;  %v3827_v43 = vmul.f32 %v3795_v7, %v8813_v39 }
 0x553   : > { %v4113_v56 = vadd.f32 1.0, %v4049_v59  ;;  %v2739_v63 = vmul.f32 %v8845_v32, %v2707_v12  ;;  %v2612_v15 = vadd.f32 1.0, %v2580_v57  ;;  %v3730_v55 = vadd.f32 0.2548296, %v3698_v5 }
 0x554   : > { %v3090_v3 = vmul.f32 %v5268_v46, %v2930_v22  ;;  %v8868_v20 = vadd.f32 %v8865_v21, %v2464_v31  ;;  %v3045_v23 = vmul.f32 1.442695, %v2995_v29  ;;  %v3539_v25 = vadd.f32 -1.4531521, %v3507_v36 }
 0x555   : > { %v4145_v1 = vmul.f32 %v4113_v56, %v4081_v61  ;;  %v2771_v4 = vadd.f32 1.4214138, %v2739_v63  ;;  %5273 = vrcp.f32 %v2612_v15  ;;  %v3762_v61 = vmul.f32 %v8815_v34, %v3730_v55 }
 0x556   : > { %v5272_v52 = vpop.eup %5271  ;;  %v3122_v39 = vsub.f32 1.0, %v3090_v3  ;;  %v8874_v54 = vmul.f32 0.70710677, %v8868_v20  ;;  %vm3154_vm9 = vcmp.ge.f32.partialorder %v8767_v16, 0.0  ;;  %v4082_v45 = vmul.f32 0.5, %v8761_v42 }
 0x557   : > { %v8870_v48 = vadd.f32 %v4145_v1, %v3313_v53  ;;  %v2803_v51 = vmul.f32 %v8845_v32, %v2771_v4  ;;  %v3571_v7 = vmul.f32 %v8855_v13, %v3539_v25  ;;  %v3922_v17 = vmul.f32 %v5272_v52, %v3762_v61 }
 0x558   : > { %v3186_v18 = vsub.f32 0.0, %v3122_v39  ;;  %v3877_v46 = vmul.f32 1.442695, %v3827_v43  ;;  %v2964_v59 = vsub.f32 0.0, %v2548_v40  ;;  %v8881_v34 = vand.u32 2147483647, %v8874_v54 }
 0x559   : > { %10930 = vst [vmem:[#allocation109_spill] sm:$0xff] %v8870_v48  ;;  %v2835_v12 = vadd.f32 -0.28449672, %v2803_v51  ;;  %v3603_v29 = vadd.f32 1.4214138, %v3571_v7  ;;  %v8884_v57 = vadd.f32 %v8828_v47, %v2310_v30  ;;  %v3954_v16 = vsub.f32 1.0, %v3922_v17 }
 0x55a   : > { %v3218_v31 = vsel %vm3154_vm9, %v3122_v39, %v3186_v18  ;;  %vm3986_vm10 = vcmp.ge.f32.partialorder %v8776_v8, 0.0  ;;  %5275 = vpow2.f32 %v3045_v23  ;;  %v3412_v5 = vmul.f32 0.3275911, %v8881_v34  ;;  %v2467_v18 = vpop.f32.mrf.mxu2 }
 0x55b   : > { %v8887_v42 = vpop.eup %5273  ;;  %v3282_v53 = vadd.f32 1.0, %v3218_v31  ;;  %v2867_v56 = vmul.f32 %v8845_v32, %v2835_v12  ;;  %v3635_v22 = vmul.f32 %v8855_v13, %v3603_v29  ;;  %v4018_v63 = vsub.f32 0.0, %v3954_v16 }
 0x55c   : > { %5277 = vpow2.f32 %v3877_v46  ;;  %v2676_v36 = vmul.f32 1.0614054, %v8887_v42  ;;  %v8894_v43 = vmul.f32 0.70710677, %v8884_v57  ;;  %v2996_v3 = vmul.f32 %v2964_v59, %v2548_v40 }
 0x55d   : > { %v2899_v15 = vadd.f32 0.2548296, %v2867_v56  ;;  %v3667_v1 = vadd.f32 -0.28449672, %v3635_v22  ;;  %v3444_v55 = vadd.f32 1.0, %v3412_v5  ;;  %v3314_v4 = vmul.f32 %v3282_v53, %v3250_v38 }
 0x55e   : > { %v4050_v23 = vsel %vm3986_vm10, %v3954_v16, %v4018_v63  ;;  %v2708_v25 = vadd.f32 -1.4531521, %v2676_v36  ;;  %v8899_v52 = vand.u32 2147483647, %v8894_v43  ;;  %v4236_v59 = vmul.f32 %v8209_v62, %v8209_v62 }
 0x55f   : > { %v4114_v39 = vadd.f32 1.0, %v4050_v23  ;;  %v2931_v61 = vmul.f32 %v8845_v32, %v2899_v15  ;;  %v3699_v30 = vmul.f32 %v8855_v13, %v3667_v1  ;;  %5279 = vrcp.f32 %v3444_v55 }
 0x560   : > { %v5276_v51 = vpop.eup %5275  ;;  %v2740_v7 = vmul.f32 %v8887_v42, %v2708_v25  ;;  %v2581_v40 = vmul.f32 0.3275911, %v8899_v52  ;;  %v4237_v12 = vmul.f32 %v8233_v24, %v8233_v24  ;;  %v3047_v56 = vmul.f32 1.442695, %v2996_v3 }
 0x561   : > { %v4146_v38 = vmul.f32 %v4114_v39, %v4082_v45  ;;  %v3091_v17 = vmul.f32 %v5276_v51, %v2931_v61  ;;  %v3731_v8 = vadd.f32 0.2548296, %v3699_v30  ;;  %v3251_v22 = vmul.f32 0.5, %v8793_v6 }
 0x562   : > { %v5278_v46 = vpop.eup %5277  ;;  %v2772_v32 = vadd.f32 1.4214138, %v2740_v7  ;;  %v2613_v29 = vadd.f32 1.0, %v2581_v40  ;;  %v8915_v5 = vadd.f32 %v8865_v21, %v2467_v18  ;;  %vm3155_vm11 = vcmp.ge.f32.partialorder %v8799_v60, 0.0 }
 0x563   : > { %v8909_v31 = vadd.f32 %v4146_v38, %v3314_v4  ;;  %v3123_v16 = vsub.f32 1.0, %v3091_v17  ;;  %v3763_v53 = vmul.f32 %v8855_v13, %v3731_v8  ;;  %v3796_v1 = vsub.f32 0.0, %v8881_v34  ;;  %v2312_v4 = vpop.f32.mrf.mxu1 }
 0x564   : > { %v2804_v45 = vmul.f32 %v8887_v42, %v2772_v32  ;;  %5281 = vrcp.f32 %v2613_v29  ;;  %v4238_v13 = vmul.f32 %v8257_v44, %v8257_v44  ;;  %v8925_v55 = vmul.f32 0.70710677, %v8915_v5  ;;  %v2469_v32 = vpop.f32.mrf.mxu2 }
 0x565   : > { %10931 = vst [vmem:[#allocation110_spill] sm:$0xff] %v8909_v31  ;;  %v8917_v63 = vpop.eup %5279  ;;  %v3187_v36 = vsub.f32 0.0, %v3123_v16  ;;  %v3923_v15 = vmul.f32 %v5278_v46, %v3763_v53  ;;  %v4083_v39 = vmul.f32 0.5, %v8796_v9  ;;  %5283 = vpow2.f32 %v3047_v56 }
 0x566   : > { %v2836_v3 = vadd.f32 -0.28449672, %v2804_v45  ;;  %v3508_v6 = vmul.f32 1.0614054, %v8917_v63  ;;  %v8930_v51 = vand.u32 2147483647, %v8925_v55  ;;  %v3828_v40 = vmul.f32 %v3796_v1, %v8881_v34 }
 0x567   : > { %v3219_v23 = vsel %vm3155_vm11, %v3123_v16, %v3187_v36  ;;  %v3955_v25 = vsub.f32 1.0, %v3923_v15  ;;  %v2965_v18 = vsub.f32 0.0, %v8899_v52  ;;  %v8935_v38 = vadd.f32 %v8828_v47, %v2312_v4 }
 0x568   : > { %v3283_v60 = vadd.f32 1.0, %v3219_v23  ;;  %v2868_v61 = vmul.f32 %v8887_v42, %v2836_v3  ;;  %v3540_v30 = vadd.f32 -1.4531521, %v3508_v6  ;;  %vm3987_vm12 = vcmp.ge.f32.partialorder %v8806_v11, 0.0 }
 0x569   : > { %v4019_v7 = vsub.f32 0.0, %v3955_v25  ;;  %v3413_v46 = vmul.f32 0.3275911, %v8930_v51  ;;  %v8944_v34 = vmul.f32 0.70710677, %v8935_v38  ;;  %v2997_v6 = vmul.f32 %v2965_v18, %v8899_v52 }
 0x56a   : > { %v8937_v17 = vpop.eup %5281  ;;  %v2900_v9 = vadd.f32 0.2548296, %v2868_v61  ;;  %v3572_v8 = vmul.f32 %v8917_v63, %v3540_v30  ;;  %v3315_v29 = vmul.f32 %v3283_v60, %v3251_v22  ;;  %v3879_v11 = vmul.f32 1.442695, %v3828_v40 }
 0x56b   : > { %v4051_v16 = vsel %vm3987_vm12, %v3955_v25, %v4019_v7  ;;  %v2677_v53 = vmul.f32 1.0614054, %v8937_v17  ;;  %v3445_v15 = vadd.f32 1.0, %v3413_v46  ;;  %v5284_v1 = vpop.eup %5283  ;;  %v8949_v4 = vand.u32 2147483647, %v8944_v34 }
 0x56c   : > { %v4115_v56 = vadd.f32 1.0, %v4051_v16  ;;  %v2932_v45 = vmul.f32 %v8887_v42, %v2900_v9  ;;  %v3604_v36 = vadd.f32 1.4214138, %v3572_v8  ;;  %v4195_v60 = vadd.f32 %v8233_v24, %v8209_v62 }
 0x56d   : > { %v2709_v3 = vadd.f32 -1.4531521, %v2677_v53  ;;  %5285 = vrcp.f32 %v3445_v15  ;;  %v4268_v61 = vadd.f32 %v4237_v12, %v4236_v59  ;;  %v8956_v30 = vadd.f32 %v8865_v21, %v2469_v32 }
 0x56e   : > { %v4147_v22 = vmul.f32 %v4115_v56, %v4083_v39  ;;  %v3092_v23 = vmul.f32 %v5284_v1, %v2932_v45  ;;  %v3636_v25 = vmul.f32 %v8917_v63, %v3604_v36  ;;  %v4239_v52 = vmul.f32 %v8320_v14, %v8320_v14  ;;  %v2315_v56 = vpop.f32.mrf.mxu1 }
 0x56f   : > { %v2741_v42 = vmul.f32 %v8937_v17, %v2709_v3  ;;  %v4196_v18 = vadd.f32 %v4195_v60, %v8257_v44  ;;  %5287 = vpow2.f32 %v3879_v11  ;;  %v2582_v8 = vmul.f32 0.3275911, %v8949_v4  ;;  %v2472_v11 = vpop.f32.mrf.mxu2 }
 0x570   : > { %v8960_v7 = vadd.f32 %v4147_v22, %v3315_v29  ;;  %v3124_v40 = vsub.f32 1.0, %v3092_v23  ;;  %v3668_v39 = vadd.f32 -0.28449672, %v3636_v25  ;;  %v4269_v46 = vadd.f32 %v4268_v61, %v4238_v13 }
 0x571   : > { %v2773_v9 = vadd.f32 1.4214138, %v2741_v42  ;;  %v3049_v12 = vmul.f32 1.442695, %v2997_v6  ;;  %v4197_v32 = vadd.f32 %v4196_v18, %v8320_v14  ;;  %v8968_v29 = vmul.f32 0.70710677, %v8956_v30 }
 0x572   : > { %10932 = vst [vmem:[#allocation118_spill] sm:$0xff] %v8960_v7  ;;  %v3700_v59 = vmul.f32 %v8917_v63, %v3668_v39  ;;  %v3188_v16 = vsub.f32 0.0, %v3124_v40  ;;  %v4270_v36 = vadd.f32 %v4269_v46, %v4239_v52  ;;  %v4240_v15 = vmul.f32 %v8377_v28, %v8377_v28 }
 0x573   : > { %v2805_v53 = vmul.f32 %v8937_v17, %v2773_v9  ;;  %v8970_v45 = vpop.eup %5285  ;;  %v3797_v13 = vsub.f32 0.0, %v8930_v51  ;;  %vm3156_vm13 = vcmp.ge.f32.partialorder %v8843_v27, 0.0  ;;  %v2614_v22 = vadd.f32 1.0, %v2582_v8 }
 0x574   : > { %v3732_v1 = vadd.f32 0.2548296, %v3700_v59  ;;  %v3509_v6 = vmul.f32 1.0614054, %v8970_v45  ;;  %5289 = vpow2.f32 %v3049_v12  ;;  %v8979_v25 = vand.u32 2147483647, %v8968_v29 }
 0x575   : > { %v2837_v3 = vadd.f32 -0.28449672, %v2805_v53  ;;  %v8982_v60 = vadd.f32 %v8828_v47, %v2315_v56  ;;  %v5288_v61 = vpop.eup %5287  ;;  %v3220_v42 = vsel %vm3156_vm13, %v3124_v40, %v3188_v16  ;;  %v8986_v27 = vadd.f32 %v8865_v21, %v2472_v11 }
 0x576   : > { %v3764_v23 = vmul.f32 %v8917_v63, %v3732_v1  ;;  %v3541_v39 = vadd.f32 -1.4531521, %v3509_v6  ;;  %v3829_v9 = vmul.f32 %v3797_v13, %v8930_v51  ;;  %v3414_v63 = vmul.f32 0.3275911, %v8979_v25 }
 0x577   : > { %v2869_v52 = vmul.f32 %v8937_v17, %v2837_v3  ;;  %v8991_v8 = vmul.f32 0.70710677, %v8982_v60  ;;  %v4198_v46 = vadd.f32 %v4197_v32, %v8377_v28  ;;  %5291 = vrcp.f32 %v2614_v22 }
 0x578   : > { %v3924_v18 = vmul.f32 %v5288_v61, %v3764_v23  ;;  %v3573_v12 = vmul.f32 %v8970_v45, %v3541_v39  ;;  %v4271_v40 = vadd.f32 %v4270_v36, %v4240_v15  ;;  %v3284_v16 = vadd.f32 1.0, %v3220_v42 }
 0x579   : > { %v2901_v59 = vadd.f32 0.2548296, %v2869_v52  ;;  %v3446_v56 = vadd.f32 1.0, %v3414_v63  ;;  %v8997_v51 = vand.u32 2147483647, %v8991_v8  ;;  %v4241_v32 = vmul.f32 %v8415_v41, %v8415_v41 }
 0x57a   : > { %v3956_v53 = vsub.f32 1.0, %v3924_v18  ;;  %v3605_v11 = vadd.f32 1.4214138, %v3573_v12  ;;  %v9000_v13 = vmul.f32 0.70710677, %v8986_v27  ;;  %v5290_v3 = vpop.eup %5289  ;;  %v3252_v6 = vmul.f32 0.5, %v8831_v49 }
 0x57b   : > { %v2933_v1 = vmul.f32 %v8937_v17, %v2901_v59  ;;  %v3881_v36 = vmul.f32 1.442695, %v3829_v9  ;;  %vm3988_vm14 = vcmp.ge.f32.partialorder %v8874_v54, 0.0  ;;  %v4084_v15 = vmul.f32 0.5, %v8868_v20 }
 0x57c   : > { %v4020_v22 = vsub.f32 0.0, %v3956_v53  ;;  %v3637_v23 = vmul.f32 %v8970_v45, %v3605_v11  ;;  %v3316_v61 = vmul.f32 %v3284_v16, %v3252_v6  ;;  %5293 = vrcp.f32 %v3446_v56 }
 0x57d   : > { %v3093_v17 = vmul.f32 %v5290_v3, %v2933_v1  ;;  %v2583_v52 = vmul.f32 0.3275911, %v8997_v51  ;;  %v9009_v39 = vpop.eup %5291  ;;  %v9012_v49 = vand.u32 2147483647, %v9000_v13  ;;  %v4199_v54 = vadd.f32 %v4198_v46, %v8415_v41 }
 0x57e   : > { %v4052_v42 = vsel %vm3988_vm14, %v3956_v53, %v4020_v22  ;;  %v3669_v59 = vadd.f32 -0.28449672, %v3637_v23  ;;  %v4242_v20 = vmul.f32 %v8442_v58, %v8442_v58  ;;  %5295 = vpow2.f32 %v3881_v36  ;;  %v2317_v23 = vpop.f32.mrf.mxu1 }
 0x57f   : > { %v4116_v18 = vadd.f32 1.0, %v4052_v42  ;;  %v3125_v63 = vsub.f32 1.0, %v3093_v17  ;;  %v4272_v9 = vadd.f32 %v4271_v40, %v4241_v32  ;;  %v4200_v53 = vadd.f32 %v4199_v54, %v8442_v58 }
 0x580   : > { %v3701_v16 = vmul.f32 %v8970_v45, %v3669_v59  ;;  %v4243_v56 = vmul.f32 %v8500_v10, %v8500_v10  ;;  %v2678_v1 = vmul.f32 1.0614054, %v9009_v39  ;;  %v2615_v11 = vadd.f32 1.0, %v2583_v52  ;;  %v2474_v52 = vpop.f32.mrf.mxu2 }
 0x581   : > { %v4148_v12 = vmul.f32 %v4116_v18, %v4084_v15  ;;  %v3189_v6 = vsub.f32 0.0, %v3125_v63  ;;  %v3415_v22 = vmul.f32 0.3275911, %v9012_v49  ;;  %v4273_v40 = vadd.f32 %v4272_v9, %v4242_v20 }
 0x582   : > { %v3733_v46 = vadd.f32 0.2548296, %v3701_v16  ;;  %v9025_v17 = vpop.eup %5293  ;;  %v4201_v32 = vadd.f32 %v4200_v53, %v8500_v10  ;;  %v4244_v36 = vmul.f32 %v8548_v0, %v8548_v0  ;;  %vm3157_vm3 = vcmp.ge.f32.partialorder %v8894_v43, 0.0 }
 0x583   : > { %v9022_v3 = vadd.f32 %v4148_v12, %v3316_v61  ;;  %v4274_v18 = vadd.f32 %v4273_v40, %v4243_v56  ;;  %v2710_v61 = vadd.f32 -1.4531521, %v2678_v1  ;;  %5297 = vrcp.f32 %v2615_v11 }
 0x584   : > { %v3765_v15 = vmul.f32 %v8970_v45, %v3733_v46  ;;  %v5296_v42 = vpop.eup %5295  ;;  %v3221_v59 = vsel %vm3157_vm3, %v3125_v63, %v3189_v6  ;;  %v3510_v12 = vmul.f32 1.0614054, %v9025_v17  ;;  %v3447_v20 = vadd.f32 1.0, %v3415_v22 }
 0x585   : > { %10933 = vst [vmem:[#allocation120_spill] sm:$0xff] %v9022_v3  ;;  %v4202_v9 = vadd.f32 %v4201_v32, %v8548_v0  ;;  %v9035_v16 = vadd.f32 %v8828_v47, %v2317_v23  ;;  %v4275_v53 = vadd.f32 %v4274_v18, %v4244_v36  ;;  %v4245_v45 = vmul.f32 %v8567_v37, %v8567_v37 }
 0x586   : > { %v3925_v54 = vmul.f32 %v5296_v42, %v3765_v15  ;;  %v9040_v43 = vadd.f32 %v8865_v21, %v2474_v52  ;;  %v3285_v63 = vadd.f32 1.0, %v3221_v59  ;;  %v2742_v11 = vmul.f32 %v9009_v39, %v2710_v61  ;;  %v2320_v58 = vpop.f32.mrf.mxu1 }
 0x587   : > { %v4203_v1 = vadd.f32 %v4202_v9, %v8567_v37  ;;  %v9045_v6 = vmul.f32 0.70710677, %v9035_v16  ;;  %v3542_v22 = vadd.f32 -1.4531521, %v3510_v12  ;;  %5299 = vrcp.f32 %v3447_v20 }
 0x588   : > { %v3957_v56 = vsub.f32 1.0, %v3925_v54  ;;  %v9048_v40 = vmul.f32 0.70710677, %v9040_v43  ;;  %v4246_v36 = vmul.f32 %v8616_v2, %v8616_v2  ;;  %v3253_v15 = vmul.f32 0.5, %v8884_v57 }
 0x589   : > { %v9050_v32 = vpop.eup %5297  ;;  %vm3989_vm4 = vcmp.ge.f32.partialorder %v8925_v55, 0.0  ;;  %v9057_v23 = vand.u32 2147483647, %v9045_v6  ;;  %v4276_v42 = vadd.f32 %v4275_v53, %v4245_v45  ;;  %v4247_v18 = vmul.f32 %v8668_v19, %v8668_v19 }
 0x58a   : > { %v4021_v46 = vsub.f32 0.0, %v3957_v56  ;;  %v9062_v52 = vand.u32 2147483647, %v9048_v40  ;;  %v3317_v59 = vmul.f32 %v3285_v63, %v3253_v15  ;;  %v4085_v54 = vmul.f32 0.5, %v8915_v5 }
 0x58b   : > { %v2584_v20 = vmul.f32 0.3275911, %v9057_v23  ;;  %v4204_v57 = vadd.f32 %v4203_v1, %v8616_v2  ;;  %v2774_v55 = vadd.f32 1.4214138, %v2742_v11  ;;  %v3574_v9 = vmul.f32 %v9025_v17, %v3542_v22 }
 0x58c   : > { %v4053_v61 = vsel %vm3989_vm4, %v3957_v56, %v4021_v46  ;;  %v3416_v53 = vmul.f32 0.3275911, %v9062_v52  ;;  %v4277_v45 = vadd.f32 %v4276_v42, %v4246_v36  ;;  %v2679_v56 = vmul.f32 1.0614054, %v9050_v32 }
 0x58d   : > { %v4117_v12 = vadd.f32 1.0, %v4053_v61  ;;  %v2616_v46 = vadd.f32 1.0, %v2584_v20  ;;  %v9070_v37 = vpop.eup %5299  ;;  %v4205_v5 = vadd.f32 %v4204_v57, %v8668_v19  ;;  %v4248_v1 = vmul.f32 %v8701_v50, %v8701_v50 }
 0x58e   : > { %v3448_v63 = vadd.f32 1.0, %v3416_v53  ;;  %v4278_v15 = vadd.f32 %v4277_v45, %v4247_v18  ;;  %v2966_v22 = vsub.f32 0.0, %v8949_v4  ;;  %v2806_v36 = vmul.f32 %v9009_v39, %v2774_v55 }
 0x58f   : > { %v4149_v10 = vmul.f32 %v4117_v12, %v4085_v54  ;;  %v3606_v42 = vadd.f32 1.4214138, %v3574_v9  ;;  %5301 = vrcp.f32 %v2616_v46  ;;  %v9080_v61 = vadd.f32 %v8828_v47, %v2320_v58 }
 0x590   : > { %v4206_v54 = vadd.f32 %v4205_v5, %v8701_v50  ;;  %v2711_v12 = vadd.f32 -1.4531521, %v2679_v56  ;;  %v3511_v20 = vmul.f32 1.0614054, %v9070_v37  ;;  %5303 = vrcp.f32 %v3448_v63 }
 0x591   : > { %v9075_v11 = vadd.f32 %v4149_v10, %v3317_v59  ;;  %v4249_v18 = vmul.f32 %v8728_v33, %v8728_v33  ;;  %v2477_v10 = vpop.f32.mrf.mxu2  ;;  %v4279_v59 = vadd.f32 %v4278_v15, %v4248_v1  ;;  %v4250_v55 = vmul.f32 %v8769_v26, %v8769_v26 }
 0x592   : > { %v4207_v57 = vadd.f32 %v4206_v54, %v8728_v33  ;;  %v2838_v9 = vadd.f32 -0.28449672, %v2806_v36  ;;  %v2998_v58 = vmul.f32 %v2966_v22, %v8949_v4  ;;  %v3638_v53 = vmul.f32 %v9025_v17, %v3606_v42 }
 0x593   : > { %10934 = vst [vmem:[#allocation122_spill] sm:$0xff] %v9075_v11  ;;  %v9092_v45 = vmul.f32 0.70710677, %v9080_v61  ;;  %v3798_v56 = vsub.f32 0.0, %v8979_v25  ;;  %v2743_v46 = vmul.f32 %v9050_v32, %v2711_v12  ;;  %v3543_v5 = vadd.f32 -1.4531521, %v3511_v20 }
 0x594   : > { %v9097_v63 = vadd.f32 %v8865_v21, %v2477_v10  ;;  %v4280_v1 = vadd.f32 %v4279_v59, %v4249_v18  ;;  %v4208_v22 = vadd.f32 %v4207_v57, %v8769_v26  ;;  %v4251_v42 = vmul.f32 %v8833_v35, %v8833_v35 }
 0x595   : > { %v9099_v15 = vpop.eup %5301  ;;  %v9102_v36 = vand.u32 2147483647, %v9092_v45  ;;  %v2870_v20 = vmul.f32 %v9009_v39, %v2838_v9  ;;  %v3051_v10 = vmul.f32 1.442695, %v2998_v58  ;;  %v3670_v33 = vadd.f32 -0.28449672, %v3638_v53 }
 0x596   : > { %v9104_v4 = vpop.eup %5303  ;;  %v9110_v54 = vmul.f32 0.70710677, %v9097_v63  ;;  %v4281_v12 = vadd.f32 %v4280_v1, %v4250_v55  ;;  %v3830_v18 = vmul.f32 %v3798_v56, %v8979_v25  ;;  %v2775_v59 = vadd.f32 1.4214138, %v2743_v46 }
 0x597   : > { %v3575_v50 = vmul.f32 %v9070_v37, %v3543_v5  ;;  %v2585_v19 = vmul.f32 0.3275911, %v9102_v36  ;;  %v4209_v57 = vadd.f32 %v4208_v22, %v8833_v35  ;;  %v4252_v26 = vmul.f32 %v8870_v48, %v8870_v48  ;;  %v2322_v5 = vpop.f32.mrf.mxu1 }
 0x598   : > { %v2680_v2 = vmul.f32 1.0614054, %v9099_v15  ;;  %v3512_v55 = vmul.f32 1.0614054, %v9104_v4  ;;  %v4282_v1 = vadd.f32 %v4281_v12, %v4251_v42  ;;  %v2967_v9 = vsub.f32 0.0, %v8997_v51 }
 0x599   : > { %v2617_v58 = vadd.f32 1.0, %v2585_v19  ;;  %v9123_v25 = vand.u32 2147483647, %v9110_v54  ;;  %v4253_v53 = vmul.f32 %v8909_v31, %v8909_v31  ;;  %v2902_v56 = vadd.f32 0.2548296, %v2870_v20 }
 0x59a   : > { %5305 = vpow2.f32 %v3051_v10  ;;  %v3702_v46 = vmul.f32 %v9025_v17, %v3670_v33  ;;  %v3883_v22 = vmul.f32 1.442695, %v3830_v18  ;;  %v2807_v35 = vmul.f32 %v9050_v32, %v2775_v59 }
 0x59b   : > { %v3607_v0 = vadd.f32 1.4214138, %v3575_v50  ;;  %v3417_v42 = vmul.f32 0.3275911, %v9123_v25  ;;  %v4210_v12 = vadd.f32 %v4209_v57, %v8870_v48  ;;  %v4283_v19 = vadd.f32 %v4282_v1, %v4252_v26 }
 0x59c   : > { %v2712_v41 = vadd.f32 -1.4531521, %v2680_v2  ;;  %v3544_v28 = vadd.f32 -1.4531521, %v3512_v55  ;;  %v2999_v14 = vmul.f32 %v2967_v9, %v8997_v51  ;;  %5307 = vrcp.f32 %v2617_v58 }
 0x59d   : > { %v3449_v44 = vadd.f32 1.0, %v3417_v42  ;;  %v9133_v20 = vadd.f32 %v8828_v47, %v2322_v5  ;;  %v4211_v33 = vadd.f32 %v4210_v12, %v8909_v31  ;;  %v4254_v10 = vmul.f32 %v8960_v7, %v8960_v7 }
 0x59e   : > { %v2934_v50 = vmul.f32 %v9009_v39, %v2902_v56  ;;  %v3734_v18 = vadd.f32 0.2548296, %v3702_v46  ;;  %v4284_v59 = vadd.f32 %v4283_v19, %v4253_v53  ;;  %5309 = vpow2.f32 %v3883_v22  ;;  %v2479_v53 = vpop.f32.mrf.mxu2 }
 0x59f   : > { %v2839_v26 = vadd.f32 -0.28449672, %v2807_v35  ;;  %v3639_v2 = vmul.f32 %v9070_v37, %v3607_v0  ;;  %v3799_v51 = vsub.f32 0.0, %v9012_v49  ;;  %v2744_v55 = vmul.f32 %v9099_v15, %v2712_v41 }
 0x5a0   : > { %v5306_v57 = vpop.eup %5305  ;;  %v3576_v1 = vmul.f32 %v9104_v4, %v3544_v28  ;;  %5311 = vrcp.f32 %v3449_v44  ;;  %v9144_v9 = vmul.f32 0.5, %v8935_v38  ;;  %v3053_v58 = vmul.f32 1.442695, %v2999_v14 }
 0x5a1   : > { %v9147_v39 = vmul.f32 0.70710677, %v9133_v20  ;;  %v4212_v35 = vadd.f32 %v4211_v33, %v8960_v7  ;;  %v4285_v56 = vadd.f32 %v4284_v59, %v4254_v10  ;;  %v3094_v0 = vmul.f32 %v5306_v57, %v2934_v50  ;;  %v2325_v7 = vpop.f32.mrf.mxu1 }
 0x5a2   : > { %v3766_v46 = vmul.f32 %v9025_v17, %v3734_v18  ;;  %v9151_v5 = vpop.eup %5307  ;;  %v9154_v41 = vmul.f32 0.5, %v8956_v30  ;;  %v2871_v44 = vmul.f32 %v9050_v32, %v2839_v26  ;;  %v3671_v28 = vadd.f32 -0.28449672, %v3639_v2 }
 0x5a3   : > { %v9158_v14 = vand.u32 2147483647, %v9147_v39  ;;  %v3831_v38 = vmul.f32 %v3799_v51, %v9012_v49  ;;  %v2776_v22 = vadd.f32 1.4214138, %v2744_v55  ;;  %v3608_v42 = vadd.f32 1.4214138, %v3576_v1 }
 0x5a4   : > { %v9162_v12 = vadd.f32 %v8865_v21, %v2479_v53  ;;  %v5310_v19 = vpop.eup %5309  ;;  %v4255_v17 = vmul.f32 %v9022_v3, %v9022_v3  ;;  %vm3158_vm5 = vcmp.ge.f32.partialorder %v8944_v34, 0.0  ;;  %5313 = vpow2.f32 %v3053_v58 }
 0x5a5   : > { %v9168_v30 = vmul.f32 0.5, %v8982_v60  ;;  %v2586_v33 = vmul.f32 0.3275911, %v9158_v14  ;;  %v3126_v49 = vsub.f32 1.0, %v3094_v0  ;;  %v3926_v50 = vmul.f32 %v5310_v19, %v3766_v46 }
 0x5a6   : > { %v9171_v10 = vpop.eup %5311  ;;  %v2681_v18 = vmul.f32 1.0614054, %v9151_v5  ;;  %v9175_v59 = vmul.f32 0.70710677, %v9162_v12  ;;  %v2903_v26 = vadd.f32 0.2548296, %v2871_v44  ;;  %v3703_v2 = vmul.f32 %v9070_v37, %v3671_v28 }
 0x5a7   : > { %v2968_v57 = vsub.f32 0.0, %v9057_v23  ;;  %v2618_v51 = vadd.f32 1.0, %v2586_v33  ;;  %v9180_v60 = vadd.f32 %v4212_v35, %v9022_v3  ;;  %v3885_v55 = vmul.f32 1.442695, %v3831_v38 }
 0x5a8   : > { %v2808_v1 = vmul.f32 %v9099_v15, %v2776_v22  ;;  %v3640_v58 = vmul.f32 %v9104_v4, %v3608_v42  ;;  %vm3990_vm6 = vcmp.ge.f32.partialorder %v8968_v29, 0.0  ;;  %v3800_v53 = vsub.f32 0.0, %v9062_v52 }
 0x5a9   : > { %v3513_v0 = vmul.f32 1.0614054, %v9171_v10  ;;  %5315 = vrcp.f32 %v2618_v51  ;;  %v9188_v46 = vand.u32 2147483647, %v9175_v59  ;;  %v9190_v44 = vadd.f32 %v4285_v56, %v4255_v17 }
 0x5aa   : > { %v3190_v28 = vsub.f32 0.0, %v3126_v49  ;;  %v3958_v35 = vsub.f32 1.0, %v3926_v50  ;;  %v2713_v19 = vadd.f32 -1.4531521, %v2681_v18  ;;  %v5314_v38 = vpop.eup %5313  ;;  %v2935_v22 = vmul.f32 %v9050_v32, %v2903_v26  ;;  %v2482_v32 = vpop.f32.mrf.mxu2 }
 0x5ab   : > { %v3735_v33 = vadd.f32 0.2548296, %v3703_v2  ;;  %v3000_v42 = vmul.f32 %v2968_v57, %v9057_v23  ;;  %v3418_v3 = vmul.f32 0.3275911, %v9188_v46  ;;  %5317 = vpow2.f32 %v3885_v55 }
 0x5ac   : > { %v9196_v51 = vmul.f32 0.5, %v8986_v27  ;;  %v2840_v31 = vadd.f32 -0.28449672, %v2808_v1  ;;  %v3672_v48 = vadd.f32 -0.28449672, %v3640_v58  ;;  %v9199_v56 = vmul.f32 0.5, %v9035_v16 }
 0x5ad   : > { %v3832_v17 = vmul.f32 %v3800_v53, %v9062_v52  ;;  %v3545_v50 = vadd.f32 -1.4531521, %v3513_v0  ;;  %v3450_v18 = vadd.f32 1.0, %v3418_v3  ;;  %v3222_v23 = vsel %vm3158_vm5, %v3126_v49, %v3190_v28 }
 0x5ae   : > { %v4022_v26 = vsub.f32 0.0, %v3958_v35  ;;  %v2745_v2 = vmul.f32 %v9151_v5, %v2713_v19  ;;  %v9206_v57 = vadd.f32 %v8828_v47, %v2325_v7  ;;  %v3095_v55 = vmul.f32 %v5314_v38, %v2935_v22 }
 0x5af   : > { %v9208_v27 = vpop.eup %5315  ;;  %v3767_v16 = vmul.f32 %v9070_v37, %v3735_v33  ;;  %v3055_v1 = vmul.f32 1.442695, %v3000_v42  ;;  %5319 = vrcp.f32 %v3450_v18  ;;  %v2872_v52 = vmul.f32 %v9099_v15, %v2840_v31 }
 0x5b0   : > { %v3704_v3 = vmul.f32 %v9104_v4, %v3672_v48  ;;  %v2682_v34 = vmul.f32 1.0614054, %v9208_v27  ;;  %v9215_v49 = vadd.f32 %v8865_v21, %v2482_v32  ;;  %v3887_v58 = vmul.f32 1.442695, %v3832_v17 }
 0x5b1   : > { %v9218_v47 = vmul.f32 0.5, %v9040_v43  ;;  %v3577_v7 = vmul.f32 %v9171_v10, %v3545_v50  ;;  %v9222_v53 = vmul.f32 0.70710677, %v9206_v57  ;;  %v5318_v37 = vpop.eup %5317  ;;  %v3286_v0 = vadd.f32 1.0, %v3222_v23 }
 0x5b2   : > { %v4054_v31 = vsel %vm3990_vm6, %v3958_v35, %v4022_v26  ;;  %v2777_v48 = vadd.f32 1.4214138, %v2745_v2  ;;  %v9227_v28 = vmul.f32 0.70710677, %v9215_v49  ;;  %v3127_v19 = vsub.f32 1.0, %v3095_v55 }
 0x5b3   : > { %vm3159_vm15 = vcmp.ge.f32.partialorder %v8991_v8, 0.0  ;;  %v3927_v38 = vmul.f32 %v5318_v37, %v3767_v16  ;;  %v2714_v43 = vadd.f32 -1.4531521, %v2682_v34  ;;  %v9231_v22 = vand.u32 2147483647, %v9222_v53  ;;  %v2484_v8 = vpop.f32.mrf.mxu2 }
 0x5b4   : > { %10935 = vst [vmem:[#allocation114_spill] sm:$0xff] %v9227_v28  ;;  %v2904_v33 = vadd.f32 0.2548296, %v2872_v52  ;;  %5321 = vpow2.f32 %v3055_v1  ;;  %v3736_v42 = vadd.f32 0.2548296, %v3704_v3  ;;  %v4256_v35 = vmul.f32 %v9075_v11, %v9075_v11 }
 0x5b5   : > { %v9234_v17 = vand.u32 2147483647, %v9227_v28  ;;  %v9236_v29 = vpop.eup %5319  ;;  %5323 = vpow2.f32 %v3887_v58  ;;  %v3609_v50 = vadd.f32 1.4214138, %v3577_v7  ;;  %v2587_v18 = vmul.f32 0.3275911, %v9231_v22 }
 0x5b6   : > { %v4118_v32 = vadd.f32 1.0, %v4054_v31  ;;  %vm3991_vm0 = vcmp.ge.f32.partialorder %v9000_v13, 0.0  ;;  %v2809_v23 = vmul.f32 %v9151_v5, %v2777_v48  ;;  %v2969_v26 = vsub.f32 0.0, %v9102_v36 }
 0x5b7   : > { %v3514_v2 = vmul.f32 1.0614054, %v9236_v29  ;;  %v3959_v55 = vsub.f32 1.0, %v3927_v38  ;;  %v2746_v16 = vmul.f32 %v9208_v27, %v2714_v43  ;;  %v2619_v1 = vadd.f32 1.0, %v2587_v18  ;;  %v2327_v38 = vpop.f32.mrf.mxu1 }
 0x5b8   : > { %v3419_v52 = vmul.f32 0.3275911, %v9234_v17  ;;  %v3191_v3 = vsub.f32 0.0, %v3127_v19  ;;  %v2936_v34 = vmul.f32 %v9099_v15, %v2904_v33  ;;  %v3768_v58 = vmul.f32 %v9104_v4, %v3736_v42 }
 0x5b9   : > { %v3546_v7 = vadd.f32 -1.4531521, %v3514_v2  ;;  %v4214_v37 = vadd.f32 %v9180_v60, %v9075_v11  ;;  %v3641_v31 = vmul.f32 %v9171_v10, %v3609_v50  ;;  %v3801_v48 = vsub.f32 0.0, %v9123_v25 }
 0x5ba   : > { %5325 = vrcp.f32 %v2619_v1  ;;  %v5322_v24 = vpop.eup %5321  ;;  %v3318_v43 = vmul.f32 %v3286_v0, %v9144_v9  ;;  %v2841_v18 = vadd.f32 -0.28449672, %v2809_v23  ;;  %v3451_v28 = vadd.f32 1.0, %v3419_v52 }
 0x5bb   : > { %v3578_v62 = vmul.f32 %v9236_v29, %v3546_v7  ;;  %v5324_v15 = vpop.eup %5323  ;;  %v4287_v4 = vadd.f32 %v9190_v44, %v4256_v35  ;;  %v4023_v33 = vsub.f32 0.0, %v3959_v55  ;;  %v3001_v42 = vmul.f32 %v2969_v26, %v9102_v36  ;;  %v9270_v36 = vld [vmem:[%s10131_s6] ss:$0 sm:$0xff] }
 0x5bc   : > { %v2778_v60 = vadd.f32 1.4214138, %v2746_v16  ;;  %v4150_v50 = vmul.f32 %v4118_v32, %v9154_v41  ;;  %v3223_v2 = vsel %vm3159_vm15, %v3127_v19, %v3191_v3  ;;  %v3096_v1 = vmul.f32 %v5322_v24, %v2936_v34 }
 0x5bd   : > { %v3928_v11 = vmul.f32 %v5324_v15, %v3768_v58  ;;  %v9261_v9 = vmul.f32 0.5, %v9080_v61  ;;  %v3673_v0 = vadd.f32 -0.28449672, %v3641_v31  ;;  %v3833_v23 = vmul.f32 %v3801_v48, %v9123_v25 }
 0x5be   : > { %v3610_v52 = vadd.f32 1.4214138, %v3578_v62  ;;  %v9264_v7 = vadd.f32 %v4150_v50, %v3318_v43  ;;  %v2873_v44 = vmul.f32 %v9151_v5, %v2841_v18  ;;  %5327 = vrcp.f32 %v3451_v28 }
 0x5bf   : > { %v9273_v24 = vadd.f32 %v9270_v36, %v2327_v38  ;;  %v3287_v41 = vadd.f32 1.0, %v3223_v2  ;;  %v4055_v62 = vsel %vm3991_vm0, %v3959_v55, %v4023_v33  ;;  %vm3160_vm1 = vcmp.ge.f32.partialorder %v9045_v6, 0.0  ;;  %v2330_v18 = vpop.f32.mrf.mxu1 }
 0x5c0   : > { %10936 = vst [vmem:[#allocation115_spill] sm:$0xff] %v9264_v7  ;;  %v9275_v61 = vpop.eup %5325  ;;  %v3057_v25 = vmul.f32 1.442695, %v3001_v42  ;;  %v2810_v28 = vmul.f32 %v9208_v27, %v2778_v60  ;;  %v3128_v19 = vsub.f32 1.0, %v3096_v1  ;;  %v3960_v35 = vsub.f32 1.0, %v3928_v11 }
 0x5c1   : > { %vm3992_vm2 = vcmp.ge.f32.partialorder %v9048_v40, 0.0  ;;  %v2970_v32 = vsub.f32 0.0, %v9158_v14  ;;  %v2683_v26 = vmul.f32 1.0614054, %v9275_v61  ;;  %v3705_v16 = vmul.f32 %v9171_v10, %v3673_v0 }
 0x5c2   : > { %v3889_v3 = vmul.f32 1.442695, %v3833_v23  ;;  %v3642_v34 = vmul.f32 %v9236_v29, %v3610_v52  ;;  %v9287_v13 = vadd.f32 %v8865_v21, %v2484_v8  ;;  %v9290_v55 = vadd.f32 %v4214_v37, %v9264_v7 }
 0x5c3   : > { %v2905_v58 = vadd.f32 0.2548296, %v2873_v44  ;;  %v3802_v11 = vsub.f32 0.0, %v9188_v46  ;;  %v9294_v31 = vmul.f32 0.70710677, %v9273_v24  ;;  %v4257_v48 = vmul.f32 %v9264_v7, %v9264_v7 }
 0x5c4   : > { %v4119_v38 = vadd.f32 1.0, %v4055_v62  ;;  %5329 = vpow2.f32 %v3057_v25  ;;  %v2842_v43 = vadd.f32 -0.28449672, %v2810_v28  ;;  %v9298_v15 = vpop.eup %5327  ;;  %v3192_v21 = vsub.f32 0.0, %v3128_v19 }
 0x5c5   : > { %v4024_v33 = vsub.f32 0.0, %v3960_v35  ;;  %v3002_v37 = vmul.f32 %v2970_v32, %v9158_v14  ;;  %v2715_v42 = vadd.f32 -1.4531521, %v2683_v26  ;;  %v3737_v60 = vadd.f32 0.2548296, %v3705_v16 }
 0x5c6   : > { %5331 = vpow2.f32 %v3889_v3  ;;  %v3674_v50 = vadd.f32 -0.28449672, %v3642_v34  ;;  %v9302_v2 = vmul.f32 0.70710677, %v9287_v13  ;;  %v2937_v1 = vmul.f32 %v9151_v5, %v2905_v58 }
 0x5c7   : > { %v3834_v0 = vmul.f32 %v3802_v11, %v9188_v46  ;;  %v9307_v23 = vand.u32 2147483647, %v9294_v31  ;;  %v9310_v52 = vadd.f32 %v9270_v36, %v2330_v18  ;;  %v9312_v44 = vadd.f32 %v4287_v4, %v4257_v48 }
 0x5c8   : > { %v3319_v14 = vmul.f32 %v3287_v41, %v9168_v30  ;;  %v2874_v8 = vmul.f32 %v9208_v27, %v2842_v43  ;;  %v3515_v62 = vmul.f32 1.0614054, %v9298_v15  ;;  %v4151_v25 = vmul.f32 %v4119_v38, %v9196_v51 }
 0x5c9   : > { %v3224_v5 = vsel %vm3160_vm1, %v3128_v19, %v3192_v21  ;;  %v3059_v46 = vmul.f32 1.442695, %v3002_v37  ;;  %v2747_v28 = vmul.f32 %v9275_v61, %v2715_v42  ;;  %v4056_v26 = vsel %vm3992_vm2, %v3960_v35, %v4024_v33  ;;  %v2487_v19 = vpop.f32.mrf.mxu2  ;;  %v9342_v33 = vld [vmem:[%s10133_s8] ss:$0 sm:$0xff] }
 0x5ca   : > { %v5330_v32 = vpop.eup %5329  ;;  %v3769_v4 = vmul.f32 %v9171_v10, %v3737_v60  ;;  %v3706_v30 = vmul.f32 %v9236_v29, %v3674_v50  ;;  %v9326_v41 = vand.u32 2147483647, %v9302_v2  ;;  %v3891_v3 = vmul.f32 1.442695, %v3834_v0 }
 0x5cb   : > { %v3097_v16 = vmul.f32 %v5330_v32, %v2937_v1  ;;  %v2588_v51 = vmul.f32 0.3275911, %v9307_v23  ;;  %v9330_v6 = vmul.f32 0.70710677, %v9310_v52  ;;  %v9332_v58 = vadd.f32 %v4151_v25, %v3319_v14 }
 0x5cc   : > { %v5332_v34 = vpop.eup %5331  ;;  %v3288_v40 = vadd.f32 1.0, %v3224_v5  ;;  %v2906_v35 = vadd.f32 0.2548296, %v2874_v8  ;;  %v3547_v11 = vadd.f32 -1.4531521, %v3515_v62  ;;  %v4120_v10 = vadd.f32 1.0, %v4056_v26 }
 0x5cd   : > { %10937 = vst [vmem:[#allocation119_spill] sm:$0xff] %v9332_v58  ;;  %5333 = vpow2.f32 %v3059_v46  ;;  %v2779_v48 = vadd.f32 1.4214138, %v2747_v28  ;;  %v9335_v38 = vand.u32 2147483647, %v9330_v6  ;;  %vm3161_vm7 = vcmp.ge.f32.partialorder %v9092_v45, 0.0 }
 0x5ce   : > { %v3929_v43 = vmul.f32 %v5332_v34, %v3769_v4  ;;  %v3738_v18 = vadd.f32 0.2548296, %v3706_v30  ;;  %v3420_v21 = vmul.f32 0.3275911, %v9326_v41  ;;  %v9345_v37 = vadd.f32 %v9342_v33, %v2487_v19 }
 0x5cf   : > { %v3129_v42 = vsub.f32 1.0, %v3097_v16  ;;  %v9348_v60 = vmul.f32 0.5, %v9097_v63  ;;  %5335 = vpow2.f32 %v3891_v3  ;;  %v2620_v50 = vadd.f32 1.0, %v2588_v51 }
 0x5d0   : > { %v4258_v1 = vmul.f32 %v9332_v58, %v9332_v58  ;;  %v3320_v0 = vmul.f32 %v3288_v40, %v9199_v56  ;;  %v2938_v14 = vmul.f32 %v9208_v27, %v2906_v35  ;;  %v3579_v8 = vmul.f32 %v9298_v15, %v3547_v11 }
 0x5d1   : > { %vm3993_vm8 = vcmp.ge.f32.partialorder %v9110_v54, 0.0  ;;  %v2811_v62 = vmul.f32 %v9275_v61, %v2779_v48  ;;  %v2971_v25 = vsub.f32 0.0, %v9231_v22  ;;  %v2589_v63 = vmul.f32 0.3275911, %v9335_v38  ;;  %v2489_v54 = vpop.f32.mrf.mxu2 }
 0x5d2   : > { %v9360_v5 = vmul.f32 0.70710677, %v9345_v37  ;;  %v4152_v46 = vmul.f32 %v4120_v10, %v9218_v47  ;;  %v3961_v28 = vsub.f32 1.0, %v3929_v43  ;;  %v3770_v56 = vmul.f32 %v9236_v29, %v3738_v18  ;;  %v2332_v47 = vpop.f32.mrf.mxu1 }
 0x5d3   : > { %v3452_v32 = vadd.f32 1.0, %v3420_v21  ;;  %v5334_v27 = vpop.eup %5333  ;;  %v3193_v26 = vsub.f32 0.0, %v3129_v42  ;;  %v3803_v4 = vsub.f32 0.0, %v9234_v17  ;;  %5337 = vrcp.f32 %v2620_v50 }
 0x5d4   : > { %v9366_v30 = vand.u32 2147483647, %v9360_v5  ;;  %v9368_v16 = vadd.f32 %v4152_v46, %v3320_v0  ;;  %v3098_v3 = vmul.f32 %v5334_v27, %v2938_v14  ;;  %v9371_v51 = vmul.f32 0.5, %v9133_v20 }
 0x5d5   : > { %v3611_v19 = vadd.f32 1.4214138, %v3579_v8  ;;  %v5336_v34 = vpop.eup %5335  ;;  %v2843_v40 = vadd.f32 -0.28449672, %v2811_v62  ;;  %v3003_v29 = vmul.f32 %v2971_v25, %v9231_v22  ;;  %v2621_v35 = vadd.f32 1.0, %v2589_v63 }
 0x5d6   : > { %10938 = vst [vmem:[#allocation124_spill] sm:$0xff] %v9368_v16  ;;  %v3421_v11 = vmul.f32 0.3275911, %v9366_v30  ;;  %v4216_v10 = vadd.f32 %v9290_v55, %v9332_v58  ;;  %v4025_v48 = vsub.f32 0.0, %v3961_v28  ;;  %v3930_v43 = vmul.f32 %v5336_v34, %v3770_v56 }
 0x5d7   : > { %5339 = vrcp.f32 %v3452_v32  ;;  %v4289_v18 = vadd.f32 %v9312_v44, %v4258_v1  ;;  %v3225_v20 = vsel %vm3161_vm7, %v3129_v42, %v3193_v26  ;;  %vm3162_vm9 = vcmp.ge.f32.partialorder %v9147_v39, 0.0 }
 0x5d8   : > { %v3835_v21 = vmul.f32 %v3803_v4, %v9234_v17  ;;  %v9383_v22 = vadd.f32 %v9270_v36, %v2332_v47  ;;  %v3130_v50 = vsub.f32 1.0, %v3098_v3  ;;  %v9386_v0 = vmul.f32 0.5, %v9162_v12 }
 0x5d9   : > { %v3643_v55 = vmul.f32 %v9298_v15, %v3611_v19  ;;  %v3453_v14 = vadd.f32 1.0, %v3421_v11  ;;  %v9389_v8 = vpop.eup %5337  ;;  %v4259_v45 = vmul.f32 %v9368_v16, %v9368_v16  ;;  %vm3994_vm10 = vcmp.ge.f32.partialorder %v9175_v59, 0.0 }
 0x5da   : > { %v2875_v44 = vmul.f32 %v9275_v61, %v2843_v40  ;;  %v3061_v17 = vmul.f32 1.442695, %v3003_v29  ;;  %5341 = vrcp.f32 %v2621_v35  ;;  %v3289_v42 = vadd.f32 1.0, %v3225_v20 }
 0x5db   : > { %v4057_v1 = vsel %vm3993_vm8, %v3961_v28, %v4025_v48  ;;  %v3962_v12 = vsub.f32 1.0, %v3930_v43  ;;  %v9398_v62 = vmul.f32 0.5, %v9206_v57  ;;  %v4217_v25 = vadd.f32 %v4216_v10, %v9368_v16 }
 0x5dc   : > { %v3893_v63 = vmul.f32 1.442695, %v3835_v21  ;;  %v2972_v46 = vsub.f32 0.0, %v9307_v23  ;;  %v9403_v56 = vmul.f32 0.70710677, %v9383_v22  ;;  %v3194_v27 = vsub.f32 0.0, %v3130_v50 }
 0x5dd   : > { %v9405_v32 = vpop.eup %5339  ;;  %v3675_v26 = vadd.f32 -0.28449672, %v3643_v55  ;;  %v2684_v4 = vmul.f32 1.0614054, %v9389_v8  ;;  %5343 = vrcp.f32 %v3453_v14  ;;  %v9408_v28 = vadd.f32 %v4289_v18, %v4259_v45 }
 0x5de   : > { %v4121_v57 = vadd.f32 1.0, %v4057_v1  ;;  %v2907_v3 = vadd.f32 0.2548296, %v2875_v44  ;;  %5345 = vpow2.f32 %v3061_v17  ;;  %v3321_v19 = vmul.f32 %v3289_v42, %v9261_v9  ;;  %v2335_v44 = vpop.f32.mrf.mxu1 }
 0x5df   : > { %10939 = vst [vmem:[#allocation127_spill] sm:$0xff] %v9408_v28  ;;  %v4026_v47 = vsub.f32 0.0, %v3962_v12  ;;  %v9412_v34 = vmul.f32 0.5, %v9215_v49  ;;  %v9415_v40 = vand.u32 2147483647, %v9403_v56  ;;  %5347 = vpow2.f32 %v3893_v63 }
 0x5e0   : > { %v9417_v29 = vpop.eup %5341  ;;  %v3004_v35 = vmul.f32 %v2972_v46, %v9307_v23  ;;  %v3516_v11 = vmul.f32 1.0614054, %v9405_v32  ;;  %v9422_v10 = vadd.f32 %v9342_v33, %v2489_v54  ;;  %v3226_v9 = vsel %vm3162_vm9, %v3130_v50, %v3194_v27 }
 0x5e1   : > { %v3707_v48 = vmul.f32 %v9298_v15, %v3675_v26  ;;  %v2716_v49 = vadd.f32 -1.4531521, %v2684_v4  ;;  %v2590_v43 = vmul.f32 0.3275911, %v9415_v40  ;;  %v4153_v18 = vmul.f32 %v4121_v57, %v9348_v60 }
 0x5e2   : > { %v2939_v20 = vmul.f32 %v9275_v61, %v2907_v3  ;;  %v9431_v21 = vmul.f32 0.5, %v9273_v24  ;;  %v3804_v23 = vsub.f32 0.0, %v9326_v41  ;;  %v4058_v39 = vsel %vm3994_vm10, %v3962_v12, %v4026_v47 }
 0x5e3   : > { %v9434_v55 = vpop.eup %5343  ;;  %v2685_v50 = vmul.f32 1.0614054, %v9417_v29  ;;  %v2622_v14 = vadd.f32 1.0, %v2590_v43  ;;  %v9440_v45 = vmul.f32 0.70710677, %v9422_v10  ;;  %v9442_v17 = vadd.f32 %v4153_v18, %v3321_v19 }
 0x5e4   : > { %v5346_v60 = vpop.eup %5345  ;;  %v3290_v61 = vadd.f32 1.0, %v3226_v9  ;;  %v3063_v24 = vmul.f32 1.442695, %v3004_v35  ;;  %v3548_v42 = vadd.f32 -1.4531521, %v3516_v11  ;;  %v2748_v63 = vmul.f32 %v9389_v8, %v2716_v49 }
 0x5e5   : > { %10940 = vst [vmem:[#allocation132_spill] sm:$0xff] %v9442_v17  ;;  %v3739_v1 = vadd.f32 0.2548296, %v3707_v48  ;;  %5349 = vrcp.f32 %v2622_v14  ;;  %v9446_v59 = vand.u32 2147483647, %v9440_v45  ;;  %v5348_v12 = vpop.eup %5347  ;;  %v4122_v46 = vadd.f32 1.0, %v4058_v39 }
 0x5e6   : > { %v3099_v27 = vmul.f32 %v5346_v60, %v2939_v20  ;;  %v3517_v26 = vmul.f32 1.0614054, %v9434_v55  ;;  %v9450_v4 = vadd.f32 %v9270_v36, %v2335_v44  ;;  %v3836_v54 = vmul.f32 %v3804_v23, %v9326_v41 }
 0x5e7   : > { %v9454_v57 = vmul.f32 0.5, %v9287_v13  ;;  %v2717_v3 = vadd.f32 -1.4531521, %v2685_v50  ;;  %v3422_v19 = vmul.f32 0.3275911, %v9446_v59  ;;  %v4218_v47 = vadd.f32 %v4217_v25, %v9442_v17  ;;  %v2492_v25 = vpop.f32.mrf.mxu2 }
 0x5e8   : > { %v3322_v35 = vmul.f32 %v3290_v61, %v9371_v51  ;;  %v3580_v11 = vmul.f32 %v9405_v32, %v3548_v42  ;;  %v2973_v9 = vsub.f32 0.0, %v9335_v38  ;;  %vm3163_vm11 = vcmp.ge.f32.partialorder %v9222_v53, 0.0 }
 0x5e9   : > { %v3771_v48 = vmul.f32 %v9298_v15, %v3739_v1  ;;  %v2780_v49 = vadd.f32 1.4214138, %v2748_v63  ;;  %5351 = vpow2.f32 %v3063_v24  ;;  %v3454_v41 = vadd.f32 1.0, %v3422_v19 }
 0x5ea   : > { %v4154_v13 = vmul.f32 %v4122_v46, %v9386_v0  ;;  %v3131_v43 = vsub.f32 1.0, %v3099_v27  ;;  %v3549_v18 = vadd.f32 -1.4531521, %v3517_v26  ;;  %v9465_v20 = vmul.f32 0.70710677, %v9450_v4 }
 0x5eb   : > { %v9467_v51 = vpop.eup %5349  ;;  %v9471_v23 = vmul.f32 %v9442_v17, %v9442_v17  ;;  %v3895_v39 = vmul.f32 1.442695, %v3836_v54  ;;  %v2749_v15 = vmul.f32 %v9417_v29, %v2717_v3  ;;  %5353 = vrcp.f32 %v3454_v41 }
 0x5ec   : > { %v9474_v50 = vadd.f32 %v4154_v13, %v3322_v35  ;;  %v3612_v14 = vadd.f32 1.4214138, %v3580_v11  ;;  %v3005_v0 = vmul.f32 %v2973_v9, %v9335_v38  ;;  %v2686_v44 = vmul.f32 1.0614054, %v9467_v51  ;;  %v2337_v13 = vpop.f32.mrf.mxu1 }
 0x5ed   : > { %10941 = vst [vmem:[#allocation136_spill] sm:$0xff] %v9471_v23  ;;  %v9478_v60 = vmul.f32 %v5348_v12, %v3771_v48  ;;  %v2812_v61 = vmul.f32 %v9389_v8, %v2780_v49  ;;  %v9482_v24 = vand.u32 2147483647, %v9465_v20  ;;  %v9485_v42 = vadd.f32 %v9342_v33, %v2492_v25 }
 0x5ee   : > { %v3195_v1 = vsub.f32 0.0, %v3131_v43  ;;  %v9488_v63 = vmul.f32 0.5, %v9310_v52  ;;  %v3581_v46 = vmul.f32 %v9434_v55, %v3549_v18  ;;  %v2718_v27 = vadd.f32 -1.4531521, %v2686_v44  ;;  %v10942_v44 = vld [vmem:[#allocation114_spill] sm:$0xff] }
 0x5ef   : > { %v9491_v38 = vpop.eup %5351  ;;  %5355 = vpow2.f32 %v3895_v39  ;;  %v2781_v12 = vadd.f32 1.4214138, %v2749_v15  ;;  %v3805_v26 = vsub.f32 0.0, %v9366_v30  ;;  %v2591_v54 = vmul.f32 0.3275911, %v9482_v24 }
 0x5f0   : > { %v3644_v3 = vmul.f32 %v9405_v32, %v3612_v14  ;;  %v3065_v19 = vmul.f32 1.442695, %v3005_v0  ;;  %v2750_v35 = vmul.f32 %v9467_v51, %v2718_v27  ;;  %v9498_v11 = vmul.f32 0.70710677, %v9485_v42 }
 0x5f1   : > { %v9500_v52 = vpop.eup %5353  ;;  %v9503_v9 = vadd.f32 %v4218_v47, %v9474_v50  ;;  %v3963_v48 = vsub.f32 1.0, %v9478_v60  ;;  %v2844_v49 = vadd.f32 -0.28449672, %v2812_v61  ;;  %v2623_v41 = vadd.f32 1.0, %v2591_v54 }
 0x5f2   : > { %v3227_v18 = vsel %vm3163_vm11, %v3131_v43, %v3195_v1  ;;  %v3613_v25 = vadd.f32 1.4214138, %v3581_v46  ;;  %v3518_v39 = vmul.f32 1.0614054, %v9500_v52  ;;  %v9510_v15 = vand.u32 2147483647, %v9498_v11 }
 0x5f3   : > { %v2813_v14 = vmul.f32 %v9417_v29, %v2781_v12  ;;  %v3837_v0 = vmul.f32 %v3805_v26, %v9366_v30  ;;  %v2782_v47 = vadd.f32 1.4214138, %v2750_v35  ;;  %5357 = vrcp.f32 %v2623_v41 }
 0x5f4   : > { %vm3995_vm12 = vcmp.ge.f32.partialorder %v10942_v44, 0.0  ;;  %v3676_v60 = vadd.f32 -0.28449672, %v3644_v3  ;;  %5359 = vpow2.f32 %v3065_v19  ;;  %v3550_v61 = vadd.f32 -1.4531521, %v3518_v39 }
 0x5f5   : > { %v9516_v53 = vadd.f32 %v9270_v36, %v2337_v13  ;;  %v9518_v43 = vpop.eup %5355  ;;  %v4027_v1 = vsub.f32 0.0, %v3963_v48  ;;  %v9521_v46 = vmul.f32 0.5, %v9345_v37  ;;  %v2974_v27 = vsub.f32 0.0, %v9415_v40  ;;  %v2494_v36 = vpop.f32.mrf.mxu2 }
 0x5f6   : > { %v3423_v30 = vmul.f32 0.3275911, %v9510_v15  ;;  %v9525_v12 = vadd.f32 1.0, %v3227_v18  ;;  %v2876_v26 = vmul.f32 %v9389_v8, %v2844_v49  ;;  %v3645_v54 = vmul.f32 %v9434_v55, %v3613_v25 }
 0x5f7   : > { %v3582_v3 = vmul.f32 %v9500_v52, %v3550_v61  ;;  %v2845_v19 = vadd.f32 -0.28449672, %v2813_v14  ;;  %v3897_v35 = vmul.f32 1.442695, %v3837_v0  ;;  %v2814_v41 = vmul.f32 %v9467_v51, %v2782_v47 }
 0x5f8   : > { %v3455_v13 = vadd.f32 1.0, %v3423_v30  ;;  %v3708_v37 = vmul.f32 %v9405_v32, %v3676_v60  ;;  %v3806_v16 = vsub.f32 0.0, %v9446_v59  ;;  %v9534_v18 = vmul.f32 0.70710677, %v9516_v53 }
 0x5f9   : > { %v3614_v39 = vadd.f32 1.4214138, %v3582_v3  ;;  %v9536_v58 = vpop.eup %5357  ;;  %v3006_v49 = vmul.f32 %v2974_v27, %v9415_v40  ;;  %v9540_v25 = vmul.f32 0.5, %v9383_v22  ;;  %v9543_v14 = vadd.f32 %v9342_v33, %v2494_v36 }
 0x5fa   : > { %5361 = vrcp.f32 %v3455_v13  ;;  %v5360_v0 = vpop.eup %5359  ;;  %v3677_v47 = vadd.f32 -0.28449672, %v3645_v54  ;;  %v2687_v61 = vmul.f32 1.0614054, %v9536_v58  ;;  %v2975_v30 = vsub.f32 0.0, %v9482_v24 }
 0x5fb   : > { %10943 = vst [vmem:[#allocation138_spill] sm:$0xff] %v9543_v14  ;;  %v3646_v60 = vmul.f32 %v9500_v52, %v3614_v39  ;;  %v2877_v3 = vmul.f32 %v9417_v29, %v2845_v19  ;;  %v2846_v7 = vadd.f32 -0.28449672, %v2814_v41  ;;  %v9550_v40 = vand.u32 2147483647, %v9534_v18 }
 0x5fc   : > { %v9553_v22 = vmul.f32 0.70710677, %v9543_v14  ;;  %v2908_v27 = vadd.f32 0.2548296, %v2876_v26  ;;  %v3740_v33 = vadd.f32 0.2548296, %v3708_v37  ;;  %v3838_v36 = vmul.f32 %v3806_v16, %v9446_v59 }
 0x5fd   : > { %v2719_v54 = vadd.f32 -1.4531521, %v2687_v61  ;;  %v4059_v13 = vsel %vm3995_vm12, %v3963_v48, %v4027_v1  ;;  %v3678_v39 = vadd.f32 -0.28449672, %v3646_v60  ;;  %v2592_v17 = vmul.f32 0.3275911, %v9550_v40 }
 0x5fe   : > { %v9560_v19 = vand.u32 2147483647, %v9553_v22  ;;  %v3709_v41 = vmul.f32 %v9434_v55, %v3677_v47  ;;  %v3067_v28 = vmul.f32 1.442695, %v3006_v49  ;;  %v3007_v26 = vmul.f32 %v2975_v30, %v9482_v24 }
 0x5ff   : > { %v2751_v14 = vmul.f32 %v9536_v58, %v2719_v54  ;;  %v2909_v16 = vadd.f32 0.2548296, %v2877_v3  ;;  %v2878_v59 = vmul.f32 %v9467_v51, %v2846_v7  ;;  %v2624_v44 = vadd.f32 1.0, %v2592_v17 }
 0x600   : > { %v9565_v37 = vpop.eup %5361  ;;  %v3424_v48 = vmul.f32 0.3275911, %v9560_v19  ;;  %v2940_v1 = vmul.f32 %v9389_v8, %v2908_v27  ;;  %v3899_v60 = vmul.f32 1.442695, %v3838_v36  ;;  %v3807_v23 = vsub.f32 0.0, %v9510_v15 }
 0x601   : > { %v2783_v61 = vadd.f32 1.4214138, %v2751_v14  ;;  %v3710_v49 = vmul.f32 %v9500_v52, %v3678_v39  ;;  %v3519_v47 = vmul.f32 1.0614054, %v9565_v37  ;;  %5363 = vrcp.f32 %v2624_v44 }
 0x602   : > { %v3456_v24 = vadd.f32 1.0, %v3424_v48  ;;  %v3741_v30 = vadd.f32 0.2548296, %v3709_v41  ;;  %5365 = vpow2.f32 %v3897_v35  ;;  %v3069_v7 = vmul.f32 1.442695, %v3007_v26 }
 0x603   : > { %v2815_v3 = vmul.f32 %v9536_v58, %v2783_v61  ;;  %v3772_v17 = vmul.f32 %v9405_v32, %v3740_v33  ;;  %v2910_v54 = vadd.f32 0.2548296, %v2878_v59  ;;  %5367 = vpow2.f32 %v3067_v28 }
 0x604   : > { %v3551_v8 = vadd.f32 -1.4531521, %v3519_v47  ;;  %v2941_v14 = vmul.f32 %v9417_v29, %v2909_v16  ;;  %v3839_v36 = vmul.f32 %v3807_v23, %v9510_v15  ;;  %5369 = vrcp.f32 %v3456_v24 }
 0x605   : > { %v2847_v27 = vadd.f32 -0.28449672, %v2815_v3  ;;  %v9578_v39 = vmul.f32 %v9491_v38, %v2940_v1  ;;  %v3742_v44 = vadd.f32 0.2548296, %v3710_v49  ;;  %5371 = vpow2.f32 %v3899_v60 }
 0x606   : > { %v3583_v35 = vmul.f32 %v9565_v37, %v3551_v8  ;;  %v9583_v41 = vmul.f32 %v9525_v12, %v9398_v62  ;;  %v3773_v32 = vmul.f32 %v9434_v55, %v3741_v30  ;;  %5373 = vpow2.f32 %v3069_v7 }
 0x607   : > { %v2879_v28 = vmul.f32 %v9536_v58, %v2847_v27  ;;  %v9587_v29 = vpop.eup %5363  ;;  %v9590_v23 = vmul.f32 %v9518_v43, %v3772_v17  ;;  %v2942_v38 = vmul.f32 %v9467_v51, %v2910_v54  ;;  %v2976_v33 = vsub.f32 0.0, %v9550_v40 }
 0x608   : > { %v3615_v15 = vadd.f32 1.4214138, %v3583_v35  ;;  %v5366_v26 = vpop.eup %5365  ;;  %v3101_v16 = vmul.f32 %v5360_v0, %v2941_v14  ;;  %v3901_v62 = vmul.f32 1.442695, %v3839_v36  ;;  %v2688_v12 = vmul.f32 1.0614054, %v9587_v29 }
 0x609   : > { %v2911_v59 = vadd.f32 0.2548296, %v2879_v28  ;;  %v5368_v55 = vpop.eup %5367  ;;  %v4123_v48 = vadd.f32 1.0, %v4059_v13  ;;  %v3132_v1 = vsub.f32 1.0, %v9578_v39  ;;  %vm3164_vm13 = vcmp.ge.f32.partialorder %v9294_v31, 0.0 }
 0x60a   : > { %v3774_v43 = vmul.f32 %v9500_v52, %v3742_v44  ;;  %v3647_v60 = vmul.f32 %v9565_v37, %v3615_v15  ;;  %v9599_v51 = vpop.eup %5369  ;;  %v3933_v61 = vmul.f32 %v5366_v26, %v3773_v32  ;;  %v2720_v0 = vadd.f32 -1.4531521, %v2688_v12 }
 0x60b   : > { %v2943_v49 = vmul.f32 %v9536_v58, %v2911_v59  ;;  %v3808_v47 = vsub.f32 0.0, %v9560_v19  ;;  %v5372_v24 = vpop.eup %5371  ;;  %vm3996_vm14 = vcmp.ge.f32.partialorder %v9302_v2, 0.0  ;;  %vm3165_vm3 = vcmp.ge.f32.partialorder %v9330_v6, 0.0 }
 0x60c   : > { %v3102_v13 = vmul.f32 %v5368_v55, %v2942_v38  ;;  %v3679_v30 = vadd.f32 -0.28449672, %v3647_v60  ;;  %v3008_v3 = vmul.f32 %v2976_v33, %v9550_v40  ;;  %v3520_v52 = vmul.f32 1.0614054, %v9599_v51  ;;  %v5374_v7 = vpop.eup %5373 }
 0x60d   : > { %v3964_v17 = vsub.f32 1.0, %v9590_v23  ;;  %v3133_v54 = vsub.f32 1.0, %v3101_v16  ;;  %5375 = vpow2.f32 %v3901_v62  ;;  %v2752_v58 = vmul.f32 %v9587_v29, %v2720_v0 }
 0x60e   : > { %vm3997_vm4 = vcmp.ge.f32.partialorder %v9360_v5, 0.0  ;;  %v3934_v8 = vmul.f32 %v5372_v24, %v3774_v43  ;;  %v3103_v14 = vmul.f32 %v5374_v7, %v2943_v49  ;;  %v3711_v27 = vmul.f32 %v9565_v37, %v3679_v30 }
 0x60f   : > { %v3552_v36 = vadd.f32 -1.4531521, %v3520_v52  ;;  %v3196_v39 = vsub.f32 0.0, %v3132_v1  ;;  %v3965_v44 = vsub.f32 1.0, %v3933_v61  ;;  %v2784_v35 = vadd.f32 1.4214138, %v2752_v58 }
 0x610   : > { %v3840_v40 = vmul.f32 %v3808_v47, %v9560_v19  ;;  %v3134_v32 = vsub.f32 1.0, %v3102_v13  ;;  %v3743_v28 = vadd.f32 0.2548296, %v3711_v27  ;;  %v3071_v38 = vmul.f32 1.442695, %v3008_v3 }
 0x611   : > { %v3584_v23 = vmul.f32 %v9599_v51, %v3552_v36  ;;  %v4028_v15 = vsub.f32 0.0, %v3964_v17  ;;  %v3197_v33 = vsub.f32 0.0, %v3133_v54  ;;  %vm3166_vm5 = vcmp.ge.f32.partialorder %v9403_v56, 0.0 }
 0x612   : > { %v2816_v26 = vmul.f32 %v9587_v29, %v2784_v35  ;;  %v3966_v16 = vsub.f32 1.0, %v3934_v8  ;;  %v3135_v59 = vsub.f32 1.0, %v3103_v14  ;;  %v3775_v62 = vmul.f32 %v9565_v37, %v3743_v28 }
 0x613   : > { %v3616_v12 = vadd.f32 1.4214138, %v3584_v23  ;;  %v5376_v55 = vpop.eup %5375  ;;  %v3228_v19 = vsel %vm3164_vm13, %v3132_v1, %v3196_v39  ;;  %v4029_v43 = vsub.f32 0.0, %v3965_v44  ;;  %v3903_v61 = vmul.f32 1.442695, %v3840_v40 }
 0x614   : > { %v2848_v60 = vadd.f32 -0.28449672, %v2816_v26  ;;  %v3198_v49 = vsub.f32 0.0, %v3134_v32  ;;  %v3935_v0 = vmul.f32 %v5376_v55, %v3775_v62  ;;  %5377 = vpow2.f32 %v3071_v38 }
 0x615   : > { %v3648_v47 = vmul.f32 %v9599_v51, %v3616_v12  ;;  %v4155_v24 = vmul.f32 %v4123_v48, %v9412_v34  ;;  %v4060_v13 = vsel %vm3996_vm14, %v3964_v17, %v4028_v15  ;;  %v3229_v37 = vsel %vm3165_vm3, %v3133_v54, %v3197_v33 }
 0x616   : > { %v2880_v30 = vmul.f32 %v9587_v29, %v2848_v60  ;;  %v4030_v31 = vsub.f32 0.0, %v3966_v16  ;;  %v3199_v1 = vsub.f32 0.0, %v3135_v59  ;;  %v3967_v3 = vsub.f32 1.0, %v3935_v0 }
 0x617   : > { %v3680_v52 = vadd.f32 -0.28449672, %v3648_v47  ;;  %v3292_v7 = vadd.f32 1.0, %v3228_v19  ;;  %v4061_v58 = vsel %vm3997_vm4, %v3965_v44, %v4029_v43  ;;  %5379 = vpow2.f32 %v3903_v61 }
 0x618   : > { %v2912_v8 = vadd.f32 0.2548296, %v2880_v30  ;;  %v3293_v14 = vadd.f32 1.0, %v3229_v37  ;;  %v3230_v2 = vsel %vm3166_vm5, %v3134_v32, %v3198_v49  ;;  %v4031_v34 = vsub.f32 0.0, %v3967_v3  ;;  %v10945_v49 = vld [vmem:[#allocation127_spill] sm:$0xff] }
 0x619   : > { %v3712_v6 = vmul.f32 %v9599_v51, %v3680_v52  ;;  %v4124_v48 = vadd.f32 1.0, %v4060_v13  ;;  %vm3998_vm6 = vcmp.ge.f32.partialorder %v9440_v45, 0.0  ;;  %vm3167_vm15 = vcmp.ge.f32.partialorder %v9465_v20, 0.0 }
 0x61a   : > { %v2944_v17 = vmul.f32 %v9587_v29, %v2912_v8  ;;  %v5378_v54 = vpop.eup %5377  ;;  %v4125_v27 = vadd.f32 1.0, %v4061_v58  ;;  %v4062_v5 = vsel %vm3998_vm6, %v3966_v16, %v4030_v31  ;;  %v3231_v36 = vsel %vm3167_vm15, %v3135_v59, %v3199_v1 }
 0x61b   : > { %v3744_v39 = vadd.f32 0.2548296, %v3712_v6  ;;  %v3324_v44 = vmul.f32 %v3292_v7, %v9431_v21  ;;  %v3294_v35 = vadd.f32 1.0, %v3230_v2  ;;  %vm3999_vm0 = vcmp.ge.f32.partialorder %v9498_v11, 0.0 }
 0x61c   : > { %v3104_v56 = vmul.f32 %v5378_v54, %v2944_v17  ;;  %v9636_v40 = vadd.f32 %v4155_v24, %v9583_v41  ;;  %v3325_v45 = vmul.f32 %v3293_v14, %v9488_v63  ;;  %v4063_v32 = vsel %vm3999_vm0, %v3967_v3, %v4031_v34  ;;  %v10946_v24 = vld [vmem:[#allocation138_spill] sm:$0xff] }
 0x61d   : > { %v3776_v20 = vmul.f32 %v9599_v51, %v3744_v39  ;;  %v5380_v29 = vpop.eup %5379  ;;  %v4156_v28 = vmul.f32 %v4124_v48, %v9454_v57  ;;  %v4126_v38 = vadd.f32 1.0, %v4062_v5  ;;  %v3295_v23 = vadd.f32 1.0, %v3231_v36 }
 0x61e   : > { %v3136_v15 = vsub.f32 1.0, %v3104_v56  ;;  %v4157_v21 = vmul.f32 %v4125_v27, %v9521_v46  ;;  %v4094_v33 = vmul.f32 0.5, %v9422_v10  ;;  %v3263_v11 = vmul.f32 0.5, %v9450_v4 }
 0x61f   : > { %v3936_v26 = vmul.f32 %v5380_v29, %v3776_v20  ;;  %v9644_v41 = vadd.f32 %v4156_v28, %v3324_v44  ;;  %v3326_v63 = vmul.f32 %v3294_v35, %v9540_v25  ;;  %v4127_v16 = vadd.f32 1.0, %v4063_v32 }
 0x620   : > { %v3200_v59 = vsub.f32 0.0, %v3136_v15  ;;  %v9647_v51 = vadd.f32 %v4157_v21, %v3325_v45  ;;  %v4095_v57 = vmul.f32 0.5, %v9485_v42  ;;  %vm3168_vm1 = vcmp.ge.f32.partialorder %v9534_v18, 0.0  ;;  %v10944_v18 = vld [vmem:[#allocation136_spill] sm:$0xff] }
 0x621   : > { %v3968_v62 = vsub.f32 1.0, %v3936_v26  ;;  %v4158_v12 = vmul.f32 %v4126_v38, %v4094_v33  ;;  %v3327_v46 = vmul.f32 %v3295_v23, %v3263_v11  ;;  %v4220_v10 = vadd.f32 %v9503_v9, %v9636_v40  ;;  %v4926_v11 = vld [vmem:[%s10136_s11 + $0x38] sm:$0xff]  ;;  %v4925_v26 = vld [vmem:[%s10136_s11 + $0x30] sm:$0xff] }
 0x622   : > { %v3232_v55 = vsel %vm3168_vm1, %v3136_v15, %v3200_v59  ;;  %v4261_v4 = vmul.f32 %v9474_v50, %v9474_v50  ;;  %v3264_v25 = vmul.f32 0.5, %v9516_v53  ;;  %v4159_v61 = vmul.f32 %v4127_v16, %v4095_v57  ;;  %4542 = vmatpush.bf16.msra.mxu3 %v4926_v11  ;;  %v4923_v16 = vld [vmem:[%s10136_s11 + $0x20] sm:$0xff]  ;;  %v4922_v59 = vld [vmem:[%s10136_s11 + $0x18] sm:$0xff]  ;;  %v4921_v57 = vld [vmem:[%s10136_s11 + $0x10] sm:$0xff] }
 0x623   : > { %v3296_v19 = vadd.f32 1.0, %v3232_v55  ;;  %v4032_v43 = vsub.f32 0.0, %v3968_v62  ;;  %v9656_v60 = vadd.f32 %v4158_v12, %v3326_v63  ;;  %vm4000_vm2 = vcmp.ge.f32.partialorder %v9553_v22, 0.0  ;;  %v4924_v63 = vld [vmem:[%s10136_s11 + $0x28] sm:$0xff]  ;;  %v10958_v11 = vld [vmem:[#allocation105_spill] sm:$0xff] }
 0x624   : > { %v4221_v42 = vadd.f32 %v4220_v10, %v9644_v41  ;;  %v4291_v0 = vadd.f32 %v10945_v49, %v10944_v18  ;;  %v4262_v9 = vmul.f32 %v9636_v40, %v9636_v40  ;;  %v4096_v13 = vmul.f32 0.5, %v10946_v24  ;;  %v4920_v12 = vld [vmem:[%s10136_s11 + $0x8] sm:$0xff]  ;;  %v4919_v10 = vld [vmem:[%s10136_s11] sm:$0xff] }
 0x625   : > { %v4064_v47 = vsel %vm4000_vm2, %v3968_v62, %v4032_v43  ;;  %v3328_v37 = vmul.f32 %v3296_v19, %v3264_v25  ;;  %v9665_v30 = vadd.f32 %v4159_v61, %v3327_v46  ;;  %v4263_v22 = vmul.f32 %v9644_v41, %v9644_v41 }
 0x626   : > { %v4128_v53 = vadd.f32 1.0, %v4064_v47  ;;  %v4222_v31 = vadd.f32 %v4221_v42, %v9647_v51  ;;  %v4292_v1 = vadd.f32 %v4291_v0, %v4261_v4  ;;  %v4264_v8 = vmul.f32 %v9647_v51, %v9647_v51  ;;  %4543 = vmatpush.bf16.msra.mxu3 %v4925_v26  ;;  %v10947_v0 = vld [vmem:[#allocation132_spill] sm:$0xff] }
 0x627   : > { %v4265_v34 = vmul.f32 %v9656_v60, %v9656_v60  ;;  %v4266_v48 = vmul.f32 %v9665_v30, %v9665_v30 }
 0x628   : > { %v4160_v3 = vmul.f32 %v4128_v53, %v4096_v13  ;;  %v4223_v52 = vadd.f32 %v4222_v31, %v9656_v60  ;;  %v4293_v14 = vadd.f32 %v4292_v1, %v4262_v9 }
 0x62a   : > { %v9671_v7 = vadd.f32 %v4160_v3, %v3328_v37  ;;  %v4224_v58 = vadd.f32 %v4223_v52, %v9665_v30  ;;  %v4294_v6 = vadd.f32 %v4293_v14, %v4263_v22  ;;  %4544 = vmatpush.bf16.msra.mxu3 %v4924_v63  ;;  %v10948_v52 = vld [vmem:[#allocation93_spill] sm:$0xff]  ;;  %v10959_v63 = vld [vmem:[#allocation106_spill] sm:$0xff] }
 0x62c   : > { %v4225_v2 = vadd.f32 %v4224_v58, %v9671_v7  ;;  %v4295_v17 = vadd.f32 %v4294_v6, %v4264_v8  ;;  %v4267_v54 = vmul.f32 %v9671_v7, %v9671_v7  ;;  %v10949_v8 = vld [vmem:[#allocation94_spill] sm:$0xff] }
 0x62e   : > { %4226 = vadd.xlane.f32.xlu1 %v4225_v2  ;;  %v4296_v27 = vadd.f32 %v4295_v17, %v4265_v34  ;;  %4545 = vmatpush.bf16.msra.mxu3 %v4923_v16  ;;  %v9734_v2 = vld [vmem:[%s10134_s9] ss:$0 sm:$0xff]  ;;  %v10950_v34 = vld [vmem:[#allocation95_spill] sm:$0xff] }
 0x630   : > { %v4297_v5 = vadd.f32 %v4296_v27, %v4266_v48  ;;  %v10951_v48 = vld [vmem:[#allocation96_spill] sm:$0xff] }
 0x632   : > { %v4298_v36 = vadd.f32 %v4297_v5, %v4267_v54  ;;  %4546 = vmatpush.bf16.msra.mxu3 %v4922_v59  ;;  %v10952_v54 = vld [vmem:[#allocation97_spill] sm:$0xff]  ;;  %v10953_v5 = vld [vmem:[#allocation98_spill] sm:$0xff]  ;;  %v10960_v59 = vld [vmem:[#allocation107_spill] sm:$0xff] }
 0x636   : > { %4299 = vadd.xlane.f32.xlu1 %v4298_v36  ;;  %4547 = vmatpush.bf16.msra.mxu3 %v4921_v57 }
 0x63a   : > { %4548 = vmatpush.bf16.msra.mxu3 %v4920_v12 }
 0x63e   : > { %4549 = vmatpush.bf16.msra.mxu3 %v4919_v10 }
 0x6a1   : > { %v4227_v39 = vpop.xlane.xlu1 %4226 }
 0x6a2   : > { %v4228_v44 = vrot.slane %v4227_v39, 4 }
 0x6a4   : > { %v4229_v35 = vadd.f32 %v4228_v44, %v4227_v39  ;;  %v10954_v44 = vld [vmem:[#allocation101_spill] sm:$0xff] }
 0x6a6   : > { %v4230_v56 = vrot.slane %v4229_v35, 2 }
 0x6a8   : > { %v4231_v45 = vadd.f32 %v4230_v56, %v4229_v35  ;;  %v10955_v56 = vld [vmem:[#allocation102_spill] sm:$0xff] }
 0x6a9   : > { %v4300_v32 = vpop.xlane.xlu1 %4299 }
 0x6aa   : > { %v4301_v20 = vrot.slane %v4300_v32, 4  ;;  %v4232_v29 = vrot.slane %v4231_v45, 1 }
 0x6ac   : > { %v4302_v28 = vadd.f32 %v4301_v20, %v4300_v32  ;;  %v4233_v38 = vadd.f32 %v4232_v29, %v4231_v45  ;;  %v10956_v32 = vld [vmem:[#allocation103_spill] sm:$0xff] }
 0x6ae   : > { %v4303_v23 = vrot.slane %v4302_v28, 2  ;;  %4932 = vpush %v4233_v38  ;;  %v9757_v38 = vld [vmem:[%s10135_s10] ss:$0 sm:$0xff] }
 0x6b0   : > { %v4304_v15 = vadd.f32 %v4303_v23, %v4302_v28 }
 0x6b2   : > { %v4305_v21 = vrot.slane %v4304_v15, 1 }
 0x6b4   : > { %v4306_v33 = vadd.f32 %v4305_v21, %v4304_v15  ;;  %v10957_v21 = vld [vmem:[#allocation104_spill] sm:$0xff] }
 0x6b6   : > { %4934 = vpush %v4306_v33 }
 0x6df   : > { %s4933_s23 = spop %4932 }
 0x6e0   : > { %v4235_v62 = vstv %s4933_s23 }
 0x6e1   : > { %v9704_v46 = vmul.f32 3.0517578e-05, %v4235_v62 }
 0x6e3   : > { %v4311_v25 = vmul.f32 %v9704_v46, %v9704_v46  ;;  %v4348_v9 = vsub.f32 %v10947_v0, %v9704_v46  ;;  %v4349_v47 = vsub.f32 %v9474_v50, %v9704_v46  ;;  %v4350_v24 = vsub.f32 %v9636_v40, %v9704_v46 }
 0x6e4   : > { %v4351_v13 = vsub.f32 %v9644_v41, %v9704_v46  ;;  %v4352_v53 = vsub.f32 %v9647_v51, %v9704_v46  ;;  %v4353_v31 = vsub.f32 %v9656_v60, %v9704_v46  ;;  %v4354_v1 = vsub.f32 %v9665_v30, %v9704_v46 }
 0x6e5   : > { %v4355_v22 = vsub.f32 %v9671_v7, %v9704_v46  ;;  %v4324_v58 = vsub.f32 %v10948_v52, %v9704_v46  ;;  %v4325_v14 = vsub.f32 %v10949_v8, %v9704_v46  ;;  %v4326_v6 = vsub.f32 %v10950_v34, %v9704_v46  ;;  %v10965_v8 = vld [vmem:[#allocation120_spill] sm:$0xff]  ;;  %v10966_v34 = vld [vmem:[#allocation122_spill] sm:$0xff] }
 0x6e6   : > { %v4327_v17 = vsub.f32 %v10951_v48, %v9704_v46  ;;  %v4328_v27 = vsub.f32 %v10952_v54, %v9704_v46  ;;  %v4329_v36 = vsub.f32 %v10953_v5, %v9704_v46  ;;  %v4332_v35 = vsub.f32 %v10954_v44, %v9704_v46  ;;  %v10967_v48 = vld [vmem:[#allocation115_spill] sm:$0xff] }
 0x6e7   : > { %s4935_s22 = spop %4934  ;;  %v4333_v45 = vsub.f32 %v10955_v56, %v9704_v46  ;;  %v4334_v20 = vsub.f32 %v10956_v32, %v9704_v46  ;;  %v4335_v33 = vsub.f32 %v10957_v21, %v9704_v46  ;;  %v4336_v26 = vsub.f32 %v10958_v11, %v9704_v46  ;;  %v10968_v54 = vld [vmem:[#allocation119_spill] sm:$0xff] }
 0x6e8   : > { %v4308_v55 = vstv %s4935_s22  ;;  %v4337_v16 = vsub.f32 %v10959_v63, %v9704_v46  ;;  %v4338_v57 = vsub.f32 %v10960_v59, %v9704_v46  ;;  %v4346_v44 = vsub.f32 %v10968_v54, %v9704_v46  ;;  %s10973_s22 = sld [smem:[#allocation141_spill]] }
 0x6e9   : > { %v4310_v4 = vmul.f32 3.0517578e-05, %v4308_v55 }
 0x6eb   : > { %v4312_v19 = vsub.f32 %v4310_v4, %v4311_v25  ;;  %v10961_v4 = vld [vmem:[#allocation108_spill] sm:$0xff] }
 0x6ec   : > { %v4339_v25 = vsub.f32 %v10961_v4, %v9704_v46 }
 0x6ed   : > { %v4313_v43 = vadd.f32 1e-05, %v4312_v19  ;;  %v10962_v19 = vld [vmem:[#allocation109_spill] sm:$0xff] }
 0x6ee   : > { %s4675_s16 = scalar_lea.hbm %s10973_s22, %s4927_s20  ;;  %s5439_s23 = scalar_lea.hbm %s10973_s22, 512 }
 0x6ef   : > { %5381 = vrsqrt.f32 %v4313_v43  ;;  %vm4320_vm8 = vweird.f32 %v4313_v43  ;;  %s4678_s13 = sshll.u32 %s4675_s16, 4  ;;  %s4679_s13 = int_to_ptr.hbm [resolvable:$true] %s4678_s13 }
 0x6f0   : > { %s5433_s27 = sshra.s32 %s4679_s13, 4  ;;  %s5434_s27 = int_to_ptr.hbm [resolvable:$true] %s5433_s27 }
 0x6f1   : > { %s5435_s29 = scalar_lea.hbm %s5434_s27, 256  ;;  %p5440_p0 = scmp.lt.s32.totalorder %s5434_s27, %s10973_s22 }
 0x6f2   : > { %p5436_p6 = scmp.ne.s32.totalorder %s5434_s27, %s5435_s29  ;;  %p5441_p1 = scmp.lt.s32.totalorder %s5439_s23, %s5435_s29 }
 0x6f4   : > { %p5437_p9 = pnand %p5436_p6, %p5612_p11  ;;  %p5442_p3 = por %p5441_p1, %p5440_p0 }
 0x6f5   : > { %v5382_v61 = vpop.eup %5381 }
 0x6f6   : > { %v4315_v42 = vmul.f32 %v5382_v61, %v4313_v43  ;;  %vm4321_vm7 = vweird.f32 %v5382_v61  ;;  %v4340_v43 = vsub.f32 %v10962_v19, %v9704_v46  ;;  %p5438_p13 = pneg %p5437_p9 }
 0x6f7   : > { %vm4322_vm9 = vmor %vm4320_vm8, %vm4321_vm7 }
 0x6f8   : > { %v4316_v18 = vmul.f32 %v5382_v61, %v4315_v42  ;;  %p5443_p4 = pnand %p5442_p3, %p5438_p13 }
 0x6fa   : > { %v4317_v49 = vmul.f32 0.5, %v4316_v18  ;;  %v10964_v18 = vld [vmem:[#allocation118_spill] sm:$0xff] }
 0x6fc   : > { %v4318_v37 = vsub.f32 1.5, %v4317_v49  ;;  %v4342_v49 = vsub.f32 %v10964_v18, %v9704_v46 }
 0x6fe   : > { %v4319_v3 = vmul.f32 %v5382_v61, %v4318_v37 }
 0x700   : > { %v9744_v39 = vsel %vm4322_vm9, %v5382_v61, %v4319_v3  ;;  %v10963_v61 = vld [vmem:[#allocation110_spill] sm:$0xff] }
 0x701   : > { %v4356_v29 = vmul.f32 %v4324_v58, %v9744_v39  ;;  %v4357_v28 = vmul.f32 %v4325_v14, %v9744_v39  ;;  %v4358_v23 = vmul.f32 %v4326_v6, %v9744_v39  ;;  %v4359_v15 = vmul.f32 %v4327_v17, %v9744_v39 }
 0x702   : > { %v4341_v42 = vsub.f32 %v10963_v61, %v9704_v46  ;;  %v4343_v14 = vsub.f32 %v10965_v8, %v9704_v46  ;;  %v4344_v6 = vsub.f32 %v10966_v34, %v9704_v46  ;;  %v4345_v17 = vsub.f32 %v10967_v48, %v9704_v46 }
 0x703   : > { %v4391_v62 = vmul.f32 %v9734_v2, %v4356_v29  ;;  %v4392_v12 = vmul.f32 %v9734_v2, %v4357_v28  ;;  %v4393_v55 = vmul.f32 %v9734_v2, %v4358_v23  ;;  %v4394_v10 = vmul.f32 %v9734_v2, %v4359_v15  ;;  %v10969_v28 = vld [vmem:[#allocation124_spill] sm:$0xff] }
 0x704   : > { %v4364_v32 = vmul.f32 %v4332_v35, %v9744_v39  ;;  %v4365_v29 = vmul.f32 %v4333_v45, %v9744_v39  ;;  %v4347_v23 = vsub.f32 %v10969_v28, %v9704_v46  ;;  %v9804_v21 = vmul.f32 %v4328_v27, %v9744_v39 }
 0x705   : > { %v4426_v37 = vadd.f32 %v9757_v38, %v4391_v62  ;;  %v4427_v3 = vadd.f32 %v9757_v38, %v4392_v12  ;;  %v9784_v52 = vadd.f32 %v9757_v38, %v4393_v55  ;;  %v9787_v58 = vadd.f32 %v9757_v38, %v4394_v10 }
 0x706   : > { %v4366_v11 = vmul.f32 %v4334_v20, %v9744_v39  ;;  %v4367_v63 = vmul.f32 %v4335_v33, %v9744_v39  ;;  %v4399_v59 = vmul.f32 %v9734_v2, %v4364_v32  ;;  %v4400_v35 = vmul.f32 %v9734_v2, %v4365_v29 }
 0x707   : > { %v4458_v56 = vpack.c.bf16 %v4427_v3, %v4426_v37  ;;  %v4459_v15 = vpack.c.bf16 %v9787_v58, %v9784_v52  ;;  %v4368_v45 = vmul.f32 %v4336_v26, %v9744_v39  ;;  %v4369_v62 = vmul.f32 %v4337_v16, %v9744_v39 }
 0x708   : > { %v4401_v12 = vmul.f32 %v9734_v2, %v4366_v11  ;;  %v4402_v55 = vmul.f32 %v9734_v2, %v4367_v63  ;;  %v4370_v27 = vmul.f32 %v4338_v57, %v9744_v39  ;;  %v4371_v10 = vmul.f32 %v4339_v25, %v9744_v39 }
 0x709   : > { %4550 = vmatmul.bf16.vlgmr.msra.gmra.mxu3 %v4458_v56  ;;  %v9817_v20 = vadd.f32 %v9757_v38, %v4399_v59  ;;  %v9820_v33 = vadd.f32 %v9757_v38, %v4400_v35  ;;  %v4403_v4 = vmul.f32 %v9734_v2, %v4368_v45  ;;  %v4404_v26 = vmul.f32 %v9734_v2, %v4369_v62 }
 0x70a   : > { %v9825_v16 = vadd.f32 %v9757_v38, %v4401_v12  ;;  %v9828_v19 = vadd.f32 %v9757_v38, %v4402_v55  ;;  %v4405_v57 = vmul.f32 %v9734_v2, %v4370_v27  ;;  %v4406_v25 = vmul.f32 %v9734_v2, %v4371_v10 }
 0x70b   : > { %v4462_v61 = vpack.c.bf16 %v9820_v33, %v9817_v20  ;;  %v9835_v18 = vadd.f32 %v9757_v38, %v4403_v4  ;;  %v9838_v37 = vadd.f32 %v9757_v38, %v4404_v26  ;;  %v4372_v3 = vmul.f32 %v4340_v43, %v9744_v39 }
 0x70c   : > { %v4463_v8 = vpack.c.bf16 %v9828_v19, %v9825_v16  ;;  %v9844_v34 = vadd.f32 %v9757_v38, %v4405_v57  ;;  %v9847_v48 = vadd.f32 %v9757_v38, %v4406_v25  ;;  %v4373_v54 = vmul.f32 %v4341_v42, %v9744_v39 }
 0x70d   : > { %v4464_v56 = vpack.c.bf16 %v9838_v37, %v9835_v18  ;;  %v4407_v32 = vmul.f32 %v9734_v2, %v4372_v3  ;;  %v4374_v29 = vmul.f32 %v4342_v49, %v9744_v39  ;;  %v4375_v43 = vmul.f32 %v4343_v14, %v9744_v39 }
 0x70e   : > { %v4465_v28 = vpack.c.bf16 %v9847_v48, %v9844_v34  ;;  %v4408_v11 = vmul.f32 %v9734_v2, %v4373_v54  ;;  %v4376_v63 = vmul.f32 %v4344_v6, %v9744_v39  ;;  %v4377_v59 = vmul.f32 %v4345_v17, %v9744_v39 }
 0x70f   : > { %v9861_v42 = vadd.f32 %v9757_v38, %v4407_v32  ;;  %v4409_v35 = vmul.f32 %v9734_v2, %v4374_v29  ;;  %v4410_v45 = vmul.f32 %v9734_v2, %v4375_v43  ;;  %v4378_v49 = vmul.f32 %v4346_v44, %v9744_v39 }
 0x710   : > { %v9867_v14 = vadd.f32 %v9757_v38, %v4408_v11  ;;  %v4411_v62 = vmul.f32 %v9734_v2, %v4376_v63  ;;  %v4412_v12 = vmul.f32 %v9734_v2, %v4377_v59  ;;  %v4379_v6 = vmul.f32 %v4347_v23, %v9744_v39 }
 0x711   : > { %v9873_v17 = vadd.f32 %v9757_v38, %v4409_v35  ;;  %v9876_v55 = vadd.f32 %v9757_v38, %v4410_v45  ;;  %v4413_v27 = vmul.f32 %v9734_v2, %v4378_v49  ;;  %v4380_v44 = vmul.f32 %v4348_v9, %v9744_v39 }
 0x712   : > { %v4466_v10 = vpack.c.bf16 %v9867_v14, %v9861_v42  ;;  %v9886_v4 = vadd.f32 %v9757_v38, %v4411_v62  ;;  %v9889_v23 = vadd.f32 %v9757_v38, %v4412_v12  ;;  %v4414_v26 = vmul.f32 %v9734_v2, %v4379_v6  ;;  %v10970_v6 = vld [vmem:[#allocation99_spill] sm:$0xff] }
 0x713   : > { %v4467_v57 = vpack.c.bf16 %v9876_v55, %v9873_v17  ;;  %v9895_v25 = vadd.f32 %v9757_v38, %v4413_v27  ;;  %v4381_v0 = vmul.f32 %v4349_v47, %v9744_v39  ;;  %v4415_v9 = vmul.f32 %v9734_v2, %v4380_v44  ;;  %v10971_v55 = vld [vmem:[#allocation100_spill] sm:$0xff] }
 0x714   : > { %v4468_v3 = vpack.c.bf16 %v9889_v23, %v9886_v4  ;;  %v9905_v54 = vadd.f32 %v9757_v38, %v4414_v26  ;;  %v4382_v32 = vmul.f32 %v4350_v24, %v9744_v39  ;;  %v4383_v29 = vmul.f32 %v4351_v13, %v9744_v39 }
 0x715   : > { %v4416_v50 = vmul.f32 %v9734_v2, %v4381_v0  ;;  %v9917_v47 = vadd.f32 %v9757_v38, %v4415_v9  ;;  %v4384_v43 = vmul.f32 %v4352_v53, %v9744_v39  ;;  %v4385_v40 = vmul.f32 %v4353_v31, %v9744_v39 }
 0x716   : > { %v4469_v24 = vpack.c.bf16 %v9905_v54, %v9895_v25  ;;  %v4417_v41 = vmul.f32 %v9734_v2, %v4382_v32  ;;  %v4418_v13 = vmul.f32 %v9734_v2, %v4383_v29  ;;  %v4386_v11 = vmul.f32 %v4354_v1, %v9744_v39 }
 0x717   : > { %v9939_v51 = vadd.f32 %v9757_v38, %v4416_v50  ;;  %v4419_v60 = vmul.f32 %v9734_v2, %v4384_v43  ;;  %v4420_v53 = vmul.f32 %v9734_v2, %v4385_v40  ;;  %v4387_v31 = vmul.f32 %v4355_v22, %v9744_v39 }
 0x718   : > { %v4361_v30 = vmul.f32 %v4329_v36, %v9744_v39  ;;  %v9952_v1 = vadd.f32 %v9757_v38, %v4417_v41  ;;  %v9955_v52 = vadd.f32 %v9757_v38, %v4418_v13  ;;  %v4421_v58 = vmul.f32 %v9734_v2, %v4386_v11 }
 0x719   : > { %4555 = vmatmul.bf16.gmra.mxu3 %v4459_v15  ;;  %v4470_v15 = vpack.c.bf16 %v9939_v51, %v9917_v47  ;;  %v9961_v63 = vadd.f32 %v9757_v38, %v4419_v60  ;;  %v9964_v7 = vadd.f32 %v9757_v38, %v4420_v53  ;;  %v4422_v22 = vmul.f32 %v9734_v2, %v4387_v31 }
 0x71a   : > { %v4471_v5 = vpack.c.bf16 %v9955_v52, %v9952_v1  ;;  %v9970_v36 = vadd.f32 %v9757_v38, %v4421_v58  ;;  %v4395_v35 = vmul.f32 %v9734_v2, %v9804_v21  ;;  %v4396_v45 = vmul.f32 %v9734_v2, %v4361_v30 }
 0x71b   : > { %v4472_v59 = vpack.c.bf16 %v9964_v7, %v9961_v63  ;;  %v9975_v42 = vadd.f32 %v9757_v38, %v4422_v22  ;;  %v4330_v17 = vsub.f32 %v10970_v6, %v9704_v46  ;;  %v4331_v27 = vsub.f32 %v10971_v55, %v9704_v46  ;;  %v10009_v46 = vld [vmem:[%s10137_s12] ss:$0 sm:$0xff] }
 0x71c   : > { %v4430_v14 = vadd.f32 %v9757_v38, %v4395_v35  ;;  %v4431_v62 = vadd.f32 %v9757_v38, %v4396_v45 }
 0x71d   : > { %v4473_v49 = vpack.c.bf16 %v9975_v42, %v9970_v36  ;;  %v4362_v44 = vmul.f32 %v4330_v17, %v9744_v39  ;;  %v4363_v21 = vmul.f32 %v4331_v27, %v9744_v39 }
 0x71e   : > { %v4460_v12 = vpack.c.bf16 %v4431_v62, %v4430_v14 }
 0x71f   : > { %v4397_v26 = vmul.f32 %v9734_v2, %v4362_v44  ;;  %v4398_v0 = vmul.f32 %v9734_v2, %v4363_v21 }
 0x721   : > { %v4432_v9 = vadd.f32 %v9757_v38, %v4397_v26  ;;  %v4433_v32 = vadd.f32 %v9757_v38, %v4398_v0 }
 0x723   : > { %v4461_v29 = vpack.c.bf16 %v4433_v32, %v4432_v9 }
 0x729   : > { %4560 = vmatmul.bf16.gmra.mxu3 %v4460_v12 }
 0x739   : > { %4565 = vmatmul.bf16.gmra.mxu3 %v4461_v29 }
 0x749   : > { %4570 = vmatmul.bf16.gmra.mxu3 %v4462_v61 }
 0x759   : > { %4575 = vmatmul.bf16.gmra.mxu3 %v4463_v8 }
 0x769   : > { %4580 = vmatmul.bf16.gmra.mxu3 %v4464_v56 }
 0x779   : > { %4585 = vmatmul.bf16.gmra.mxu3 %v4465_v28 }
 0x789   : > { %4590 = vmatmul.bf16.gmra.mxu3 %v4466_v10 }
 0x78c   : > { %v4551_v2 = vpop.f32.mrf.mxu3 }
 0x78d   : > { %v4552_v39 = vadd.f32 %v10009_v46, %v4551_v2 }
 0x78f   : > { %4631 = vst [vmem:[%s10014_s18] sm:$0xff] %v4552_v39 }
 0x794   : > { %v4553_v38 = vpop.f32.mrf.mxu3 }
 0x795   : > { %v4554_v20 = vadd.f32 %v10009_v46, %v4553_v38 }
 0x797   : > { %4632 = vst [vmem:[%s10014_s18 + $0x8] sm:$0xff] %v4554_v20 }
 0x799   : > { %4595 = vmatmul.bf16.gmra.mxu3 %v4467_v57 }
 0x79c   : > { %v4556_v33 = vpop.f32.mrf.mxu3 }
 0x79d   : > { %v4557_v16 = vadd.f32 %v10009_v46, %v4556_v33 }
 0x79f   : > { %4633 = vst [vmem:[%s10014_s18 + $0x10] sm:$0xff] %v4557_v16 }
 0x7a4   : > { %v4558_v19 = vpop.f32.mrf.mxu3 }
 0x7a5   : > { %v4559_v61 = vadd.f32 %v10009_v46, %v4558_v19 }
 0x7a7   : > { %4634 = vst [vmem:[%s10014_s18 + $0x18] sm:$0xff] %v4559_v61 }
 0x7a9   : > { %4600 = vmatmul.bf16.gmra.mxu3 %v4468_v3 }
 0x7ac   : > { %v4561_v18 = vpop.f32.mrf.mxu3 }
 0x7ad   : > { %v4562_v37 = vadd.f32 %v10009_v46, %v4561_v18 }
 0x7af   : > { %4635 = vst [vmem:[%s10014_s18 + $0x20] sm:$0xff] %v4562_v37 }
 0x7b4   : > { %v4563_v8 = vpop.f32.mrf.mxu3 }
 0x7b5   : > { %v4564_v34 = vadd.f32 %v10009_v46, %v4563_v8 }
 0x7b7   : > { %4636 = vst [vmem:[%s10014_s18 + $0x28] sm:$0xff] %v4564_v34 }
 0x7b9   : > { %4605 = vmatmul.bf16.gmra.mxu3 %v4469_v24 }
 0x7bc   : > { %v4566_v48 = vpop.f32.mrf.mxu3 }
 0x7bd   : > { %v4567_v56 = vadd.f32 %v10009_v46, %v4566_v48 }
 0x7bf   : > { %4637 = vst [vmem:[%s10014_s18 + $0x30] sm:$0xff] %v4567_v56 }
 0x7c4   : > { %v4568_v28 = vpop.f32.mrf.mxu3 }
 0x7c5   : > { %v4569_v10 = vadd.f32 %v10009_v46, %v4568_v28 }
 0x7c7   : > { %4638 = vst [vmem:[%s10014_s18 + $0x38] sm:$0xff] %v4569_v10 }
 0x7c9   : > { %4610 = vmatmul.bf16.gmra.mxu3 %v4470_v15 }
 0x7cc   : > { %v4571_v4 = vpop.f32.mrf.mxu3 }
 0x7cd   : > { %v4572_v23 = vadd.f32 %v10009_v46, %v4571_v4 }
 0x7cf   : > { %4639 = vst [vmem:[%s10014_s18 + $0x40] sm:$0xff] %v4572_v23 }
 0x7d4   : > { %v4573_v57 = vpop.f32.mrf.mxu3 }
 0x7d5   : > { %v4574_v25 = vadd.f32 %v10009_v46, %v4573_v57 }
 0x7d7   : > { %4640 = vst [vmem:[%s10014_s18 + $0x48] sm:$0xff] %v4574_v25 }
 0x7d9   : > { %4615 = vmatmul.bf16.gmra.mxu3 %v4471_v5 }
 0x7dc   : > { %v4576_v3 = vpop.f32.mrf.mxu3 }
 0x7dd   : > { %v4577_v54 = vadd.f32 %v10009_v46, %v4576_v3 }
 0x7df   : > { %4641 = vst [vmem:[%s10014_s18 + $0x50] sm:$0xff] %v4577_v54 }
 0x7e4   : > { %v4578_v50 = vpop.f32.mrf.mxu3 }
 0x7e5   : > { %v4579_v47 = vadd.f32 %v10009_v46, %v4578_v50 }
 0x7e7   : > { %4642 = vst [vmem:[%s10014_s18 + $0x58] sm:$0xff] %v4579_v47 }
 0x7e9   : > { %4620 = vmatmul.bf16.gmra.mxu3 %v4472_v59 }
 0x7ec   : > { %v4581_v43 = vpop.f32.mrf.mxu3 }
 0x7ed   : > { %v4582_v40 = vadd.f32 %v10009_v46, %v4581_v43 }
 0x7ef   : > { %4643 = vst [vmem:[%s10014_s18 + $0x60] sm:$0xff] %v4582_v40 }
 0x7f4   : > { %v4583_v24 = vpop.f32.mrf.mxu3 }
 0x7f5   : > { %v4584_v41 = vadd.f32 %v10009_v46, %v4583_v24 }
 0x7f7   : > { %4644 = vst [vmem:[%s10014_s18 + $0x68] sm:$0xff] %v4584_v41 }
 0x7f9   : > { %4625 = vmatmul.bf16.gmra.mxu3 %v4473_v49 }
 0x7fc   : > { %v4586_v13 = vpop.f32.mrf.mxu3 }
 0x7fd   : > { %v4587_v11 = vadd.f32 %v10009_v46, %v4586_v13 }
 0x7ff   : > { %4645 = vst [vmem:[%s10014_s18 + $0x70] sm:$0xff] %v4587_v11 }
 0x804   : > { %v4588_v51 = vpop.f32.mrf.mxu3 }
 0x805   : > { %v4589_v60 = vadd.f32 %v10009_v46, %v4588_v51 }
 0x807   : > { %4646 = vst [vmem:[%s10014_s18 + $0x78] sm:$0xff] %v4589_v60 }
 0x80c   : > { %v4591_v53 = vpop.f32.mrf.mxu3 }
 0x80d   : > { %v4592_v31 = vadd.f32 %v10009_v46, %v4591_v53 }
 0x80f   : > { %4647 = vst [vmem:[%s10014_s18 + $0x80] sm:$0xff] %v4592_v31 }
 0x814   : > { %v4593_v30 = vpop.f32.mrf.mxu3 }
 0x815   : > { %v4594_v1 = vadd.f32 %v10009_v46, %v4593_v30 }
 0x817   : > { %4648 = vst [vmem:[%s10014_s18 + $0x88] sm:$0xff] %v4594_v1 }
 0x81c   : > { %v4596_v52 = vpop.f32.mrf.mxu3 }
 0x81d   : > { %v4597_v58 = vadd.f32 %v10009_v46, %v4596_v52 }
 0x81f   : > { %4649 = vst [vmem:[%s10014_s18 + $0x90] sm:$0xff] %v4597_v58 }
 0x824   : > { %v4598_v15 = vpop.f32.mrf.mxu3 }
 0x825   : > { %v4599_v63 = vadd.f32 %v10009_v46, %v4598_v15 }
 0x827   : > { %4650 = vst [vmem:[%s10014_s18 + $0x98] sm:$0xff] %v4599_v63 }
 0x82c   : > { %v4601_v7 = vpop.f32.mrf.mxu3 }
 0x82d   : > { %v4602_v22 = vadd.f32 %v10009_v46, %v4601_v7 }
 0x82f   : > { %4651 = vst [vmem:[%s10014_s18 + $0xa0] sm:$0xff] %v4602_v22 }
 0x834   : > { %v4603_v5 = vpop.f32.mrf.mxu3 }
 0x835   : > { %v4604_v36 = vadd.f32 %v10009_v46, %v4603_v5 }
 0x837   : > { %4652 = vst [vmem:[%s10014_s18 + $0xa8] sm:$0xff] %v4604_v36 }
 0x83c   : > { %v4606_v59 = vpop.f32.mrf.mxu3 }
 0x83d   : > { %v4607_v42 = vadd.f32 %v10009_v46, %v4606_v59 }
 0x83f   : > { %4653 = vst [vmem:[%s10014_s18 + $0xb0] sm:$0xff] %v4607_v42 }
 0x844   : > { %v4608_v35 = vpop.f32.mrf.mxu3 }
 0x845   : > { %v4609_v45 = vadd.f32 %v10009_v46, %v4608_v35 }
 0x847   : > { %4654 = vst [vmem:[%s10014_s18 + $0xb8] sm:$0xff] %v4609_v45 }
 0x84c   : > { %v4611_v49 = vpop.f32.mrf.mxu3 }
 0x84d   : > { %v4612_v14 = vadd.f32 %v10009_v46, %v4611_v49 }
 0x84f   : > { %4655 = vst [vmem:[%s10014_s18 + $0xc0] sm:$0xff] %v4612_v14 }
 0x854   : > { %v4613_v62 = vpop.f32.mrf.mxu3 }
 0x855   : > { %v4614_v12 = vadd.f32 %v10009_v46, %v4613_v62 }
 0x857   : > { %4656 = vst [vmem:[%s10014_s18 + $0xc8] sm:$0xff] %v4614_v12 }
 0x85c   : > { %v4616_v6 = vpop.f32.mrf.mxu3 }
 0x85d   : > { %v4617_v17 = vadd.f32 %v10009_v46, %v4616_v6 }
 0x85f   : > { %4657 = vst [vmem:[%s10014_s18 + $0xd0] sm:$0xff] %v4617_v17 }
 0x864   : > { %v4618_v55 = vpop.f32.mrf.mxu3 }
 0x865   : > { %v4619_v27 = vadd.f32 %v10009_v46, %v4618_v55 }
 0x867   : > { %4658 = vst [vmem:[%s10014_s18 + $0xd8] sm:$0xff] %v4619_v27 }
 0x86c   : > { %v4621_v44 = vpop.f32.mrf.mxu3 }
 0x86d   : > { %v4622_v21 = vadd.f32 %v10009_v46, %v4621_v44 }
 0x86f   : > { %4659 = vst [vmem:[%s10014_s18 + $0xe0] sm:$0xff] %v4622_v21 }
 0x874   : > { %v4623_v26 = vpop.f32.mrf.mxu3 }
 0x875   : > { %v4624_v0 = vadd.f32 %v10009_v46, %v4623_v26 }
 0x877   : > { %4660 = vst [vmem:[%s10014_s18 + $0xe8] sm:$0xff] %v4624_v0 }
 0x87c   : > { %v4626_v9 = vpop.f32.mrf.mxu3 }
 0x87d   : > { %v4627_v32 = vadd.f32 %v10009_v46, %v4626_v9 }
 0x87f   : > { %4661 = vst [vmem:[%s10014_s18 + $0xf0] sm:$0xff] %v4627_v32 }
 0x884   : > { %v4628_v29 = vpop.f32.mrf.mxu3 }
 0x885   : > { %v4629_v2 = vadd.f32 %v10009_v46, %v4628_v29 }
 0x887   : > { %4662 = vst [vmem:[%s10014_s18 + $0xf8] sm:$0xff] %v4629_v2 }
 0x888   : > { %5446 = shalt.err (!%p5443_p4)
}
 0x889   : > { %s5490_s30 = smov 128   ;;  %s5491_s18 = smov 8  }
 0x88a   : > { %4938 = dma.vmem_to_hbm [thread:$0]  (%p5612_p11), %s4677_s21, 4096, %s4679_s13, %s4664_s25, %s5490_s30, %s5490_s30, %s5491_s18  }
 0x88b PF: > { %s10974_s15 = sld [smem:[#allocation9_spill]]  ;;  %p10976_p7 = scmp.ge.s32.totalorder %s5485_s28, 2 }
 0x88d   : > { %p4945_p5 = pnand %p10976_p7, %p5616_p12 }
 0x88f   : > { %p4946_p8 = pneg %p4945_p5 }
 0x891   : > { %s4693_s0 = sand.u32 1, %s10974_s15  }
 0x892   : > { %s4694_s14 = scalar_lea.sflag [#allocation5], %s4693_s0 }
 0x893   : > { %5468 = dma.done.wait (%p4946_p8), %s4694_s14, 4096  }
 0x894   : > { %5470 = vsyncadd (%p4946_p8), %s4694_s14, 4294963200  ;;  %s10977_s28 = sld [smem:[#allocation11_spill]]  ;;  %s10980_s25 = smov %s5477_s26 }
 0x895   : > { %s10978_s27 = sld [smem:[#allocation10_spill]] }
 0x896   : > { %s10979_s29 = sld [smem:[#allocation12_spill]] }
 0x89a   : > { %p26_p10 = scmp.ge.s32.totalorder %s10977_s28, 4  }
 0x89b   : > { %s10981_s26 = smov %s10978_s27 }
 0x89c   : > { %s10982_s27 = smov %s10979_s29  ;;  %28 = sbr.rel (!%p26_p10) target bundleno = 8 (0x8), region = 119 }
 0x8a1   :  { %4700 = vsyncpa [#allocation4], 1 }
 0x8a2   :  { %4702 = vsyncpa [#allocation4 + $0x1], 1 }
 0x8a3   :  { %4703 = vsyncpa [#allocation5], 1 }
 0x8a4   :  { %4705 = vsyncpa [#allocation5 + $0x1], 1 }

</bundles_post_ra>
